<compile_context>
chip_gen: v7x
topology: tpu7x:2x2x1
jax: 0.10.0
libtpu: 0.0.40
codegen_flags: <defaults>
</compile_context>

<pallas_src>
import jax
import jax.numpy as jnp
from jax import lax
from jax.experimental import pallas as pl
from jax.experimental.pallas import tpu as pltpu

BN_EPS = 1e-3
BN_MOMENTUM = 0.01


def _fused_kernel(xa_ref, xb_ref, w_ref, gb_ref, out_ref, mean_ref, var_ref):
    # xa_ref, xb_ref: [Cin, M] f32 (resident across grid steps)
    # w_ref:          [tc, Cin] bf16
    # gb_ref:         [tc, 2]  f32   (col 0 = gamma, col 1 = beta)
    # out_ref:        [tc, M]  f32
    # mean_ref/var_ref: [tc, 1] f32  (batch statistics, biased var)
    # Residual add in f32 (VPU), then cast to bf16 for the MXU operands.
    x = (xa_ref[...] + xb_ref[...]).astype(jnp.bfloat16)               # [Cin, M]
    y = jnp.dot(w_ref[...], x, preferred_element_type=jnp.float32)     # [tc, M]

    # Single-pass biased batch statistics per output channel (row).
    m = y.shape[1]
    inv_m = 1.0 / m
    mean = jnp.sum(y, axis=1, keepdims=True) * inv_m                   # [tc, 1]
    mean_sq = jnp.sum(y * y, axis=1, keepdims=True) * inv_m            # E[y^2]
    var = jnp.maximum(mean_sq - mean * mean, 0.0)                      # clamp cancellation
    inv_std = lax.rsqrt(var + BN_EPS)                                  # EUP

    # Fold BN affine into one scale/shift FMA pass over y.
    gamma = gb_ref[:, 0:1]
    beta = gb_ref[:, 1:2]
    scale = gamma * inv_std                                            # [tc, 1]
    shift = beta - mean * scale
    out_ref[...] = (y * scale + shift).astype(out_ref.dtype)
    mean_ref[...] = mean
    var_ref[...] = var


def fused_add_conv1x1_bn(x492, x477, conv_w, gamma, beta,
                         running_mean=None, running_var=None,
                         momentum=BN_MOMENTUM, *, tc=672):
    """x492, x477: [1, Cin, H, W] f32
       conv_w: [Cout, Cin, 1, 1]   gamma, beta: [Cout]
       Returns out [1, Cout, H, W]; if running stats are given, also returns
       the momentum-updated (running_mean, running_var)."""
    n, c_in, h, w = x492.shape
    c_out = conv_w.shape[0]
    assert n == 1, "channel-major reshape path assumes batch size 1"
    # NOTE: tc=672 is 5.25x128 -> slight MXU row padding on v5e; ragged 512/512/320
    # would shave a few % of (small) MXU time there, but needs relaxing this assert.
    assert c_out % tc == 0 and tc % 8 == 0
    m = n * h * w

    # Pure reshapes -- no transposes, no extra HBM round-trips.
    xa = x492.reshape(c_in, m)                                  # [Cin, M] f32
    xb = x477.reshape(c_in, m)                                  # [Cin, M] f32
    # Weight as bf16: halves the largest HBM stream; MXU accumulates in f32.
    w_mat = conv_w.reshape(c_out, c_in).astype(jnp.bfloat16)    # [Cout, Cin] bf16
    gb = jnp.stack([gamma, beta], axis=1)                       # [Cout, 2] f32

    # Advisory cost estimate for XLA's scheduler (latency-bound kernel).
    flops = 2 * c_out * c_in * m + c_in * m + 8 * c_out * m
    bytes_accessed = (2 * c_in * m * 4 + c_out * c_in * 2 + c_out * 2 * 4
                      + c_out * m * 4 + 2 * c_out * 4)
    cost = pl.CostEstimate(flops=flops, transcendentals=c_out,
                           bytes_accessed=bytes_accessed)

    out, bmean, bvar = pl.pallas_call(
        _fused_kernel,
        out_shape=(
            jax.ShapeDtypeStruct((c_out, m), jnp.float32),
            jax.ShapeDtypeStruct((c_out, 1), jnp.float32),
            jax.ShapeDtypeStruct((c_out, 1), jnp.float32),
        ),
        grid_spec=pl.GridSpec(
            grid=(c_out // tc,),
            in_specs=[
                pl.BlockSpec((c_in, m), lambda i: (0, 0)),      # xa (resident)
                pl.BlockSpec((c_in, m), lambda i: (0, 0)),      # xb (resident)
                pl.BlockSpec((tc, c_in), lambda i: (i, 0)),     # weight tile (bf16)
                pl.BlockSpec((tc, 2), lambda i: (i, 0)),        # packed gamma|beta
            ],
            out_specs=[
                pl.BlockSpec((tc, m), lambda i: (i, 0)),        # normalized output
                pl.BlockSpec((tc, 1), lambda i: (i, 0)),        # batch mean
                pl.BlockSpec((tc, 1), lambda i: (i, 0)),        # batch var (biased)
            ],
        ),
        compiler_params=pltpu.CompilerParams(
            dimension_semantics=("parallel",),
        ),
        cost_estimate=cost,
    )(xa, xb, w_mat, gb)

    out4d = out.reshape(n, c_out, h, w)                         # pure reshape back to NCHW

    if running_mean is None or running_var is None:
        return out4d

    # PyTorch BatchNorm2d running-stat update (training mode): running_var uses
    # the UNBIASED estimate while normalization above used the biased one.
    bmean = bmean.reshape(c_out)
    bvar_unbiased = bvar.reshape(c_out) * (m / (m - 1))
    new_rm = (1.0 - momentum) * running_mean + momentum * bmean
    new_rv = (1.0 - momentum) * running_var + momentum * bvar_unbiased
    return out4d, new_rm, new_rv


def reference(x492, x477, conv_w, gamma, beta):
    """Pure-f32 (highest precision) reference of the module's forward pass."""
    x = x492 + x477
    c_out, c_in = conv_w.shape[0], conv_w.shape[1]
    n, _, h, w = x.shape
    xm = jnp.transpose(x, (0, 2, 3, 1)).reshape(n * h * w, c_in)
    y = jnp.dot(xm, jnp.transpose(conv_w.reshape(c_out, c_in), (1, 0)),
                precision=lax.Precision.HIGHEST)
    mean = jnp.mean(y, axis=0, keepdims=True)
    var = jnp.mean((y - mean) ** 2, axis=0, keepdims=True)
    out = (y - mean) / jnp.sqrt(var + BN_EPS) * gamma[None, :] + beta[None, :]
    return (jnp.transpose(out.reshape(n, h, w, c_out), (0, 3, 1, 2)),
            mean.reshape(-1), var.reshape(-1))


if __name__ == "__main__":
    # Shapes fixed by the module's conv (224 -> 1344); batch/spatial as in source.
    N, C_IN, H, W = 1, 224, 14, 14
    C_OUT = 1344

    key = jax.random.PRNGKey(0)
    k1, k2, k3, k4, k5 = jax.random.split(key, 5)
    x492 = jax.random.normal(k1, (N, C_IN, H, W), dtype=jnp.float32)
    x477 = jax.random.normal(k2, (N, C_IN, H, W), dtype=jnp.float32)
    conv_w = jax.random.normal(k3, (C_OUT, C_IN, 1, 1), dtype=jnp.float32) * 0.05
    gamma = jax.random.normal(k4, (C_OUT,), dtype=jnp.float32) * 0.1 + 1.0
    beta = jax.random.normal(k5, (C_OUT,), dtype=jnp.float32) * 0.1
    running_mean = jnp.zeros((C_OUT,), jnp.float32)   # PyTorch BN init
    running_var = jnp.ones((C_OUT,), jnp.float32)

    out, new_rm, new_rv = fused_add_conv1x1_bn(
        x492, x477, conv_w, gamma, beta,
        running_mean=running_mean, running_var=running_var)
    out = jax.block_until_ready(out)

    ref, ref_mean, ref_var = reference(x492, x477, conv_w, gamma, beta)
    assert out.shape == (N, C_OUT, H, W), out.shape
    # bf16 MXU operands -> worst-case ~1e-2 abs deviation from the f32 reference.
    assert jnp.allclose(out, ref, atol=3e-2, rtol=3e-2), float(jnp.max(jnp.abs(out - ref)))
    # Running-stat update sanity check against the f32 reference batch stats.
    exp_rm = (1.0 - BN_MOMENTUM) * running_mean + BN_MOMENTUM * ref_mean
    exp_rv = (1.0 - BN_MOMENTUM) * running_var + BN_MOMENTUM * ref_var * (H * W / (H * W - 1))
    assert jnp.allclose(new_rm, exp_rm, atol=2e-2, rtol=2e-2)
    assert jnp.allclose(new_rv, exp_rv, atol=2e-2, rtol=2e-2)

    # TODO(synk): in-place mutation of module buffers (PyTorch updates
    # running_mean/running_var as a side effect) has no JAX equivalent; the
    # updated stats are returned functionally instead.
    print("KERNEL_OK")
</pallas_src>

<mosaic_0001>
module attributes {stable_mosaic.version = 11 : i64} {
  func.func @_fused_kernel(%arg0: i32, %arg1: memref<224x196xf32, #tpu.memory_space<vmem>>, %arg2: memref<224x196xf32, #tpu.memory_space<vmem>>, %arg3: memref<672x224xbf16, #tpu.memory_space<vmem>>, %arg4: memref<672x2xf32, #tpu.memory_space<vmem>>, %arg5: memref<672x196xf32, #tpu.memory_space<vmem>>, %arg6: memref<672x1xf32, #tpu.memory_space<vmem>>, %arg7: memref<672x1xf32, #tpu.memory_space<vmem>>) attributes {dimension_semantics = [#tpu.dimension_semantics<parallel>], iteration_bounds = array<i64: 2>, scalar_prefetch = 0 : i64, scratch_operands = 0 : i64, tpu.core_type = #tpu.core_type<tc>, window_params = [{pipeline_mode = #tpu.pipeline_mode<synchronous>, transform_indices = @transform_0, window_bounds = array<i64: 224, 196>}, {pipeline_mode = #tpu.pipeline_mode<synchronous>, transform_indices = @transform_1, window_bounds = array<i64: 224, 196>}, {transform_indices = @transform_2, window_bounds = array<i64: 672, 224>}, {transform_indices = @transform_3, window_bounds = array<i64: 672, 2>}, {transform_indices = @transform_4, window_bounds = array<i64: 672, 196>}, {transform_indices = @transform_5, window_bounds = array<i64: 672, 1>}, {transform_indices = @transform_6, window_bounds = array<i64: 672, 1>}]} {
    %c0 = arith.constant 0 : index
    %c0_0 = arith.constant 0 : index
    %0 = vector.load %arg1[%c0, %c0_0] : memref<224x196xf32, #tpu.memory_space<vmem>>, vector<224x196xf32>
    %c0_1 = arith.constant 0 : index
    %c0_2 = arith.constant 0 : index
    %1 = vector.load %arg2[%c0_1, %c0_2] : memref<224x196xf32, #tpu.memory_space<vmem>>, vector<224x196xf32>
    %2 = arith.addf %0, %1 : vector<224x196xf32>
    %3 = arith.truncf %2 : vector<224x196xf32> to vector<224x196xbf16>
    %c0_3 = arith.constant 0 : index
    %c0_4 = arith.constant 0 : index
    %4 = vector.load %arg3[%c0_3, %c0_4] : memref<672x224xbf16, #tpu.memory_space<vmem>>, vector<672x224xbf16>
    %cst = arith.constant dense<0.000000e+00> : vector<672x196xf32>
    %5 = tpu.matmul %4, %3, %cst {dimension_numbers = #tpu.dot_dimension_numbers<[1], [0], [0], [1], [0, 0, 1, 1], [], []>} : vector<672x224xbf16>, vector<224x196xbf16>, vector<672x196xf32> -> vector<672x196xf32>
    %cst_5 = arith.constant dense<0.000000e+00> : vector<672xf32>
    %6 = vector.multi_reduction <add>, %5, %cst_5 [1] : vector<672x196xf32> to vector<672xf32>
    %7 = vector.shape_cast %6 : vector<672xf32> to vector<672x1xf32>
    %cst_6 = arith.constant 0.00510204071 : f32
    %8 = vector.broadcast %cst_6 : f32 to vector<672x1xf32>
    %9 = arith.mulf %7, %8 : vector<672x1xf32>
    %10 = arith.mulf %5, %5 : vector<672x196xf32>
    %cst_7 = arith.constant dense<0.000000e+00> : vector<672xf32>
    %11 = vector.multi_reduction <add>, %10, %cst_7 [1] : vector<672x196xf32> to vector<672xf32>
    %12 = vector.shape_cast %11 : vector<672xf32> to vector<672x1xf32>
    %cst_8 = arith.constant 0.00510204071 : f32
    %13 = vector.broadcast %cst_8 : f32 to vector<672x1xf32>
    %14 = arith.mulf %12, %13 : vector<672x1xf32>
    %15 = arith.mulf %9, %9 : vector<672x1xf32>
    %16 = arith.subf %14, %15 : vector<672x1xf32>
    %cst_9 = arith.constant 0.000000e+00 : f32
    %17 = vector.broadcast %cst_9 : f32 to vector<672x1xf32>
    %18 = arith.maximumf %16, %17 : vector<672x1xf32>
    %cst_10 = arith.constant 1.000000e-03 : f32
    %19 = vector.broadcast %cst_10 : f32 to vector<672x1xf32>
    %20 = arith.addf %18, %19 : vector<672x1xf32>
    %21 = math.rsqrt %20 : vector<672x1xf32>
    %c0_11 = arith.constant 0 : index
    %c0_12 = arith.constant 0 : index
    %22 = vector.load %arg4[%c0_11, %c0_12] : memref<672x2xf32, #tpu.memory_space<vmem>>, vector<672x1xf32>
    %c0_13 = arith.constant 0 : index
    %c1 = arith.constant 1 : index
    %23 = vector.load %arg4[%c0_13, %c1] : memref<672x2xf32, #tpu.memory_space<vmem>>, vector<672x1xf32>
    %24 = arith.mulf %22, %21 : vector<672x1xf32>
    %25 = arith.mulf %9, %24 : vector<672x1xf32>
    %26 = arith.subf %23, %25 : vector<672x1xf32>
    %27 = vector.broadcast %24 : vector<672x1xf32> to vector<672x196xf32>
    %28 = arith.mulf %5, %27 : vector<672x196xf32>
    %29 = vector.broadcast %26 : vector<672x1xf32> to vector<672x196xf32>
    %30 = arith.addf %28, %29 : vector<672x196xf32>
    %c0_14 = arith.constant 0 : index
    %c0_15 = arith.constant 0 : index
    %31 = vector.load %arg5[%c0_14, %c0_15] : memref<672x196xf32, #tpu.memory_space<vmem>>, vector<672x196xf32>
    tpu.vector_store %arg5[%c0_14, %c0_15], %30 {strides = array<i32>} : memref<672x196xf32, #tpu.memory_space<vmem>>, vector<672x196xf32>,
    %c0_16 = arith.constant 0 : index
    %c0_17 = arith.constant 0 : index
    %32 = vector.load %arg6[%c0_16, %c0_17] : memref<672x1xf32, #tpu.memory_space<vmem>>, vector<672x1xf32>
    tpu.vector_store %arg6[%c0_16, %c0_17], %9 {strides = array<i32>} : memref<672x1xf32, #tpu.memory_space<vmem>>, vector<672x1xf32>,
    %c0_18 = arith.constant 0 : index
    %c0_19 = arith.constant 0 : index
    %33 = vector.load %arg7[%c0_18, %c0_19] : memref<672x1xf32, #tpu.memory_space<vmem>>, vector<672x1xf32>
    tpu.vector_store %arg7[%c0_18, %c0_19], %18 {strides = array<i32>} : memref<672x1xf32, #tpu.memory_space<vmem>>, vector<672x1xf32>,
    return
  }
  func.func @transform_0(%arg0: i32) -> (i32, i32) {
    %c0_i32 = arith.constant 0 : i32
    %c0_i32_0 = arith.constant 0 : i32
    %c0_i32_1 = arith.constant 0 : i32
    return %c0_i32, %c0_i32_0 : i32, i32
  }
  func.func @transform_1(%arg0: i32) -> (i32, i32) {
    %c0_i32 = arith.constant 0 : i32
    %c0_i32_0 = arith.constant 0 : i32
    %c0_i32_1 = arith.constant 0 : i32
    return %c0_i32, %c0_i32_0 : i32, i32
  }
  func.func @transform_2(%arg0: i32) -> (i32, i32) {
    %c0_i32 = arith.constant 0 : i32
    %c0_i32_0 = arith.constant 0 : i32
    return %arg0, %c0_i32 : i32, i32
  }
  func.func @transform_3(%arg0: i32) -> (i32, i32) {
    %c0_i32 = arith.constant 0 : i32
    %c0_i32_0 = arith.constant 0 : i32
    return %arg0, %c0_i32 : i32, i32
  }
  func.func @transform_4(%arg0: i32) -> (i32, i32) {
    %c0_i32 = arith.constant 0 : i32
    %c0_i32_0 = arith.constant 0 : i32
    return %arg0, %c0_i32 : i32, i32
  }
  func.func @transform_5(%arg0: i32) -> (i32, i32) {
    %c0_i32 = arith.constant 0 : i32
    %c0_i32_0 = arith.constant 0 : i32
    return %arg0, %c0_i32 : i32, i32
  }
  func.func @transform_6(%arg0: i32) -> (i32, i32) {
    %c0_i32 = arith.constant 0 : i32
    %c0_i32_0 = arith.constant 0 : i32
    return %arg0, %c0_i32 : i32, i32
  }
}

</mosaic_0001>

<bundles_post_ra>
// kernel: tpu_custom_call.1
= control target key start
LH: loop header
LB: loop body
LE: loop exit
PB: predicated region body
PF: predicated region fallthrough
CT: control target
= control target key end

     0   :  { %s5896_s21 = smov 0   ;;  %s10687_s0 = inlined_call_operand.vmem [shape: f32[224,196], index: 0, kind: input, shape index: {}]   ;;  %s10688_s1 = inlined_call_operand.vmem [shape: f32[224,196], index: 1, kind: input, shape index: {}]   ;;  %s10689_s2 = inlined_call_operand.vmem [shape: bf16[1344,224], index: 2, kind: input, shape index: {}]   ;;  %s10690_s3 = inlined_call_operand.vmem [shape: f32[1344,2], index: 3, kind: input, shape index: {}]   ;;  %s10691_s4 = inlined_call_operand.vmem [shape: f32[1344,196], index: 4, kind: output, shape index: {0}]   ;;  %s10692_s5 = inlined_call_operand.vmem [shape: f32[1344,1], index: 5, kind: output, shape index: {1}]   ;;  %s10693_s6 = inlined_call_operand.vmem [shape: f32[1344,1], index: 6, kind: output, shape index: {2}]  }
   0x1 LB: > { %s5300_s22 = sadd.s32 4294967295, %s5856_s21   ;;  %p5304_p0 = scmp.ge.s32.totalorder %s5856_s21, 1  ;;  %s5856_s21 = sphi %s5896_s21, %s17_s21  }
   0x2   : > { %p230_p1 = scmp.lt.s32.totalorder %s5856_s21, 3 }
   0x4   : > { %p231_p2 = pnand %p5304_p0, %p230_p1 }
   0x6   : > { %234 = sbr.rel (%p231_p2) target bundleno = 1282 (0x502), region = 36 }
   0xd   : > { %v311_v0 = vld [vmem:[%s10687_s0 + $0x8] sm:$0xff]  ;;  %v313_v1 = vld [vmem:[%s10687_s0 + $0x18] sm:$0xff]  ;;  %v310_v5 = vld [vmem:[%s10687_s0] sm:$0xff]  ;;  %s6077_s27 = smul.u32 84, %s5300_s22  ;;  %vm968_vm0 = vcmask 785408   ;;  %vm1548_vm1 = vcmask 556032  }
   0xe   : > { %v367_v2 = vld [vmem:[%s10688_s1 + $0x8] sm:$0xff]  ;;  %v369_v3 = vld [vmem:[%s10688_s1 + $0x18] sm:$0xff]  ;;  %v312_v6 = vld [vmem:[%s10687_s0 + $0x10] sm:$0xff]  ;;  %vm4993_vm2 = vcmask 7168  }
   0xf   : > { %v423_v4 = vadd.f32 %v367_v2, %v311_v0  ;;  %v425_v7 = vadd.f32 %v369_v3, %v313_v1  ;;  %v366_v8 = vld [vmem:[%s10688_s1] sm:$0xff]  ;;  %v368_v9 = vld [vmem:[%s10688_s1 + $0x10] sm:$0xff]  ;;  %v315_v10 = vld [vmem:[%s10687_s0 + $0x28] sm:$0xff]  ;;  %p278_p3 = scmp.lt.s32.totalorder %s6077_s27, 167 }
  0x10   : > { %v422_v11 = vadd.f32 %v366_v8, %v310_v5  ;;  %v424_v12 = vadd.f32 %v368_v9, %v312_v6  ;;  %v317_v13 = vld [vmem:[%s10687_s0 + $0x38] sm:$0xff]  ;;  %v371_v14 = vld [vmem:[%s10688_s1 + $0x28] sm:$0xff]  ;;  %v314_v19 = vld [vmem:[%s10687_s0 + $0x20] sm:$0xff] }
  0x11   : > { %v373_v15 = vld [vmem:[%s10688_s1 + $0x38] sm:$0xff]  ;;  %v479_v16 = vpack.c.bf16 %v425_v7, %v423_v4  ;;  %v427_v17 = vadd.f32 %v371_v14, %v315_v10  ;;  %v316_v20 = vld [vmem:[%s10687_s0 + $0x30] sm:$0xff]  ;;  %v370_v21 = vld [vmem:[%s10688_s1 + $0x20] sm:$0xff]  ;;  %s11814_s27 = smov (!%p278_p3, %s6077_s27), 167 }
  0x12   : > { %v429_v18 = vadd.f32 %v373_v15, %v317_v13  ;;  %v478_v22 = vpack.c.bf16 %v424_v12, %v422_v11  ;;  %v372_v23 = vld [vmem:[%s10688_s1 + $0x30] sm:$0xff]  ;;  %v426_v24 = vadd.f32 %v370_v21, %v314_v19  ;;  %v319_v25 = vld [vmem:[%s10687_s0 + $0x48] sm:$0xff]  ;;  %v321_v26 = vld [vmem:[%s10687_s0 + $0x58] sm:$0xff]  ;;  %s6158_s8 = sshll.u32 %s11814_s27, 3  ;;  %s5441_s20 = sshll.u32 %s11814_s27, 4 }
  0x13   : > { %1095 = vmatprep.subr.bf16.mxu0 %v479_v16  ;;  %5442 = vmatprep.subr.bf16.mxu1 %v479_v16  ;;  %v428_v28 = vadd.f32 %v372_v23, %v316_v20  ;;  %v375_v29 = vld [vmem:[%s10688_s1 + $0x48] sm:$0xff]  ;;  %v377_v30 = vld [vmem:[%s10688_s1 + $0x58] sm:$0xff]  ;;  %v318_v31 = vld [vmem:[%s10687_s0 + $0x40] sm:$0xff]  ;;  %s6185_s26 = scalar_lea.vmem %s10689_s2, %s6158_s8  ;;  %s7533_s13 = scalar_lea.vmem %s10692_s5, %s6158_s8 }
  0x14   : > { %v481_v27 = vpack.c.bf16 %v429_v18, %v427_v17  ;;  %1096 = vmatpush1.bf16.msra.mxu0 %v478_v22  ;;  %5456 = vmatpush1.bf16.msra.mxu1 %v478_v22  ;;  %v431_v32 = vadd.f32 %v375_v29, %v319_v25  ;;  %v433_v33 = vadd.f32 %v377_v30, %v321_v26  ;;  %v320_v34 = vld [vmem:[%s10687_s0 + $0x50] sm:$0xff]  ;;  %v374_v35 = vld [vmem:[%s10688_s1 + $0x40] sm:$0xff]  ;;  %v323_v40 = vld [vmem:[%s10687_s0 + $0x68] sm:$0xff]  ;;  %s7624_s16 = scalar_lea.vmem %s10693_s6, %s6158_s8  ;;  %s7711_s19 = scalar_lea.vmem %s10690_s3, %s6158_s8 }
  0x15   : > { %v376_v36 = vld [vmem:[%s10688_s1 + $0x50] sm:$0xff]  ;;  %v480_v37 = vpack.c.bf16 %v428_v28, %v426_v24  ;;  %v430_v38 = vadd.f32 %v374_v35, %v318_v31  ;;  %v325_v41 = vld [vmem:[%s10687_s0 + $0x78] sm:$0xff]  ;;  %v379_v42 = vld [vmem:[%s10688_s1 + $0x68] sm:$0xff]  ;;  %s5859_s8 = smov 1   ;;  %s10080_s24 = scalar_lea.vmem %s10691_s4, %s5441_s20 }
  0x16   : > { %1097 = vmatprep.subr.bf16.mxu0 %v481_v27  ;;  %5443 = vmatprep.subr.bf16.mxu1 %v481_v27  ;;  %v432_v39 = vadd.f32 %v376_v36, %v320_v34  ;;  %v483_v43 = vpack.c.bf16 %v433_v33, %v431_v32  ;;  %v381_v44 = vld [vmem:[%s10688_s1 + $0x78] sm:$0xff]  ;;  %v435_v45 = vadd.f32 %v379_v42, %v323_v40  ;;  %v322_v46 = vld [vmem:[%s10687_s0 + $0x60] sm:$0xff]  ;;  %v324_v47 = vld [vmem:[%s10687_s0 + $0x70] sm:$0xff] }
  0x17   : > { %v437_v48 = vadd.f32 %v381_v44, %v325_v41  ;;  %v378_v49 = vld [vmem:[%s10688_s1 + $0x60] sm:$0xff]  ;;  %v380_v50 = vld [vmem:[%s10688_s1 + $0x70] sm:$0xff]  ;;  %v327_v51 = vld [vmem:[%s10687_s0 + $0x88] sm:$0xff] }
  0x18   : > { %1098 = vmatpush1.bf16.msra.mxu0 %v480_v37  ;;  %5457 = vmatpush1.bf16.msra.mxu1 %v480_v37  ;;  %v482_v52 = vpack.c.bf16 %v432_v39, %v430_v38  ;;  %v434_v53 = vadd.f32 %v378_v49, %v322_v46  ;;  %v436_v54 = vadd.f32 %v380_v50, %v324_v47  ;;  %v329_v55 = vld [vmem:[%s10687_s0 + $0x98] sm:$0xff]  ;;  %v383_v56 = vld [vmem:[%s10688_s1 + $0x88] sm:$0xff]  ;;  %v326_v61 = vld [vmem:[%s10687_s0 + $0x80] sm:$0xff] }
  0x19   : > { %v385_v57 = vld [vmem:[%s10688_s1 + $0x98] sm:$0xff]  ;;  %1099 = vmatprep.subr.bf16.mxu0 %v483_v43  ;;  %5444 = vmatprep.subr.bf16.mxu1 %v483_v43  ;;  %v485_v58 = vpack.c.bf16 %v437_v48, %v435_v45  ;;  %v439_v59 = vadd.f32 %v383_v56, %v327_v51  ;;  %v328_v62 = vld [vmem:[%s10687_s0 + $0x90] sm:$0xff]  ;;  %v382_v63 = vld [vmem:[%s10688_s1 + $0x80] sm:$0xff] }
  0x1a   : > { %v441_v60 = vadd.f32 %v385_v57, %v329_v55  ;;  %v384_v0 = vld [vmem:[%s10688_s1 + $0x90] sm:$0xff]  ;;  %v331_v1 = vld [vmem:[%s10687_s0 + $0xa8] sm:$0xff]  ;;  %v333_v2 = vld [vmem:[%s10687_s0 + $0xb8] sm:$0xff]  ;;  %v484_v5 = vpack.c.bf16 %v436_v54, %v434_v53  ;;  %v438_v6 = vadd.f32 %v382_v63, %v326_v61 }
  0x1b   : > { %v387_v3 = vld [vmem:[%s10688_s1 + $0xa8] sm:$0xff]  ;;  %v389_v4 = vld [vmem:[%s10688_s1 + $0xb8] sm:$0xff]  ;;  %v440_v7 = vadd.f32 %v384_v0, %v328_v62  ;;  %v330_v8 = vld [vmem:[%s10687_s0 + $0xa0] sm:$0xff] }
  0x1c   : > { %1100 = vmatpush1.bf16.msra.mxu0 %v482_v52  ;;  %5458 = vmatpush1.bf16.msra.mxu1 %v482_v52  ;;  %v332_v9 = vld [vmem:[%s10687_s0 + $0xb0] sm:$0xff]  ;;  %v487_v10 = vpack.c.bf16 %v441_v60, %v439_v59  ;;  %v443_v11 = vadd.f32 %v387_v3, %v331_v1  ;;  %v445_v12 = vadd.f32 %v389_v4, %v333_v2  ;;  %v386_v13 = vld [vmem:[%s10688_s1 + $0xa0] sm:$0xff]  ;;  %v335_v15 = vld [vmem:[%s10687_s0 + $0xc8] sm:$0xff] }
  0x1d   : > { %1101 = vmatprep.subr.bf16.mxu0 %v485_v58  ;;  %5445 = vmatprep.subr.bf16.mxu1 %v485_v58  ;;  %v388_v14 = vld [vmem:[%s10688_s1 + $0xb0] sm:$0xff]  ;;  %v337_v16 = vld [vmem:[%s10687_s0 + $0xd8] sm:$0xff]  ;;  %v391_v17 = vld [vmem:[%s10688_s1 + $0xc8] sm:$0xff]  ;;  %v486_v19 = vpack.c.bf16 %v440_v7, %v438_v6  ;;  %v442_v20 = vadd.f32 %v386_v13, %v330_v8 }
  0x1e   : > { %v393_v18 = vld [vmem:[%s10688_s1 + $0xd8] sm:$0xff]  ;;  %v444_v21 = vadd.f32 %v388_v14, %v332_v9  ;;  %v334_v22 = vld [vmem:[%s10687_s0 + $0xc0] sm:$0xff]  ;;  %v336_v23 = vld [vmem:[%s10687_s0 + $0xd0] sm:$0xff]  ;;  %v489_v24 = vpack.c.bf16 %v445_v12, %v443_v11  ;;  %v447_v25 = vadd.f32 %v391_v17, %v335_v15 }
  0x1f   : > { %v449_v26 = vadd.f32 %v393_v18, %v337_v16  ;;  %v390_v27 = vld [vmem:[%s10688_s1 + $0xc0] sm:$0xff]  ;;  %v392_v28 = vld [vmem:[%s10688_s1 + $0xd0] sm:$0xff]  ;;  %v339_v29 = vld [vmem:[%s10687_s0 + $0xe8] sm:$0xff] }
  0x20   : > { %1102 = vmatpush1.bf16.msra.mxu0 %v484_v5  ;;  %5459 = vmatpush1.bf16.msra.mxu1 %v484_v5  ;;  %v341_v30 = vld [vmem:[%s10687_s0 + $0xf8] sm:$0xff]  ;;  %v395_v31 = vld [vmem:[%s10688_s1 + $0xe8] sm:$0xff]  ;;  %v488_v33 = vpack.c.bf16 %v444_v21, %v442_v20  ;;  %v446_v34 = vadd.f32 %v390_v27, %v334_v22  ;;  %v448_v35 = vadd.f32 %v392_v28, %v336_v23  ;;  %v338_v36 = vld [vmem:[%s10687_s0 + $0xe0] sm:$0xff] }
  0x21   : > { %1103 = vmatprep.subr.bf16.mxu0 %v487_v10  ;;  %5446 = vmatprep.subr.bf16.mxu1 %v487_v10  ;;  %v397_v32 = vld [vmem:[%s10688_s1 + $0xf8] sm:$0xff]  ;;  %v340_v37 = vld [vmem:[%s10687_s0 + $0xf0] sm:$0xff]  ;;  %v491_v38 = vpack.c.bf16 %v449_v26, %v447_v25  ;;  %v451_v39 = vadd.f32 %v395_v31, %v339_v29  ;;  %v394_v41 = vld [vmem:[%s10688_s1 + $0xe0] sm:$0xff] }
  0x22   : > { %v453_v40 = vadd.f32 %v397_v32, %v341_v30  ;;  %v396_v42 = vld [vmem:[%s10688_s1 + $0xf0] sm:$0xff]  ;;  %v343_v43 = vld [vmem:[%s10687_s0 + $0x108] sm:$0xff]  ;;  %v345_v44 = vld [vmem:[%s10687_s0 + $0x118] sm:$0xff]  ;;  %v490_v47 = vpack.c.bf16 %v448_v35, %v446_v34  ;;  %v450_v48 = vadd.f32 %v394_v41, %v338_v36 }
  0x23   : > { %v399_v45 = vld [vmem:[%s10688_s1 + $0x108] sm:$0xff]  ;;  %v401_v46 = vld [vmem:[%s10688_s1 + $0x118] sm:$0xff]  ;;  %v452_v49 = vadd.f32 %v396_v42, %v340_v37  ;;  %v342_v50 = vld [vmem:[%s10687_s0 + $0x100] sm:$0xff] }
  0x24   : > { %1104 = vmatpush1.bf16.msra.mxu0 %v486_v19  ;;  %5460 = vmatpush1.bf16.msra.mxu1 %v486_v19  ;;  %v344_v51 = vld [vmem:[%s10687_s0 + $0x110] sm:$0xff]  ;;  %v493_v52 = vpack.c.bf16 %v453_v40, %v451_v39  ;;  %v455_v53 = vadd.f32 %v399_v45, %v343_v43  ;;  %v457_v54 = vadd.f32 %v401_v46, %v345_v44  ;;  %v398_v55 = vld [vmem:[%s10688_s1 + $0x100] sm:$0xff]  ;;  %v347_v57 = vld [vmem:[%s10687_s0 + $0x128] sm:$0xff] }
  0x25   : > { %1105 = vmatprep.subr.bf16.mxu0 %v489_v24  ;;  %5447 = vmatprep.subr.bf16.mxu1 %v489_v24  ;;  %v400_v56 = vld [vmem:[%s10688_s1 + $0x110] sm:$0xff]  ;;  %v349_v58 = vld [vmem:[%s10687_s0 + $0x138] sm:$0xff]  ;;  %v403_v59 = vld [vmem:[%s10688_s1 + $0x128] sm:$0xff]  ;;  %v492_v61 = vpack.c.bf16 %v452_v49, %v450_v48  ;;  %v454_v62 = vadd.f32 %v398_v55, %v342_v50 }
  0x26   : > { %v405_v60 = vld [vmem:[%s10688_s1 + $0x138] sm:$0xff]  ;;  %v456_v63 = vadd.f32 %v400_v56, %v344_v51  ;;  %v346_v0 = vld [vmem:[%s10687_s0 + $0x120] sm:$0xff]  ;;  %v348_v1 = vld [vmem:[%s10687_s0 + $0x130] sm:$0xff]  ;;  %v495_v2 = vpack.c.bf16 %v457_v54, %v455_v53  ;;  %v459_v3 = vadd.f32 %v403_v59, %v347_v57 }
  0x27   : > { %v461_v4 = vadd.f32 %v405_v60, %v349_v58  ;;  %v402_v5 = vld [vmem:[%s10688_s1 + $0x120] sm:$0xff]  ;;  %v404_v6 = vld [vmem:[%s10688_s1 + $0x130] sm:$0xff]  ;;  %v351_v7 = vld [vmem:[%s10687_s0 + $0x148] sm:$0xff] }
  0x28   : > { %1106 = vmatpush1.bf16.msra.mxu0 %v488_v33  ;;  %5461 = vmatpush1.bf16.msra.mxu1 %v488_v33  ;;  %v353_v8 = vld [vmem:[%s10687_s0 + $0x158] sm:$0xff]  ;;  %v407_v9 = vld [vmem:[%s10688_s1 + $0x148] sm:$0xff]  ;;  %v350_v11 = vld [vmem:[%s10687_s0 + $0x140] sm:$0xff]  ;;  %v494_v12 = vpack.c.bf16 %v456_v63, %v454_v62  ;;  %v458_v13 = vadd.f32 %v402_v5, %v346_v0  ;;  %v460_v14 = vadd.f32 %v404_v6, %v348_v1 }
  0x29   : > { %1107 = vmatprep.subr.bf16.mxu0 %v491_v38  ;;  %5448 = vmatprep.subr.bf16.mxu1 %v491_v38  ;;  %v409_v10 = vld [vmem:[%s10688_s1 + $0x158] sm:$0xff]  ;;  %v352_v15 = vld [vmem:[%s10687_s0 + $0x150] sm:$0xff]  ;;  %v406_v16 = vld [vmem:[%s10688_s1 + $0x140] sm:$0xff]  ;;  %v497_v18 = vpack.c.bf16 %v461_v4, %v459_v3  ;;  %v463_v19 = vadd.f32 %v407_v9, %v351_v7 }
  0x2a   : > { %v408_v17 = vld [vmem:[%s10688_s1 + $0x150] sm:$0xff]  ;;  %v465_v20 = vadd.f32 %v409_v10, %v353_v8  ;;  %v355_v21 = vld [vmem:[%s10687_s0 + $0x168] sm:$0xff]  ;;  %v357_v22 = vld [vmem:[%s10687_s0 + $0x178] sm:$0xff]  ;;  %v496_v30 = vpack.c.bf16 %v460_v14, %v458_v13  ;;  %v462_v31 = vadd.f32 %v406_v16, %v350_v11 }
  0x2b   : > { %v411_v23 = vld [vmem:[%s10688_s1 + $0x168] sm:$0xff]  ;;  %v413_v24 = vld [vmem:[%s10688_s1 + $0x178] sm:$0xff]  ;;  %v354_v25 = vld [vmem:[%s10687_s0 + $0x160] sm:$0xff]  ;;  %v464_v32 = vadd.f32 %v408_v17, %v352_v15 }
  0x2c   : > { %1108 = vmatpush1.bf16.msra.mxu0 %v490_v47  ;;  %5462 = vmatpush1.bf16.msra.mxu1 %v490_v47  ;;  %v356_v26 = vld [vmem:[%s10687_s0 + $0x170] sm:$0xff]  ;;  %v410_v27 = vld [vmem:[%s10688_s1 + $0x160] sm:$0xff]  ;;  %v359_v33 = vld [vmem:[%s10687_s0 + $0x188] sm:$0xff]  ;;  %v499_v36 = vpack.c.bf16 %v465_v20, %v463_v19  ;;  %v467_v37 = vadd.f32 %v411_v23, %v355_v21  ;;  %v469_v38 = vadd.f32 %v413_v24, %v357_v22 }
  0x2d   : > { %1109 = vmatprep.subr.bf16.mxu0 %v493_v52  ;;  %5449 = vmatprep.subr.bf16.mxu1 %v493_v52  ;;  %v412_v28 = vld [vmem:[%s10688_s1 + $0x170] sm:$0xff]  ;;  %v5487_v29 = vld [vmem:[%s6185_s26 + $0x4] ss:$8 sps:$4 sm:$0xff]   ;;  %v361_v34 = vld [vmem:[%s10687_s0 + $0x198] sm:$0xff]  ;;  %v498_v45 = vpack.c.bf16 %v464_v32, %v462_v31  ;;  %v466_v46 = vadd.f32 %v410_v27, %v354_v25 }
  0x2e   : > { %v5490_v35 = vld [vmem:[%s6185_s26 + $0x154] ss:$8 sps:$4 sm:$0xff]   ;;  %v415_v39 = vld [vmem:[%s10688_s1 + $0x188] sm:$0xff]  ;;  %5396 = vmatprep.mubr.msk.bf16.mxu0 %vm968_vm0, %v5487_v29  ;;  %v358_v41 = vld [vmem:[%s10687_s0 + $0x180] sm:$0xff]  ;;  %v468_v47 = vadd.f32 %v412_v28, %v356_v26  ;;  %v501_v50 = vpack.c.bf16 %v469_v38, %v467_v37 }
  0x2f   : > { %v417_v40 = vld [vmem:[%s10688_s1 + $0x198] sm:$0xff]  ;;  %5417 = vmatprep.mubr.msk.bf16.mxu1 %vm968_vm0, %v5490_v35  ;;  %v360_v42 = vld [vmem:[%s10687_s0 + $0x190] sm:$0xff]  ;;  %v414_v43 = vld [vmem:[%s10688_s1 + $0x180] sm:$0xff]  ;;  %v471_v51 = vadd.f32 %v415_v39, %v359_v33 }
  0x30   : > { %1110 = vmatpush1.bf16.msra.mxu0 %v492_v61  ;;  %5463 = vmatpush1.bf16.msra.mxu1 %v492_v61  ;;  %v416_v44 = vld [vmem:[%s10688_s1 + $0x190] sm:$0xff]  ;;  %v363_v48 = vld [vmem:[%s10687_s0 + $0x1a8] sm:$0xff]  ;;  %v365_v49 = vld [vmem:[%s10687_s0 + $0x1b8] sm:$0xff]  ;;  %v473_v52 = vadd.f32 %v417_v40, %v361_v34  ;;  %v500_v56 = vpack.c.bf16 %v468_v47, %v466_v46  ;;  %v470_v57 = vadd.f32 %v414_v43, %v358_v41 }
  0x31   : > { %1111 = vmatprep.subr.bf16.mxu0 %v495_v2  ;;  %5450 = vmatprep.subr.bf16.mxu1 %v495_v2  ;;  %v419_v53 = vld [vmem:[%s10688_s1 + $0x1a8] sm:$0xff]  ;;  %v421_v54 = vld [vmem:[%s10688_s1 + $0x1b8] sm:$0xff]  ;;  %v362_v55 = vld [vmem:[%s10687_s0 + $0x1a0] sm:$0xff]  ;;  %v472_v58 = vadd.f32 %v416_v44, %v360_v42 }
  0x32   : > { %v364_v59 = vld [vmem:[%s10687_s0 + $0x1b0] sm:$0xff]  ;;  %v418_v60 = vld [vmem:[%s10688_s1 + $0x1a0] sm:$0xff]  ;;  %v503_v61 = vpack.c.bf16 %v473_v52, %v471_v51  ;;  %v475_v62 = vadd.f32 %v419_v53, %v363_v48  ;;  %v477_v63 = vadd.f32 %v421_v54, %v365_v49 }
  0x33   : > { %v420_v0 = vld [vmem:[%s10688_s1 + $0x1b0] sm:$0xff]  ;;  %v502_v1 = vpack.c.bf16 %v472_v58, %v470_v57  ;;  %v474_v2 = vadd.f32 %v418_v60, %v362_v55  ;;  %v5485_v6 = vld [vmem:[%s6185_s26] ss:$8 sps:$4 sm:$0xff]   ;;  %v5494_v9 = vld [vmem:[%s6185_s26 + $0x164] ss:$8 sps:$4 sm:$0xff]  }
  0x34   : > { %1112 = vmatpush1.bf16.msra.mxu0 %v494_v12  ;;  %5464 = vmatpush1.bf16.msra.mxu1 %v494_v12  ;;  %v476_v3 = vadd.f32 %v420_v0, %v364_v59  ;;  %v505_v4 = vpack.c.bf16 %v477_v63, %v475_v62  ;;  %v5488_v7 = vld [vmem:[%s6185_s26 + $0x150] ss:$8 sps:$4 sm:$0xff]   ;;  %v5491_v8 = vld [vmem:[%s6185_s26 + $0x14] ss:$8 sps:$4 sm:$0xff]   ;;  %v5496_v11 = vld [vmem:[%s6185_s26 + $0x160] ss:$8 sps:$4 sm:$0xff]  }
  0x35   : > { %1113 = vmatprep.subr.bf16.mxu0 %v497_v18  ;;  %5451 = vmatprep.subr.bf16.mxu1 %v497_v18  ;;  %v5493_v10 = vld [vmem:[%s6185_s26 + $0x10] ss:$8 sps:$4 sm:$0xff]   ;;  %v5497_v12 = vld [vmem:[%s6185_s26 + $0x24] ss:$8 sps:$4 sm:$0xff]   ;;  %v5500_v13 = vld [vmem:[%s6185_s26 + $0x174] ss:$8 sps:$4 sm:$0xff]  }
  0x36   : > { %v504_v5 = vpack.c.bf16 %v476_v3, %v474_v2  ;;  %v5499_v14 = vld [vmem:[%s6185_s26 + $0x20] ss:$8 sps:$4 sm:$0xff]   ;;  %v5502_v15 = vld [vmem:[%s6185_s26 + $0x170] ss:$8 sps:$4 sm:$0xff]   ;;  %v5503_v16 = vld [vmem:[%s6185_s26 + $0x34] ss:$8 sps:$4 sm:$0xff]  }
  0x37   : > { %v5506_v17 = vld [vmem:[%s6185_s26 + $0x184] ss:$8 sps:$4 sm:$0xff]   ;;  %v5505_v18 = vld [vmem:[%s6185_s26 + $0x30] ss:$8 sps:$4 sm:$0xff]   ;;  %v5508_v19 = vld [vmem:[%s6185_s26 + $0x180] ss:$8 sps:$4 sm:$0xff]  }
  0x38   : > { %1114 = vmatpush1.bf16.msra.mxu0 %v496_v30  ;;  %5465 = vmatpush1.bf16.msra.mxu1 %v496_v30  ;;  %v5509_v20 = vld [vmem:[%s6185_s26 + $0x44] ss:$8 sps:$4 sm:$0xff]   ;;  %v5512_v21 = vld [vmem:[%s6185_s26 + $0x194] ss:$8 sps:$4 sm:$0xff]   ;;  %v5511_v22 = vld [vmem:[%s6185_s26 + $0x40] ss:$8 sps:$4 sm:$0xff]  }
  0x39   : > { %1115 = vmatprep.subr.bf16.mxu0 %v499_v36  ;;  %5452 = vmatprep.subr.bf16.mxu1 %v499_v36  ;;  %v5514_v23 = vld [vmem:[%s6185_s26 + $0x190] ss:$8 sps:$4 sm:$0xff]   ;;  %v5515_v24 = vld [vmem:[%s6185_s26 + $0x54] ss:$8 sps:$4 sm:$0xff]   ;;  %v5518_v25 = vld [vmem:[%s6185_s26 + $0x1a4] ss:$8 sps:$4 sm:$0xff]  }
  0x3a   : > { %v5517_v26 = vld [vmem:[%s6185_s26 + $0x50] ss:$8 sps:$4 sm:$0xff]   ;;  %v5520_v27 = vld [vmem:[%s6185_s26 + $0x1a0] ss:$8 sps:$4 sm:$0xff]   ;;  %v5521_v28 = vld [vmem:[%s6185_s26 + $0x64] ss:$8 sps:$4 sm:$0xff]  }
  0x3b   : > { %v5524_v29 = vld [vmem:[%s6185_s26 + $0x1b4] ss:$8 sps:$4 sm:$0xff]   ;;  %v5523_v30 = vld [vmem:[%s6185_s26 + $0x60] ss:$8 sps:$4 sm:$0xff]   ;;  %v5526_v31 = vld [vmem:[%s6185_s26 + $0x1b0] ss:$8 sps:$4 sm:$0xff]  }
  0x3c   : > { %1116 = vmatpush1.bf16.msra.mxu0 %v498_v45  ;;  %5466 = vmatpush1.bf16.msra.mxu1 %v498_v45  ;;  %v5527_v32 = vld [vmem:[%s6185_s26 + $0x74] ss:$8 sps:$4 sm:$0xff]   ;;  %v5530_v33 = vld [vmem:[%s6185_s26 + $0x1c4] ss:$8 sps:$4 sm:$0xff]   ;;  %v5529_v34 = vld [vmem:[%s6185_s26 + $0x70] ss:$8 sps:$4 sm:$0xff]  }
  0x3d   : > { %1117 = vmatprep.subr.bf16.mxu0 %v501_v50  ;;  %5453 = vmatprep.subr.bf16.mxu1 %v501_v50  ;;  %v5532_v35 = vld [vmem:[%s6185_s26 + $0x1c0] ss:$8 sps:$4 sm:$0xff]   ;;  %v5533_v36 = vld [vmem:[%s6185_s26 + $0x84] ss:$8 sps:$4 sm:$0xff]   ;;  %v5536_v37 = vld [vmem:[%s6185_s26 + $0x1d4] ss:$8 sps:$4 sm:$0xff]  }
  0x3e   : > { %v5535_v38 = vld [vmem:[%s6185_s26 + $0x80] ss:$8 sps:$4 sm:$0xff]   ;;  %v5538_v39 = vld [vmem:[%s6185_s26 + $0x1d0] ss:$8 sps:$4 sm:$0xff]   ;;  %v5539_v40 = vld [vmem:[%s6185_s26 + $0x94] ss:$8 sps:$4 sm:$0xff]  }
  0x3f   : > { %v5542_v41 = vld [vmem:[%s6185_s26 + $0x1e4] ss:$8 sps:$4 sm:$0xff]   ;;  %v5541_v42 = vld [vmem:[%s6185_s26 + $0x90] ss:$8 sps:$4 sm:$0xff]   ;;  %v5544_v43 = vld [vmem:[%s6185_s26 + $0x1e0] ss:$8 sps:$4 sm:$0xff]  }
  0x40   : > { %1118 = vmatpush1.bf16.msra.mxu0 %v500_v56  ;;  %5467 = vmatpush1.bf16.msra.mxu1 %v500_v56  ;;  %v5545_v44 = vld [vmem:[%s6185_s26 + $0xa4] ss:$8 sps:$4 sm:$0xff]   ;;  %v5548_v45 = vld [vmem:[%s6185_s26 + $0x1f4] ss:$8 sps:$4 sm:$0xff]   ;;  %v5547_v46 = vld [vmem:[%s6185_s26 + $0xa0] ss:$8 sps:$4 sm:$0xff]  }
  0x41   : > { %1119 = vmatprep.subr.bf16.mxu0 %v503_v61  ;;  %5454 = vmatprep.subr.bf16.mxu1 %v503_v61  ;;  %v5550_v47 = vld [vmem:[%s6185_s26 + $0x1f0] ss:$8 sps:$4 sm:$0xff]   ;;  %v5551_v48 = vld [vmem:[%s6185_s26 + $0xb4] ss:$8 sps:$4 sm:$0xff]   ;;  %v5554_v49 = vld [vmem:[%s6185_s26 + $0x204] ss:$8 sps:$4 sm:$0xff]  }
  0x42   : > { %v5553_v50 = vld [vmem:[%s6185_s26 + $0xb0] ss:$8 sps:$4 sm:$0xff]   ;;  %v5556_v51 = vld [vmem:[%s6185_s26 + $0x200] ss:$8 sps:$4 sm:$0xff]   ;;  %v5557_v52 = vld [vmem:[%s6185_s26 + $0xc4] ss:$8 sps:$4 sm:$0xff]  }
  0x43   : > { %v5560_v53 = vld [vmem:[%s6185_s26 + $0x214] ss:$8 sps:$4 sm:$0xff]   ;;  %v5559_v54 = vld [vmem:[%s6185_s26 + $0xc0] ss:$8 sps:$4 sm:$0xff]   ;;  %v5562_v55 = vld [vmem:[%s6185_s26 + $0x210] ss:$8 sps:$4 sm:$0xff]  }
  0x44   : > { %1120 = vmatpush1.bf16.msra.mxu0 %v502_v1  ;;  %5468 = vmatpush1.bf16.msra.mxu1 %v502_v1  ;;  %v5563_v56 = vld [vmem:[%s6185_s26 + $0xd4] ss:$8 sps:$4 sm:$0xff]   ;;  %v5566_v57 = vld [vmem:[%s6185_s26 + $0x224] ss:$8 sps:$4 sm:$0xff]   ;;  %v5565_v58 = vld [vmem:[%s6185_s26 + $0xd0] ss:$8 sps:$4 sm:$0xff]  }
  0x45   : > { %1121 = vmatprep.subr.bf16.mxu0 %v505_v4  ;;  %5455 = vmatprep.subr.bf16.mxu1 %v505_v4  ;;  %v5568_v59 = vld [vmem:[%s6185_s26 + $0x220] ss:$8 sps:$4 sm:$0xff]   ;;  %v5569_v60 = vld [vmem:[%s6185_s26 + $0xe4] ss:$8 sps:$4 sm:$0xff]   ;;  %v5572_v61 = vld [vmem:[%s6185_s26 + $0x234] ss:$8 sps:$4 sm:$0xff]  }
  0x46   : > { %v5571_v62 = vld [vmem:[%s6185_s26 + $0xe0] ss:$8 sps:$4 sm:$0xff]   ;;  %v5574_v63 = vld [vmem:[%s6185_s26 + $0x230] ss:$8 sps:$4 sm:$0xff]   ;;  %v5575_v0 = vld [vmem:[%s6185_s26 + $0xf4] ss:$8 sps:$4 sm:$0xff]  }
  0x47   : > { %v5578_v1 = vld [vmem:[%s6185_s26 + $0x244] ss:$8 sps:$4 sm:$0xff]   ;;  %v5577_v2 = vld [vmem:[%s6185_s26 + $0xf0] ss:$8 sps:$4 sm:$0xff]   ;;  %v5580_v3 = vld [vmem:[%s6185_s26 + $0x240] ss:$8 sps:$4 sm:$0xff]  }
  0x48   : > { %1122 = vmatpush1.bf16.msra.mxu0 %v504_v5  ;;  %5469 = vmatpush1.bf16.msra.mxu1 %v504_v5  ;;  %v5581_v4 = vld [vmem:[%s6185_s26 + $0x104] ss:$8 sps:$4 sm:$0xff]   ;;  %v5583_v5 = vld [vmem:[%s6185_s26 + $0x100] ss:$8 sps:$4 sm:$0xff]  }
  0x4b   : > { %1128 = vmatmul.mubr.bf16.vlgmr.msra.gmra.mrb[0].mxu0 %v5485_v6  ;;  %1338 = vmatmul.mubr.bf16.vlgmr.msra.gmra.mrb[0].mxu1 %v5488_v7  ;;  %v5584_v6 = vld [vmem:[%s6185_s26 + $0x254] ss:$8 sps:$4 sm:$0xff]   ;;  %v5586_v7 = vld [vmem:[%s6185_s26 + $0x250] ss:$8 sps:$4 sm:$0xff]  }
  0x4c   : > { %5397 = vmatprep.mubr.msk.bf16.mxu0 %vm968_vm0, %v5491_v8  ;;  %5418 = vmatprep.mubr.msk.bf16.mxu1 %vm968_vm0, %v5494_v9  ;;  %v5587_v8 = vld [vmem:[%s6185_s26 + $0x114] ss:$8 sps:$4 sm:$0xff]   ;;  %v5589_v9 = vld [vmem:[%s6185_s26 + $0x110] ss:$8 sps:$4 sm:$0xff]  }
  0x53   : > { %1138 = vmatmul.mubr.bf16.gmra.mrb[4].mxu0 %v5493_v10  ;;  %1348 = vmatmul.mubr.bf16.gmra.mrb[4].mxu1 %v5496_v11  ;;  %v5590_v10 = vld [vmem:[%s6185_s26 + $0x264] ss:$8 sps:$4 sm:$0xff]   ;;  %v5592_v11 = vld [vmem:[%s6185_s26 + $0x260] ss:$8 sps:$4 sm:$0xff]  }
  0x54   : > { %5398 = vmatprep.mubr.msk.bf16.mxu0 %vm968_vm0, %v5497_v12  ;;  %5419 = vmatprep.mubr.msk.bf16.mxu1 %vm968_vm0, %v5500_v13  ;;  %v5593_v12 = vld [vmem:[%s6185_s26 + $0x124] ss:$8 sps:$4 sm:$0xff]   ;;  %v5595_v13 = vld [vmem:[%s6185_s26 + $0x120] ss:$8 sps:$4 sm:$0xff]  }
  0x5b   : > { %1148 = vmatmul.mubr.bf16.gmra.mrb[8].mxu0 %v5499_v14  ;;  %1358 = vmatmul.mubr.bf16.gmra.mrb[8].mxu1 %v5502_v15  ;;  %v5596_v14 = vld [vmem:[%s6185_s26 + $0x274] ss:$8 sps:$4 sm:$0xff]   ;;  %v5598_v15 = vld [vmem:[%s6185_s26 + $0x270] ss:$8 sps:$4 sm:$0xff]  }
  0x5c   : > { %5399 = vmatprep.mubr.msk.bf16.mxu0 %vm968_vm0, %v5503_v16  ;;  %5420 = vmatprep.mubr.msk.bf16.mxu1 %vm968_vm0, %v5506_v17  ;;  %v5599_v16 = vld [vmem:[%s6185_s26 + $0x134] ss:$8 sps:$4 sm:$0xff]   ;;  %v5601_v17 = vld [vmem:[%s6185_s26 + $0x130] ss:$8 sps:$4 sm:$0xff]  }
  0x63   : > { %1158 = vmatmul.mubr.bf16.gmra.mrb[12].mxu0 %v5505_v18  ;;  %1368 = vmatmul.mubr.bf16.gmra.mrb[12].mxu1 %v5508_v19  ;;  %v5602_v18 = vld [vmem:[%s6185_s26 + $0x284] ss:$8 sps:$4 sm:$0xff]   ;;  %v5604_v19 = vld [vmem:[%s6185_s26 + $0x280] ss:$8 sps:$4 sm:$0xff]  }
  0x64   : > { %5400 = vmatprep.mubr.msk.bf16.mxu0 %vm968_vm0, %v5509_v20  ;;  %5421 = vmatprep.mubr.msk.bf16.mxu1 %vm968_vm0, %v5512_v21  ;;  %v5605_v20 = vld [vmem:[%s6185_s26 + $0x144] ss:$8 sps:$4 sm:$0xff]   ;;  %v5607_v21 = vld [vmem:[%s6185_s26 + $0x140] ss:$8 sps:$4 sm:$0xff]  }
  0x6b   : > { %1168 = vmatmul.mubr.bf16.gmra.mrb[16].mxu0 %v5511_v22  ;;  %1378 = vmatmul.mubr.bf16.gmra.mrb[16].mxu1 %v5514_v23  ;;  %v5608_v22 = vld [vmem:[%s6185_s26 + $0x294] ss:$8 sps:$4 sm:$0xff]   ;;  %v5610_v23 = vld [vmem:[%s6185_s26 + $0x290] ss:$8 sps:$4 sm:$0xff]  }
  0x6c   : > { %5401 = vmatprep.mubr.msk.bf16.mxu0 %vm968_vm0, %v5515_v24  ;;  %5422 = vmatprep.mubr.msk.bf16.mxu1 %vm968_vm0, %v5518_v25 }
  0x73   : > { %1178 = vmatmul.mubr.bf16.gmra.mrb[20].mxu0 %v5517_v26  ;;  %1388 = vmatmul.mubr.bf16.gmra.mrb[20].mxu1 %v5520_v27 }
  0x74   : > { %5402 = vmatprep.mubr.msk.bf16.mxu0 %vm968_vm0, %v5521_v28  ;;  %5423 = vmatprep.mubr.msk.bf16.mxu1 %vm968_vm0, %v5524_v29 }
  0x7b   : > { %1188 = vmatmul.mubr.bf16.gmra.mrb[24].mxu0 %v5523_v30  ;;  %1398 = vmatmul.mubr.bf16.gmra.mrb[24].mxu1 %v5526_v31 }
  0x7c   : > { %5403 = vmatprep.mubr.msk.bf16.mxu0 %vm968_vm0, %v5527_v32  ;;  %5424 = vmatprep.mubr.msk.bf16.mxu1 %vm968_vm0, %v5530_v33 }
  0x83   : > { %1198 = vmatmul.mubr.bf16.gmra.mrb[28].mxu0 %v5529_v34  ;;  %1408 = vmatmul.mubr.bf16.gmra.mrb[28].mxu1 %v5532_v35 }
  0x84   : > { %5404 = vmatprep.mubr.msk.bf16.mxu0 %vm968_vm0, %v5533_v36  ;;  %5425 = vmatprep.mubr.msk.bf16.mxu1 %vm968_vm0, %v5536_v37 }
  0x8b   : > { %1208 = vmatmul.mubr.bf16.gmra.mrb[32].mxu0 %v5535_v38  ;;  %1418 = vmatmul.mubr.bf16.gmra.mrb[32].mxu1 %v5538_v39 }
  0x8c   : > { %5405 = vmatprep.mubr.msk.bf16.mxu0 %vm968_vm0, %v5539_v40  ;;  %5426 = vmatprep.mubr.msk.bf16.mxu1 %vm968_vm0, %v5542_v41 }
  0x93   : > { %1218 = vmatmul.mubr.bf16.gmra.mrb[36].mxu0 %v5541_v42  ;;  %1428 = vmatmul.mubr.bf16.gmra.mrb[36].mxu1 %v5544_v43 }
  0x94   : > { %5406 = vmatprep.mubr.msk.bf16.mxu0 %vm968_vm0, %v5545_v44  ;;  %5427 = vmatprep.mubr.msk.bf16.mxu1 %vm968_vm0, %v5548_v45 }
  0x9b   : > { %1228 = vmatmul.mubr.bf16.gmra.mrb[40].mxu0 %v5547_v46  ;;  %1438 = vmatmul.mubr.bf16.gmra.mrb[40].mxu1 %v5550_v47 }
  0x9c   : > { %5407 = vmatprep.mubr.msk.bf16.mxu0 %vm968_vm0, %v5551_v48  ;;  %5428 = vmatprep.mubr.msk.bf16.mxu1 %vm968_vm0, %v5554_v49 }
  0xa3   : > { %1238 = vmatmul.mubr.bf16.gmra.mrb[44].mxu0 %v5553_v50  ;;  %1448 = vmatmul.mubr.bf16.gmra.mrb[44].mxu1 %v5556_v51 }
  0xa4   : > { %5408 = vmatprep.mubr.msk.bf16.mxu0 %vm968_vm0, %v5557_v52  ;;  %5429 = vmatprep.mubr.msk.bf16.mxu1 %vm968_vm0, %v5560_v53 }
  0xab   : > { %1248 = vmatmul.mubr.bf16.gmra.mrb[48].mxu0 %v5559_v54  ;;  %1458 = vmatmul.mubr.bf16.gmra.mrb[48].mxu1 %v5562_v55 }
  0xac   : > { %5409 = vmatprep.mubr.msk.bf16.mxu0 %vm968_vm0, %v5563_v56  ;;  %5430 = vmatprep.mubr.msk.bf16.mxu1 %vm968_vm0, %v5566_v57 }
  0xb3   : > { %1258 = vmatmul.mubr.bf16.gmra.mrb[52].mxu0 %v5565_v58  ;;  %1468 = vmatmul.mubr.bf16.gmra.mrb[52].mxu1 %v5568_v59 }
  0xb4   : > { %5410 = vmatprep.mubr.msk.bf16.mxu0 %vm968_vm0, %v5569_v60  ;;  %5431 = vmatprep.mubr.msk.bf16.mxu1 %vm968_vm0, %v5572_v61 }
  0xbb   : > { %1268 = vmatmul.mubr.bf16.gmra.mrb[56].mxu0 %v5571_v62  ;;  %1478 = vmatmul.mubr.bf16.gmra.mrb[56].mxu1 %v5574_v63 }
  0xbc   : > { %5411 = vmatprep.mubr.msk.bf16.mxu0 %vm968_vm0, %v5575_v0  ;;  %5432 = vmatprep.mubr.msk.bf16.mxu1 %vm968_vm0, %v5578_v1 }
  0xc3   : > { %1278 = vmatmul.mubr.bf16.gmra.mrb[60].mxu0 %v5577_v2  ;;  %1488 = vmatmul.mubr.bf16.gmra.mrb[60].mxu1 %v5580_v3 }
  0xc4   : > { %5412 = vmatprep.mubr.msk.bf16.mxu0 %vm968_vm0, %v5581_v4  ;;  %5433 = vmatprep.mubr.msk.bf16.mxu1 %vm968_vm0, %v5584_v6 }
  0xcb   : > { %1288 = vmatmul.mubr.bf16.gmra.mrb[64].mxu0 %v5583_v5  ;;  %1498 = vmatmul.mubr.bf16.gmra.mrb[64].mxu1 %v5586_v7 }
  0xcc   : > { %5413 = vmatprep.mubr.msk.bf16.mxu0 %vm968_vm0, %v5587_v8  ;;  %5434 = vmatprep.mubr.msk.bf16.mxu1 %vm968_vm0, %v5590_v10 }
  0xd3   : > { %1298 = vmatmul.mubr.bf16.gmra.mrb[68].mxu0 %v5589_v9  ;;  %1508 = vmatmul.mubr.bf16.gmra.mrb[68].mxu1 %v5592_v11 }
  0xd4   : > { %5414 = vmatprep.mubr.msk.bf16.mxu0 %vm968_vm0, %v5593_v12  ;;  %5435 = vmatprep.mubr.msk.bf16.mxu1 %vm968_vm0, %v5596_v14 }
  0xdb   : > { %1308 = vmatmul.mubr.bf16.gmra.mrb[72].mxu0 %v5595_v13  ;;  %1518 = vmatmul.mubr.bf16.gmra.mrb[72].mxu1 %v5598_v15 }
  0xdc   : > { %5415 = vmatprep.mubr.msk.bf16.mxu0 %vm968_vm0, %v5599_v16  ;;  %5436 = vmatprep.mubr.msk.bf16.mxu1 %vm968_vm0, %v5602_v18 }
  0xe3   : > { %1318 = vmatmul.mubr.bf16.gmra.mrb[76].mxu0 %v5601_v17  ;;  %1528 = vmatmul.mubr.bf16.gmra.mrb[76].mxu1 %v5604_v19 }
  0xe4   : > { %5416 = vmatprep.mubr.msk.bf16.mxu0 %vm968_vm0, %v5605_v20  ;;  %5437 = vmatprep.mubr.msk.bf16.mxu1 %vm968_vm0, %v5608_v22 }
  0xeb   : > { %1328 = vmatmul.mubr.bf16.gmra.mrb[80].mxu0 %v5607_v21  ;;  %1538 = vmatmul.mubr.bf16.gmra.mrb[80].mxu1 %v5610_v23 }
 0x11e   : > { %v6385_v24 = vpop.f32.mrb[0].mxu0  ;;  %v6387_v25 = vpop.f32.mrb[0].mxu1 }
 0x11f   : > { %10999 = vst [vmem:[#allocation2_spill] sm:$0xff] %v6385_v24  ;;  %11000 = vst [vmem:[#allocation3_spill] sm:$0xff] %v6387_v25  ;;  %v6389_v26 = vpop.f32.mrb[1].mxu0  ;;  %v6391_v27 = vpop.f32.mrb[1].mxu1  ;;  %v1969_v28 = vmul.f32 %v6385_v24, %v6385_v24  ;;  %v2053_v29 = vmul.f32 %v6387_v25, %v6387_v25 }
 0x120   : > { %11001 = vst [vmem:[#allocation4_spill] sm:$0xff] %v6389_v26  ;;  %11002 = vst [vmem:[#allocation5_spill] sm:$0xff] %v6391_v27  ;;  %v1970_v30 = vmul.f32 %v6389_v26, %v6389_v26  ;;  %v2054_v31 = vmul.f32 %v6391_v27, %v6391_v27  ;;  %v6401_v32 = vpop.f32.mrb[2].mxu0  ;;  %v6403_v33 = vpop.f32.mrb[2].mxu1  ;;  %v1549_v34 = vsel %vm1548_vm1, %v6389_v26, 0.0  ;;  %v1717_v35 = vsel %vm1548_vm1, %v6391_v27, 0.0 }
 0x121   : > { %11003 = vst [vmem:[#allocation6_spill] sm:$0xff] %v6401_v32  ;;  %11004 = vst [vmem:[#allocation7_spill] sm:$0xff] %v6403_v33  ;;  %v6409_v36 = vpop.f32.mrb[3].mxu0  ;;  %v6411_v37 = vpop.f32.mrb[3].mxu1  ;;  %v1550_v38 = vadd.f32 %v1549_v34, %v6385_v24  ;;  %v1718_v39 = vadd.f32 %v1717_v35, %v6387_v25  ;;  %v1971_v40 = vmul.f32 %v6401_v32, %v6401_v32 }
 0x122   : > { %11005 = vst [vmem:[#allocation8_spill] sm:$0xff] %v6409_v36  ;;  %11006 = vst [vmem:[#allocation9_spill] sm:$0xff] %v6411_v37  ;;  %v2055_v41 = vmul.f32 %v6403_v33, %v6403_v33  ;;  %v1972_v42 = vmul.f32 %v6409_v36, %v6409_v36  ;;  %v2056_v43 = vmul.f32 %v6411_v37, %v6411_v37  ;;  %v1721_v44 = vsel %vm1548_vm1, %v6411_v37, 0.0 }
 0x123   : > { %v1553_v45 = vsel %vm1548_vm1, %v6409_v36, 0.0  ;;  %1551 = vadd.xlane.f32.xlu0 %v1550_v38  ;;  %v1722_v46 = vadd.f32 %v1721_v44, %v6403_v33  ;;  %v2137_v48 = vsel %vm1548_vm1, %v1970_v30, 0.0  ;;  %v2305_v49 = vsel %vm1548_vm1, %v2054_v31, 0.0 }
 0x124   : > { %v1554_v47 = vadd.f32 %v1553_v45, %v6401_v32  ;;  %v2141_v50 = vsel %vm1548_vm1, %v1972_v42, 0.0  ;;  %v2309_v51 = vsel %vm1548_vm1, %v2056_v43, 0.0  ;;  %v2138_v52 = vadd.f32 %v2137_v48, %v1969_v28 }
 0x125   : > { %v6433_v53 = vadd.f32 %v2305_v49, %v2053_v29  ;;  %1723 = vadd.xlane.f32.xlu1 %v1722_v46  ;;  %v2142_v54 = vadd.f32 %v2141_v50, %v1971_v40  ;;  %v2310_v55 = vadd.f32 %v2309_v51, %v2055_v41 }
 0x126   : > { %v6435_v56 = vpop.f32.mrb[4].mxu0  ;;  %v6437_v57 = vpop.f32.mrb[4].mxu1 }
 0x127   : > { %11007 = vst [vmem:[#allocation10_spill] sm:$0xff] %v6435_v56  ;;  %11008 = vst [vmem:[#allocation11_spill] sm:$0xff] %v6437_v57  ;;  %1719 = vadd.xlane.f32.xlu0 %v1718_v39  ;;  %v6439_v58 = vpop.f32.mrb[5].mxu0  ;;  %v6441_v59 = vpop.f32.mrb[5].mxu1  ;;  %v1973_v60 = vmul.f32 %v6435_v56, %v6435_v56  ;;  %v2057_v61 = vmul.f32 %v6437_v57, %v6437_v57 }
 0x128   : > { %11009 = vst [vmem:[#allocation12_spill] sm:$0xff] %v6439_v58  ;;  %11010 = vst [vmem:[#allocation13_spill] sm:$0xff] %v6441_v59  ;;  %v1974_v62 = vmul.f32 %v6439_v58, %v6439_v58  ;;  %v6449_v63 = vpop.f32.mrb[6].mxu0  ;;  %v2058_v0 = vmul.f32 %v6441_v59, %v6441_v59  ;;  %v6453_v1 = vpop.f32.mrb[6].mxu1  ;;  %v1557_v2 = vsel %vm1548_vm1, %v6439_v58, 0.0  ;;  %v1725_v3 = vsel %vm1548_vm1, %v6441_v59, 0.0 }
 0x129   : > { %11011 = vst [vmem:[#allocation14_spill] sm:$0xff] %v6449_v63  ;;  %11012 = vst [vmem:[#allocation15_spill] sm:$0xff] %v6453_v1  ;;  %2143 = vadd.xlane.f32.xlu1 %v2142_v54  ;;  %v6459_v4 = vpop.f32.mrb[7].mxu0  ;;  %v6461_v5 = vpop.f32.mrb[7].mxu1  ;;  %v1558_v6 = vadd.f32 %v1557_v2, %v6435_v56  ;;  %v1726_v7 = vadd.f32 %v1725_v3, %v6437_v57  ;;  %v1975_v8 = vmul.f32 %v6449_v63, %v6449_v63 }
 0x12a   : > { %11013 = vst [vmem:[#allocation16_spill] sm:$0xff] %v6459_v4  ;;  %11014 = vst [vmem:[#allocation17_spill] sm:$0xff] %v6461_v5  ;;  %v2059_v9 = vmul.f32 %v6453_v1, %v6453_v1  ;;  %v1976_v10 = vmul.f32 %v6459_v4, %v6459_v4  ;;  %v2060_v11 = vmul.f32 %v6461_v5, %v6461_v5  ;;  %v1561_v12 = vsel %vm1548_vm1, %v6459_v4, 0.0 }
 0x12b   : > { %v1729_v13 = vsel %vm1548_vm1, %v6461_v5, 0.0  ;;  %1555 = vadd.xlane.f32.xlu0 %v1554_v47  ;;  %v1562_v14 = vadd.f32 %v1561_v12, %v6449_v63  ;;  %v2145_v16 = vsel %vm1548_vm1, %v1974_v62, 0.0  ;;  %v2313_v17 = vsel %vm1548_vm1, %v2058_v0, 0.0 }
 0x12c   : > { %v1730_v15 = vadd.f32 %v1729_v13, %v6453_v1  ;;  %v6481_v18 = vadd.f32 %v2145_v16, %v1973_v60  ;;  %v2149_v19 = vsel %vm1548_vm1, %v1976_v10, 0.0  ;;  %v6484_v20 = vadd.f32 %v2313_v17, %v2057_v61 }
 0x12d   : > { %v2317_v21 = vsel %vm1548_vm1, %v2060_v11, 0.0  ;;  %2311 = vadd.xlane.f32.xlu1 %v2310_v55  ;;  %v6487_v22 = vadd.f32 %v2149_v19, %v1975_v8 }
 0x12e   : > { %v6489_v23 = vadd.f32 %v2317_v21, %v2059_v9  ;;  %v6491_v28 = vpop.f32.mrb[8].mxu0  ;;  %v6493_v29 = vpop.f32.mrb[8].mxu1 }
 0x12f   : > { %11015 = vst [vmem:[#allocation18_spill] sm:$0xff] %v6491_v28  ;;  %11016 = vst [vmem:[#allocation19_spill] sm:$0xff] %v6493_v29  ;;  %2139 = vadd.xlane.f32.xlu0 %v2138_v52  ;;  %v6495_v30 = vpop.f32.mrb[9].mxu0  ;;  %v6497_v31 = vpop.f32.mrb[9].mxu1  ;;  %v1977_v34 = vmul.f32 %v6491_v28, %v6491_v28  ;;  %v2061_v35 = vmul.f32 %v6493_v29, %v6493_v29 }
 0x130   : > { %11017 = vst [vmem:[#allocation20_spill] sm:$0xff] %v6495_v30  ;;  %11018 = vst [vmem:[#allocation21_spill] sm:$0xff] %v6497_v31  ;;  %v1978_v38 = vmul.f32 %v6495_v30, %v6495_v30  ;;  %v6505_v39 = vpop.f32.mrb[10].mxu0  ;;  %v2062_v40 = vmul.f32 %v6497_v31, %v6497_v31  ;;  %v6509_v41 = vpop.f32.mrb[10].mxu1  ;;  %v1565_v42 = vsel %vm1548_vm1, %v6495_v30, 0.0  ;;  %v1733_v43 = vsel %vm1548_vm1, %v6497_v31, 0.0 }
 0x131   : > { %11019 = vst [vmem:[#allocation22_spill] sm:$0xff] %v6505_v39  ;;  %11020 = vst [vmem:[#allocation23_spill] sm:$0xff] %v6509_v41  ;;  %1559 = vadd.xlane.f32.xlu1 %v1558_v6  ;;  %v6515_v44 = vpop.f32.mrb[11].mxu0  ;;  %v6517_v45 = vpop.f32.mrb[11].mxu1  ;;  %v6520_v46 = vadd.f32 %v1565_v42, %v6491_v28  ;;  %v6523_v47 = vadd.f32 %v1733_v43, %v6493_v29  ;;  %v1979_v48 = vmul.f32 %v6505_v39, %v6505_v39 }
 0x132   : > { %11021 = vst [vmem:[#allocation24_spill] sm:$0xff] %v6515_v44  ;;  %11022 = vst [vmem:[#allocation25_spill] sm:$0xff] %v6517_v45  ;;  %v2063_v49 = vmul.f32 %v6509_v41, %v6509_v41  ;;  %v1980_v50 = vmul.f32 %v6515_v44, %v6515_v44  ;;  %v2064_v51 = vmul.f32 %v6517_v45, %v6517_v45  ;;  %v1569_v52 = vsel %vm1548_vm1, %v6515_v44, 0.0 }
 0x133   : > { %v1737_v54 = vsel %vm1548_vm1, %v6517_v45, 0.0  ;;  %2307 = vadd.xlane.f32.xlu0 %v6433_v53  ;;  %v6539_v55 = vadd.f32 %v1569_v52, %v6505_v39  ;;  %v2153_v61 = vsel %vm1548_vm1, %v1978_v38, 0.0  ;;  %v2321_v62 = vsel %vm1548_vm1, %v2062_v40, 0.0 }
 0x134   : > { %v6542_v60 = vadd.f32 %v1737_v54, %v6509_v41  ;;  %v6546_v0 = vadd.f32 %v2153_v61, %v1977_v34  ;;  %v2157_v2 = vsel %vm1548_vm1, %v1980_v50, 0.0  ;;  %v6549_v3 = vadd.f32 %v2321_v62, %v2061_v35 }
 0x135   : > { %v2325_v6 = vsel %vm1548_vm1, %v2064_v51, 0.0  ;;  %1563 = vadd.xlane.f32.xlu1 %v1562_v14  ;;  %v6552_v53 = vadd.f32 %v2157_v2, %v1979_v48 }
 0x136   : > { %v6554_v8 = vadd.f32 %v2325_v6, %v2063_v49  ;;  %v6556_v9 = vpop.f32.mrb[12].mxu0  ;;  %v6558_v10 = vpop.f32.mrb[12].mxu1 }
 0x137   : > { %11023 = vst [vmem:[#allocation26_spill] sm:$0xff] %v6556_v9  ;;  %11024 = vst [vmem:[#allocation27_spill] sm:$0xff] %v6558_v10  ;;  %1727 = vadd.xlane.f32.xlu0 %v1726_v7  ;;  %v6560_v11 = vpop.f32.mrb[13].mxu0  ;;  %v6562_v12 = vpop.f32.mrb[13].mxu1  ;;  %v1981_v13 = vmul.f32 %v6556_v9, %v6556_v9  ;;  %v2065_v16 = vmul.f32 %v6558_v10, %v6558_v10 }
 0x138   : > { %11025 = vst [vmem:[#allocation28_spill] sm:$0xff] %v6560_v11  ;;  %11026 = vst [vmem:[#allocation29_spill] sm:$0xff] %v6562_v12  ;;  %v1982_v14 = vmul.f32 %v6560_v11, %v6560_v11  ;;  %v6570_v17 = vpop.f32.mrb[14].mxu0  ;;  %v2066_v19 = vmul.f32 %v6562_v12, %v6562_v12  ;;  %v6574_v21 = vpop.f32.mrb[14].mxu1  ;;  %v1573_v7 = vsel %vm1548_vm1, %v6560_v11, 0.0  ;;  %v1741_v34 = vsel %vm1548_vm1, %v6562_v12, 0.0 }
 0x139   : > { %11027 = vst [vmem:[#allocation30_spill] sm:$0xff] %v6570_v17  ;;  %11028 = vst [vmem:[#allocation31_spill] sm:$0xff] %v6574_v21  ;;  %1731 = vadd.xlane.f32.xlu1 %v1730_v15  ;;  %v6580_v35 = vpop.f32.mrb[15].mxu0  ;;  %v6582_v38 = vpop.f32.mrb[15].mxu1  ;;  %v6585_v40 = vadd.f32 %v1573_v7, %v6556_v9  ;;  %v6588_v42 = vadd.f32 %v1741_v34, %v6558_v10  ;;  %v1983_v43 = vmul.f32 %v6570_v17, %v6570_v17 }
 0x13a   : > { %11029 = vst [vmem:[#allocation32_spill] sm:$0xff] %v6580_v35  ;;  %11030 = vst [vmem:[#allocation33_spill] sm:$0xff] %v6582_v38  ;;  %v2067_v48 = vmul.f32 %v6574_v21, %v6574_v21  ;;  %v1984_v49 = vmul.f32 %v6580_v35, %v6580_v35  ;;  %v2068_v15 = vmul.f32 %v6582_v38, %v6582_v38  ;;  %v1577_v50 = vsel %vm1548_vm1, %v6580_v35, 0.0 }
 0x13b   : > { %v1745_v51 = vsel %vm1548_vm1, %v6582_v38, 0.0  ;;  %2147 = vadd.xlane.f32.xlu0 %v6481_v18  ;;  %v6604_v52 = vadd.f32 %v1577_v50, %v6570_v17  ;;  %v2161_v61 = vsel %vm1548_vm1, %v1982_v14, 0.0  ;;  %v2329_v62 = vsel %vm1548_vm1, %v2066_v19, 0.0 }
 0x13c   : > { %v6607_v54 = vadd.f32 %v1745_v51, %v6574_v21  ;;  %v6611_v2 = vadd.f32 %v2161_v61, %v1981_v13  ;;  %v2165_v6 = vsel %vm1548_vm1, %v1984_v49, 0.0  ;;  %v6614_v7 = vadd.f32 %v2329_v62, %v2065_v16 }
 0x13d   : > { %v2333_v34 = vsel %vm1548_vm1, %v2068_v15, 0.0  ;;  %2151 = vadd.xlane.f32.xlu1 %v6487_v22  ;;  %v6618_v18 = vadd.f32 %v2165_v6, %v1983_v43 }
 0x13e   : > { %v6620_v50 = vadd.f32 %v2333_v34, %v2067_v48  ;;  %v6622_v51 = vpop.f32.mrb[16].mxu0  ;;  %v6624_v38 = vpop.f32.mrb[16].mxu1 }
 0x13f   : > { %11031 = vst [vmem:[#allocation34_spill] sm:$0xff] %v6622_v51  ;;  %11032 = vst [vmem:[#allocation35_spill] sm:$0xff] %v6624_v38  ;;  %2315 = vadd.xlane.f32.xlu0 %v6484_v20  ;;  %v6627_v13 = vpop.f32.mrb[17].mxu0  ;;  %v6629_v14 = vpop.f32.mrb[17].mxu1  ;;  %v1985_v16 = vmul.f32 %v6622_v51, %v6622_v51  ;;  %v2069_v22 = vmul.f32 %v6624_v38, %v6624_v38 }
 0x140   : > { %11033 = vst [vmem:[#allocation36_spill] sm:$0xff] %v6627_v13  ;;  %11034 = vst [vmem:[#allocation37_spill] sm:$0xff] %v6629_v14  ;;  %v1986_v19 = vmul.f32 %v6627_v13, %v6627_v13  ;;  %v6637_v43 = vpop.f32.mrb[18].mxu0  ;;  %v2070_v48 = vmul.f32 %v6629_v14, %v6629_v14  ;;  %v6641_v49 = vpop.f32.mrb[18].mxu1  ;;  %v1581_v20 = vsel %vm1548_vm1, %v6627_v13, 0.0  ;;  %v1749_v15 = vsel %vm1548_vm1, %v6629_v14, 0.0 }
 0x141   : > { %11035 = vst [vmem:[#allocation38_spill] sm:$0xff] %v6637_v43  ;;  %11036 = vst [vmem:[#allocation39_spill] sm:$0xff] %v6641_v49  ;;  %2319 = vadd.xlane.f32.xlu1 %v6489_v23  ;;  %v6648_v61 = vpop.f32.mrb[19].mxu0  ;;  %v6650_v62 = vpop.f32.mrb[19].mxu1  ;;  %v6653_v6 = vadd.f32 %v1581_v20, %v6622_v51  ;;  %v6656_v34 = vadd.f32 %v1749_v15, %v6624_v38  ;;  %v1987_v21 = vmul.f32 %v6637_v43, %v6637_v43 }
 0x142   : > { %11037 = vst [vmem:[#allocation40_spill] sm:$0xff] %v6648_v61  ;;  %11038 = vst [vmem:[#allocation41_spill] sm:$0xff] %v6650_v62  ;;  %v2071_v45 = vmul.f32 %v6641_v49, %v6641_v49  ;;  %v1988_v41 = vmul.f32 %v6648_v61, %v6648_v61  ;;  %v2072_v23 = vmul.f32 %v6650_v62, %v6650_v62  ;;  %v1585_v5 = vsel %vm1548_vm1, %v6648_v61, 0.0 }
 0x143   : > { %v1753_v20 = vsel %vm1548_vm1, %v6650_v62, 0.0  ;;  %1567 = vadd.xlane.f32.xlu0 %v6520_v46  ;;  %v6672_v15 = vadd.f32 %v1585_v5, %v6637_v43  ;;  %v2169_v14 = vsel %vm1548_vm1, %v1986_v19, 0.0  ;;  %v2337_v38 = vsel %vm1548_vm1, %v2070_v48, 0.0 }
 0x144   : > { %v6675_v1 = vadd.f32 %v1753_v20, %v6641_v49  ;;  %v6679_v37 = vadd.f32 %v2169_v14, %v1985_v16  ;;  %v2173_v33 = vsel %vm1548_vm1, %v1988_v41, 0.0  ;;  %v6682_v12 = vadd.f32 %v2337_v38, %v2069_v22 }
 0x145   : > { %v2341_v62 = vsel %vm1548_vm1, %v2072_v23, 0.0  ;;  %1571 = vadd.xlane.f32.xlu1 %v6539_v55  ;;  %v6686_v46 = vadd.f32 %v2173_v33, %v1987_v21 }
 0x146   : > { %v6688_v5 = vadd.f32 %v2341_v62, %v2071_v45  ;;  %v6690_v20 = vpop.f32.mrb[20].mxu0  ;;  %v6692_v49 = vpop.f32.mrb[20].mxu1 }
 0x147   : > { %11039 = vst [vmem:[#allocation42_spill] sm:$0xff] %v6690_v20  ;;  %11040 = vst [vmem:[#allocation43_spill] sm:$0xff] %v6692_v49  ;;  %1735 = vadd.xlane.f32.xlu0 %v6523_v47  ;;  %v6695_v14 = vpop.f32.mrb[21].mxu0  ;;  %v6697_v16 = vpop.f32.mrb[21].mxu1  ;;  %v1989_v41 = vmul.f32 %v6690_v20, %v6690_v20  ;;  %v2073_v55 = vmul.f32 %v6692_v49, %v6692_v49 }
 0x148   : > { %11041 = vst [vmem:[#allocation44_spill] sm:$0xff] %v6695_v14  ;;  %11042 = vst [vmem:[#allocation45_spill] sm:$0xff] %v6697_v16  ;;  %v1990_v33 = vmul.f32 %v6695_v14, %v6695_v14  ;;  %v6705_v45 = vpop.f32.mrb[22].mxu0  ;;  %v2074_v21 = vmul.f32 %v6697_v16, %v6697_v16  ;;  %v6709_v38 = vpop.f32.mrb[22].mxu1  ;;  %v1589_v47 = vsel %vm1548_vm1, %v6695_v14, 0.0  ;;  %v1757_v22 = vsel %vm1548_vm1, %v6697_v16, 0.0 }
 0x149   : > { %11043 = vst [vmem:[#allocation46_spill] sm:$0xff] %v6705_v45  ;;  %11044 = vst [vmem:[#allocation47_spill] sm:$0xff] %v6709_v38  ;;  %1739 = vadd.xlane.f32.xlu1 %v6542_v60  ;;  %v6716_v19 = vpop.f32.mrb[23].mxu0  ;;  %v6718_v48 = vpop.f32.mrb[23].mxu1  ;;  %v6721_v62 = vadd.f32 %v1589_v47, %v6690_v20  ;;  %v6724_v23 = vadd.f32 %v1757_v22, %v6692_v49  ;;  %v1991_v10 = vmul.f32 %v6705_v45, %v6705_v45 }
 0x14a   : > { %11045 = vst [vmem:[#allocation48_spill] sm:$0xff] %v6716_v19  ;;  %11046 = vst [vmem:[#allocation49_spill] sm:$0xff] %v6718_v48  ;;  %v2075_v31 = vmul.f32 %v6709_v38, %v6709_v38  ;;  %v1992_v16 = vmul.f32 %v6716_v19, %v6716_v19  ;;  %v2076_v60 = vmul.f32 %v6718_v48, %v6718_v48  ;;  %v1593_v29 = vsel %vm1548_vm1, %v6716_v19, 0.0 }
 0x14b   : > { %v1761_v47 = vsel %vm1548_vm1, %v6718_v48, 0.0  ;;  %2155 = vadd.xlane.f32.xlu0 %v6546_v0  ;;  %v6740_v22 = vadd.f32 %v1593_v29, %v6705_v45  ;;  %v2177_v59 = vsel %vm1548_vm1, %v1990_v33, 0.0  ;;  %v2345_v57 = vsel %vm1548_vm1, %v2074_v21, 0.0 }
 0x14c   : > { %v6743_v49 = vadd.f32 %v1761_v47, %v6709_v38  ;;  %v6747_v27 = vadd.f32 %v2177_v59, %v1989_v41  ;;  %v2181_v25 = vsel %vm1548_vm1, %v1992_v16, 0.0  ;;  %v6750_v19 = vadd.f32 %v2345_v57, %v2073_v55 }
 0x14d   : > { %v2349_v48 = vsel %vm1548_vm1, %v2076_v60, 0.0  ;;  %2159 = vadd.xlane.f32.xlu1 %v6552_v53  ;;  %v6754_v0 = vadd.f32 %v2181_v25, %v1991_v10 }
 0x14e   : > { %v6756_v29 = vadd.f32 %v2349_v48, %v2075_v31  ;;  %v6758_v47 = vpop.f32.mrb[24].mxu0  ;;  %v6760_v38 = vpop.f32.mrb[24].mxu1 }
 0x14f   : > { %11047 = vst [vmem:[#allocation50_spill] sm:$0xff] %v6758_v47  ;;  %11048 = vst [vmem:[#allocation51_spill] sm:$0xff] %v6760_v38  ;;  %2323 = vadd.xlane.f32.xlu0 %v6549_v3  ;;  %v6763_v59 = vpop.f32.mrb[25].mxu0  ;;  %v6765_v41 = vpop.f32.mrb[25].mxu1  ;;  %v1993_v57 = vmul.f32 %v6758_v47, %v6758_v47  ;;  %v2077_v53 = vmul.f32 %v6760_v38, %v6760_v38 }
 0x150   : > { %11049 = vst [vmem:[#allocation52_spill] sm:$0xff] %v6763_v59  ;;  %11050 = vst [vmem:[#allocation53_spill] sm:$0xff] %v6765_v41  ;;  %v1994_v25 = vmul.f32 %v6763_v59, %v6763_v59  ;;  %v6773_v31 = vpop.f32.mrb[26].mxu0  ;;  %v2078_v10 = vmul.f32 %v6765_v41, %v6765_v41  ;;  %v6777_v16 = vpop.f32.mrb[26].mxu1  ;;  %v1597_v3 = vsel %vm1548_vm1, %v6763_v59, 0.0  ;;  %v1765_v55 = vsel %vm1548_vm1, %v6765_v41, 0.0 }
 0x151   : > { %11051 = vst [vmem:[#allocation54_spill] sm:$0xff] %v6773_v31  ;;  %11052 = vst [vmem:[#allocation55_spill] sm:$0xff] %v6777_v16  ;;  %2327 = vadd.xlane.f32.xlu1 %v6554_v8  ;;  %v6784_v33 = vpop.f32.mrb[27].mxu0  ;;  %v6786_v21 = vpop.f32.mrb[27].mxu1  ;;  %v6789_v48 = vadd.f32 %v1597_v3, %v6758_v47  ;;  %v6792_v60 = vadd.f32 %v1765_v55, %v6760_v38  ;;  %v1995_v45 = vmul.f32 %v6773_v31, %v6773_v31 }
 0x152   : > { %11053 = vst [vmem:[#allocation56_spill] sm:$0xff] %v6784_v33  ;;  %11054 = vst [vmem:[#allocation57_spill] sm:$0xff] %v6786_v21  ;;  %v2079_v61 = vmul.f32 %v6777_v16, %v6777_v16  ;;  %v1996_v41 = vmul.f32 %v6784_v33, %v6784_v33  ;;  %v2080_v8 = vmul.f32 %v6786_v21, %v6786_v21  ;;  %v1601_v43 = vsel %vm1548_vm1, %v6784_v33, 0.0 }
 0x153   : > { %v1769_v3 = vsel %vm1548_vm1, %v6786_v21, 0.0  ;;  %1575 = vadd.xlane.f32.xlu0 %v6585_v40  ;;  %v6808_v55 = vadd.f32 %v1601_v43, %v6773_v31  ;;  %v2185_v35 = vsel %vm1548_vm1, %v1994_v25, 0.0  ;;  %v2353_v17 = vsel %vm1548_vm1, %v2078_v10, 0.0 }
 0x154   : > { %v6811_v38 = vadd.f32 %v1769_v3, %v6777_v16  ;;  %v6815_v59 = vadd.f32 %v2185_v35, %v1993_v57  ;;  %v2189_v47 = vsel %vm1548_vm1, %v1996_v41, 0.0  ;;  %v6818_v33 = vadd.f32 %v2353_v17, %v2077_v53 }
 0x155   : > { %v2357_v21 = vsel %vm1548_vm1, %v2080_v8, 0.0  ;;  %1579 = vadd.xlane.f32.xlu1 %v6604_v52  ;;  %v6822_v40 = vadd.f32 %v2189_v47, %v1995_v45 }
 0x156   : > { %v6824_v43 = vadd.f32 %v2357_v21, %v2079_v61  ;;  %v6826_v3 = vpop.f32.mrb[28].mxu0  ;;  %v6828_v16 = vpop.f32.mrb[28].mxu1 }
 0x157   : > { %11055 = vst [vmem:[#allocation58_spill] sm:$0xff] %v6826_v3  ;;  %11056 = vst [vmem:[#allocation59_spill] sm:$0xff] %v6828_v16  ;;  %1743 = vadd.xlane.f32.xlu0 %v6588_v42  ;;  %v6831_v35 = vpop.f32.mrb[29].mxu0  ;;  %v6833_v57 = vpop.f32.mrb[29].mxu1  ;;  %v1997_v17 = vmul.f32 %v6826_v3, %v6826_v3  ;;  %v2081_v52 = vmul.f32 %v6828_v16, %v6828_v16 }
 0x158   : > { %11057 = vst [vmem:[#allocation60_spill] sm:$0xff] %v6831_v35  ;;  %11058 = vst [vmem:[#allocation61_spill] sm:$0xff] %v6833_v57  ;;  %v1998_v61 = vmul.f32 %v6831_v35, %v6831_v35  ;;  %v6841_v45 = vpop.f32.mrb[30].mxu0  ;;  %v2082_v47 = vmul.f32 %v6833_v57, %v6833_v57  ;;  %v6845_v41 = vpop.f32.mrb[30].mxu1  ;;  %v1605_v42 = vsel %vm1548_vm1, %v6831_v35, 0.0  ;;  %v1773_v53 = vsel %vm1548_vm1, %v6833_v57, 0.0 }
 0x159   : > { %11059 = vst [vmem:[#allocation62_spill] sm:$0xff] %v6841_v45  ;;  %11060 = vst [vmem:[#allocation63_spill] sm:$0xff] %v6845_v41  ;;  %1747 = vadd.xlane.f32.xlu1 %v6607_v54  ;;  %v6852_v25 = vpop.f32.mrb[31].mxu0  ;;  %v6854_v10 = vpop.f32.mrb[31].mxu1  ;;  %v6857_v21 = vadd.f32 %v1605_v42, %v6826_v3  ;;  %v6860_v8 = vadd.f32 %v1773_v53, %v6828_v16  ;;  %v1999_v31 = vmul.f32 %v6841_v45, %v6841_v45 }
 0x15a   : > { %11061 = vst [vmem:[#allocation64_spill] sm:$0xff] %v6852_v25  ;;  %11062 = vst [vmem:[#allocation65_spill] sm:$0xff] %v6854_v10  ;;  %v2083_v35 = vmul.f32 %v6845_v41, %v6845_v41  ;;  %v2000_v57 = vmul.f32 %v6852_v25, %v6852_v25  ;;  %v2084_v54 = vmul.f32 %v6854_v10, %v6854_v10  ;;  %v1609_v44 = vsel %vm1548_vm1, %v6852_v25, 0.0 }
 0x15b   : > { %v1777_v42 = vsel %vm1548_vm1, %v6854_v10, 0.0  ;;  %2163 = vadd.xlane.f32.xlu0 %v6611_v2  ;;  %v6876_v53 = vadd.f32 %v1609_v44, %v6841_v45  ;;  %v2193_v3 = vsel %vm1548_vm1, %v1998_v61, 0.0  ;;  %v2361_v39 = vsel %vm1548_vm1, %v2082_v47, 0.0 }
 0x15c   : > { %v6879_v16 = vadd.f32 %v1777_v42, %v6845_v41  ;;  %v6883_v14 = vadd.f32 %v2193_v3, %v1997_v17  ;;  %v2197_v20 = vsel %vm1548_vm1, %v2000_v57, 0.0  ;;  %v6886_v25 = vadd.f32 %v2361_v39, %v2081_v52 }
 0x15d   : > { %v2365_v10 = vsel %vm1548_vm1, %v2084_v54, 0.0  ;;  %2167 = vadd.xlane.f32.xlu1 %v6618_v18  ;;  %v6890_v2 = vadd.f32 %v2197_v20, %v1999_v31 }
 0x15e   : > { %v6892_v44 = vadd.f32 %v2365_v10, %v2083_v35  ;;  %v6894_v42 = vpop.f32.mrb[32].mxu0  ;;  %v6896_v41 = vpop.f32.mrb[32].mxu1 }
 0x15f   : > { %11063 = vst [vmem:[#allocation66_spill] sm:$0xff] %v6894_v42  ;;  %11064 = vst [vmem:[#allocation67_spill] sm:$0xff] %v6896_v41  ;;  %2331 = vadd.xlane.f32.xlu0 %v6614_v7  ;;  %v6899_v3 = vpop.f32.mrb[33].mxu0  ;;  %v6901_v17 = vpop.f32.mrb[33].mxu1  ;;  %v2001_v39 = vmul.f32 %v6894_v42, %v6894_v42  ;;  %v2085_v18 = vmul.f32 %v6896_v41, %v6896_v41 }
 0x160   : > { %11065 = vst [vmem:[#allocation68_spill] sm:$0xff] %v6899_v3  ;;  %11066 = vst [vmem:[#allocation69_spill] sm:$0xff] %v6901_v17  ;;  %v2002_v20 = vmul.f32 %v6899_v3, %v6899_v3  ;;  %v6909_v31 = vpop.f32.mrb[34].mxu0  ;;  %v2086_v35 = vmul.f32 %v6901_v17, %v6901_v17  ;;  %v6913_v57 = vpop.f32.mrb[34].mxu1  ;;  %v1613_v7 = vsel %vm1548_vm1, %v6899_v3, 0.0  ;;  %v1781_v52 = vsel %vm1548_vm1, %v6901_v17, 0.0 }
 0x161   : > { %11067 = vst [vmem:[#allocation70_spill] sm:$0xff] %v6909_v31  ;;  %11068 = vst [vmem:[#allocation71_spill] sm:$0xff] %v6913_v57  ;;  %2335 = vadd.xlane.f32.xlu1 %v6620_v50  ;;  %v6920_v61 = vpop.f32.mrb[35].mxu0  ;;  %v6922_v47 = vpop.f32.mrb[35].mxu1  ;;  %v6925_v10 = vadd.f32 %v1613_v7, %v6894_v42  ;;  %v6928_v54 = vadd.f32 %v1781_v52, %v6896_v41  ;;  %v2003_v45 = vmul.f32 %v6909_v31, %v6909_v31 }
 0x162   : > { %11069 = vst [vmem:[#allocation72_spill] sm:$0xff] %v6920_v61  ;;  %11070 = vst [vmem:[#allocation73_spill] sm:$0xff] %v6922_v47  ;;  %v2087_v3 = vmul.f32 %v6913_v57, %v6913_v57  ;;  %v2004_v17 = vmul.f32 %v6920_v61, %v6920_v61  ;;  %v2088_v50 = vmul.f32 %v6922_v47, %v6922_v47  ;;  %v1617_v4 = vsel %vm1548_vm1, %v6920_v61, 0.0 }
 0x163   : > { %v1785_v7 = vsel %vm1548_vm1, %v6922_v47, 0.0  ;;  %1583 = vadd.xlane.f32.xlu0 %v6653_v6  ;;  %v6944_v52 = vadd.f32 %v1617_v4, %v6909_v31  ;;  %v2201_v42 = vsel %vm1548_vm1, %v2002_v20, 0.0  ;;  %v2369_v63 = vsel %vm1548_vm1, %v2086_v35, 0.0 }
 0x164   : > { %v6947_v41 = vadd.f32 %v1785_v7, %v6913_v57  ;;  %v6951_v13 = vadd.f32 %v2201_v42, %v2001_v39  ;;  %v2205_v51 = vsel %vm1548_vm1, %v2004_v17, 0.0  ;;  %v6954_v61 = vadd.f32 %v2369_v63, %v2085_v18 }
 0x165   : > { %v2373_v47 = vsel %vm1548_vm1, %v2088_v50, 0.0  ;;  %1587 = vadd.xlane.f32.xlu1 %v6672_v15  ;;  %v6958_v6 = vadd.f32 %v2205_v51, %v2003_v45 }
 0x166   : > { %v6960_v4 = vadd.f32 %v2373_v47, %v2087_v3  ;;  %v6962_v7 = vpop.f32.mrb[36].mxu0  ;;  %v6964_v57 = vpop.f32.mrb[36].mxu1 }
 0x167   : > { %11071 = vst [vmem:[#allocation74_spill] sm:$0xff] %v6962_v7  ;;  %11072 = vst [vmem:[#allocation75_spill] sm:$0xff] %v6964_v57  ;;  %1751 = vadd.xlane.f32.xlu0 %v6656_v34  ;;  %v6967_v42 = vpop.f32.mrb[37].mxu0  ;;  %v6969_v39 = vpop.f32.mrb[37].mxu1  ;;  %v2005_v63 = vmul.f32 %v6962_v7, %v6962_v7  ;;  %v2089_v15 = vmul.f32 %v6964_v57, %v6964_v57 }
 0x168   : > { %11073 = vst [vmem:[#allocation76_spill] sm:$0xff] %v6967_v42  ;;  %11074 = vst [vmem:[#allocation77_spill] sm:$0xff] %v6969_v39  ;;  %v2006_v51 = vmul.f32 %v6967_v42, %v6967_v42  ;;  %v6977_v45 = vpop.f32.mrb[38].mxu0  ;;  %v2090_v3 = vmul.f32 %v6969_v39, %v6969_v39  ;;  %v6981_v17 = vpop.f32.mrb[38].mxu1  ;;  %v1621_v34 = vsel %vm1548_vm1, %v6967_v42, 0.0  ;;  %v1789_v18 = vsel %vm1548_vm1, %v6969_v39, 0.0 }
 0x169   : > { %11075 = vst [vmem:[#allocation78_spill] sm:$0xff] %v6977_v45  ;;  %11076 = vst [vmem:[#allocation79_spill] sm:$0xff] %v6981_v17  ;;  %1755 = vadd.xlane.f32.xlu1 %v6675_v1  ;;  %v6988_v20 = vpop.f32.mrb[39].mxu0  ;;  %v6990_v35 = vpop.f32.mrb[39].mxu1  ;;  %v6993_v47 = vadd.f32 %v1621_v34, %v6962_v7  ;;  %v6996_v50 = vadd.f32 %v1789_v18, %v6964_v57  ;;  %v2007_v31 = vmul.f32 %v6977_v45, %v6977_v45 }
 0x16a   : > { %11077 = vst [vmem:[#allocation80_spill] sm:$0xff] %v6988_v20  ;;  %11078 = vst [vmem:[#allocation81_spill] sm:$0xff] %v6990_v35  ;;  %v2091_v42 = vmul.f32 %v6981_v17, %v6981_v17  ;;  %v2008_v39 = vmul.f32 %v6988_v20, %v6988_v20  ;;  %v2092_v1 = vmul.f32 %v6990_v35, %v6990_v35  ;;  %v1625_v58 = vsel %vm1548_vm1, %v6988_v20, 0.0 }
 0x16b   : > { %v1793_v34 = vsel %vm1548_vm1, %v6990_v35, 0.0  ;;  %2171 = vadd.xlane.f32.xlu0 %v6679_v37  ;;  %v7012_v18 = vadd.f32 %v1625_v58, %v6977_v45  ;;  %v2209_v7 = vsel %vm1548_vm1, %v2006_v51, 0.0  ;;  %v2377_v56 = vsel %vm1548_vm1, %v2090_v3, 0.0 }
 0x16c   : > { %v7015_v57 = vadd.f32 %v1793_v34, %v6981_v17  ;;  %v7019_v11 = vadd.f32 %v2209_v7, %v2005_v63  ;;  %v2213_v9 = vsel %vm1548_vm1, %v2008_v39, 0.0  ;;  %v7022_v20 = vadd.f32 %v2377_v56, %v2089_v15 }
 0x16d   : > { %v2381_v35 = vsel %vm1548_vm1, %v2092_v1, 0.0  ;;  %2175 = vadd.xlane.f32.xlu1 %v6686_v46  ;;  %v7026_v37 = vadd.f32 %v2213_v9, %v2007_v31 }
 0x16e   : > { %v7028_v58 = vadd.f32 %v2381_v35, %v2091_v42  ;;  %v7030_v34 = vpop.f32.mrb[40].mxu0  ;;  %v7032_v17 = vpop.f32.mrb[40].mxu1 }
 0x16f   : > { %11079 = vst [vmem:[#allocation82_spill] sm:$0xff] %v7030_v34  ;;  %11080 = vst [vmem:[#allocation83_spill] sm:$0xff] %v7032_v17  ;;  %2339 = vadd.xlane.f32.xlu0 %v6682_v12  ;;  %v7035_v7 = vpop.f32.mrb[41].mxu0  ;;  %v7037_v63 = vpop.f32.mrb[41].mxu1  ;;  %v2009_v56 = vmul.f32 %v7030_v34, %v7030_v34  ;;  %v2093_v46 = vmul.f32 %v7032_v17, %v7032_v17 }
 0x170   : > { %11081 = vst [vmem:[#allocation84_spill] sm:$0xff] %v7035_v7  ;;  %11082 = vst [vmem:[#allocation85_spill] sm:$0xff] %v7037_v63  ;;  %v2010_v9 = vmul.f32 %v7035_v7, %v7035_v7  ;;  %v7045_v31 = vpop.f32.mrb[42].mxu0  ;;  %v2094_v42 = vmul.f32 %v7037_v63, %v7037_v63  ;;  %v7049_v39 = vpop.f32.mrb[42].mxu1  ;;  %v1629_v12 = vsel %vm1548_vm1, %v7035_v7, 0.0  ;;  %v1797_v15 = vsel %vm1548_vm1, %v7037_v63, 0.0 }
 0x171   : > { %11083 = vst [vmem:[#allocation86_spill] sm:$0xff] %v7045_v31  ;;  %11084 = vst [vmem:[#allocation87_spill] sm:$0xff] %v7049_v39  ;;  %2343 = vadd.xlane.f32.xlu1 %v6688_v5  ;;  %v7056_v51 = vpop.f32.mrb[43].mxu0  ;;  %v7058_v3 = vpop.f32.mrb[43].mxu1  ;;  %v7061_v35 = vadd.f32 %v1629_v12, %v7030_v34  ;;  %v7064_v1 = vadd.f32 %v1797_v15, %v7032_v17  ;;  %v2011_v45 = vmul.f32 %v7045_v31, %v7045_v31 }
 0x172   : > { %11085 = vst [vmem:[#allocation88_spill] sm:$0xff] %v7056_v51  ;;  %11086 = vst [vmem:[#allocation89_spill] sm:$0xff] %v7058_v3  ;;  %v2095_v7 = vmul.f32 %v7049_v39, %v7049_v39  ;;  %v2012_v63 = vmul.f32 %v7056_v51, %v7056_v51  ;;  %v2096_v5 = vmul.f32 %v7058_v3, %v7058_v3  ;;  %v1633_v26 = vsel %vm1548_vm1, %v7056_v51, 0.0 }
 0x173   : > { %v1801_v12 = vsel %vm1548_vm1, %v7058_v3, 0.0  ;;  %1591 = vadd.xlane.f32.xlu0 %v6721_v62  ;;  %v7080_v15 = vadd.f32 %v1633_v26, %v7045_v31  ;;  %v2217_v34 = vsel %vm1548_vm1, %v2010_v9, 0.0  ;;  %v2385_v24 = vsel %vm1548_vm1, %v2094_v42, 0.0 }
 0x174   : > { %v7083_v17 = vadd.f32 %v1801_v12, %v7049_v39  ;;  %v7087_v30 = vadd.f32 %v2217_v34, %v2009_v56  ;;  %v2221_v28 = vsel %vm1548_vm1, %v2012_v63, 0.0  ;;  %v7090_v51 = vadd.f32 %v2385_v24, %v2093_v46 }
 0x175   : > { %v2389_v3 = vsel %vm1548_vm1, %v2096_v5, 0.0  ;;  %1595 = vadd.xlane.f32.xlu1 %v6740_v22  ;;  %v7094_v62 = vadd.f32 %v2221_v28, %v2011_v45 }
 0x176   : > { %v7096_v26 = vadd.f32 %v2389_v3, %v2095_v7  ;;  %v7098_v12 = vpop.f32.mrb[44].mxu0  ;;  %v7100_v39 = vpop.f32.mrb[44].mxu1 }
 0x177   : > { %11087 = vst [vmem:[#allocation90_spill] sm:$0xff] %v7098_v12  ;;  %11088 = vst [vmem:[#allocation91_spill] sm:$0xff] %v7100_v39  ;;  %1759 = vadd.xlane.f32.xlu0 %v6724_v23  ;;  %v7103_v34 = vpop.f32.mrb[45].mxu0  ;;  %v7105_v56 = vpop.f32.mrb[45].mxu1  ;;  %v2013_v24 = vmul.f32 %v7098_v12, %v7098_v12  ;;  %v2097_v22 = vmul.f32 %v7100_v39, %v7100_v39 }
 0x178   : > { %11089 = vst [vmem:[#allocation92_spill] sm:$0xff] %v7103_v34  ;;  %11090 = vst [vmem:[#allocation93_spill] sm:$0xff] %v7105_v56  ;;  %v2014_v28 = vmul.f32 %v7103_v34, %v7103_v34  ;;  %v7113_v45 = vpop.f32.mrb[46].mxu0  ;;  %v2098_v7 = vmul.f32 %v7105_v56, %v7105_v56  ;;  %v7117_v63 = vpop.f32.mrb[46].mxu1  ;;  %v1637_v23 = vsel %vm1548_vm1, %v7103_v34, 0.0  ;;  %v1805_v46 = vsel %vm1548_vm1, %v7105_v56, 0.0 }
 0x179   : > { %11091 = vst [vmem:[#allocation94_spill] sm:$0xff] %v7113_v45  ;;  %11092 = vst [vmem:[#allocation95_spill] sm:$0xff] %v7117_v63  ;;  %1763 = vadd.xlane.f32.xlu1 %v6743_v49  ;;  %v7124_v9 = vpop.f32.mrb[47].mxu0  ;;  %v7126_v42 = vpop.f32.mrb[47].mxu1  ;;  %v7129_v3 = vadd.f32 %v1637_v23, %v7098_v12  ;;  %v7132_v5 = vadd.f32 %v1805_v46, %v7100_v39  ;;  %v2015_v31 = vmul.f32 %v7113_v45, %v7113_v45 }
 0x17a   : > { %11093 = vst [vmem:[#allocation96_spill] sm:$0xff] %v7124_v9  ;;  %11094 = vst [vmem:[#allocation97_spill] sm:$0xff] %v7126_v42  ;;  %v2099_v34 = vmul.f32 %v7117_v63, %v7117_v63  ;;  %v2016_v56 = vmul.f32 %v7124_v9, %v7124_v9  ;;  %v2100_v49 = vmul.f32 %v7126_v42, %v7126_v42  ;;  %v1641_v36 = vsel %vm1548_vm1, %v7124_v9, 0.0 }
 0x17b   : > { %11095 = vst [vmem:[#allocation98_spill] sm:$0xff] %v7129_v3  ;;  %11096 = vst [vmem:[#allocation99_spill] sm:$0xff] %v7132_v5  ;;  %v1809_v23 = vsel %vm1548_vm1, %v7126_v42, 0.0  ;;  %2179 = vadd.xlane.f32.xlu0 %v6747_v27  ;;  %v7148_v46 = vadd.f32 %v1641_v36, %v7113_v45  ;;  %v2225_v12 = vsel %vm1548_vm1, %v2014_v28, 0.0  ;;  %v2393_v32 = vsel %vm1548_vm1, %v2098_v7, 0.0 }
 0x17c   : > { %v7151_v39 = vadd.f32 %v1809_v23, %v7117_v63  ;;  %v7155_v5 = vadd.f32 %v2225_v12, %v2013_v24  ;;  %v2229_v3 = vsel %vm1548_vm1, %v2016_v56, 0.0  ;;  %v7158_v9 = vadd.f32 %v2393_v32, %v2097_v22 }
 0x17d   : > { %v2397_v42 = vsel %vm1548_vm1, %v2100_v49, 0.0  ;;  %2183 = vadd.xlane.f32.xlu1 %v6754_v0  ;;  %v7162_v27 = vadd.f32 %v2229_v3, %v2015_v31 }
 0x17e   : > { %11097 = vst [vmem:[#allocation100_spill] sm:$0xff] %v7158_v9  ;;  %v7164_v36 = vadd.f32 %v2397_v42, %v2099_v34  ;;  %v7166_v23 = vpop.f32.mrb[48].mxu0  ;;  %v7168_v63 = vpop.f32.mrb[48].mxu1 }
 0x17f   : > { %11099 = vst [vmem:[#allocation102_spill] sm:$0xff] %v7166_v23  ;;  %11100 = vst [vmem:[#allocation103_spill] sm:$0xff] %v7168_v63  ;;  %2347 = vadd.xlane.f32.xlu0 %v6750_v19  ;;  %v2017_v12 = vmul.f32 %v7166_v23, %v7166_v23  ;;  %v7173_v56 = vpop.f32.mrb[49].mxu0  ;;  %v2101_v32 = vmul.f32 %v7168_v63, %v7168_v63  ;;  %v7177_v24 = vpop.f32.mrb[49].mxu1 }
 0x180   : > { %11098 = vst [vmem:[#allocation101_spill] sm:$0xff] %v7164_v36  ;;  %11101 = vst [vmem:[#allocation104_spill] sm:$0xff] %v7173_v56  ;;  %v2018_v0 = vmul.f32 %v7173_v56, %v7173_v56  ;;  %v7181_v31 = vpop.f32.mrb[50].mxu0  ;;  %v1813_v34 = vsel %vm1548_vm1, %v7177_v24, 0.0  ;;  %v2102_v19 = vmul.f32 %v7177_v24, %v7177_v24  ;;  %v7187_v22 = vpop.f32.mrb[50].mxu1  ;;  %v1645_v28 = vsel %vm1548_vm1, %v7173_v56, 0.0 }
 0x181   : > { %11102 = vst [vmem:[#allocation105_spill] sm:$0xff] %v7177_v24  ;;  %11103 = vst [vmem:[#allocation106_spill] sm:$0xff] %v7181_v31  ;;  %2351 = vadd.xlane.f32.xlu1 %v6756_v29  ;;  %v2019_v7 = vmul.f32 %v7181_v31, %v7181_v31  ;;  %v7194_v42 = vpop.f32.mrb[51].mxu0  ;;  %v2103_v3 = vmul.f32 %v7187_v22, %v7187_v22  ;;  %v7198_v49 = vpop.f32.mrb[51].mxu1  ;;  %v7201_v45 = vadd.f32 %v1645_v28, %v7166_v23 }
 0x182   : > { %11104 = vst [vmem:[#allocation107_spill] sm:$0xff] %v7187_v22  ;;  %11105 = vst [vmem:[#allocation108_spill] sm:$0xff] %v7194_v42  ;;  %v7204_v24 = vadd.f32 %v1813_v34, %v7168_v63  ;;  %v2020_v56 = vmul.f32 %v7194_v42, %v7194_v42  ;;  %v1817_v29 = vsel %vm1548_vm1, %v7198_v49, 0.0  ;;  %v2104_v36 = vmul.f32 %v7198_v49, %v7198_v49 }
 0x183   : > { %11106 = vst [vmem:[#allocation109_spill] sm:$0xff] %v7198_v49  ;;  %11107 = vst [vmem:[#allocation110_spill] sm:$0xff] %v7201_v45  ;;  %v1649_v9 = vsel %vm1548_vm1, %v7194_v42, 0.0  ;;  %1599 = vadd.xlane.f32.xlu0 %v6789_v48  ;;  %v7219_v34 = vadd.f32 %v1817_v29, %v7187_v22  ;;  %v2233_v63 = vsel %vm1548_vm1, %v2018_v0, 0.0  ;;  %v2401_v23 = vsel %vm1548_vm1, %v2102_v19, 0.0 }
 0x184   : > { %11108 = vst [vmem:[#allocation111_spill] sm:$0xff] %v7204_v24  ;;  %v7216_v28 = vadd.f32 %v1649_v9, %v7181_v31  ;;  %v7223_v24 = vadd.f32 %v2233_v63, %v2017_v12  ;;  %v2237_v45 = vsel %vm1548_vm1, %v2020_v56, 0.0  ;;  %v7226_v49 = vadd.f32 %v2401_v23, %v2101_v32 }
 0x185   : > { %v2405_v42 = vsel %vm1548_vm1, %v2104_v36, 0.0  ;;  %1603 = vadd.xlane.f32.xlu1 %v6808_v55  ;;  %v7230_v48 = vadd.f32 %v2237_v45, %v2019_v7 }
 0x186   : > { %11109 = vst [vmem:[#allocation112_spill] sm:$0xff] %v7226_v49  ;;  %v7232_v9 = vadd.f32 %v2405_v42, %v2103_v3  ;;  %v7234_v29 = vpop.f32.mrb[52].mxu0  ;;  %v7236_v22 = vpop.f32.mrb[52].mxu1 }
 0x187   : > { %11111 = vst [vmem:[#allocation114_spill] sm:$0xff] %v7234_v29  ;;  %11112 = vst [vmem:[#allocation115_spill] sm:$0xff] %v7236_v22  ;;  %1767 = vadd.xlane.f32.xlu0 %v6792_v60  ;;  %v2021_v63 = vmul.f32 %v7234_v29, %v7234_v29  ;;  %v7241_v12 = vpop.f32.mrb[53].mxu0  ;;  %v2105_v36 = vmul.f32 %v7236_v22, %v7236_v22  ;;  %v7245_v23 = vpop.f32.mrb[53].mxu1 }
 0x188   : > { %11110 = vst [vmem:[#allocation113_spill] sm:$0xff] %v7232_v9  ;;  %11113 = vst [vmem:[#allocation116_spill] sm:$0xff] %v7241_v12  ;;  %v1653_v55 = vsel %vm1548_vm1, %v7241_v12, 0.0  ;;  %v2022_v45 = vmul.f32 %v7241_v12, %v7241_v12  ;;  %v7251_v56 = vpop.f32.mrb[54].mxu0  ;;  %v1821_v60 = vsel %vm1548_vm1, %v7245_v23, 0.0  ;;  %v2106_v32 = vmul.f32 %v7245_v23, %v7245_v23  ;;  %v7257_v0 = vpop.f32.mrb[54].mxu1 }
 0x189   : > { %11114 = vst [vmem:[#allocation117_spill] sm:$0xff] %v7245_v23  ;;  %11115 = vst [vmem:[#allocation118_spill] sm:$0xff] %v7251_v56  ;;  %1771 = vadd.xlane.f32.xlu1 %v6811_v38  ;;  %v2023_v19 = vmul.f32 %v7251_v56, %v7251_v56  ;;  %v7262_v7 = vpop.f32.mrb[55].mxu0  ;;  %v2107_v42 = vmul.f32 %v7257_v0, %v7257_v0  ;;  %v7266_v3 = vpop.f32.mrb[55].mxu1  ;;  %v7269_v31 = vadd.f32 %v1653_v55, %v7234_v29 }
 0x18a   : > { %11116 = vst [vmem:[#allocation119_spill] sm:$0xff] %v7257_v0  ;;  %11117 = vst [vmem:[#allocation120_spill] sm:$0xff] %v7262_v7  ;;  %v7272_v12 = vadd.f32 %v1821_v60, %v7236_v22  ;;  %v1657_v23 = vsel %vm1548_vm1, %v7262_v7, 0.0  ;;  %v2024_v38 = vmul.f32 %v7262_v7, %v7262_v7  ;;  %v1825_v9 = vsel %vm1548_vm1, %v7266_v3, 0.0 }
 0x18b   : > { %11118 = vst [vmem:[#allocation121_spill] sm:$0xff] %v7266_v3  ;;  %11119 = vst [vmem:[#allocation122_spill] sm:$0xff] %v7269_v31  ;;  %v2108_v49 = vmul.f32 %v7266_v3, %v7266_v3  ;;  %2187 = vadd.xlane.f32.xlu0 %v6815_v59  ;;  %v7284_v55 = vadd.f32 %v1657_v23, %v7251_v56  ;;  %v7287_v60 = vadd.f32 %v1825_v9, %v7257_v0 }
 0x18c   : > { %11120 = vst [vmem:[#allocation123_spill] sm:$0xff] %v7272_v12  ;;  %v2241_v22 = vsel %vm1548_vm1, %v2022_v45, 0.0  ;;  %v2409_v29 = vsel %vm1548_vm1, %v2106_v32, 0.0  ;;  %v2245_v7 = vsel %vm1548_vm1, %v2024_v38, 0.0 }
 0x18d   : > { %v7291_v12 = vadd.f32 %v2241_v22, %v2021_v63  ;;  %v7294_v31 = vadd.f32 %v2409_v29, %v2105_v36  ;;  %v2413_v3 = vsel %vm1548_vm1, %v2108_v49, 0.0  ;;  %2191 = vadd.xlane.f32.xlu1 %v6822_v40  ;;  %v7298_v59 = vadd.f32 %v2245_v7, %v2023_v19 }
 0x18e   : > { %v7300_v23 = vadd.f32 %v2413_v3, %v2107_v42  ;;  %v7302_v9 = vpop.f32.mrb[56].mxu0  ;;  %v7304_v56 = vpop.f32.mrb[56].mxu1 }
 0x18f   : > { %11121 = vst [vmem:[#allocation124_spill] sm:$0xff] %v7294_v31  ;;  %11123 = vst [vmem:[#allocation126_spill] sm:$0xff] %v7302_v9  ;;  %2355 = vadd.xlane.f32.xlu0 %v6818_v33  ;;  %v2025_v22 = vmul.f32 %v7302_v9, %v7302_v9  ;;  %v7309_v63 = vpop.f32.mrb[57].mxu0  ;;  %v2109_v49 = vmul.f32 %v7304_v56, %v7304_v56  ;;  %v7313_v29 = vpop.f32.mrb[57].mxu1 }
 0x190   : > { %11122 = vst [vmem:[#allocation125_spill] sm:$0xff] %v7300_v23  ;;  %11124 = vst [vmem:[#allocation127_spill] sm:$0xff] %v7304_v56  ;;  %v1661_v40 = vsel %vm1548_vm1, %v7309_v63, 0.0  ;;  %v2026_v36 = vmul.f32 %v7309_v63, %v7309_v63  ;;  %v7319_v45 = vpop.f32.mrb[58].mxu0  ;;  %v1829_v33 = vsel %vm1548_vm1, %v7313_v29, 0.0  ;;  %v2110_v32 = vmul.f32 %v7313_v29, %v7313_v29  ;;  %v7325_v19 = vpop.f32.mrb[58].mxu1 }
 0x191   : > { %11125 = vst [vmem:[#allocation128_spill] sm:$0xff] %v7309_v63  ;;  %11126 = vst [vmem:[#allocation129_spill] sm:$0xff] %v7313_v29  ;;  %2359 = vadd.xlane.f32.xlu1 %v6824_v43  ;;  %v2027_v7 = vmul.f32 %v7319_v45, %v7319_v45  ;;  %v7330_v42 = vpop.f32.mrb[59].mxu0  ;;  %v2111_v3 = vmul.f32 %v7325_v19, %v7325_v19  ;;  %v7334_v38 = vpop.f32.mrb[59].mxu1  ;;  %v7337_v63 = vadd.f32 %v1661_v40, %v7302_v9 }
 0x192   : > { %11127 = vst [vmem:[#allocation130_spill] sm:$0xff] %v7319_v45  ;;  %11128 = vst [vmem:[#allocation131_spill] sm:$0xff] %v7325_v19  ;;  %v7340_v0 = vadd.f32 %v1829_v33, %v7304_v56  ;;  %v1665_v29 = vsel %vm1548_vm1, %v7330_v42, 0.0  ;;  %v2028_v43 = vmul.f32 %v7330_v42, %v7330_v42  ;;  %v1833_v23 = vsel %vm1548_vm1, %v7334_v38, 0.0 }
 0x193   : > { %11129 = vst [vmem:[#allocation132_spill] sm:$0xff] %v7330_v42  ;;  %11130 = vst [vmem:[#allocation133_spill] sm:$0xff] %v7334_v38  ;;  %v2112_v31 = vmul.f32 %v7334_v38, %v7334_v38  ;;  %1607 = vadd.xlane.f32.xlu0 %v6857_v21  ;;  %v7352_v40 = vadd.f32 %v1665_v29, %v7319_v45  ;;  %v7355_v33 = vadd.f32 %v1833_v23, %v7325_v19 }
 0x194   : > { %11131 = vst [vmem:[#allocation134_spill] sm:$0xff] %v7337_v63  ;;  %11132 = vst [vmem:[#allocation135_spill] sm:$0xff] %v7340_v0  ;;  %v2249_v56 = vsel %vm1548_vm1, %v2026_v36, 0.0  ;;  %v2417_v9 = vsel %vm1548_vm1, %v2110_v32, 0.0  ;;  %v2253_v42 = vsel %vm1548_vm1, %v2028_v43, 0.0 }
 0x195   : > { %v7359_v0 = vadd.f32 %v2249_v56, %v2025_v22  ;;  %v7362_v63 = vadd.f32 %v2417_v9, %v2109_v49  ;;  %v2421_v38 = vsel %vm1548_vm1, %v2112_v31, 0.0  ;;  %1611 = vadd.xlane.f32.xlu1 %v6876_v53  ;;  %v7366_v21 = vadd.f32 %v2253_v42, %v2027_v7 }
 0x196   : > { %v7368_v29 = vadd.f32 %v2421_v38, %v2111_v3  ;;  %v7370_v23 = vpop.f32.mrb[60].mxu0  ;;  %v7372_v45 = vpop.f32.mrb[60].mxu1 }
 0x197   : > { %11133 = vst [vmem:[#allocation136_spill] sm:$0xff] %v7362_v63  ;;  %11135 = vst [vmem:[#allocation138_spill] sm:$0xff] %v7370_v23  ;;  %1775 = vadd.xlane.f32.xlu0 %v6860_v8  ;;  %v2029_v56 = vmul.f32 %v7370_v23, %v7370_v23  ;;  %v7377_v22 = vpop.f32.mrb[61].mxu0  ;;  %v2113_v31 = vmul.f32 %v7372_v45, %v7372_v45  ;;  %v7381_v9 = vpop.f32.mrb[61].mxu1 }
 0x198   : > { %11134 = vst [vmem:[#allocation137_spill] sm:$0xff] %v7368_v29  ;;  %11136 = vst [vmem:[#allocation139_spill] sm:$0xff] %v7372_v45  ;;  %v1669_v53 = vsel %vm1548_vm1, %v7377_v22, 0.0  ;;  %v2030_v49 = vmul.f32 %v7377_v22, %v7377_v22  ;;  %v7387_v36 = vpop.f32.mrb[62].mxu0  ;;  %v1837_v8 = vsel %vm1548_vm1, %v7381_v9, 0.0  ;;  %v2114_v32 = vmul.f32 %v7381_v9, %v7381_v9  ;;  %v7393_v7 = vpop.f32.mrb[62].mxu1 }
 0x199   : > { %11137 = vst [vmem:[#allocation140_spill] sm:$0xff] %v7377_v22  ;;  %11138 = vst [vmem:[#allocation141_spill] sm:$0xff] %v7381_v9  ;;  %1779 = vadd.xlane.f32.xlu1 %v6879_v16  ;;  %v2031_v42 = vmul.f32 %v7387_v36, %v7387_v36  ;;  %v7398_v3 = vpop.f32.mrb[63].mxu0  ;;  %v2115_v38 = vmul.f32 %v7393_v7, %v7393_v7  ;;  %v7402_v43 = vpop.f32.mrb[63].mxu1  ;;  %v7405_v22 = vadd.f32 %v1669_v53, %v7370_v23 }
 0x19a   : > { %11139 = vst [vmem:[#allocation142_spill] sm:$0xff] %v7387_v36  ;;  %11140 = vst [vmem:[#allocation143_spill] sm:$0xff] %v7393_v7  ;;  %v7408_v19 = vadd.f32 %v1837_v8, %v7372_v45  ;;  %v1673_v9 = vsel %vm1548_vm1, %v7398_v3, 0.0  ;;  %v2032_v16 = vmul.f32 %v7398_v3, %v7398_v3  ;;  %v1841_v29 = vsel %vm1548_vm1, %v7402_v43, 0.0 }
 0x19b   : > { %11141 = vst [vmem:[#allocation144_spill] sm:$0xff] %v7398_v3  ;;  %11142 = vst [vmem:[#allocation145_spill] sm:$0xff] %v7402_v43  ;;  %v2116_v63 = vmul.f32 %v7402_v43, %v7402_v43  ;;  %2195 = vadd.xlane.f32.xlu0 %v6883_v14  ;;  %v7420_v53 = vadd.f32 %v1673_v9, %v7387_v36  ;;  %v7423_v8 = vadd.f32 %v1841_v29, %v7393_v7 }
 0x19c   : > { %11143 = vst [vmem:[#allocation146_spill] sm:$0xff] %v7405_v22  ;;  %11144 = vst [vmem:[#allocation147_spill] sm:$0xff] %v7408_v19  ;;  %v2257_v23 = vsel %vm1548_vm1, %v2030_v49, 0.0  ;;  %v2425_v45 = vsel %vm1548_vm1, %v2114_v32, 0.0  ;;  %v2261_v3 = vsel %vm1548_vm1, %v2032_v16, 0.0 }
 0x19d   : > { %v7427_v19 = vadd.f32 %v2257_v23, %v2029_v56  ;;  %v7430_v22 = vadd.f32 %v2425_v45, %v2113_v31  ;;  %v2429_v43 = vsel %vm1548_vm1, %v2116_v63, 0.0  ;;  %2199 = vadd.xlane.f32.xlu1 %v6890_v2  ;;  %v7434_v14 = vadd.f32 %v2261_v3, %v2031_v42 }
 0x19e   : > { %v7436_v9 = vadd.f32 %v2429_v43, %v2115_v38  ;;  %v7438_v29 = vpop.f32.mrb[64].mxu0  ;;  %v7443_v23 = vpop.f32.mrb[64].mxu1 }
 0x19f   : > { %11145 = vst [vmem:[#allocation148_spill] sm:$0xff] %v7430_v22  ;;  %11146 = vst [vmem:[#allocation149_spill] sm:$0xff] %v7434_v14  ;;  %2363 = vadd.xlane.f32.xlu0 %v6886_v25  ;;  %v7441_v49 = vpop.f32.mrb[65].mxu0  ;;  %v7451_v2 = vpop.f32.mrb[65].mxu1  ;;  %v2033_v31 = vmul.f32 %v7438_v29, %v7438_v29 }
 0x1a0   : > { %11147 = vst [vmem:[#allocation150_spill] sm:$0xff] %v7436_v9  ;;  %11148 = vst [vmem:[#allocation151_spill] sm:$0xff] %v7438_v29  ;;  %v1677_v45 = vsel %vm1548_vm1, %v7441_v49, 0.0  ;;  %v2034_v63 = vmul.f32 %v7441_v49, %v7441_v49  ;;  %v7449_v56 = vpop.f32.mrb[66].mxu0  ;;  %v7458_v32 = vpop.f32.mrb[66].mxu1  ;;  %v1845_v36 = vsel %vm1548_vm1, %v7451_v2, 0.0 }
 0x1a1   : > { %11149 = vst [vmem:[#allocation152_spill] sm:$0xff] %v7441_v49  ;;  %11150 = vst [vmem:[#allocation153_spill] sm:$0xff] %v7443_v23  ;;  %2367 = vadd.xlane.f32.xlu1 %v6892_v44  ;;  %v7456_v25 = vpop.f32.mrb[67].mxu0  ;;  %v7461_v42 = vadd.f32 %v1677_v45, %v7438_v29  ;;  %v2035_v3 = vmul.f32 %v7449_v56, %v7449_v56  ;;  %v7469_v44 = vpop.f32.mrb[67].mxu1  ;;  %v2118_v45 = vmul.f32 %v7451_v2, %v7451_v2 }
 0x1a2   : > { %11151 = vst [vmem:[#allocation154_spill] sm:$0xff] %v7449_v56  ;;  %11152 = vst [vmem:[#allocation155_spill] sm:$0xff] %v7451_v2  ;;  %v1681_v38 = vsel %vm1548_vm1, %v7456_v25, 0.0  ;;  %v2036_v43 = vmul.f32 %v7456_v25, %v7456_v25  ;;  %v2265_v16 = vsel %vm1548_vm1, %v2034_v63, 0.0  ;;  %v1849_v49 = vsel %vm1548_vm1, %v7469_v44, 0.0 }
 0x1a3   : > { %11153 = vst [vmem:[#allocation156_spill] sm:$0xff] %v7456_v25  ;;  %11154 = vst [vmem:[#allocation157_spill] sm:$0xff] %v7458_v32  ;;  %1615 = vadd.xlane.f32.xlu0 %v6925_v10  ;;  %v2120_v29 = vmul.f32 %v7469_v44, %v7469_v44  ;;  %v2117_v25 = vmul.f32 %v7443_v23, %v7443_v23  ;;  %v2119_v63 = vmul.f32 %v7458_v32, %v7458_v32 }
 0x1a4   : > { %11155 = vst [vmem:[#allocation158_spill] sm:$0xff] %v7461_v42  ;;  %11156 = vst [vmem:[#allocation159_spill] sm:$0xff] %v7469_v44  ;;  %v7486_v10 = vadd.f32 %v1681_v38, %v7449_v56  ;;  %v7489_v7 = vadd.f32 %v1845_v36, %v7443_v23  ;;  %v7493_v2 = vadd.f32 %v1849_v49, %v7458_v32  ;;  %v2269_v44 = vsel %vm1548_vm1, %v2036_v43, 0.0 }
 0x1a5   : > { %1619 = vadd.xlane.f32.xlu1 %v6944_v52  ;;  %v7495_v42 = vadd.f32 %v2265_v16, %v2033_v31  ;;  %v2433_v9 = vsel %vm1548_vm1, %v2118_v45, 0.0  ;;  %v7499_v22 = vadd.f32 %v2269_v44, %v2035_v3  ;;  %v2437_v38 = vsel %vm1548_vm1, %v2120_v29, 0.0 }
 0x1a6   : > { %v7501_v14 = vadd.f32 %v2433_v9, %v2117_v25  ;;  %v7505_v36 = vadd.f32 %v2437_v38, %v2119_v63  ;;  %v7509_v52 = vpop.f32.mrb[68].mxu0 }
 0x1a7   : > { %1783 = vadd.xlane.f32.xlu0 %v6928_v54  ;;  %11157 = vst [vmem:[#allocation160_spill] sm:$0xff] %v7509_v52  ;;  %v7511_v49 = vpop.f32.mrb[69].mxu0  ;;  %v2037_v25 = vmul.f32 %v7509_v52, %v7509_v52 }
 0x1a8   : > { %11158 = vst [vmem:[#allocation161_spill] sm:$0xff] %v7511_v49  ;;  %v7514_v31 = vpop.f32.mrb[70].mxu0  ;;  %v1685_v54 = vsel %vm1548_vm1, %v7511_v49, 0.0 }
 0x1a9   : > { %1787 = vadd.xlane.f32.xlu1 %v6947_v41  ;;  %11159 = vst [vmem:[#allocation162_spill] sm:$0xff] %v7514_v31  ;;  %v7516_v9 = vpop.f32.mrb[71].mxu0  ;;  %v2038_v41 = vmul.f32 %v7511_v49, %v7511_v49  ;;  %v2039_v3 = vmul.f32 %v7514_v31, %v7514_v31  ;;  %v7542_v44 = vadd.f32 %v1685_v54, %v7509_v52 }
 0x1aa   : > { %11160 = vst [vmem:[#allocation163_spill] sm:$0xff] %v7516_v9  ;;  %v2040_v29 = vmul.f32 %v7516_v9, %v7516_v9 }
 0x1ab   : > { %2203 = vadd.xlane.f32.xlu0 %v6951_v13  ;;  %v1689_v13 = vsel %vm1548_vm1, %v7516_v9, 0.0  ;;  %v2273_v38 = vsel %vm1548_vm1, %v2038_v41, 0.0 }
 0x1ac   : > { %v7545_v16 = vadd.f32 %v1689_v13, %v7514_v31  ;;  %v2277_v9 = vsel %vm1548_vm1, %v2040_v29, 0.0  ;;  %v7556_v23 = vadd.f32 %v2273_v38, %v2037_v25 }
 0x1ad   : > { %2207 = vadd.xlane.f32.xlu1 %v6958_v6  ;;  %v7527_v6 = vpop.f32.mrb[68].mxu1  ;;  %v7558_v54 = vadd.f32 %v2277_v9, %v2039_v3 }
 0x1ae   : > { %11161 = vst [vmem:[#allocation164_spill] sm:$0xff] %v7527_v6  ;;  %v7539_v43 = vpop.f32.mrb[69].mxu1  ;;  %11165 = vst [vmem:[#allocation168_spill] sm:$0xff] %v7556_v23 }
 0x1af   : > { %2371 = vadd.xlane.f32.xlu0 %v6954_v61  ;;  %11162 = vst [vmem:[#allocation165_spill] sm:$0xff] %v7539_v43  ;;  %v7550_v63 = vpop.f32.mrb[70].mxu1  ;;  %11166 = vst [vmem:[#allocation169_spill] sm:$0xff] %v7558_v54  ;;  %v2122_v41 = vmul.f32 %v7539_v43, %v7539_v43 }
 0x1b0   : > { %v1552_v61 = vpop.xlane.xlu0 %1551  ;;  %11163 = vst [vmem:[#allocation166_spill] sm:$0xff] %v7550_v63  ;;  %v7554_v49 = vpop.f32.mrb[71].mxu1  ;;  %v2123_v9 = vmul.f32 %v7550_v63, %v7550_v63 }
 0x1b1   : > { %v7547_v45 = vmul.f32 0.0051020407, %v1552_v61  ;;  %2375 = vadd.xlane.f32.xlu1 %v6960_v4  ;;  %11164 = vst [vmem:[#allocation167_spill] sm:$0xff] %v7554_v49  ;;  %v1853_v4 = vsel %vm1548_vm1, %v7539_v43, 0.0  ;;  %v2121_v61 = vmul.f32 %v7527_v6, %v7527_v6  ;;  %v2441_v52 = vsel %vm1548_vm1, %v2122_v41, 0.0 }
 0x1b2   : > { %v1724_v56 = vpop.xlane.xlu1 %1723  ;;  %v7585_v3 = vadd.f32 %v1853_v4, %v7527_v6 }
 0x1b3   : > { %4994 = vst.msk [vmem:[%s7533_s13] sm:$0xff] %vm4993_vm2, %v7547_v45  ;;  %v7563_v13 = vmul.f32 0.0051020407, %v1724_v56  ;;  %1623 = vadd.xlane.f32.xlu0 %v6993_v47  ;;  %v1857_v56 = vsel %vm1548_vm1, %v7554_v49, 0.0  ;;  %v2124_v47 = vmul.f32 %v7554_v49, %v7554_v49 }
 0x1b4   : > { %v1720_v29 = vpop.xlane.xlu0 %1719  ;;  %v7588_v38 = vadd.f32 %v1857_v56, %v7550_v63 }
 0x1b5   : > { %11167 = vst [vmem:[#allocation170_spill] sm:$0xff] %v7563_v13  ;;  %5037 = vst.msk [vmem:[%s7533_s13 + $0x158] sm:$0xff] %vm4993_vm2, %v7563_v13  ;;  %v7581_v25 = vmul.f32 0.0051020407, %v1720_v29  ;;  %1627 = vadd.xlane.f32.xlu1 %v7012_v18  ;;  %v2445_v43 = vsel %vm1548_vm1, %v2124_v47, 0.0  ;;  %v7596_v29 = vadd.f32 %v2441_v52, %v2121_v61 }
 0x1b6   : > { %11168 = vst [vmem:[#allocation171_spill] sm:$0xff] %v7588_v38  ;;  %v2144_v31 = vpop.xlane.xlu1 %2143  ;;  %v7598_v18 = vadd.f32 %v2445_v43, %v2123_v9  ;;  %v7611_v43 = vpop.f32.mrb[72].mxu0 }
 0x1b7   : > { %5036 = vst.msk [vmem:[%s7533_s13 + $0x150] sm:$0xff] %vm4993_vm2, %v7581_v25  ;;  %1791 = vadd.xlane.f32.xlu0 %v6996_v50  ;;  %11169 = vst [vmem:[#allocation172_spill] sm:$0xff] %v7596_v29  ;;  %v2474_v6 = vmul.f32 0.0051020407, %v2144_v31  ;;  %v2600_v50 = vmul.f32 %v7563_v13, %v7563_v13  ;;  %v7613_v61 = vpop.f32.mrb[73].mxu0  ;;  %v2557_v31 = vmul.f32 %v7547_v45, %v7547_v45 }
 0x1b8   : > { %11170 = vst [vmem:[#allocation173_spill] sm:$0xff] %v7598_v18  ;;  %v1556_v49 = vpop.xlane.xlu0 %1555  ;;  %11171 = vst [vmem:[#allocation174_spill] sm:$0xff] %v7611_v43  ;;  %v7618_v63 = vpop.f32.mrb[74].mxu0  ;;  %v1693_v32 = vsel %vm1548_vm1, %v7613_v61, 0.0 }
 0x1b9   : > { %v7600_v4 = vmul.f32 0.0051020407, %v1556_v49  ;;  %1795 = vadd.xlane.f32.xlu1 %v7015_v57  ;;  %11172 = vst [vmem:[#allocation175_spill] sm:$0xff] %v7613_v61  ;;  %11173 = vst [vmem:[#allocation176_spill] sm:$0xff] %v7618_v63 }
 0x1ba   : > { %v2312_v56 = vpop.xlane.xlu1 %2311 }
 0x1bb   : > { %v2558_v41 = vmul.f32 %v7600_v4, %v7600_v4  ;;  %4995 = vst.msk [vmem:[%s7533_s13 + $0x8] sm:$0xff] %vm4993_vm2, %v7600_v4  ;;  %v2516_v52 = vmul.f32 0.0051020407, %v2312_v56  ;;  %2211 = vadd.xlane.f32.xlu0 %v7019_v11  ;;  %v7626_v56 = vpop.f32.mrb[75].mxu0 }
 0x1bc   : > { %v2140_v49 = vpop.xlane.xlu0 %2139  ;;  %11174 = vst [vmem:[#allocation177_spill] sm:$0xff] %v7626_v56 }
 0x1bd   : > { %v2642_v57 = vsub.f32 %v2474_v6, %v2558_v41  ;;  %v2684_v9 = vsub.f32 %v2516_v52, %v2600_v50  ;;  %v2473_v47 = vmul.f32 0.0051020407, %v2140_v49  ;;  %2215 = vadd.xlane.f32.xlu1 %v7026_v37  ;;  %v7633_v37 = vpop.f32.mrb[72].mxu1 }
 0x1be   : > { %v1560_v11 = vpop.xlane.xlu1 %1559  ;;  %11176 = vst [vmem:[#allocation179_spill] sm:$0xff] %v7633_v37  ;;  %v7637_v13 = vpop.f32.mrb[73].mxu1 }
 0x1bf   : > { %v2726_v6 = vmax.f32 %v2642_v57, 0.0  ;;  %v7628_v41 = vmax.f32 %v2684_v9, 0.0  ;;  %v2641_v50 = vsub.f32 %v2473_v47, %v2557_v31  ;;  %v7630_v52 = vmul.f32 0.0051020407, %v1560_v11  ;;  %2379 = vadd.xlane.f32.xlu0 %v7022_v20  ;;  %11177 = vst [vmem:[#allocation180_spill] sm:$0xff] %v7637_v13  ;;  %v7648_v20 = vpop.f32.mrb[74].mxu1 }
 0x1c0   : > { %v2308_v49 = vpop.xlane.xlu0 %2307  ;;  %11178 = vst [vmem:[#allocation181_spill] sm:$0xff] %v7648_v20  ;;  %v2599_v9 = vmul.f32 %v7581_v25, %v7581_v25  ;;  %v2041_v11 = vmul.f32 %v7611_v43, %v7611_v43 }
 0x1c1   : > { %11175 = vst [vmem:[#allocation178_spill] sm:$0xff] %v7628_v41  ;;  %v2810_v18 = vadd.f32 0.001, %v2726_v6  ;;  %5079 = vst.msk [vmem:[%s7624_s16 + $0x8] sm:$0xff] %vm4993_vm2, %v2726_v6  ;;  %v2725_v57 = vmax.f32 %v2641_v50, 0.0  ;;  %2383 = vadd.xlane.f32.xlu1 %v7028_v58  ;;  %v7654_v6 = vpop.f32.mrb[75].mxu1  ;;  %v7657_v50 = vadd.f32 %v1693_v32, %v7611_v43  ;;  %v2044_v32 = vmul.f32 %v7626_v56, %v7626_v56 }
 0x1c2   : > { %5121 = vst.msk [vmem:[%s7624_s16 + $0x158] sm:$0xff] %vm4993_vm2, %v7628_v41  ;;  %4996 = vst.msk [vmem:[%s7533_s13 + $0x10] sm:$0xff] %vm4993_vm2, %v7630_v52  ;;  %v2515_v31 = vmul.f32 0.0051020407, %v2308_v49  ;;  %v1564_v47 = vpop.xlane.xlu1 %1563  ;;  %v2042_v49 = vmul.f32 %v7613_v61, %v7613_v61  ;;  %v1697_v41 = vsel %vm1548_vm1, %v7626_v56, 0.0  ;;  %v2125_v56 = vmul.f32 %v7633_v37, %v7633_v37 }
 0x1c3   : > { %11179 = vst [vmem:[#allocation182_spill] sm:$0xff] %v7654_v6  ;;  %11180 = vst [vmem:[#allocation183_spill] sm:$0xff] %v7657_v50  ;;  %5611 = vrsqrt.f32 %v2810_v18  ;;  %v7661_v58 = vmul.f32 0.0051020407, %v1564_v47  ;;  %1631 = vadd.xlane.f32.xlu0 %v7061_v35  ;;  %v1861_v18 = vsel %vm1548_vm1, %v7637_v13, 0.0  ;;  %v2126_v47 = vmul.f32 %v7637_v13, %v7637_v13 }
 0x1c4   : > { %5078 = vst.msk [vmem:[%s7624_s16] sm:$0xff] %vm4993_vm2, %v2725_v57  ;;  %v2683_v29 = vsub.f32 %v2515_v31, %v2599_v9  ;;  %v1728_v54 = vpop.xlane.xlu0 %1727  ;;  %v2559_v9 = vmul.f32 %v7630_v52, %v7630_v52  ;;  %v2043_v31 = vmul.f32 %v7618_v63, %v7618_v63  ;;  %v1865_v13 = vsel %vm1548_vm1, %v7654_v6, 0.0 }
 0x1c5   : > { %4997 = vst.msk [vmem:[%s7533_s13 + $0x18] sm:$0xff] %vm4993_vm2, %v7661_v58  ;;  %v7677_v35 = vmul.f32 0.0051020407, %v1728_v54  ;;  %1635 = vadd.xlane.f32.xlu1 %v7080_v15  ;;  %v2128_v54 = vmul.f32 %v7654_v6, %v7654_v6  ;;  %v7691_v15 = vadd.f32 %v1697_v41, %v7618_v63  ;;  %v7702_v23 = vadd.f32 %v1861_v18, %v7633_v37 }
 0x1c6   : > { %v2767_v61 = vmax.f32 %v2683_v29, 0.0  ;;  %v1732_v43 = vpop.xlane.xlu1 %1731  ;;  %v2127_v29 = vmul.f32 %v7648_v20, %v7648_v20  ;;  %v7705_v38 = vadd.f32 %v1865_v13, %v7648_v20  ;;  %v2809_v41 = vadd.f32 0.001, %v2725_v57 }
 0x1c7   : > { %11181 = vst [vmem:[#allocation184_spill] sm:$0xff] %v7677_v35  ;;  %5038 = vst.msk [vmem:[%s7533_s13 + $0x160] sm:$0xff] %vm4993_vm2, %v7677_v35  ;;  %v7696_v50 = vmul.f32 0.0051020407, %v1732_v43  ;;  %1799 = vadd.xlane.f32.xlu0 %v7064_v1  ;;  %v2281_v1 = vsel %vm1548_vm1, %v2042_v49, 0.0  ;;  %v2285_v63 = vsel %vm1548_vm1, %v2044_v32, 0.0 }
 0x1c8   : > { %11183 = vst [vmem:[#allocation186_spill] sm:$0xff] %v7702_v23  ;;  %11184 = vst [vmem:[#allocation187_spill] sm:$0xff] %v7705_v38  ;;  %v2148_v43 = vpop.xlane.xlu0 %2147  ;;  %v2449_v18 = vsel %vm1548_vm1, %v2126_v47, 0.0  ;;  %v2851_v37 = vadd.f32 0.001, %v2767_v61  ;;  %v7722_v6 = vadd.f32 %v2281_v1, %v2041_v11  ;;  %v7724_v20 = vadd.f32 %v2285_v63, %v2043_v31  ;;  %v2978_v23 = vld [vmem:[%s7711_s19 + $0x8] sm:$0xff] }
 0x1c9   : > { %11182 = vst [vmem:[#allocation185_spill] sm:$0xff] %v7696_v50  ;;  %5120 = vst.msk [vmem:[%s7624_s16 + $0x150] sm:$0xff] %vm4993_vm2, %v2767_v61  ;;  %v2475_v13 = vmul.f32 0.0051020407, %v2148_v43  ;;  %1803 = vadd.xlane.f32.xlu1 %v7083_v17  ;;  %v7726_v38 = vadd.f32 %v2449_v18, %v2125_v56  ;;  %v2453_v49 = vsel %vm1548_vm1, %v2128_v54, 0.0  ;;  %v2560_v61 = vmul.f32 %v7661_v58, %v7661_v58  ;;  %v7733_v43 = vpop.f32.mrb[76].mxu0 }
 0x1ca   : > { %5039 = vst.msk [vmem:[%s7533_s13 + $0x168] sm:$0xff] %vm4993_vm2, %v7696_v50  ;;  %11185 = vst [vmem:[#allocation188_spill] sm:$0xff] %v7724_v20  ;;  %v2152_v57 = vpop.xlane.xlu1 %2151  ;;  %v7735_v17 = vadd.f32 %v2453_v49, %v2127_v29  ;;  %5613 = vrsqrt.f32 %v2809_v41  ;;  %v2601_v63 = vmul.f32 %v7677_v35, %v7677_v35  ;;  %v7739_v11 = vpop.f32.mrb[77].mxu0  ;;  %v2602_v29 = vmul.f32 %v7696_v50, %v7696_v50 }
 0x1cb   : > { %11186 = vst [vmem:[#allocation189_spill] sm:$0xff] %v7726_v38  ;;  %v2643_v32 = vsub.f32 %v2475_v13, %v2559_v9  ;;  %v2476_v47 = vmul.f32 0.0051020407, %v2152_v57  ;;  %2219 = vadd.xlane.f32.xlu0 %v7087_v30  ;;  %11187 = vst [vmem:[#allocation190_spill] sm:$0xff] %v7733_v43  ;;  %5615 = vrsqrt.f32 %v2851_v37  ;;  %v7742_v30 = vpop.f32.mrb[78].mxu0 }
 0x1cc   : > { %11188 = vst [vmem:[#allocation191_spill] sm:$0xff] %v7735_v17  ;;  %v2316_v56 = vpop.xlane.xlu0 %2315  ;;  %11189 = vst [vmem:[#allocation192_spill] sm:$0xff] %v7739_v11  ;;  %v7748_v13 = vpop.f32.mrb[79].mxu0 }
 0x1cd   : > { %v5612_v31 = vpop.eup %5611  ;;  %v2727_v9 = vmax.f32 %v2643_v32, 0.0  ;;  %v2644_v54 = vsub.f32 %v2476_v47, %v2560_v61  ;;  %v2517_v1 = vmul.f32 0.0051020407, %v2316_v56  ;;  %2223 = vadd.xlane.f32.xlu1 %v7094_v62  ;;  %11190 = vst [vmem:[#allocation193_spill] sm:$0xff] %v7742_v30  ;;  %11192 = vst [vmem:[#allocation195_spill] sm:$0xff] %v7748_v13  ;;  %v7753_v62 = vpop.f32.mrb[76].mxu1 }
 0x1ce   : > { %v7744_v18 = vmul.f32 %v5612_v31, %v2978_v23  ;;  %v2320_v41 = vpop.xlane.xlu1 %2319  ;;  %11193 = vst [vmem:[#allocation196_spill] sm:$0xff] %v7753_v62  ;;  %v7759_v47 = vpop.f32.mrb[77].mxu1 }
 0x1cf   : > { %v2811_v57 = vadd.f32 0.001, %v2727_v9  ;;  %5080 = vst.msk [vmem:[%s7624_s16 + $0x10] sm:$0xff] %vm4993_vm2, %v2727_v9  ;;  %v2728_v37 = vmax.f32 %v2644_v54, 0.0  ;;  %v2685_v49 = vsub.f32 %v2517_v1, %v2601_v63  ;;  %v2518_v32 = vmul.f32 0.0051020407, %v2320_v41  ;;  %2387 = vadd.xlane.f32.xlu0 %v7090_v51 }
 0x1d0   : > { %11191 = vst [vmem:[#allocation194_spill] sm:$0xff] %v7744_v18  ;;  %v7757_v23 = vmul.f32 %v7744_v18, %v7600_v4  ;;  %v1568_v61 = vpop.xlane.xlu0 %1567  ;;  %11195 = vst [vmem:[#allocation198_spill] sm:$0xff] %v7759_v47  ;;  %v7766_v51 = vpop.f32.mrb[78].mxu1  ;;  %v2130_v50 = vmul.f32 %v7759_v47, %v7759_v47  ;;  %v11204_v18 = vld [vmem:[#allocation99_spill] sm:$0xff] }
 0x1d1   : > { %5617 = vrsqrt.f32 %v2811_v57  ;;  %v2812_v56 = vadd.f32 0.001, %v2728_v37  ;;  %5081 = vst.msk [vmem:[%s7624_s16 + $0x18] sm:$0xff] %vm4993_vm2, %v2728_v37  ;;  %v7763_v31 = vmax.f32 %v2685_v49, 0.0  ;;  %v2686_v63 = vsub.f32 %v2518_v32, %v2602_v29  ;;  %2391 = vadd.xlane.f32.xlu1 %v7096_v26  ;;  %11197 = vst [vmem:[#allocation200_spill] sm:$0xff] %v7766_v51  ;;  %v7770_v54 = vpop.f32.mrb[79].mxu1 }
 0x1d2   : > { %11194 = vst [vmem:[#allocation197_spill] sm:$0xff] %v7757_v23  ;;  %v7768_v9 = vmul.f32 0.0051020407, %v1568_v61  ;;  %v1572_v4 = vpop.xlane.xlu1 %1571  ;;  %11198 = vst [vmem:[#allocation201_spill] sm:$0xff] %v7770_v54  ;;  %v11200_v57 = vld [vmem:[#allocation98_spill] sm:$0xff]  ;;  %v2045_v26 = vmul.f32 %v7733_v43, %v7733_v43  ;;  %v1701_v29 = vsel %vm1548_vm1, %v7739_v11, 0.0  ;;  %v2046_v49 = vmul.f32 %v7739_v11, %v7739_v11 }
 0x1d3   : > { %11196 = vst [vmem:[#allocation199_spill] sm:$0xff] %v7763_v31  ;;  %5122 = vst.msk [vmem:[%s7624_s16 + $0x160] sm:$0xff] %vm4993_vm2, %v7763_v31  ;;  %v7775_v1 = vmax.f32 %v2686_v63, 0.0  ;;  %v7777_v41 = vmul.f32 0.0051020407, %v1572_v4  ;;  %1639 = vadd.xlane.f32.xlu0 %v11200_v57  ;;  %v2047_v32 = vmul.f32 %v7742_v30, %v7742_v30  ;;  %v1705_v61 = vsel %vm1548_vm1, %v7748_v13, 0.0 }
 0x1d4   : > { %4998 = vst.msk [vmem:[%s7533_s13 + $0x20] sm:$0xff] %vm4993_vm2, %v7768_v9  ;;  %v1736_v37 = vpop.xlane.xlu0 %1735  ;;  %v2048_v63 = vmul.f32 %v7748_v13, %v7748_v13  ;;  %5619 = vrsqrt.f32 %v2812_v56  ;;  %v2561_v57 = vmul.f32 %v7768_v9, %v7768_v9  ;;  %v1869_v11 = vsel %vm1548_vm1, %v7759_v47, 0.0  ;;  %v5614_v13 = vpop.eup %5613 }
 0x1d5   : > { %11199 = vst [vmem:[#allocation202_spill] sm:$0xff] %v7775_v1  ;;  %5123 = vst.msk [vmem:[%s7624_s16 + $0x168] sm:$0xff] %vm4993_vm2, %v7775_v1  ;;  %v7801_v4 = vmul.f32 0.0051020407, %v1736_v37  ;;  %1643 = vadd.xlane.f32.xlu1 %v7148_v46  ;;  %v1873_v35 = vsel %vm1548_vm1, %v7770_v54, 0.0  ;;  %v2132_v37 = vmul.f32 %v7770_v54, %v7770_v54  ;;  %v7815_v46 = vadd.f32 %v1701_v29, %v7733_v43  ;;  %v5616_v23 = vpop.eup %5615  ;;  %v3019_v29 = vld [vmem:[%s7711_s19 + $0x150] sm:$0xff] }
 0x1d6   : > { %4999 = vst.msk [vmem:[%s7533_s13 + $0x28] sm:$0xff] %vm4993_vm2, %v7777_v41  ;;  %v1740_v56 = vpop.xlane.xlu1 %1739  ;;  %v2129_v47 = vmul.f32 %v7753_v62, %v7753_v62  ;;  %v2131_v31 = vmul.f32 %v7766_v51, %v7766_v51  ;;  %v7828_v54 = vadd.f32 %v1705_v61, %v7742_v30  ;;  %v2977_v43 = vld [vmem:[%s7711_s19] sm:$0xff]  ;;  %v7833_v17 = vadd.f32 %v1869_v11, %v7753_v62  ;;  %v2979_v62 = vld [vmem:[%s7711_s19 + $0x10] sm:$0xff] }
 0x1d7   : > { %11201 = vst [vmem:[#allocation98_spill] sm:$0xff] %v7801_v4  ;;  %11202 = vst [vmem:[#allocation203_spill] sm:$0xff] %v7815_v46  ;;  %v7820_v1 = vmul.f32 0.0051020407, %v1740_v56  ;;  %1807 = vadd.xlane.f32.xlu0 %v11204_v18  ;;  %v7836_v56 = vadd.f32 %v1873_v35, %v7766_v51  ;;  %v2289_v18 = vsel %vm1548_vm1, %v2046_v49, 0.0  ;;  %v2293_v38 = vsel %vm1548_vm1, %v2048_v63, 0.0 }
 0x1d8   : > { %5040 = vst.msk [vmem:[%s7533_s13 + $0x170] sm:$0xff] %vm4993_vm2, %v7801_v4  ;;  %11205 = vst [vmem:[#allocation99_spill] sm:$0xff] %v7828_v54  ;;  %v2156_v46 = vpop.xlane.xlu0 %2155  ;;  %v2562_v61 = vmul.f32 %v7777_v41, %v7777_v41  ;;  %v7846_v30 = vadd.f32 %v2289_v18, %v2045_v26  ;;  %v7848_v11 = vadd.f32 %v2293_v38, %v2047_v32  ;;  %v2457_v51 = vsel %vm1548_vm1, %v2130_v50, 0.0  ;;  %v7858_v54 = vpop.f32.mrb[80].mxu0 }
 0x1d9   : > { %11203 = vst [vmem:[#allocation204_spill] sm:$0xff] %v7820_v1  ;;  %11206 = vst [vmem:[#allocation205_spill] sm:$0xff] %v7833_v17  ;;  %v2477_v20 = vmul.f32 0.0051020407, %v2156_v46  ;;  %1811 = vadd.xlane.f32.xlu1 %v7151_v39  ;;  %v2461_v49 = vsel %vm1548_vm1, %v2132_v37, 0.0  ;;  %v7853_v63 = vmul.f32 %v5616_v23, %v3019_v29  ;;  %v7860_v26 = vadd.f32 %v2457_v51, %v2129_v47  ;;  %v7864_v18 = vpop.f32.mrb[81].mxu0 }
 0x1da   : > { %11207 = vst [vmem:[#allocation206_spill] sm:$0xff] %v7836_v56  ;;  %5041 = vst.msk [vmem:[%s7533_s13 + $0x178] sm:$0xff] %vm4993_vm2, %v7820_v1  ;;  %v2160_v35 = vpop.xlane.xlu1 %2159  ;;  %v7855_v56 = vmul.f32 %v5614_v13, %v2977_v43  ;;  %v7862_v38 = vadd.f32 %v2461_v49, %v2131_v31  ;;  %v2603_v23 = vmul.f32 %v7801_v4, %v7801_v4  ;;  %v7879_v31 = vpop.f32.mrb[82].mxu0 }
 0x1db   : > { %v5618_v46 = vpop.eup %5617  ;;  %v2645_v17 = vsub.f32 %v2477_v20, %v2561_v57  ;;  %v2478_v39 = vmul.f32 0.0051020407, %v2160_v35  ;;  %2227 = vadd.xlane.f32.xlu0 %v7155_v5  ;;  %11208 = vst [vmem:[#allocation207_spill] sm:$0xff] %v7858_v54  ;;  %11209 = vst [vmem:[#allocation208_spill] sm:$0xff] %v7864_v18  ;;  %v7872_v20 = vmul.f32 %v7853_v63, %v7581_v25  ;;  %v7883_v57 = vpop.f32.mrb[83].mxu0 }
 0x1dc   : > { %v2324_v32 = vpop.xlane.xlu0 %2323  ;;  %v7868_v50 = vmul.f32 %v7855_v56, %v7547_v45  ;;  %v7874_v43 = vmul.f32 %v5618_v46, %v2979_v62  ;;  %11213 = vst [vmem:[#allocation212_spill] sm:$0xff] %v7879_v31  ;;  %v2604_v45 = vmul.f32 %v7820_v1, %v7820_v1  ;;  %11214 = vst [vmem:[#allocation213_spill] sm:$0xff] %v7883_v57  ;;  %v7892_v35 = vpop.f32.mrb[80].mxu1  ;;  %v1709_v46 = vsel %vm1548_vm1, %v7864_v18, 0.0 }
 0x1dd   : > { %11211 = vst [vmem:[#allocation210_spill] sm:$0xff] %v7872_v20  ;;  %v2729_v5 = vmax.f32 %v2645_v17, 0.0  ;;  %v2646_v13 = vsub.f32 %v2478_v39, %v2562_v61  ;;  %v2519_v47 = vmul.f32 0.0051020407, %v2324_v32  ;;  %2231 = vadd.xlane.f32.xlu1 %v7162_v27  ;;  %v11216_v61 = vld [vmem:[#allocation100_spill] sm:$0xff]  ;;  %v7896_v39 = vpop.f32.mrb[81].mxu1 }
 0x1de   : > { %11210 = vst [vmem:[#allocation209_spill] sm:$0xff] %v7868_v50  ;;  %11212 = vst [vmem:[#allocation211_spill] sm:$0xff] %v7874_v43  ;;  %v2328_v51 = vpop.xlane.xlu1 %2327  ;;  %v7887_v25 = vmul.f32 %v7874_v43, %v7630_v52  ;;  %v5620_v17 = vpop.eup %5619  ;;  %v1877_v4 = vsel %vm1548_vm1, %v7896_v39, 0.0 }
 0x1df   : > { %v2813_v62 = vadd.f32 0.001, %v2729_v5  ;;  %5082 = vst.msk [vmem:[%s7624_s16 + $0x20] sm:$0xff] %vm4993_vm2, %v2729_v5  ;;  %v2730_v37 = vmax.f32 %v2646_v13, 0.0  ;;  %v2687_v29 = vsub.f32 %v2519_v47, %v2603_v23  ;;  %v2520_v27 = vmul.f32 0.0051020407, %v2328_v51  ;;  %2395 = vadd.xlane.f32.xlu0 %v11216_v61 }
 0x1e0   : > { %11215 = vst [vmem:[#allocation214_spill] sm:$0xff] %v7887_v25  ;;  %11217 = vst [vmem:[#allocation100_spill] sm:$0xff] %v7892_v35  ;;  %v1576_v49 = vpop.xlane.xlu0 %1575  ;;  %v11220_v13 = vld [vmem:[#allocation101_spill] sm:$0xff]  ;;  %v7903_v23 = vpop.f32.mrb[82].mxu1  ;;  %v1713_v61 = vsel %vm1548_vm1, %v7883_v57, 0.0 }
 0x1e1   : > { %11218 = vst [vmem:[#allocation215_spill] sm:$0xff] %v7896_v39  ;;  %5621 = vrsqrt.f32 %v2813_v62  ;;  %v2814_v52 = vadd.f32 0.001, %v2730_v37  ;;  %5083 = vst.msk [vmem:[%s7624_s16 + $0x28] sm:$0xff] %vm4993_vm2, %v2730_v37  ;;  %v7900_v32 = vmax.f32 %v2687_v29, 0.0  ;;  %v2688_v5 = vsub.f32 %v2520_v27, %v2604_v45  ;;  %2399 = vadd.xlane.f32.xlu1 %v11220_v13  ;;  %v7911_v37 = vpop.f32.mrb[83].mxu1 }
 0x1e2   : > { %11221 = vst [vmem:[#allocation101_spill] sm:$0xff] %v7903_v23  ;;  %v7905_v47 = vmul.f32 0.0051020407, %v1576_v49  ;;  %v1580_v51 = vpop.xlane.xlu1 %1579  ;;  %v2052_v62 = vmul.f32 %v7883_v57, %v7883_v57  ;;  %11222 = vst [vmem:[#allocation217_spill] sm:$0xff] %v7911_v37  ;;  %v7914_v29 = vadd.f32 %v1709_v46, %v7858_v54  ;;  %v2980_v45 = vld [vmem:[%s7711_s19 + $0x18] sm:$0xff]  ;;  %v11224_v13 = vld [vmem:[#allocation110_spill] sm:$0xff]  ;;  %v2050_v46 = vmul.f32 %v7864_v18, %v7864_v18 }
 0x1e3   : > { %11219 = vst [vmem:[#allocation216_spill] sm:$0xff] %v7900_v32  ;;  %5623 = vrsqrt.f32 %v2814_v52  ;;  %5124 = vst.msk [vmem:[%s7624_s16 + $0x170] sm:$0xff] %vm4993_vm2, %v7900_v32  ;;  %v7920_v27 = vmax.f32 %v2688_v5, 0.0  ;;  %v7922_v49 = vmul.f32 0.0051020407, %v1580_v51  ;;  %1647 = vadd.xlane.f32.xlu0 %v11224_v13  ;;  %v2051_v52 = vmul.f32 %v7879_v31, %v7879_v31 }
 0x1e4   : > { %5000 = vst.msk [vmem:[%s7533_s13 + $0x30] sm:$0xff] %vm4993_vm2, %v7905_v47  ;;  %v1744_v57 = vpop.xlane.xlu0 %1743  ;;  %v7933_v1 = vadd.f32 %v1713_v61, %v7879_v31  ;;  %v2049_v51 = vmul.f32 %v7858_v54, %v7858_v54  ;;  %v2301_v13 = vsel %vm1548_vm1, %v2052_v62, 0.0  ;;  %v7947_v18 = vmul.f32 %v5620_v17, %v2980_v45  ;;  %v11227_v62 = vld [vmem:[#allocation111_spill] sm:$0xff] }
 0x1e5   : > { %11223 = vst [vmem:[#allocation218_spill] sm:$0xff] %v7920_v27  ;;  %5125 = vst.msk [vmem:[%s7624_s16 + $0x178] sm:$0xff] %vm4993_vm2, %v7920_v27  ;;  %v7941_v5 = vmul.f32 0.0051020407, %v1744_v57  ;;  %1651 = vadd.xlane.f32.xlu1 %v7216_v28  ;;  %v2133_v31 = vmul.f32 %v7892_v35, %v7892_v35  ;;  %v2134_v57 = vmul.f32 %v7896_v39, %v7896_v39  ;;  %v1881_v28 = vsel %vm1548_vm1, %v7911_v37, 0.0 }
 0x1e6   : > { %5001 = vst.msk [vmem:[%s7533_s13 + $0x38] sm:$0xff] %vm4993_vm2, %v7922_v49  ;;  %v1748_v61 = vpop.xlane.xlu1 %1747  ;;  %v2135_v45 = vmul.f32 %v7903_v23, %v7903_v23  ;;  %v7966_v54 = vadd.f32 %v1881_v28, %v7903_v23  ;;  %v2136_v39 = vmul.f32 %v7911_v37, %v7911_v37  ;;  %v7971_v27 = vadd.f32 %v1877_v4, %v7892_v35  ;;  %v2981_v4 = vld [vmem:[%s7711_s19 + $0x20] sm:$0xff] }
 0x1e7   : > { %11225 = vst [vmem:[#allocation110_spill] sm:$0xff] %v7941_v5  ;;  %5042 = vst.msk [vmem:[%s7533_s13 + $0x180] sm:$0xff] %vm4993_vm2, %v7941_v5  ;;  %v7960_v17 = vmul.f32 0.0051020407, %v1748_v61  ;;  %1815 = vadd.xlane.f32.xlu0 %v11227_v62  ;;  %v2297_v43 = vsel %vm1548_vm1, %v2050_v46, 0.0  ;;  %v7974_v20 = vadd.f32 %v2301_v13, %v2051_v52  ;;  %v2563_v61 = vmul.f32 %v7905_v47, %v7905_v47 }
 0x1e8   : > { %v2164_v25 = vpop.xlane.xlu0 %2163  ;;  %v7982_v62 = vadd.f32 %v2297_v43, %v2049_v51  ;;  %v2465_v37 = vsel %vm1548_vm1, %v2134_v57, 0.0  ;;  %v2469_v46 = vsel %vm1548_vm1, %v2136_v39, 0.0  ;;  %v7991_v13 = vmul.f32 %v7947_v18, %v7661_v58  ;;  %v2982_v51 = vld [vmem:[%s7711_s19 + $0x28] sm:$0xff] }
 0x1e9   : > { %11226 = vst [vmem:[#allocation219_spill] sm:$0xff] %v7960_v17  ;;  %5043 = vst.msk [vmem:[%s7533_s13 + $0x188] sm:$0xff] %vm4993_vm2, %v7960_v17  ;;  %v2479_v28 = vmul.f32 0.0051020407, %v2164_v25  ;;  %1819 = vadd.xlane.f32.xlu1 %v7219_v34  ;;  %v7987_v52 = vadd.f32 %v2465_v37, %v2133_v31  ;;  %v2564_v25 = vmul.f32 %v7922_v49, %v7922_v49 }
 0x1ea   : > { %v2168_v35 = vpop.xlane.xlu1 %2167  ;;  %v7996_v43 = vadd.f32 %v2469_v46, %v2135_v45  ;;  %v2605_v58 = vmul.f32 %v7941_v5, %v7941_v5 }
 0x1eb   : > { %v5622_v23 = vpop.eup %5621  ;;  %v2647_v50 = vsub.f32 %v2479_v28, %v2563_v61  ;;  %v2480_v34 = vmul.f32 0.0051020407, %v2168_v35  ;;  %2235 = vadd.xlane.f32.xlu0 %v7223_v24  ;;  %v2606_v24 = vmul.f32 %v7960_v17, %v7960_v17 }
 0x1ec   : > { %v2332_v57 = vpop.xlane.xlu0 %2331  ;;  %v7999_v39 = vmul.f32 %v5622_v23, %v2981_v4 }
 0x1ed   : > { %v5624_v31 = vpop.eup %5623  ;;  %v2731_v37 = vmax.f32 %v2647_v50, 0.0  ;;  %v2648_v32 = vsub.f32 %v2480_v34, %v2564_v25  ;;  %v2521_v61 = vmul.f32 0.0051020407, %v2332_v57  ;;  %2239 = vadd.xlane.f32.xlu1 %v7230_v48  ;;  %v11228_v25 = vld [vmem:[#allocation112_spill] sm:$0xff] }
 0x1ee   : > { %v2336_v35 = vpop.xlane.xlu1 %2335  ;;  %v8008_v45 = vmul.f32 %v7999_v39, %v7768_v9  ;;  %v8010_v23 = vmul.f32 %v5624_v31, %v2982_v51 }
 0x1ef   : > { %v2815_v28 = vadd.f32 0.001, %v2731_v37  ;;  %5084 = vst.msk [vmem:[%s7624_s16 + $0x30] sm:$0xff] %vm4993_vm2, %v2731_v37  ;;  %v2732_v50 = vmax.f32 %v2648_v32, 0.0  ;;  %v2689_v4 = vsub.f32 %v2521_v61, %v2605_v58  ;;  %v2522_v46 = vmul.f32 0.0051020407, %v2336_v35  ;;  %2403 = vadd.xlane.f32.xlu0 %v11228_v25 }
 0x1f0   : > { %v1584_v48 = vpop.xlane.xlu0 %1583  ;;  %v8017_v34 = vmul.f32 %v8010_v23, %v7777_v41  ;;  %v11230_v32 = vld [vmem:[#allocation113_spill] sm:$0xff]  ;;  %v11231_v61 = vld [vmem:[#allocation122_spill] sm:$0xff] }
 0x1f1   : > { %5625 = vrsqrt.f32 %v2815_v28  ;;  %v2816_v9 = vadd.f32 0.001, %v2732_v50  ;;  %5085 = vst.msk [vmem:[%s7624_s16 + $0x38] sm:$0xff] %vm4993_vm2, %v2732_v50  ;;  %v8021_v51 = vmax.f32 %v2689_v4, 0.0  ;;  %v2690_v57 = vsub.f32 %v2522_v46, %v2606_v24  ;;  %2407 = vadd.xlane.f32.xlu1 %v11230_v32  ;;  %v11234_v4 = vld [vmem:[#allocation123_spill] sm:$0xff] }
 0x1f2   : > { %11229 = vst [vmem:[#allocation111_spill] sm:$0xff] %v8017_v34  ;;  %v8024_v31 = vmul.f32 0.0051020407, %v1584_v48  ;;  %v1588_v37 = vpop.xlane.xlu1 %1587 }
 0x1f3   : > { %5627 = vrsqrt.f32 %v2816_v9  ;;  %5126 = vst.msk [vmem:[%s7624_s16 + $0x180] sm:$0xff] %vm4993_vm2, %v8021_v51  ;;  %v8029_v41 = vmax.f32 %v2690_v57, 0.0  ;;  %v8031_v58 = vmul.f32 0.0051020407, %v1588_v37  ;;  %1655 = vadd.xlane.f32.xlu0 %v11231_v61 }
 0x1f4   : > { %5002 = vst.msk [vmem:[%s7533_s13 + $0x40] sm:$0xff] %vm4993_vm2, %v8024_v31  ;;  %v1752_v24 = vpop.xlane.xlu0 %1751  ;;  %v2565_v25 = vmul.f32 %v8024_v31, %v8024_v31 }
 0x1f5   : > { %5127 = vst.msk [vmem:[%s7624_s16 + $0x188] sm:$0xff] %vm4993_vm2, %v8029_v41  ;;  %5003 = vst.msk [vmem:[%s7533_s13 + $0x48] sm:$0xff] %vm4993_vm2, %v8031_v58  ;;  %v8043_v35 = vmul.f32 0.0051020407, %v1752_v24  ;;  %1659 = vadd.xlane.f32.xlu1 %v7284_v55  ;;  %v2983_v55 = vld [vmem:[%s7711_s19 + $0x30] sm:$0xff]  ;;  %v2566_v37 = vmul.f32 %v8031_v58, %v8031_v58  ;;  %v2984_v24 = vld [vmem:[%s7711_s19 + $0x38] sm:$0xff] }
 0x1f6   : > { %v1756_v28 = vpop.xlane.xlu1 %1755 }
 0x1f7   : > { %11232 = vst [vmem:[#allocation112_spill] sm:$0xff] %v8043_v35  ;;  %5044 = vst.msk [vmem:[%s7533_s13 + $0x190] sm:$0xff] %vm4993_vm2, %v8043_v35  ;;  %v8049_v50 = vmul.f32 0.0051020407, %v1756_v28  ;;  %1823 = vadd.xlane.f32.xlu0 %v11234_v4 }
 0x1f8   : > { %v2172_v46 = vpop.xlane.xlu0 %2171 }
 0x1f9   : > { %11233 = vst [vmem:[#allocation113_spill] sm:$0xff] %v8049_v50  ;;  %5045 = vst.msk [vmem:[%s7533_s13 + $0x198] sm:$0xff] %vm4993_vm2, %v8049_v50  ;;  %v2481_v48 = vmul.f32 0.0051020407, %v2172_v46  ;;  %1827 = vadd.xlane.f32.xlu1 %v7287_v60  ;;  %v2607_v60 = vmul.f32 %v8043_v35, %v8043_v35 }
 0x1fa   : > { %v2176_v9 = vpop.xlane.xlu1 %2175 }
 0x1fb   : > { %v5626_v57 = vpop.eup %5625  ;;  %v2649_v32 = vsub.f32 %v2481_v48, %v2565_v25  ;;  %v2482_v61 = vmul.f32 0.0051020407, %v2176_v9  ;;  %2243 = vadd.xlane.f32.xlu0 %v7291_v12  ;;  %v2608_v25 = vmul.f32 %v8049_v50, %v8049_v50 }
 0x1fc   : > { %v2340_v28 = vpop.xlane.xlu0 %2339  ;;  %v8063_v4 = vmul.f32 %v5626_v57, %v2983_v55 }
 0x1fd   : > { %v5628_v17 = vpop.eup %5627  ;;  %v2733_v5 = vmax.f32 %v2649_v32, 0.0  ;;  %v2650_v46 = vsub.f32 %v2482_v61, %v2566_v37  ;;  %v2523_v34 = vmul.f32 0.0051020407, %v2340_v28  ;;  %2247 = vadd.xlane.f32.xlu1 %v7298_v59  ;;  %v11236_v61 = vld [vmem:[#allocation124_spill] sm:$0xff] }
 0x1fe   : > { %11235 = vst [vmem:[#allocation122_spill] sm:$0xff] %v8063_v4  ;;  %v2344_v48 = vpop.xlane.xlu1 %2343  ;;  %v8072_v12 = vmul.f32 %v8063_v4, %v7905_v47  ;;  %v8074_v55 = vmul.f32 %v5628_v17, %v2984_v24  ;;  %v11238_v24 = vld [vmem:[#allocation125_spill] sm:$0xff] }
 0x1ff   : > { %v2817_v9 = vadd.f32 0.001, %v2733_v5  ;;  %5086 = vst.msk [vmem:[%s7624_s16 + $0x40] sm:$0xff] %vm4993_vm2, %v2733_v5  ;;  %v2734_v57 = vmax.f32 %v2650_v46, 0.0  ;;  %v2691_v32 = vsub.f32 %v2523_v34, %v2607_v60  ;;  %v2524_v37 = vmul.f32 0.0051020407, %v2344_v48  ;;  %2411 = vadd.xlane.f32.xlu0 %v11236_v61 }
 0x200   : > { %v1592_v59 = vpop.xlane.xlu0 %1591  ;;  %v8081_v28 = vmul.f32 %v8074_v55, %v7922_v49  ;;  %v11239_v48 = vld [vmem:[#allocation134_spill] sm:$0xff]  ;;  %v11242_v61 = vld [vmem:[#allocation135_spill] sm:$0xff] }
 0x201   : > { %5629 = vrsqrt.f32 %v2817_v9  ;;  %v2818_v47 = vadd.f32 0.001, %v2734_v57  ;;  %5087 = vst.msk [vmem:[%s7624_s16 + $0x48] sm:$0xff] %vm4993_vm2, %v2734_v57  ;;  %v8085_v17 = vmax.f32 %v2691_v32, 0.0  ;;  %v2692_v5 = vsub.f32 %v2524_v37, %v2608_v25  ;;  %2415 = vadd.xlane.f32.xlu1 %v11238_v24 }
 0x202   : > { %11237 = vst [vmem:[#allocation123_spill] sm:$0xff] %v8081_v28  ;;  %v8088_v34 = vmul.f32 0.0051020407, %v1592_v59  ;;  %v1596_v46 = vpop.xlane.xlu1 %1595  ;;  %v5858_v9 = vmov 0  }
 0x203   : > { %5631 = vrsqrt.f32 %v2818_v47  ;;  %5128 = vst.msk [vmem:[%s7624_s16 + $0x190] sm:$0xff] %vm4993_vm2, %v8085_v17  ;;  %v8093_v49 = vmax.f32 %v2692_v5, 0.0  ;;  %v8095_v60 = vmul.f32 0.0051020407, %v1596_v46  ;;  %1663 = vadd.xlane.f32.xlu0 %v11239_v48  ;;  %5482 = vset.pattern.permute.xlu1 %v5858_v9 }
 0x204   : > { %5004 = vst.msk [vmem:[%s7533_s13 + $0x50] sm:$0xff] %vm4993_vm2, %v8088_v34  ;;  %v1760_v25 = vpop.xlane.xlu0 %1759  ;;  %5481 = vset.pattern.permute.xlu0 %v5858_v9  ;;  %v2567_v47 = vmul.f32 %v8088_v34, %v8088_v34 }
 0x205   : > { %5129 = vst.msk [vmem:[%s7624_s16 + $0x198] sm:$0xff] %vm4993_vm2, %v8093_v49  ;;  %5005 = vst.msk [vmem:[%s7533_s13 + $0x58] sm:$0xff] %vm4993_vm2, %v8095_v60  ;;  %v8107_v57 = vmul.f32 0.0051020407, %v1760_v25  ;;  %1667 = vadd.xlane.f32.xlu1 %v7352_v40  ;;  %v2985_v40 = vld [vmem:[%s7711_s19 + $0x40] sm:$0xff]  ;;  %v2568_v9 = vmul.f32 %v8095_v60, %v8095_v60 }
 0x206   : > { %v1764_v32 = vpop.xlane.xlu1 %1763 }
 0x207   : > { %11240 = vst [vmem:[#allocation124_spill] sm:$0xff] %v8107_v57  ;;  %5046 = vst.msk [vmem:[%s7533_s13 + $0x1a0] sm:$0xff] %vm4993_vm2, %v8107_v57  ;;  %v8113_v37 = vmul.f32 0.0051020407, %v1764_v32  ;;  %1831 = vadd.xlane.f32.xlu0 %v11242_v61  ;;  %v2986_v32 = vld [vmem:[%s7711_s19 + $0x48] sm:$0xff] }
 0x208   : > { %v2180_v59 = vpop.xlane.xlu0 %2179 }
 0x209   : > { %11241 = vst [vmem:[#allocation125_spill] sm:$0xff] %v8113_v37  ;;  %5047 = vst.msk [vmem:[%s7533_s13 + $0x1a8] sm:$0xff] %vm4993_vm2, %v8113_v37  ;;  %v2483_v5 = vmul.f32 0.0051020407, %v2180_v59  ;;  %1835 = vadd.xlane.f32.xlu1 %v7355_v33  ;;  %v2609_v33 = vmul.f32 %v8107_v57, %v8107_v57 }
 0x20a   : > { %v2184_v24 = vpop.xlane.xlu1 %2183 }
 0x20b   : > { %v5630_v46 = vpop.eup %5629  ;;  %v2651_v48 = vsub.f32 %v2483_v5, %v2567_v47  ;;  %v2484_v25 = vmul.f32 0.0051020407, %v2184_v24  ;;  %2251 = vadd.xlane.f32.xlu0 %v7359_v0  ;;  %v2610_v47 = vmul.f32 %v8113_v37, %v8113_v37 }
 0x20c   : > { %v2348_v61 = vpop.xlane.xlu0 %2347  ;;  %v8127_v50 = vmul.f32 %v5630_v46, %v2985_v40 }
 0x20d   : > { %v5632_v35 = vpop.eup %5631  ;;  %v2735_v28 = vmax.f32 %v2651_v48, 0.0  ;;  %v2652_v59 = vsub.f32 %v2484_v25, %v2568_v9  ;;  %v2525_v4 = vmul.f32 0.0051020407, %v2348_v61  ;;  %2255 = vadd.xlane.f32.xlu1 %v7366_v21  ;;  %v11245_v25 = vld [vmem:[#allocation136_spill] sm:$0xff] }
 0x20e   : > { %11243 = vst [vmem:[#allocation134_spill] sm:$0xff] %v8127_v50  ;;  %v2352_v5 = vpop.xlane.xlu1 %2351  ;;  %v8136_v0 = vmul.f32 %v8127_v50, %v8024_v31  ;;  %v8138_v40 = vmul.f32 %v5632_v35, %v2986_v32  ;;  %v11247_v32 = vld [vmem:[#allocation137_spill] sm:$0xff] }
 0x20f   : > { %v2819_v24 = vadd.f32 0.001, %v2735_v28  ;;  %5088 = vst.msk [vmem:[%s7624_s16 + $0x50] sm:$0xff] %vm4993_vm2, %v2735_v28  ;;  %v2736_v46 = vmax.f32 %v2652_v59, 0.0  ;;  %v2693_v48 = vsub.f32 %v2525_v4, %v2609_v33  ;;  %v2526_v9 = vmul.f32 0.0051020407, %v2352_v5  ;;  %2419 = vadd.xlane.f32.xlu0 %v11245_v25 }
 0x210   : > { %11244 = vst [vmem:[#allocation135_spill] sm:$0xff] %v8138_v40  ;;  %v1600_v21 = vpop.xlane.xlu0 %1599  ;;  %v8145_v61 = vmul.f32 %v8138_v40, %v8031_v58  ;;  %v11248_v5 = vld [vmem:[#allocation146_spill] sm:$0xff]  ;;  %v11252_v40 = vld [vmem:[#allocation149_spill] sm:$0xff] }
 0x211   : > { %5633 = vrsqrt.f32 %v2819_v24  ;;  %v2820_v31 = vadd.f32 0.001, %v2736_v46  ;;  %5089 = vst.msk [vmem:[%s7624_s16 + $0x58] sm:$0xff] %vm4993_vm2, %v2736_v46  ;;  %v8149_v35 = vmax.f32 %v2693_v48, 0.0  ;;  %v2694_v28 = vsub.f32 %v2526_v9, %v2610_v47  ;;  %2423 = vadd.xlane.f32.xlu1 %v11247_v32  ;;  %v11251_v9 = vld [vmem:[#allocation147_spill] sm:$0xff] }
 0x212   : > { %11246 = vst [vmem:[#allocation136_spill] sm:$0xff] %v8145_v61  ;;  %v8152_v4 = vmul.f32 0.0051020407, %v1600_v21  ;;  %v1604_v59 = vpop.xlane.xlu1 %1603 }
 0x213   : > { %5635 = vrsqrt.f32 %v2820_v31  ;;  %5130 = vst.msk [vmem:[%s7624_s16 + $0x1a0] sm:$0xff] %vm4993_vm2, %v8149_v35  ;;  %v8157_v58 = vmax.f32 %v2694_v28, 0.0  ;;  %v8159_v33 = vmul.f32 0.0051020407, %v1604_v59  ;;  %1671 = vadd.xlane.f32.xlu0 %v11248_v5 }
 0x214   : > { %5006 = vst.msk [vmem:[%s7533_s13 + $0x60] sm:$0xff] %vm4993_vm2, %v8152_v4  ;;  %v1768_v47 = vpop.xlane.xlu0 %1767  ;;  %v2569_v21 = vmul.f32 %v8152_v4, %v8152_v4 }
 0x215   : > { %5131 = vst.msk [vmem:[%s7624_s16 + $0x1a8] sm:$0xff] %vm4993_vm2, %v8157_v58  ;;  %5007 = vst.msk [vmem:[%s7533_s13 + $0x68] sm:$0xff] %vm4993_vm2, %v8159_v33  ;;  %v8171_v24 = vmul.f32 0.0051020407, %v1768_v47  ;;  %1675 = vadd.xlane.f32.xlu1 %v7420_v53  ;;  %v2987_v53 = vld [vmem:[%s7711_s19 + $0x50] sm:$0xff]  ;;  %v2570_v5 = vmul.f32 %v8159_v33, %v8159_v33 }
 0x216   : > { %v1772_v46 = vpop.xlane.xlu1 %1771 }
 0x217   : > { %11249 = vst [vmem:[#allocation137_spill] sm:$0xff] %v8171_v24  ;;  %5048 = vst.msk [vmem:[%s7533_s13 + $0x1b0] sm:$0xff] %vm4993_vm2, %v8171_v24  ;;  %v8177_v48 = vmul.f32 0.0051020407, %v1772_v46  ;;  %1839 = vadd.xlane.f32.xlu0 %v11251_v9  ;;  %v2988_v46 = vld [vmem:[%s7711_s19 + $0x58] sm:$0xff] }
 0x218   : > { %v2188_v25 = vpop.xlane.xlu0 %2187 }
 0x219   : > { %11250 = vst [vmem:[#allocation146_spill] sm:$0xff] %v8177_v48  ;;  %5049 = vst.msk [vmem:[%s7533_s13 + $0x1b8] sm:$0xff] %vm4993_vm2, %v8177_v48  ;;  %v2485_v31 = vmul.f32 0.0051020407, %v2188_v25  ;;  %1843 = vadd.xlane.f32.xlu1 %v7423_v8  ;;  %v2611_v8 = vmul.f32 %v8171_v24, %v8171_v24 }
 0x21a   : > { %v2192_v28 = vpop.xlane.xlu1 %2191 }
 0x21b   : > { %v5634_v32 = vpop.eup %5633  ;;  %v2653_v59 = vsub.f32 %v2485_v31, %v2569_v21  ;;  %v2486_v47 = vmul.f32 0.0051020407, %v2192_v28  ;;  %2259 = vadd.xlane.f32.xlu0 %v7427_v19  ;;  %v2612_v21 = vmul.f32 %v8177_v48, %v8177_v48 }
 0x21c   : > { %v2356_v9 = vpop.xlane.xlu0 %2355  ;;  %v8191_v37 = vmul.f32 %v5634_v32, %v2987_v53 }
 0x21d   : > { %v5636_v57 = vpop.eup %5635  ;;  %v2737_v61 = vmax.f32 %v2653_v59, 0.0  ;;  %v2654_v25 = vsub.f32 %v2486_v47, %v2570_v5  ;;  %v2527_v50 = vmul.f32 0.0051020407, %v2356_v9  ;;  %2263 = vadd.xlane.f32.xlu1 %v11252_v40  ;;  %v11253_v47 = vld [vmem:[#allocation148_spill] sm:$0xff] }
 0x21e   : > { %v2360_v31 = vpop.xlane.xlu1 %2359  ;;  %v8200_v19 = vmul.f32 %v8191_v37, %v8088_v34  ;;  %v8202_v53 = vmul.f32 %v5636_v57, %v2988_v46  ;;  %v11255_v46 = vld [vmem:[#allocation150_spill] sm:$0xff] }
 0x21f   : > { %v2821_v28 = vadd.f32 0.001, %v2737_v61  ;;  %5090 = vst.msk [vmem:[%s7624_s16 + $0x60] sm:$0xff] %vm4993_vm2, %v2737_v61  ;;  %v2738_v32 = vmax.f32 %v2654_v25, 0.0  ;;  %v2695_v59 = vsub.f32 %v2527_v50, %v2611_v8  ;;  %v2528_v5 = vmul.f32 0.0051020407, %v2360_v31  ;;  %2427 = vadd.xlane.f32.xlu0 %v11253_v47 }
 0x220   : > { %v1608_v40 = vpop.xlane.xlu0 %1607  ;;  %v8209_v9 = vmul.f32 %v8202_v53, %v8095_v60  ;;  %v11256_v31 = vld [vmem:[#allocation158_spill] sm:$0xff] }
 0x221   : > { %5637 = vrsqrt.f32 %v2821_v28  ;;  %v2822_v34 = vadd.f32 0.001, %v2738_v32  ;;  %5091 = vst.msk [vmem:[%s7624_s16 + $0x68] sm:$0xff] %vm4993_vm2, %v2738_v32  ;;  %v8213_v57 = vmax.f32 %v2695_v59, 0.0  ;;  %v2696_v61 = vsub.f32 %v2528_v5, %v2612_v21  ;;  %2431 = vadd.xlane.f32.xlu1 %v11255_v46 }
 0x222   : > { %11254 = vst [vmem:[#allocation147_spill] sm:$0xff] %v8209_v9  ;;  %v8216_v50 = vmul.f32 0.0051020407, %v1608_v40  ;;  %v1612_v25 = vpop.xlane.xlu1 %1611 }
 0x223   : > { %5639 = vrsqrt.f32 %v2822_v34  ;;  %5132 = vst.msk [vmem:[%s7624_s16 + $0x1b0] sm:$0xff] %vm4993_vm2, %v8213_v57  ;;  %v8221_v60 = vmax.f32 %v2696_v61, 0.0  ;;  %v8223_v8 = vmul.f32 0.0051020407, %v1612_v25  ;;  %1679 = vadd.xlane.f32.xlu0 %v11256_v31 }
 0x224   : > { %5008 = vst.msk [vmem:[%s7533_s13 + $0x70] sm:$0xff] %vm4993_vm2, %v8216_v50  ;;  %v1776_v21 = vpop.xlane.xlu0 %1775  ;;  %v2571_v47 = vmul.f32 %v8216_v50, %v8216_v50 }
 0x225   : > { %5133 = vst.msk [vmem:[%s7624_s16 + $0x1b8] sm:$0xff] %vm4993_vm2, %v8221_v60  ;;  %5009 = vst.msk [vmem:[%s7533_s13 + $0x78] sm:$0xff] %vm4993_vm2, %v8223_v8  ;;  %v8235_v28 = vmul.f32 0.0051020407, %v1776_v21  ;;  %1683 = vadd.xlane.f32.xlu1 %v7486_v10  ;;  %v2989_v10 = vld [vmem:[%s7711_s19 + $0x60] sm:$0xff]  ;;  %v2572_v25 = vmul.f32 %v8223_v8, %v8223_v8 }
 0x226   : > { %v1780_v32 = vpop.xlane.xlu1 %1779 }
 0x227   : > { %11257 = vst [vmem:[#allocation149_spill] sm:$0xff] %v8235_v28  ;;  %5050 = vst.msk [vmem:[%s7533_s13 + $0x1c0] sm:$0xff] %vm4993_vm2, %v8235_v28  ;;  %v8241_v59 = vmul.f32 0.0051020407, %v1780_v32  ;;  %1847 = vadd.xlane.f32.xlu0 %v7489_v7  ;;  %v2990_v7 = vld [vmem:[%s7711_s19 + $0x68] sm:$0xff] }
 0x228   : > { %v2196_v5 = vpop.xlane.xlu0 %2195 }
 0x229   : > { %11258 = vst [vmem:[#allocation148_spill] sm:$0xff] %v8241_v59  ;;  %5051 = vst.msk [vmem:[%s7533_s13 + $0x1c8] sm:$0xff] %vm4993_vm2, %v8241_v59  ;;  %v2487_v40 = vmul.f32 0.0051020407, %v2196_v5  ;;  %1851 = vadd.xlane.f32.xlu1 %v7493_v2  ;;  %v2613_v2 = vmul.f32 %v8235_v28, %v8235_v28 }
 0x22a   : > { %v2200_v34 = vpop.xlane.xlu1 %2199 }
 0x22b   : > { %v5638_v61 = vpop.eup %5637  ;;  %v2655_v46 = vsub.f32 %v2487_v40, %v2571_v47  ;;  %v2488_v31 = vmul.f32 0.0051020407, %v2200_v34  ;;  %2267 = vadd.xlane.f32.xlu0 %v7495_v42  ;;  %v2614_v47 = vmul.f32 %v8241_v59, %v8241_v59 }
 0x22c   : > { %v2364_v21 = vpop.xlane.xlu0 %2363  ;;  %v8255_v32 = vmul.f32 %v5638_v61, %v2989_v10 }
 0x22d   : > { %v5640_v48 = vpop.eup %5639  ;;  %v2739_v24 = vmax.f32 %v2655_v46, 0.0  ;;  %v2656_v5 = vsub.f32 %v2488_v31, %v2572_v25  ;;  %v2529_v9 = vmul.f32 0.0051020407, %v2364_v21  ;;  %2271 = vadd.xlane.f32.xlu1 %v7499_v22 }
 0x22e   : > { %v2368_v40 = vpop.xlane.xlu1 %2367  ;;  %v8264_v42 = vmul.f32 %v8255_v32, %v8152_v4  ;;  %v8266_v10 = vmul.f32 %v5640_v48, %v2990_v7 }
 0x22f   : > { %v2823_v34 = vadd.f32 0.001, %v2739_v24  ;;  %5092 = vst.msk [vmem:[%s7624_s16 + $0x70] sm:$0xff] %vm4993_vm2, %v2739_v24  ;;  %v2740_v61 = vmax.f32 %v2656_v5, 0.0  ;;  %v2697_v46 = vsub.f32 %v2529_v9, %v2613_v2  ;;  %v2530_v25 = vmul.f32 0.0051020407, %v2368_v40  ;;  %2435 = vadd.xlane.f32.xlu0 %v7501_v14 }
 0x230   : > { %v1616_v22 = vpop.xlane.xlu0 %1615  ;;  %v8273_v31 = vmul.f32 %v8266_v10, %v8159_v33 }
 0x231   : > { %5641 = vrsqrt.f32 %v2823_v34  ;;  %v2824_v4 = vadd.f32 0.001, %v2740_v61  ;;  %5093 = vst.msk [vmem:[%s7624_s16 + $0x78] sm:$0xff] %vm4993_vm2, %v2740_v61  ;;  %v8277_v48 = vmax.f32 %v2697_v46, 0.0  ;;  %v2698_v24 = vsub.f32 %v2530_v25, %v2614_v47  ;;  %2439 = vadd.xlane.f32.xlu1 %v7505_v36  ;;  %v11262_v34 = vld [vmem:[#allocation171_spill] sm:$0xff] }
 0x232   : > { %11259 = vst [vmem:[#allocation150_spill] sm:$0xff] %v8273_v31  ;;  %v8280_v9 = vmul.f32 0.0051020407, %v1616_v22  ;;  %v1620_v14 = vpop.xlane.xlu1 %1619  ;;  %v11265_v31 = vld [vmem:[#allocation169_spill] sm:$0xff] }
 0x233   : > { %5643 = vrsqrt.f32 %v2824_v4  ;;  %5134 = vst.msk [vmem:[%s7624_s16 + $0x1c0] sm:$0xff] %vm4993_vm2, %v8277_v48  ;;  %v8285_v33 = vmax.f32 %v2698_v24, 0.0  ;;  %v8287_v7 = vmul.f32 0.0051020407, %v1620_v14  ;;  %1687 = vadd.xlane.f32.xlu0 %v7542_v44  ;;  %v11263_v24 = vld [vmem:[#allocation168_spill] sm:$0xff] }
 0x234   : > { %5010 = vst.msk [vmem:[%s7533_s13 + $0x80] sm:$0xff] %vm4993_vm2, %v8280_v9  ;;  %v1784_v21 = vpop.xlane.xlu0 %1783  ;;  %v2573_v47 = vmul.f32 %v8280_v9, %v8280_v9 }
 0x235   : > { %5135 = vst.msk [vmem:[%s7624_s16 + $0x1c8] sm:$0xff] %vm4993_vm2, %v8285_v33  ;;  %5011 = vst.msk [vmem:[%s7533_s13 + $0x88] sm:$0xff] %vm4993_vm2, %v8287_v7  ;;  %v8299_v36 = vmul.f32 0.0051020407, %v1784_v21  ;;  %1691 = vadd.xlane.f32.xlu1 %v7545_v16  ;;  %v2991_v16 = vld [vmem:[%s7711_s19 + $0x70] sm:$0xff]  ;;  %v2574_v22 = vmul.f32 %v8287_v7, %v8287_v7 }
 0x236   : > { %v1788_v5 = vpop.xlane.xlu1 %1787 }
 0x237   : > { %11260 = vst [vmem:[#allocation158_spill] sm:$0xff] %v8299_v36  ;;  %5052 = vst.msk [vmem:[%s7533_s13 + $0x1d0] sm:$0xff] %vm4993_vm2, %v8299_v36  ;;  %v8305_v44 = vmul.f32 0.0051020407, %v1788_v5  ;;  %1855 = vadd.xlane.f32.xlu0 %v7585_v3  ;;  %v2992_v3 = vld [vmem:[%s7711_s19 + $0x78] sm:$0xff] }
 0x238   : > { %v2204_v2 = vpop.xlane.xlu0 %2203 }
 0x239   : > { %11261 = vst [vmem:[#allocation220_spill] sm:$0xff] %v8305_v44  ;;  %5053 = vst.msk [vmem:[%s7533_s13 + $0x1d8] sm:$0xff] %vm4993_vm2, %v8305_v44  ;;  %v2489_v40 = vmul.f32 0.0051020407, %v2204_v2  ;;  %1859 = vadd.xlane.f32.xlu1 %v11262_v34  ;;  %v2615_v34 = vmul.f32 %v8299_v36, %v8299_v36 }
 0x23a   : > { %v2208_v61 = vpop.xlane.xlu1 %2207 }
 0x23b   : > { %v5642_v46 = vpop.eup %5641  ;;  %v2657_v25 = vsub.f32 %v2489_v40, %v2573_v47  ;;  %v2490_v4 = vmul.f32 0.0051020407, %v2208_v61  ;;  %2275 = vadd.xlane.f32.xlu0 %v11263_v24  ;;  %v2616_v47 = vmul.f32 %v8305_v44, %v8305_v44  ;;  %v11267_v24 = vld [vmem:[#allocation172_spill] sm:$0xff] }
 0x23c   : > { %v2372_v14 = vpop.xlane.xlu0 %2371  ;;  %v8319_v21 = vmul.f32 %v5642_v46, %v2991_v16 }
 0x23d   : > { %v5644_v5 = vpop.eup %5643  ;;  %v2741_v59 = vmax.f32 %v2657_v25, 0.0  ;;  %v2658_v2 = vsub.f32 %v2490_v4, %v2574_v22  ;;  %v2531_v28 = vmul.f32 0.0051020407, %v2372_v14  ;;  %2279 = vadd.xlane.f32.xlu1 %v11265_v31 }
 0x23e   : > { %11264 = vst [vmem:[#allocation171_spill] sm:$0xff] %v8319_v21  ;;  %v2376_v40 = vpop.xlane.xlu1 %2375  ;;  %v8328_v61 = vmul.f32 %v8319_v21, %v8216_v50  ;;  %v8330_v16 = vmul.f32 %v5644_v5, %v2992_v3  ;;  %v11269_v5 = vld [vmem:[#allocation173_spill] sm:$0xff] }
 0x23f   : > { %v2825_v46 = vadd.f32 0.001, %v2741_v59  ;;  %5094 = vst.msk [vmem:[%s7624_s16 + $0x80] sm:$0xff] %vm4993_vm2, %v2741_v59  ;;  %v2742_v25 = vmax.f32 %v2658_v2, 0.0  ;;  %v2699_v22 = vsub.f32 %v2531_v28, %v2615_v34  ;;  %v2532_v4 = vmul.f32 0.0051020407, %v2376_v40  ;;  %2443 = vadd.xlane.f32.xlu0 %v11267_v24 }
 0x240   : > { %11266 = vst [vmem:[#allocation168_spill] sm:$0xff] %v8330_v16  ;;  %v1624_v31 = vpop.xlane.xlu0 %1623  ;;  %v8337_v14 = vmul.f32 %v8330_v16, %v8223_v8  ;;  %v11271_v40 = vld [vmem:[#allocation183_spill] sm:$0xff] }
 0x241   : > { %5645 = vrsqrt.f32 %v2825_v46  ;;  %v2826_v50 = vadd.f32 0.001, %v2742_v25  ;;  %5095 = vst.msk [vmem:[%s7624_s16 + $0x88] sm:$0xff] %vm4993_vm2, %v2742_v25  ;;  %v8341_v3 = vmax.f32 %v2699_v22, 0.0  ;;  %v2700_v59 = vsub.f32 %v2532_v4, %v2616_v47  ;;  %2447 = vadd.xlane.f32.xlu1 %v11269_v5  ;;  %v11274_v4 = vld [vmem:[#allocation186_spill] sm:$0xff] }
 0x242   : > { %11268 = vst [vmem:[#allocation169_spill] sm:$0xff] %v8337_v14  ;;  %v8344_v28 = vmul.f32 0.0051020407, %v1624_v31  ;;  %v1628_v2 = vpop.xlane.xlu1 %1627 }
 0x243   : > { %5647 = vrsqrt.f32 %v2826_v50  ;;  %5136 = vst.msk [vmem:[%s7624_s16 + $0x1d0] sm:$0xff] %vm4993_vm2, %v8341_v3  ;;  %v8349_v8 = vmax.f32 %v2700_v59, 0.0  ;;  %v8351_v34 = vmul.f32 0.0051020407, %v1628_v2  ;;  %1695 = vadd.xlane.f32.xlu0 %v11271_v40  ;;  %v11275_v59 = vld [vmem:[#allocation187_spill] sm:$0xff] }
 0x244   : > { %5012 = vst.msk [vmem:[%s7533_s13 + $0x90] sm:$0xff] %vm4993_vm2, %v8344_v28  ;;  %v1792_v47 = vpop.xlane.xlu0 %1791  ;;  %v2575_v31 = vmul.f32 %v8344_v28, %v8344_v28 }
 0x245   : > { %11270 = vst [vmem:[#allocation172_spill] sm:$0xff] %v8349_v8  ;;  %5137 = vst.msk [vmem:[%s7624_s16 + $0x1d8] sm:$0xff] %vm4993_vm2, %v8349_v8  ;;  %v8363_v46 = vmul.f32 0.0051020407, %v1792_v47  ;;  %1699 = vadd.xlane.f32.xlu1 %v7691_v15  ;;  %v2993_v15 = vld [vmem:[%s7711_s19 + $0x80] sm:$0xff]  ;;  %v2576_v47 = vmul.f32 %v8351_v34, %v8351_v34  ;;  %v11277_v8 = vld [vmem:[#allocation188_spill] sm:$0xff] }
 0x246   : > { %5013 = vst.msk [vmem:[%s7533_s13 + $0x98] sm:$0xff] %vm4993_vm2, %v8351_v34  ;;  %v1796_v25 = vpop.xlane.xlu1 %1795 }
 0x247   : > { %11272 = vst [vmem:[#allocation173_spill] sm:$0xff] %v8363_v46  ;;  %5054 = vst.msk [vmem:[%s7533_s13 + $0x1e0] sm:$0xff] %vm4993_vm2, %v8363_v46  ;;  %v8369_v22 = vmul.f32 0.0051020407, %v1796_v25  ;;  %1863 = vadd.xlane.f32.xlu0 %v11274_v4  ;;  %v2994_v4 = vld [vmem:[%s7711_s19 + $0x88] sm:$0xff] }
 0x248   : > { %v2212_v24 = vpop.xlane.xlu0 %2211 }
 0x249   : > { %11273 = vst [vmem:[#allocation183_spill] sm:$0xff] %v8369_v22  ;;  %5055 = vst.msk [vmem:[%s7533_s13 + $0x1e8] sm:$0xff] %vm4993_vm2, %v8369_v22  ;;  %v2491_v50 = vmul.f32 0.0051020407, %v2212_v24  ;;  %1867 = vadd.xlane.f32.xlu1 %v11275_v59  ;;  %v2617_v59 = vmul.f32 %v8363_v46, %v8363_v46 }
 0x24a   : > { %v2216_v5 = vpop.xlane.xlu1 %2215 }
 0x24b   : > { %v5646_v2 = vpop.eup %5645  ;;  %v2659_v40 = vsub.f32 %v2491_v50, %v2575_v31  ;;  %v2492_v25 = vmul.f32 0.0051020407, %v2216_v5  ;;  %2283 = vadd.xlane.f32.xlu0 %v7722_v6  ;;  %v2618_v31 = vmul.f32 %v8369_v22, %v8369_v22 }
 0x24c   : > { %v2380_v44 = vpop.xlane.xlu0 %2379  ;;  %v8383_v36 = vmul.f32 %v5646_v2, %v2993_v15 }
 0x24d   : > { %v5648_v14 = vpop.eup %5647  ;;  %v2743_v21 = vmax.f32 %v2659_v40, 0.0  ;;  %v2660_v24 = vsub.f32 %v2492_v25, %v2576_v47  ;;  %v2533_v16 = vmul.f32 0.0051020407, %v2380_v44  ;;  %2287 = vadd.xlane.f32.xlu1 %v11277_v8  ;;  %v11279_v47 = vld [vmem:[#allocation189_spill] sm:$0xff] }
 0x24e   : > { %11276 = vst [vmem:[#allocation186_spill] sm:$0xff] %v8383_v36  ;;  %v2384_v50 = vpop.xlane.xlu1 %2383  ;;  %v8392_v6 = vmul.f32 %v8383_v36, %v8280_v9  ;;  %v8394_v15 = vmul.f32 %v5648_v14, %v2994_v4  ;;  %v11281_v4 = vld [vmem:[#allocation191_spill] sm:$0xff] }
 0x24f   : > { %v2827_v5 = vadd.f32 0.001, %v2743_v21  ;;  %5096 = vst.msk [vmem:[%s7624_s16 + $0x90] sm:$0xff] %vm4993_vm2, %v2743_v21  ;;  %v2744_v2 = vmax.f32 %v2660_v24, 0.0  ;;  %v2701_v40 = vsub.f32 %v2533_v16, %v2617_v59  ;;  %v2534_v44 = vmul.f32 0.0051020407, %v2384_v50  ;;  %2451 = vadd.xlane.f32.xlu0 %v11279_v47 }
 0x250   : > { %11278 = vst [vmem:[#allocation187_spill] sm:$0xff] %v8394_v15  ;;  %v1632_v8 = vpop.xlane.xlu0 %1631  ;;  %v8401_v25 = vmul.f32 %v8394_v15, %v8287_v7  ;;  %v11283_v50 = vld [vmem:[#allocation203_spill] sm:$0xff]  ;;  %v11286_v47 = vld [vmem:[#allocation205_spill] sm:$0xff] }
 0x251   : > { %5649 = vrsqrt.f32 %v2827_v5  ;;  %v2828_v9 = vadd.f32 0.001, %v2744_v2  ;;  %5097 = vst.msk [vmem:[%s7624_s16 + $0x98] sm:$0xff] %vm4993_vm2, %v2744_v2  ;;  %v8405_v14 = vmax.f32 %v2701_v40, 0.0  ;;  %v2702_v21 = vsub.f32 %v2534_v44, %v2618_v31  ;;  %2455 = vadd.xlane.f32.xlu1 %v11281_v4  ;;  %v11284_v2 = vld [vmem:[#allocation99_spill] sm:$0xff]  ;;  %v11287_v4 = vld [vmem:[#allocation206_spill] sm:$0xff] }
 0x252   : > { %11280 = vst [vmem:[#allocation188_spill] sm:$0xff] %v8401_v25  ;;  %v8408_v16 = vmul.f32 0.0051020407, %v1632_v8  ;;  %v1636_v24 = vpop.xlane.xlu1 %1635 }
 0x253   : > { %5651 = vrsqrt.f32 %v2828_v9  ;;  %5138 = vst.msk [vmem:[%s7624_s16 + $0x1e0] sm:$0xff] %vm4993_vm2, %v8405_v14  ;;  %v8413_v7 = vmax.f32 %v2702_v21, 0.0  ;;  %v8415_v59 = vmul.f32 0.0051020407, %v1636_v24  ;;  %1703 = vadd.xlane.f32.xlu0 %v11283_v50  ;;  %v2995_v24 = vld [vmem:[%s7711_s19 + $0x90] sm:$0xff] }
 0x254   : > { %5014 = vst.msk [vmem:[%s7533_s13 + $0xa0] sm:$0xff] %vm4993_vm2, %v8408_v16  ;;  %v1800_v31 = vpop.xlane.xlu0 %1799  ;;  %v2577_v9 = vmul.f32 %v8408_v16, %v8408_v16 }
 0x255   : > { %11282 = vst [vmem:[#allocation189_spill] sm:$0xff] %v8413_v7  ;;  %5139 = vst.msk [vmem:[%s7624_s16 + $0x1e8] sm:$0xff] %vm4993_vm2, %v8413_v7  ;;  %v8427_v5 = vmul.f32 0.0051020407, %v1800_v31  ;;  %1707 = vadd.xlane.f32.xlu1 %v11284_v2 }
 0x256   : > { %5015 = vst.msk [vmem:[%s7533_s13 + $0xa8] sm:$0xff] %vm4993_vm2, %v8415_v59  ;;  %v1804_v40 = vpop.xlane.xlu1 %1803 }
 0x257   : > { %5056 = vst.msk [vmem:[%s7533_s13 + $0x1f0] sm:$0xff] %vm4993_vm2, %v8427_v5  ;;  %v8433_v44 = vmul.f32 0.0051020407, %v1804_v40  ;;  %1871 = vadd.xlane.f32.xlu0 %v11286_v47  ;;  %v2578_v40 = vmul.f32 %v8415_v59, %v8415_v59  ;;  %v2996_v47 = vld [vmem:[%s7711_s19 + $0x98] sm:$0xff] }
 0x258   : > { %v2220_v8 = vpop.xlane.xlu0 %2219 }
 0x259   : > { %11285 = vst [vmem:[#allocation191_spill] sm:$0xff] %v8433_v44  ;;  %5057 = vst.msk [vmem:[%s7533_s13 + $0x1f8] sm:$0xff] %vm4993_vm2, %v8433_v44  ;;  %v2493_v21 = vmul.f32 0.0051020407, %v2220_v8  ;;  %1875 = vadd.xlane.f32.xlu1 %v11287_v4  ;;  %v2619_v4 = vmul.f32 %v8427_v5, %v8427_v5 }
 0x25a   : > { %v2224_v50 = vpop.xlane.xlu1 %2223 }
 0x25b   : > { %v5650_v31 = vpop.eup %5649  ;;  %v2661_v2 = vsub.f32 %v2493_v21, %v2577_v9  ;;  %v2494_v22 = vmul.f32 0.0051020407, %v2224_v50  ;;  %2291 = vadd.xlane.f32.xlu0 %v7846_v30  ;;  %v2620_v9 = vmul.f32 %v8433_v44, %v8433_v44 }
 0x25c   : > { %v2388_v46 = vpop.xlane.xlu0 %2387  ;;  %v8447_v25 = vmul.f32 %v5650_v31, %v2995_v24 }
 0x25d   : > { %v5652_v36 = vpop.eup %5651  ;;  %v2745_v15 = vmax.f32 %v2661_v2, 0.0  ;;  %v2662_v8 = vsub.f32 %v2494_v22, %v2578_v40  ;;  %v2535_v7 = vmul.f32 0.0051020407, %v2388_v46  ;;  %2295 = vadd.xlane.f32.xlu1 %v7848_v11 }
 0x25e   : > { %v2392_v21 = vpop.xlane.xlu1 %2391  ;;  %v8456_v30 = vmul.f32 %v8447_v25, %v8344_v28  ;;  %v8458_v24 = vmul.f32 %v5652_v36, %v2996_v47 }
 0x25f   : > { %v2829_v50 = vadd.f32 0.001, %v2745_v15  ;;  %5098 = vst.msk [vmem:[%s7624_s16 + $0xa0] sm:$0xff] %vm4993_vm2, %v2745_v15  ;;  %v2746_v22 = vmax.f32 %v2662_v8, 0.0  ;;  %v2703_v31 = vsub.f32 %v2535_v7, %v2619_v4  ;;  %v2536_v46 = vmul.f32 0.0051020407, %v2392_v21  ;;  %2459 = vadd.xlane.f32.xlu0 %v7860_v26 }
 0x260   : > { %v1640_v11 = vpop.xlane.xlu0 %1639  ;;  %v8465_v2 = vmul.f32 %v8458_v24, %v8351_v34 }
 0x261   : > { %5653 = vrsqrt.f32 %v2829_v50  ;;  %v2830_v36 = vadd.f32 0.001, %v2746_v22  ;;  %5099 = vst.msk [vmem:[%s7624_s16 + $0xa8] sm:$0xff] %vm4993_vm2, %v2746_v22  ;;  %v8469_v28 = vmax.f32 %v2703_v31, 0.0  ;;  %v2704_v15 = vsub.f32 %v2536_v46, %v2620_v9  ;;  %2463 = vadd.xlane.f32.xlu1 %v7862_v38 }
 0x262   : > { %v8472_v7 = vmul.f32 0.0051020407, %v1640_v11  ;;  %v1644_v26 = vpop.xlane.xlu1 %1643 }
 0x263   : > { %5655 = vrsqrt.f32 %v2830_v36  ;;  %5140 = vst.msk [vmem:[%s7624_s16 + $0x1f0] sm:$0xff] %vm4993_vm2, %v8469_v28  ;;  %v8477_v34 = vmax.f32 %v2704_v15, 0.0  ;;  %v8479_v40 = vmul.f32 0.0051020407, %v1644_v26  ;;  %1711 = vadd.xlane.f32.xlu0 %v7914_v29 }
 0x264   : > { %5016 = vst.msk [vmem:[%s7533_s13 + $0xb0] sm:$0xff] %vm4993_vm2, %v8472_v7  ;;  %v1808_v47 = vpop.xlane.xlu0 %1807  ;;  %v2579_v9 = vmul.f32 %v8472_v7, %v8472_v7 }
 0x265   : > { %5141 = vst.msk [vmem:[%s7624_s16 + $0x1f8] sm:$0xff] %vm4993_vm2, %v8477_v34  ;;  %5017 = vst.msk [vmem:[%s7533_s13 + $0xb8] sm:$0xff] %vm4993_vm2, %v8479_v40  ;;  %v8491_v38 = vmul.f32 0.0051020407, %v1808_v47  ;;  %1715 = vadd.xlane.f32.xlu1 %v7933_v1  ;;  %v2997_v1 = vld [vmem:[%s7711_s19 + $0xa0] sm:$0xff]  ;;  %v2580_v46 = vmul.f32 %v8479_v40, %v8479_v40 }
 0x266   : > { %v1812_v8 = vpop.xlane.xlu1 %1811 }
 0x267   : > { %11288 = vst [vmem:[#allocation203_spill] sm:$0xff] %v8491_v38  ;;  %5058 = vst.msk [vmem:[%s7533_s13 + $0x200] sm:$0xff] %vm4993_vm2, %v8491_v38  ;;  %v8497_v29 = vmul.f32 0.0051020407, %v1812_v8  ;;  %1879 = vadd.xlane.f32.xlu0 %v7971_v27  ;;  %v2998_v27 = vld [vmem:[%s7711_s19 + $0xa8] sm:$0xff] }
 0x268   : > { %v2228_v4 = vpop.xlane.xlu0 %2227 }
 0x269   : > { %11289 = vst [vmem:[#allocation99_spill] sm:$0xff] %v8497_v29  ;;  %5059 = vst.msk [vmem:[%s7533_s13 + $0x208] sm:$0xff] %vm4993_vm2, %v8497_v29  ;;  %v2495_v21 = vmul.f32 0.0051020407, %v2228_v4  ;;  %1883 = vadd.xlane.f32.xlu1 %v7966_v54  ;;  %v2621_v54 = vmul.f32 %v8491_v38, %v8491_v38 }
 0x26a   : > { %v2232_v50 = vpop.xlane.xlu1 %2231 }
 0x26b   : > { %v5654_v22 = vpop.eup %5653  ;;  %v2663_v31 = vsub.f32 %v2495_v21, %v2579_v9  ;;  %v2496_v11 = vmul.f32 0.0051020407, %v2232_v50  ;;  %2299 = vadd.xlane.f32.xlu0 %v7982_v62  ;;  %v2622_v9 = vmul.f32 %v8497_v29, %v8497_v29  ;;  %v3000_v29 = vld [vmem:[%s7711_s19 + $0xb8] sm:$0xff] }
 0x26c   : > { %v2396_v36 = vpop.xlane.xlu0 %2395  ;;  %v8511_v15 = vmul.f32 %v5654_v22, %v2997_v1 }
 0x26d   : > { %v5656_v26 = vpop.eup %5655  ;;  %v2747_v47 = vmax.f32 %v2663_v31, 0.0  ;;  %v2664_v8 = vsub.f32 %v2496_v11, %v2580_v46  ;;  %v2537_v4 = vmul.f32 0.0051020407, %v2396_v36  ;;  %2303 = vadd.xlane.f32.xlu1 %v7974_v20 }
 0x26e   : > { %11290 = vst [vmem:[#allocation205_spill] sm:$0xff] %v8511_v15  ;;  %v2400_v21 = vpop.xlane.xlu1 %2399  ;;  %v8520_v62 = vmul.f32 %v8511_v15, %v8408_v16  ;;  %v8522_v1 = vmul.f32 %v5656_v26, %v2998_v27 }
 0x26f   : > { %v2831_v50 = vadd.f32 0.001, %v2747_v47  ;;  %5100 = vst.msk [vmem:[%s7624_s16 + $0xb0] sm:$0xff] %vm4993_vm2, %v2747_v47  ;;  %v2748_v22 = vmax.f32 %v2664_v8, 0.0  ;;  %v2705_v31 = vsub.f32 %v2537_v4, %v2621_v54  ;;  %v2538_v46 = vmul.f32 0.0051020407, %v2400_v21  ;;  %2467 = vadd.xlane.f32.xlu0 %v7987_v52 }
 0x270   : > { %11291 = vst [vmem:[#allocation206_spill] sm:$0xff] %v8522_v1  ;;  %v1648_v20 = vpop.xlane.xlu0 %1647  ;;  %v8529_v11 = vmul.f32 %v8522_v1, %v8415_v59  ;;  %v11295_v4 = vld [vmem:[#allocation178_spill] sm:$0xff] }
 0x271   : > { %5657 = vrsqrt.f32 %v2831_v50  ;;  %v2832_v16 = vadd.f32 0.001, %v2748_v22  ;;  %5101 = vst.msk [vmem:[%s7624_s16 + $0xb8] sm:$0xff] %vm4993_vm2, %v2748_v22  ;;  %v8533_v27 = vmax.f32 %v2705_v31, 0.0  ;;  %v2706_v36 = vsub.f32 %v2538_v46, %v2622_v9  ;;  %2471 = vadd.xlane.f32.xlu1 %v7996_v43  ;;  %v11297_v50 = vld [vmem:[#allocation199_spill] sm:$0xff] }
 0x272   : > { %11292 = vst [vmem:[#allocation221_spill] sm:$0xff] %v8529_v11  ;;  %v8536_v26 = vmul.f32 0.0051020407, %v1648_v20  ;;  %v1652_v52 = vpop.xlane.xlu1 %1651  ;;  %v2852_v9 = vadd.f32 0.001, %v11295_v4 }
 0x273   : > { %5659 = vrsqrt.f32 %v2832_v16  ;;  %5142 = vst.msk [vmem:[%s7624_s16 + $0x200] sm:$0xff] %vm4993_vm2, %v8533_v27  ;;  %v8541_v59 = vmax.f32 %v2706_v36, 0.0  ;;  %v8543_v47 = vmul.f32 0.0051020407, %v1652_v52  ;;  %v2853_v22 = vadd.f32 0.001, %v11297_v50 }
 0x274   : > { %5018 = vst.msk [vmem:[%s7533_s13 + $0xc0] sm:$0xff] %vm4993_vm2, %v8536_v26  ;;  %v1816_v8 = vpop.xlane.xlu0 %1815  ;;  %v2581_v46 = vmul.f32 %v8536_v26, %v8536_v26  ;;  %v2999_v16 = vld [vmem:[%s7711_s19 + $0xb0] sm:$0xff]  ;;  %5661 = vrsqrt.f32 %v2852_v9 }
 0x275   : > { %11293 = vst [vmem:[#allocation222_spill] sm:$0xff] %v8541_v59  ;;  %5143 = vst.msk [vmem:[%s7624_s16 + $0x208] sm:$0xff] %vm4993_vm2, %v8541_v59  ;;  %v8554_v43 = vmul.f32 0.0051020407, %v1816_v8  ;;  %v2582_v4 = vmul.f32 %v8543_v47, %v8543_v47  ;;  %5663 = vrsqrt.f32 %v2853_v22 }
 0x276   : > { %5019 = vst.msk [vmem:[%s7533_s13 + $0xc8] sm:$0xff] %vm4993_vm2, %v8543_v47  ;;  %v1820_v54 = vpop.xlane.xlu1 %1819 }
 0x277   : > { %11294 = vst [vmem:[#allocation223_spill] sm:$0xff] %v8554_v43  ;;  %5060 = vst.msk [vmem:[%s7533_s13 + $0x210] sm:$0xff] %vm4993_vm2, %v8554_v43  ;;  %v8560_v21 = vmul.f32 0.0051020407, %v1820_v54 }
 0x278   : > { %v2236_v31 = vpop.xlane.xlu0 %2235 }
 0x279   : > { %11296 = vst [vmem:[#allocation178_spill] sm:$0xff] %v8560_v21  ;;  %5061 = vst.msk [vmem:[%s7533_s13 + $0x218] sm:$0xff] %vm4993_vm2, %v8560_v21  ;;  %v2497_v20 = vmul.f32 0.0051020407, %v2236_v31  ;;  %v2623_v31 = vmul.f32 %v8554_v43, %v8554_v43  ;;  %v2624_v9 = vmul.f32 %v8560_v21, %v8560_v21  ;;  %v11311_v43 = vld [vmem:[#allocation197_spill] sm:$0xff] }
 0x27a   : > { %v2240_v36 = vpop.xlane.xlu1 %2239 }
 0x27b   : > { %v5658_v52 = vpop.eup %5657  ;;  %v2665_v8 = vsub.f32 %v2497_v20, %v2581_v46  ;;  %v2498_v54 = vmul.f32 0.0051020407, %v2240_v36 }
 0x27c   : > { %v2404_v50 = vpop.xlane.xlu0 %2403  ;;  %v8572_v44 = vmul.f32 %v5658_v52, %v2999_v16 }
 0x27d   : > { %v5660_v38 = vpop.eup %5659  ;;  %v2749_v11 = vmax.f32 %v2665_v8, 0.0  ;;  %v2666_v15 = vsub.f32 %v2498_v54, %v2582_v4  ;;  %v2539_v1 = vmul.f32 0.0051020407, %v2404_v50 }
 0x27e   : > { %11298 = vst [vmem:[#allocation199_spill] sm:$0xff] %v8572_v44  ;;  %v2408_v46 = vpop.xlane.xlu1 %2407  ;;  %v8580_v20 = vmul.f32 %v8572_v44, %v8472_v7  ;;  %v8582_v22 = vmul.f32 %v5660_v38, %v3000_v29 }
 0x27f   : > { %v2833_v16 = vadd.f32 0.001, %v2749_v11  ;;  %5102 = vst.msk [vmem:[%s7624_s16 + $0xc0] sm:$0xff] %vm4993_vm2, %v2749_v11  ;;  %v2750_v36 = vmax.f32 %v2666_v15, 0.0  ;;  %v2707_v52 = vsub.f32 %v2539_v1, %v2623_v31  ;;  %v2540_v8 = vmul.f32 0.0051020407, %v2408_v46  ;;  %v5662_v31 = vpop.eup %5661 }
 0x280   : > { %11299 = vst [vmem:[#allocation224_spill] sm:$0xff] %v8580_v20  ;;  %11300 = vst [vmem:[#allocation225_spill] sm:$0xff] %v8582_v22  ;;  %v1656_v4 = vpop.xlane.xlu0 %1655  ;;  %v8588_v54 = vmul.f32 %v8582_v22, %v8479_v40  ;;  %v5664_v46 = vpop.eup %5663  ;;  %v11313_v20 = vld [vmem:[#allocation170_spill] sm:$0xff] }
 0x281   : > { %5665 = vrsqrt.f32 %v2833_v16  ;;  %v2834_v7 = vadd.f32 0.001, %v2750_v36  ;;  %5103 = vst.msk [vmem:[%s7624_s16 + $0xc8] sm:$0xff] %vm4993_vm2, %v2750_v36  ;;  %v8592_v38 = vmax.f32 %v2707_v52, 0.0  ;;  %v2708_v29 = vsub.f32 %v2540_v8, %v2624_v9  ;;  %v3020_v9 = vld [vmem:[%s7711_s19 + $0x158] sm:$0xff]  ;;  %v11305_v16 = vld [vmem:[#allocation216_spill] sm:$0xff] }
 0x282   : > { %11301 = vst [vmem:[#allocation226_spill] sm:$0xff] %v8588_v54  ;;  %v8594_v11 = vmul.f32 0.0051020407, %v1656_v4  ;;  %v1660_v15 = vpop.xlane.xlu1 %1659  ;;  %3861 = vperm.xlu1 %5482, %v7853_v63   ;;  %v2855_v36 = vadd.f32 0.001, %v11305_v16  ;;  %v11306_v8 = vld [vmem:[#allocation194_spill] sm:$0xff]  ;;  %v8626_v21 = vmul.f32 %v5662_v31, %v3020_v9 }
 0x283   : > { %11302 = vst [vmem:[#allocation227_spill] sm:$0xff] %v8592_v38  ;;  %5667 = vrsqrt.f32 %v2834_v7  ;;  %5144 = vst.msk [vmem:[%s7624_s16 + $0x210] sm:$0xff] %vm4993_vm2, %v8592_v38  ;;  %v8600_v40 = vmax.f32 %v2708_v29, 0.0  ;;  %v8602_v1 = vmul.f32 0.0051020407, %v1660_v15  ;;  %v11307_v4 = vld [vmem:[#allocation202_spill] sm:$0xff] }
 0x284   : > { %5020 = vst.msk [vmem:[%s7533_s13 + $0xd0] sm:$0xff] %vm4993_vm2, %v8594_v11  ;;  %v1824_v50 = vpop.xlane.xlu0 %1823  ;;  %v2854_v7 = vadd.f32 0.001, %v11307_v4  ;;  %v3021_v15 = vld [vmem:[%s7711_s19 + $0x160] sm:$0xff]  ;;  %11309 = vst [vmem:[#allocation194_spill] sm:$0xff] %v8626_v21  ;;  %5669 = vrsqrt.f32 %v2855_v36 }
 0x285   : > { %11303 = vst [vmem:[#allocation228_spill] sm:$0xff] %v8600_v40  ;;  %5145 = vst.msk [vmem:[%s7624_s16 + $0x218] sm:$0xff] %vm4993_vm2, %v8600_v40  ;;  %v8613_v63 = vmul.f32 0.0051020407, %v1824_v50  ;;  %3651 = vperm.xlu0 %5481, %v7855_v56   ;;  %v2583_v56 = vmul.f32 %v8594_v11, %v8594_v11  ;;  %v3001_v4 = vld [vmem:[%s7711_s19 + $0xc0] sm:$0xff]  ;;  %v8638_v31 = vmul.f32 %v5664_v46, %v3021_v15 }
 0x286   : > { %5021 = vst.msk [vmem:[%s7533_s13 + $0xd8] sm:$0xff] %vm4993_vm2, %v8602_v1  ;;  %v1828_v52 = vpop.xlane.xlu1 %1827  ;;  %3656 = vperm.xlu1 %5482, %v11306_v8   ;;  %v11310_v8 = vld [vmem:[#allocation209_spill] sm:$0xff]  ;;  %5671 = vrsqrt.f32 %v2854_v7  ;;  %v2584_v44 = vmul.f32 %v8602_v1, %v8602_v1  ;;  %v11314_v15 = vld [vmem:[#allocation210_spill] sm:$0xff] }
 0x287   : > { %11304 = vst [vmem:[#allocation229_spill] sm:$0xff] %v8613_v63  ;;  %5062 = vst.msk [vmem:[%s7533_s13 + $0x220] sm:$0xff] %vm4993_vm2, %v8613_v63  ;;  %v8623_v29 = vmul.f32 0.0051020407, %v1828_v52  ;;  %v2625_v46 = vmul.f32 %v8613_v63, %v8613_v63 }
 0x288   : > { %v2244_v50 = vpop.xlane.xlu0 %2243  ;;  %11312 = vst [vmem:[#allocation202_spill] sm:$0xff] %v8638_v31 }
 0x289   : > { %11308 = vst [vmem:[#allocation216_spill] sm:$0xff] %v8623_v29  ;;  %5063 = vst.msk [vmem:[%s7533_s13 + $0x228] sm:$0xff] %vm4993_vm2, %v8623_v29  ;;  %v2499_v16 = vmul.f32 0.0051020407, %v2244_v50  ;;  %3313 = vrot.lane.b32.xlu0 %v11310_v8, %s5859_s8  ;;  %v3002_v50 = vld [vmem:[%s7711_s19 + $0xc8] sm:$0xff]  ;;  %v3188_v8 = vmul.f32 %v8626_v21, %v11313_v20  ;;  %v11315_v20 = vld [vmem:[#allocation184_spill] sm:$0xff] }
 0x28a   : > { %v2248_v52 = vpop.xlane.xlu1 %2247  ;;  %3315 = vrot.lane.b32.xlu1 %v11311_v43, %s5859_s8 }
 0x28b   : > { %v5666_v9 = vpop.eup %5665  ;;  %v2667_v54 = vsub.f32 %v2499_v16, %v2583_v56  ;;  %v2500_v22 = vmul.f32 0.0051020407, %v2248_v52  ;;  %v2626_v56 = vmul.f32 %v8623_v29, %v8623_v29  ;;  %v11325_v29 = vld [vmem:[#allocation185_spill] sm:$0xff] }
 0x28c   : > { %v2412_v40 = vpop.xlane.xlu0 %2411  ;;  %v8645_v36 = vmul.f32 %v5666_v9, %v3001_v4  ;;  %v3189_v4 = vmul.f32 %v8638_v31, %v11315_v20  ;;  %v3004_v31 = vld [vmem:[%s7711_s19 + $0xd8] sm:$0xff] }
 0x28d   : > { %v5668_v38 = vpop.eup %5667  ;;  %v2751_v59 = vmax.f32 %v2667_v54, 0.0  ;;  %v2668_v43 = vsub.f32 %v2500_v22, %v2584_v44  ;;  %v2541_v7 = vmul.f32 0.0051020407, %v2412_v40  ;;  %3397 = vrot.lane.b32.xlu0 %v11314_v15, %s5859_s8 }
 0x28e   : > { %v2416_v16 = vpop.xlane.xlu1 %2415  ;;  %3399 = vrot.lane.b32.xlu1 %v3188_v8, %s5859_s8  ;;  %v8658_v44 = vmul.f32 %v8645_v36, %v8536_v26  ;;  %v8660_v22 = vmul.f32 %v5668_v38, %v3002_v50 }
 0x28f   : > { %v2835_v54 = vadd.f32 0.001, %v2751_v59  ;;  %5104 = vst.msk [vmem:[%s7624_s16 + $0xd0] sm:$0xff] %vm4993_vm2, %v2751_v59  ;;  %v2752_v40 = vmax.f32 %v2668_v43, 0.0  ;;  %v2709_v52 = vsub.f32 %v2541_v7, %v2625_v46  ;;  %v2542_v9 = vmul.f32 0.0051020407, %v2416_v16 }
 0x290   : > { %v1664_v15 = vpop.xlane.xlu0 %1663  ;;  %v8666_v8 = vmul.f32 %v8660_v22, %v8543_v47  ;;  %v2857_v59 = vadd.f32 0.001, %v8021_v51  ;;  %v11317_v47 = vld [vmem:[#allocation211_spill] sm:$0xff]  ;;  %v11318_v46 = vld [vmem:[#allocation218_spill] sm:$0xff] }
 0x291   : > { %5673 = vrsqrt.f32 %v2835_v54  ;;  %v2836_v20 = vadd.f32 0.001, %v2752_v40  ;;  %5105 = vst.msk [vmem:[%s7624_s16 + $0xd8] sm:$0xff] %vm4993_vm2, %v2752_v40  ;;  %v8670_v26 = vmax.f32 %v2709_v52, 0.0  ;;  %v2710_v38 = vsub.f32 %v2542_v9, %v2626_v56  ;;  %3401 = vrot.lane.b32.xlu0 %v3189_v4, %s5859_s8  ;;  %v5670_v4 = vpop.eup %5669  ;;  %v3023_v54 = vld [vmem:[%s7711_s19 + $0x170] sm:$0xff]  ;;  %v3022_v9 = vld [vmem:[%s7711_s19 + $0x168] sm:$0xff] }
 0x292   : > { %11316 = vst [vmem:[#allocation209_spill] sm:$0xff] %v8666_v8  ;;  %v8674_v50 = vmul.f32 0.0051020407, %v1664_v15  ;;  %v1668_v43 = vpop.xlane.xlu1 %1667  ;;  %3661 = vperm.xlu1 %5482, %v11317_v47   ;;  %v2856_v7 = vadd.f32 0.001, %v11318_v46  ;;  %v5672_v40 = vpop.eup %5671 }
 0x293   : > { %5675 = vrsqrt.f32 %v2836_v20  ;;  %5146 = vst.msk [vmem:[%s7624_s16 + $0x220] sm:$0xff] %vm4993_vm2, %v8670_v26  ;;  %v8681_v16 = vmax.f32 %v2710_v38, 0.0  ;;  %v8683_v56 = vmul.f32 0.0051020407, %v1668_v43  ;;  %v11320_v20 = vld [vmem:[#allocation214_spill] sm:$0xff]  ;;  %v8706_v43 = vmul.f32 %v5670_v4, %v3023_v54 }
 0x294   : > { %5022 = vst.msk [vmem:[%s7533_s13 + $0xe0] sm:$0xff] %vm4993_vm2, %v8674_v50  ;;  %v1832_v51 = vpop.xlane.xlu0 %1831  ;;  %5677 = vrsqrt.f32 %v2857_v59  ;;  %v8708_v46 = vmul.f32 %v5672_v40, %v3022_v9 }
 0x295   : > { %5147 = vst.msk [vmem:[%s7624_s16 + $0x228] sm:$0xff] %vm4993_vm2, %v8681_v16  ;;  %5023 = vst.msk [vmem:[%s7533_s13 + $0xe8] sm:$0xff] %vm4993_vm2, %v8683_v56  ;;  %v8695_v52 = vmul.f32 0.0051020407, %v1832_v51  ;;  %3666 = vperm.xlu0 %5481, %v7947_v18   ;;  %5679 = vrsqrt.f32 %v2856_v7  ;;  %v2585_v18 = vmul.f32 %v8674_v50, %v8674_v50  ;;  %v3003_v7 = vld [vmem:[%s7711_s19 + $0xd0] sm:$0xff]  ;;  %v2586_v40 = vmul.f32 %v8683_v56, %v8683_v56 }
 0x296   : > { %v1836_v15 = vpop.xlane.xlu1 %1835  ;;  %3317 = vrot.lane.b32.xlu1 %v11320_v20, %s5859_s8  ;;  %11322 = vst [vmem:[#allocation210_spill] sm:$0xff] %v8706_v43  ;;  %11323 = vst [vmem:[#allocation184_spill] sm:$0xff] %v8708_v46 }
 0x297   : > { %11319 = vst [vmem:[#allocation197_spill] sm:$0xff] %v8695_v52  ;;  %5064 = vst.msk [vmem:[%s7533_s13 + $0x230] sm:$0xff] %vm4993_vm2, %v8695_v52  ;;  %v8704_v38 = vmul.f32 0.0051020407, %v1836_v15  ;;  %v11324_v15 = vld [vmem:[#allocation98_spill] sm:$0xff] }
 0x298   : > { %v2252_v47 = vpop.xlane.xlu0 %2251  ;;  %v3191_v20 = vmul.f32 %v8706_v43, %v11324_v15  ;;  %v2858_v15 = vadd.f32 0.001, %v8029_v41 }
 0x299   : > { %11321 = vst [vmem:[#allocation170_spill] sm:$0xff] %v8704_v38  ;;  %5065 = vst.msk [vmem:[%s7533_s13 + $0x238] sm:$0xff] %vm4993_vm2, %v8704_v38  ;;  %v2501_v59 = vmul.f32 0.0051020407, %v2252_v47  ;;  %3321 = vrot.lane.b32.xlu0 %v8008_v45, %s5859_s8  ;;  %v2859_v47 = vadd.f32 0.001, %v8085_v17  ;;  %v3190_v45 = vmul.f32 %v8708_v46, %v11325_v29  ;;  %v2628_v17 = vmul.f32 %v8704_v38, %v8704_v38 }
 0x29a   : > { %v2256_v51 = vpop.xlane.xlu1 %2255  ;;  %3319 = vrot.lane.b32.xlu1 %v7991_v13, %s5859_s8 }
 0x29b   : > { %v5674_v4 = vpop.eup %5673  ;;  %v2669_v54 = vsub.f32 %v2501_v59, %v2585_v18  ;;  %v2502_v9 = vmul.f32 0.0051020407, %v2256_v51  ;;  %v2627_v59 = vmul.f32 %v8695_v52, %v8695_v52  ;;  %5681 = vrsqrt.f32 %v2859_v47 }
 0x29c   : > { %v2420_v21 = vpop.xlane.xlu0 %2419  ;;  %v8728_v63 = vmul.f32 %v5674_v4, %v3003_v7 }
 0x29d   : > { %v5676_v13 = vpop.eup %5675  ;;  %v2753_v8 = vmax.f32 %v2669_v54, 0.0  ;;  %v2670_v18 = vsub.f32 %v2502_v9, %v2586_v40  ;;  %v2543_v51 = vmul.f32 0.0051020407, %v2420_v21  ;;  %3405 = vrot.lane.b32.xlu0 %v3191_v20, %s5859_s8  ;;  %v3025_v20 = vld [vmem:[%s7711_s19 + $0x180] sm:$0xff] }
 0x29e   : > { %v2424_v43 = vpop.xlane.xlu1 %2423  ;;  %3403 = vrot.lane.b32.xlu1 %v3190_v45, %s5859_s8  ;;  %v8739_v29 = vmul.f32 %v8728_v63, %v8594_v11  ;;  %v8741_v7 = vmul.f32 %v5676_v13, %v3004_v31  ;;  %v5678_v40 = vpop.eup %5677 }
 0x29f   : > { %v2837_v4 = vadd.f32 0.001, %v2753_v8  ;;  %5106 = vst.msk [vmem:[%s7624_s16 + $0xe0] sm:$0xff] %vm4993_vm2, %v2753_v8  ;;  %v2754_v21 = vmax.f32 %v2670_v18, 0.0  ;;  %v2711_v54 = vsub.f32 %v2543_v51, %v2627_v59  ;;  %v2544_v41 = vmul.f32 0.0051020407, %v2424_v43  ;;  %v5680_v11 = vpop.eup %5679 }
 0x2a0   : > { %v1672_v9 = vpop.xlane.xlu0 %1671  ;;  %v8748_v45 = vmul.f32 %v8741_v7, %v8602_v1  ;;  %v3024_v43 = vld [vmem:[%s7711_s19 + $0x178] sm:$0xff]  ;;  %v8766_v51 = vmul.f32 %v5678_v40, %v3025_v20 }
 0x2a1   : > { %5683 = vrsqrt.f32 %v2837_v4  ;;  %v2838_v31 = vadd.f32 0.001, %v2754_v21  ;;  %5107 = vst.msk [vmem:[%s7624_s16 + $0xe8] sm:$0xff] %vm4993_vm2, %v2754_v21  ;;  %v8752_v8 = vmax.f32 %v2711_v54, 0.0  ;;  %v2712_v13 = vsub.f32 %v2544_v41, %v2628_v17  ;;  %3676 = vperm.xlu0 %5481, %v8010_v23   ;;  %v11329_v4 = vld [vmem:[#allocation111_spill] sm:$0xff]  ;;  %v11331_v41 = vld [vmem:[#allocation110_spill] sm:$0xff] }
 0x2a2   : > { %5685 = vrsqrt.f32 %v2858_v15  ;;  %v8756_v47 = vmul.f32 0.0051020407, %v1672_v9  ;;  %v1676_v18 = vpop.xlane.xlu1 %1675  ;;  %3671 = vperm.xlu1 %5482, %v7999_v39   ;;  %11326 = vst [vmem:[#allocation211_spill] sm:$0xff] %v8766_v51  ;;  %v8771_v15 = vmul.f32 %v5680_v11, %v3024_v43  ;;  %v2860_v21 = vadd.f32 0.001, %v8093_v49  ;;  %v11332_v11 = vld [vmem:[#allocation204_spill] sm:$0xff] }
 0x2a3   : > { %5687 = vrsqrt.f32 %v2838_v31  ;;  %5148 = vst.msk [vmem:[%s7624_s16 + $0x230] sm:$0xff] %vm4993_vm2, %v8752_v8  ;;  %v8762_v1 = vmax.f32 %v2712_v13, 0.0  ;;  %v8764_v59 = vmul.f32 0.0051020407, %v1676_v18  ;;  %v3193_v40 = vmul.f32 %v8766_v51, %v11331_v41  ;;  %v3005_v13 = vld [vmem:[%s7711_s19 + $0xe0] sm:$0xff]  ;;  %v3027_v41 = vld [vmem:[%s7711_s19 + $0x190] sm:$0xff] }
 0x2a4   : > { %5024 = vst.msk [vmem:[%s7533_s13 + $0xf0] sm:$0xff] %vm4993_vm2, %v8756_v47  ;;  %v1840_v23 = vpop.xlane.xlu0 %1839  ;;  %11327 = vst [vmem:[#allocation218_spill] sm:$0xff] %v8771_v15  ;;  %v2861_v9 = vadd.f32 0.001, %v8149_v35  ;;  %v2587_v49 = vmul.f32 %v8756_v47, %v8756_v47  ;;  %5689 = vrsqrt.f32 %v2860_v21 }
 0x2a5   : > { %5149 = vst.msk [vmem:[%s7624_s16 + $0x238] sm:$0xff] %vm4993_vm2, %v8762_v1  ;;  %5025 = vst.msk [vmem:[%s7533_s13 + $0xf8] sm:$0xff] %vm4993_vm2, %v8764_v59  ;;  %v8779_v39 = vmul.f32 0.0051020407, %v1840_v23  ;;  %3325 = vrot.lane.b32.xlu0 %v8072_v12, %s5859_s8  ;;  %v3192_v12 = vmul.f32 %v8771_v15, %v11332_v11  ;;  %v5682_v43 = vpop.eup %5681  ;;  %v3006_v11 = vld [vmem:[%s7711_s19 + $0xe8] sm:$0xff] }
 0x2a6   : > { %v1844_v17 = vpop.xlane.xlu1 %1843  ;;  %3323 = vrot.lane.b32.xlu1 %v11329_v4, %s5859_s8  ;;  %5691 = vrsqrt.f32 %v2861_v9  ;;  %v11334_v9 = vld [vmem:[#allocation122_spill] sm:$0xff]  ;;  %v8817_v52 = vmul.f32 %v5682_v43, %v3027_v41  ;;  %v11339_v41 = vld [vmem:[#allocation123_spill] sm:$0xff] }
 0x2a7   : > { %11328 = vst [vmem:[#allocation214_spill] sm:$0xff] %v8779_v39  ;;  %5066 = vst.msk [vmem:[%s7533_s13 + $0x240] sm:$0xff] %vm4993_vm2, %v8779_v39  ;;  %v8789_v54 = vmul.f32 0.0051020407, %v1844_v17  ;;  %v2588_v17 = vmul.f32 %v8764_v59, %v8764_v59  ;;  %v2629_v21 = vmul.f32 %v8779_v39, %v8779_v39  ;;  %v3008_v39 = vld [vmem:[%s7711_s19 + $0xf8] sm:$0xff] }
 0x2a8   : > { %v2260_v20 = vpop.xlane.xlu0 %2259  ;;  %11335 = vst [vmem:[#allocation111_spill] sm:$0xff] %v8817_v52 }
 0x2a9   : > { %11330 = vst [vmem:[#allocation98_spill] sm:$0xff] %v8789_v54  ;;  %5067 = vst.msk [vmem:[%s7533_s13 + $0x248] sm:$0xff] %vm4993_vm2, %v8789_v54  ;;  %v2503_v31 = vmul.f32 0.0051020407, %v2260_v20  ;;  %3409 = vrot.lane.b32.xlu0 %v3193_v40, %s5859_s8 }
 0x2aa   : > { %v2264_v18 = vpop.xlane.xlu1 %2263  ;;  %3407 = vrot.lane.b32.xlu1 %v3192_v12, %s5859_s8 }
 0x2ab   : > { %v5684_v35 = vpop.eup %5683  ;;  %v2671_v23 = vsub.f32 %v2503_v31, %v2587_v49  ;;  %v2504_v4 = vmul.f32 0.0051020407, %v2264_v18  ;;  %v3026_v49 = vld [vmem:[%s7711_s19 + $0x188] sm:$0xff]  ;;  %v2630_v31 = vmul.f32 %v8789_v54, %v8789_v54 }
 0x2ac   : > { %v5686_v51 = vpop.eup %5685  ;;  %v2428_v20 = vpop.xlane.xlu0 %2427  ;;  %v8808_v40 = vmul.f32 %v5684_v35, %v3005_v13 }
 0x2ad   : > { %v5688_v15 = vpop.eup %5687  ;;  %v2755_v46 = vmax.f32 %v2671_v23, 0.0  ;;  %v2672_v38 = vsub.f32 %v2504_v4, %v2588_v17  ;;  %v2545_v12 = vmul.f32 0.0051020407, %v2428_v20  ;;  %3686 = vperm.xlu0 %5481, %v8074_v55   ;;  %v8827_v54 = vmul.f32 %v5686_v51, %v3026_v49  ;;  %v11341_v49 = vld [vmem:[#allocation219_spill] sm:$0xff] }
 0x2ae   : > { %11333 = vst [vmem:[#allocation185_spill] sm:$0xff] %v8808_v40  ;;  %v2432_v18 = vpop.xlane.xlu1 %2431  ;;  %3681 = vperm.xlu1 %5482, %v11334_v9   ;;  %v8821_v13 = vmul.f32 %v8808_v40, %v8674_v50  ;;  %v8823_v35 = vmul.f32 %v5688_v15, %v3006_v11 }
 0x2af   : > { %v2839_v23 = vadd.f32 0.001, %v2755_v46  ;;  %5108 = vst.msk [vmem:[%s7624_s16 + $0xf0] sm:$0xff] %vm4993_vm2, %v2755_v46  ;;  %v2756_v55 = vmax.f32 %v2672_v38, 0.0  ;;  %v2713_v17 = vsub.f32 %v2545_v12, %v2629_v21  ;;  %v2546_v4 = vmul.f32 0.0051020407, %v2432_v18  ;;  %v5690_v18 = vpop.eup %5689 }
 0x2b0   : > { %11336 = vst [vmem:[#allocation110_spill] sm:$0xff] %v8823_v35  ;;  %v1680_v20 = vpop.xlane.xlu0 %1679  ;;  %11337 = vst [vmem:[#allocation204_spill] sm:$0xff] %v8827_v54  ;;  %v8831_v43 = vmul.f32 %v8823_v35, %v8683_v56  ;;  %v11340_v21 = vld [vmem:[#allocation112_spill] sm:$0xff] }
 0x2b1   : > { %5693 = vrsqrt.f32 %v2839_v23  ;;  %v2840_v50 = vadd.f32 0.001, %v2756_v55  ;;  %5109 = vst.msk [vmem:[%s7624_s16 + $0xf8] sm:$0xff] %vm4993_vm2, %v2756_v55  ;;  %v8835_v15 = vmax.f32 %v2713_v17, 0.0  ;;  %v2714_v38 = vsub.f32 %v2546_v4, %v2630_v31  ;;  %3329 = vrot.lane.b32.xlu0 %v8136_v0, %s5859_s8  ;;  %v5692_v23 = vpop.eup %5691 }
 0x2b2   : > { %11338 = vst [vmem:[#allocation122_spill] sm:$0xff] %v8831_v43  ;;  %v8839_v46 = vmul.f32 0.0051020407, %v1680_v20  ;;  %v1684_v51 = vpop.xlane.xlu1 %1683  ;;  %3327 = vrot.lane.b32.xlu1 %v11339_v41, %s5859_s8  ;;  %v3195_v12 = vmul.f32 %v8817_v52, %v11340_v21  ;;  %v3194_v31 = vmul.f32 %v8827_v54, %v11341_v49  ;;  %v2863_v55 = vadd.f32 0.001, %v8213_v57  ;;  %v11343_v41 = vld [vmem:[#allocation135_spill] sm:$0xff] }
 0x2b3   : > { %5695 = vrsqrt.f32 %v2840_v50  ;;  %5150 = vst.msk [vmem:[%s7624_s16 + $0x240] sm:$0xff] %vm4993_vm2, %v8835_v15  ;;  %v8846_v56 = vmax.f32 %v2714_v38, 0.0  ;;  %v8848_v11 = vmul.f32 0.0051020407, %v1684_v51  ;;  %v2862_v4 = vadd.f32 0.001, %v8157_v58 }
 0x2b4   : > { %5026 = vst.msk [vmem:[%s7533_s13 + $0x100] sm:$0xff] %vm4993_vm2, %v8839_v46  ;;  %v1848_v0 = vpop.xlane.xlu0 %1847  ;;  %v3029_v50 = vld [vmem:[%s7711_s19 + $0x1a0] sm:$0xff]  ;;  %v2589_v51 = vmul.f32 %v8839_v46, %v8839_v46  ;;  %v3028_v21 = vld [vmem:[%s7711_s19 + $0x198] sm:$0xff]  ;;  %5697 = vrsqrt.f32 %v2863_v55 }
 0x2b5   : > { %5151 = vst.msk [vmem:[%s7624_s16 + $0x248] sm:$0xff] %vm4993_vm2, %v8846_v56  ;;  %5027 = vst.msk [vmem:[%s7533_s13 + $0x108] sm:$0xff] %vm4993_vm2, %v8848_v11  ;;  %v8863_v9 = vmul.f32 0.0051020407, %v1848_v0  ;;  %3413 = vrot.lane.b32.xlu0 %v3195_v12, %s5859_s8  ;;  %v3007_v12 = vld [vmem:[%s7711_s19 + $0xf0] sm:$0xff]  ;;  %v11344_v0 = vld [vmem:[#allocation134_spill] sm:$0xff]  ;;  %v8884_v49 = vmul.f32 %v5692_v23, %v3029_v50  ;;  %5699 = vrsqrt.f32 %v2862_v4  ;;  %v2590_v52 = vmul.f32 %v8848_v11, %v8848_v11 }
 0x2b6   : > { %v1852_v17 = vpop.xlane.xlu1 %1851  ;;  %3411 = vrot.lane.b32.xlu1 %v3194_v31, %s5859_s8 }
 0x2b7   : > { %5068 = vst.msk [vmem:[%s7533_s13 + $0x250] sm:$0xff] %vm4993_vm2, %v8863_v9  ;;  %v8872_v20 = vmul.f32 0.0051020407, %v1852_v17  ;;  %11345 = vst [vmem:[#allocation112_spill] sm:$0xff] %v8884_v49  ;;  %v2631_v23 = vmul.f32 %v8863_v9, %v8863_v9 }
 0x2b8   : > { %v2268_v38 = vpop.xlane.xlu0 %2267 }
 0x2b9   : > { %11342 = vst [vmem:[#allocation123_spill] sm:$0xff] %v8872_v20  ;;  %5069 = vst.msk [vmem:[%s7533_s13 + $0x258] sm:$0xff] %vm4993_vm2, %v8872_v20  ;;  %v2505_v57 = vmul.f32 0.0051020407, %v2268_v38  ;;  %3696 = vperm.xlu0 %5481, %v11343_v41   ;;  %v8889_v38 = vmul.f32 %v5690_v18, %v3028_v21  ;;  %v2632_v4 = vmul.f32 %v8872_v20, %v8872_v20  ;;  %v11347_v18 = vld [vmem:[#allocation136_spill] sm:$0xff] }
 0x2ba   : > { %v2272_v58 = vpop.xlane.xlu1 %2271  ;;  %3691 = vperm.xlu1 %5482, %v11344_v0  }
 0x2bb   : > { %v5694_v31 = vpop.eup %5693  ;;  %v2673_v17 = vsub.f32 %v2505_v57, %v2589_v51  ;;  %v2506_v54 = vmul.f32 0.0051020407, %v2272_v58  ;;  %11346 = vst [vmem:[#allocation219_spill] sm:$0xff] %v8889_v38  ;;  %v11348_v57 = vld [vmem:[#allocation124_spill] sm:$0xff] }
 0x2bc   : > { %v2436_v43 = vpop.xlane.xlu0 %2435  ;;  %v8891_v41 = vmul.f32 %v5694_v31, %v3007_v12  ;;  %v3197_v21 = vmul.f32 %v8884_v49, %v11348_v57  ;;  %v11349_v31 = vld [vmem:[#allocation113_spill] sm:$0xff]  ;;  %v3031_v57 = vld [vmem:[%s7711_s19 + $0x1b0] sm:$0xff] }
 0x2bd   : > { %v5696_v55 = vpop.eup %5695  ;;  %v2757_v40 = vmax.f32 %v2673_v17, 0.0  ;;  %v2674_v35 = vsub.f32 %v2506_v54, %v2590_v52  ;;  %v2547_v50 = vmul.f32 0.0051020407, %v2436_v43  ;;  %3333 = vrot.lane.b32.xlu0 %v8200_v19, %s5859_s8  ;;  %v3196_v17 = vmul.f32 %v8889_v38, %v11349_v31 }
 0x2be   : > { %v2440_v51 = vpop.xlane.xlu1 %2439  ;;  %3331 = vrot.lane.b32.xlu1 %v11347_v18, %s5859_s8  ;;  %v8905_v52 = vmul.f32 %v8891_v41, %v8756_v47  ;;  %v8907_v54 = vmul.f32 %v5696_v55, %v3008_v39 }
 0x2bf   : > { %v2841_v43 = vadd.f32 0.001, %v2757_v40  ;;  %5110 = vst.msk [vmem:[%s7624_s16 + $0x100] sm:$0xff] %vm4993_vm2, %v2757_v40  ;;  %v2758_v19 = vmax.f32 %v2674_v35, 0.0  ;;  %v2715_v12 = vsub.f32 %v2547_v50, %v2631_v23  ;;  %v2548_v58 = vmul.f32 0.0051020407, %v2440_v51  ;;  %v5698_v51 = vpop.eup %5697 }
 0x2c0   : > { %v1688_v0 = vpop.xlane.xlu0 %1687  ;;  %v8915_v18 = vmul.f32 %v8907_v54, %v8764_v59  ;;  %v2865_v35 = vadd.f32 0.001, %v8277_v48  ;;  %v2864_v59 = vadd.f32 0.001, %v8221_v60 }
 0x2c1   : > { %5701 = vrsqrt.f32 %v2841_v43  ;;  %v2842_v47 = vadd.f32 0.001, %v2758_v19  ;;  %5111 = vst.msk [vmem:[%s7624_s16 + $0x108] sm:$0xff] %vm4993_vm2, %v2758_v19  ;;  %v8919_v39 = vmax.f32 %v2715_v12, 0.0  ;;  %v2716_v40 = vsub.f32 %v2548_v58, %v2632_v4  ;;  %3417 = vrot.lane.b32.xlu0 %v3197_v21, %s5859_s8  ;;  %v5700_v21 = vpop.eup %5699  ;;  %v3030_v43 = vld [vmem:[%s7711_s19 + $0x1a8] sm:$0xff] }
 0x2c2   : > { %v8923_v55 = vmul.f32 0.0051020407, %v1688_v0  ;;  %v1692_v23 = vpop.xlane.xlu1 %1691  ;;  %3415 = vrot.lane.b32.xlu1 %v3196_v17, %s5859_s8  ;;  %v8954_v58 = vmul.f32 %v5698_v51, %v3031_v57  ;;  %v8956_v31 = vmul.f32 %v5700_v21, %v3030_v43  ;;  %v3010_v21 = vld [vmem:[%s7711_s19 + $0x108] sm:$0xff]  ;;  %v2867_v43 = vadd.f32 0.001, %v8341_v3 }
 0x2c3   : > { %5703 = vrsqrt.f32 %v2842_v47  ;;  %5152 = vst.msk [vmem:[%s7624_s16 + $0x250] sm:$0xff] %vm4993_vm2, %v8919_v39  ;;  %v8930_v50 = vmax.f32 %v2716_v40, 0.0  ;;  %v8932_v4 = vmul.f32 0.0051020407, %v1692_v23  ;;  %v11354_v40 = vld [vmem:[#allocation147_spill] sm:$0xff] }
 0x2c4   : > { %5028 = vst.msk [vmem:[%s7533_s13 + $0x110] sm:$0xff] %vm4993_vm2, %v8923_v55  ;;  %v1856_v48 = vpop.xlane.xlu0 %1855  ;;  %5705 = vrsqrt.f32 %v2865_v35  ;;  %11352 = vst [vmem:[#allocation136_spill] sm:$0xff] %v8954_v58 }
 0x2c5   : > { %5153 = vst.msk [vmem:[%s7624_s16 + $0x258] sm:$0xff] %vm4993_vm2, %v8930_v50  ;;  %5029 = vst.msk [vmem:[%s7533_s13 + $0x118] sm:$0xff] %vm4993_vm2, %v8932_v4  ;;  %v8944_v60 = vmul.f32 0.0051020407, %v1856_v48  ;;  %3706 = vperm.xlu0 %5481, %v8202_v53   ;;  %5707 = vrsqrt.f32 %v2864_v59  ;;  %v2591_v53 = vmul.f32 %v8923_v55, %v8923_v55  ;;  %v2592_v59 = vmul.f32 %v8932_v4, %v8932_v4  ;;  %v11355_v48 = vld [vmem:[#allocation137_spill] sm:$0xff] }
 0x2c6   : > { %v1860_v19 = vpop.xlane.xlu1 %1859  ;;  %3701 = vperm.xlu1 %5482, %v8191_v37   ;;  %11353 = vst [vmem:[#allocation124_spill] sm:$0xff] %v8956_v31  ;;  %v3009_v37 = vld [vmem:[%s7711_s19 + $0x100] sm:$0xff]  ;;  %v3199_v57 = vmul.f32 %v8954_v58, %v11355_v48  ;;  %v2866_v48 = vadd.f32 0.001, %v8285_v33  ;;  %5709 = vrsqrt.f32 %v2867_v43 }
 0x2c7   : > { %11350 = vst [vmem:[#allocation135_spill] sm:$0xff] %v8944_v60  ;;  %5070 = vst.msk [vmem:[%s7533_s13 + $0x260] sm:$0xff] %vm4993_vm2, %v8944_v60  ;;  %v8952_v12 = vmul.f32 0.0051020407, %v1860_v19 }
 0x2c8   : > { %v2276_v0 = vpop.xlane.xlu0 %2275 }
 0x2c9   : > { %11351 = vst [vmem:[#allocation134_spill] sm:$0xff] %v8952_v12  ;;  %5071 = vst.msk [vmem:[%s7533_s13 + $0x268] sm:$0xff] %vm4993_vm2, %v8952_v12  ;;  %v2507_v17 = vmul.f32 0.0051020407, %v2276_v0  ;;  %3337 = vrot.lane.b32.xlu0 %v8264_v42, %s5859_s8  ;;  %v11356_v0 = vld [vmem:[#allocation125_spill] sm:$0xff]  ;;  %v2634_v3 = vmul.f32 %v8952_v12, %v8952_v12 }
 0x2ca   : > { %v2280_v47 = vpop.xlane.xlu1 %2279  ;;  %3335 = vrot.lane.b32.xlu1 %v11354_v40, %s5859_s8  ;;  %v3198_v42 = vmul.f32 %v8956_v31, %v11356_v0  ;;  %v3033_v0 = vld [vmem:[%s7711_s19 + $0x1c0] sm:$0xff] }
 0x2cb   : > { %v5702_v35 = vpop.eup %5701  ;;  %v2675_v23 = vsub.f32 %v2507_v17, %v2591_v53  ;;  %v2508_v51 = vmul.f32 0.0051020407, %v2280_v47  ;;  %v2633_v17 = vmul.f32 %v8944_v60, %v8944_v60 }
 0x2cc   : > { %v2444_v19 = vpop.xlane.xlu0 %2443  ;;  %v8976_v49 = vmul.f32 %v5702_v35, %v3009_v37 }
 0x2cd   : > { %v5704_v40 = vpop.eup %5703  ;;  %v2759_v38 = vmax.f32 %v2675_v23, 0.0  ;;  %v2676_v53 = vsub.f32 %v2508_v51, %v2592_v59  ;;  %v2549_v47 = vmul.f32 0.0051020407, %v2444_v19  ;;  %3421 = vrot.lane.b32.xlu0 %v3199_v57, %s5859_s8 }
 0x2ce   : > { %v2448_v58 = vpop.xlane.xlu1 %2447  ;;  %3419 = vrot.lane.b32.xlu1 %v3198_v42, %s5859_s8  ;;  %v8987_v37 = vmul.f32 %v8976_v49, %v8839_v46  ;;  %v8989_v35 = vmul.f32 %v5704_v40, %v3010_v21  ;;  %v5706_v57 = vpop.eup %5705 }
 0x2cf   : > { %v2843_v23 = vadd.f32 0.001, %v2759_v38  ;;  %5112 = vst.msk [vmem:[%s7624_s16 + $0x110] sm:$0xff] %vm4993_vm2, %v2759_v38  ;;  %v2760_v59 = vmax.f32 %v2676_v53, 0.0  ;;  %v2717_v51 = vsub.f32 %v2549_v47, %v2633_v17  ;;  %v2550_v33 = vmul.f32 0.0051020407, %v2448_v58  ;;  %v5708_v46 = vpop.eup %5707 }
 0x2d0   : > { %v1696_v19 = vpop.xlane.xlu0 %1695  ;;  %v8996_v42 = vmul.f32 %v8989_v35, %v8848_v11  ;;  %v3032_v58 = vld [vmem:[%s7711_s19 + $0x1b8] sm:$0xff]  ;;  %v9014_v47 = vmul.f32 %v5706_v57, %v3033_v0  ;;  %v2869_v0 = vadd.f32 0.001, %v8405_v14 }
 0x2d1   : > { %5711 = vrsqrt.f32 %v2843_v23  ;;  %v2844_v21 = vadd.f32 0.001, %v2760_v59  ;;  %5113 = vst.msk [vmem:[%s7624_s16 + $0x118] sm:$0xff] %vm4993_vm2, %v2760_v59  ;;  %v9000_v38 = vmax.f32 %v2717_v51, 0.0  ;;  %v2718_v40 = vsub.f32 %v2550_v33, %v2634_v3  ;;  %3716 = vperm.xlu0 %5481, %v8266_v10   ;;  %v11361_v23 = vld [vmem:[#allocation150_spill] sm:$0xff]  ;;  %v11362_v59 = vld [vmem:[#allocation172_spill] sm:$0xff] }
 0x2d2   : > { %11357 = vst [vmem:[#allocation113_spill] sm:$0xff] %v8996_v42  ;;  %5713 = vrsqrt.f32 %v2866_v48  ;;  %v9004_v43 = vmul.f32 0.0051020407, %v1696_v19  ;;  %v1700_v53 = vpop.xlane.xlu1 %1699  ;;  %3711 = vperm.xlu1 %5482, %v8255_v32   ;;  %11358 = vst [vmem:[#allocation147_spill] sm:$0xff] %v9014_v47  ;;  %v9019_v48 = vmul.f32 %v5708_v46, %v3032_v58  ;;  %v2868_v51 = vadd.f32 0.001, %v11362_v59 }
 0x2d3   : > { %5715 = vrsqrt.f32 %v2844_v21  ;;  %5154 = vst.msk [vmem:[%s7624_s16 + $0x260] sm:$0xff] %vm4993_vm2, %v9000_v38  ;;  %v9010_v11 = vmax.f32 %v2718_v40, 0.0  ;;  %v9012_v17 = vmul.f32 0.0051020407, %v1700_v53  ;;  %v11364_v57 = vld [vmem:[#allocation149_spill] sm:$0xff]  ;;  %v11365_v21 = vld [vmem:[#allocation146_spill] sm:$0xff] }
 0x2d4   : > { %5030 = vst.msk [vmem:[%s7533_s13 + $0x120] sm:$0xff] %vm4993_vm2, %v9004_v43  ;;  %v1864_v10 = vpop.xlane.xlu0 %1863  ;;  %11359 = vst [vmem:[#allocation137_spill] sm:$0xff] %v9019_v48  ;;  %v3201_v19 = vmul.f32 %v9014_v47, %v11364_v57  ;;  %v2593_v40 = vmul.f32 %v9004_v43, %v9004_v43  ;;  %v3011_v53 = vld [vmem:[%s7711_s19 + $0x110] sm:$0xff]  ;;  %5717 = vrsqrt.f32 %v2868_v51  ;;  %v3012_v47 = vld [vmem:[%s7711_s19 + $0x118] sm:$0xff] }
 0x2d5   : > { %5155 = vst.msk [vmem:[%s7624_s16 + $0x268] sm:$0xff] %vm4993_vm2, %v9010_v11  ;;  %5031 = vst.msk [vmem:[%s7533_s13 + $0x128] sm:$0xff] %vm4993_vm2, %v9012_v17  ;;  %v9027_v32 = vmul.f32 0.0051020407, %v1864_v10  ;;  %3341 = vrot.lane.b32.xlu0 %v8328_v61, %s5859_s8  ;;  %v3200_v61 = vmul.f32 %v9019_v48, %v11365_v21  ;;  %v5710_v10 = vpop.eup %5709  ;;  %v2594_v59 = vmul.f32 %v9012_v17, %v9012_v17  ;;  %v3035_v21 = vld [vmem:[%s7711_s19 + $0x1d0] sm:$0xff]  ;;  %5719 = vrsqrt.f32 %v2869_v0  ;;  %v11368_v0 = vld [vmem:[#allocation171_spill] sm:$0xff] }
 0x2d6   : > { %v1868_v3 = vpop.xlane.xlu1 %1867  ;;  %3339 = vrot.lane.b32.xlu1 %v11361_v23, %s5859_s8  ;;  %v9065_v42 = vmul.f32 %v5710_v10, %v3035_v21  ;;  %v11375_v21 = vld [vmem:[#allocation158_spill] sm:$0xff] }
 0x2d7   : > { %11360 = vst [vmem:[#allocation125_spill] sm:$0xff] %v9027_v32  ;;  %5072 = vst.msk [vmem:[%s7533_s13 + $0x270] sm:$0xff] %vm4993_vm2, %v9027_v32  ;;  %v9037_v33 = vmul.f32 0.0051020407, %v1868_v3  ;;  %v2635_v51 = vmul.f32 %v9027_v32, %v9027_v32 }
 0x2d8   : > { %v2284_v46 = vpop.xlane.xlu0 %2283  ;;  %11369 = vst [vmem:[#allocation149_spill] sm:$0xff] %v9065_v42 }
 0x2d9   : > { %11363 = vst [vmem:[#allocation150_spill] sm:$0xff] %v9037_v33  ;;  %5073 = vst.msk [vmem:[%s7533_s13 + $0x278] sm:$0xff] %vm4993_vm2, %v9037_v33  ;;  %v2509_v58 = vmul.f32 0.0051020407, %v2284_v46  ;;  %3425 = vrot.lane.b32.xlu0 %v3201_v19, %s5859_s8 }
 0x2da   : > { %v2288_v3 = vpop.xlane.xlu1 %2287  ;;  %3423 = vrot.lane.b32.xlu1 %v3200_v61, %s5859_s8 }
 0x2db   : > { %v5712_v14 = vpop.eup %5711  ;;  %v2677_v23 = vsub.f32 %v2509_v58, %v2593_v40  ;;  %v2510_v57 = vmul.f32 0.0051020407, %v2288_v3  ;;  %v11367_v40 = vld [vmem:[#allocation168_spill] sm:$0xff]  ;;  %v3034_v58 = vld [vmem:[%s7711_s19 + $0x1c8] sm:$0xff]  ;;  %v2636_v3 = vmul.f32 %v9037_v33, %v9037_v33 }
 0x2dc   : > { %v5714_v48 = vpop.eup %5713  ;;  %v2452_v46 = vpop.xlane.xlu0 %2451  ;;  %v9056_v19 = vmul.f32 %v5712_v14, %v3011_v53 }
 0x2dd   : > { %v5716_v31 = vpop.eup %5715  ;;  %v2761_v12 = vmax.f32 %v2677_v23, 0.0  ;;  %v2678_v20 = vsub.f32 %v2510_v57, %v2594_v59  ;;  %v2551_v61 = vmul.f32 0.0051020407, %v2452_v46  ;;  %3726 = vperm.xlu0 %5481, %v11367_v40   ;;  %v9075_v33 = vmul.f32 %v5714_v48, %v3034_v58 }
 0x2de   : > { %11366 = vst [vmem:[#allocation172_spill] sm:$0xff] %v9056_v19  ;;  %v2456_v60 = vpop.xlane.xlu1 %2455  ;;  %3721 = vperm.xlu1 %5482, %v11368_v0   ;;  %v9069_v53 = vmul.f32 %v9056_v19, %v8923_v55  ;;  %v9071_v14 = vmul.f32 %v5716_v31, %v3012_v47  ;;  %v11373_v47 = vld [vmem:[#allocation169_spill] sm:$0xff] }
 0x2df   : > { %v2845_v23 = vadd.f32 0.001, %v2761_v12  ;;  %5114 = vst.msk [vmem:[%s7624_s16 + $0x120] sm:$0xff] %vm4993_vm2, %v2761_v12  ;;  %v2762_v59 = vmax.f32 %v2678_v20, 0.0  ;;  %v2719_v57 = vsub.f32 %v2551_v61, %v2635_v51  ;;  %v2552_v46 = vmul.f32 0.0051020407, %v2456_v60 }
 0x2e0   : > { %11370 = vst [vmem:[#allocation146_spill] sm:$0xff] %v9071_v14  ;;  %v1704_v40 = vpop.xlane.xlu0 %1703  ;;  %11371 = vst [vmem:[#allocation168_spill] sm:$0xff] %v9075_v33  ;;  %v9079_v10 = vmul.f32 %v9071_v14, %v8932_v4  ;;  %v3203_v51 = vmul.f32 %v9065_v42, %v11375_v21  ;;  %v11376_v61 = vld [vmem:[#allocation148_spill] sm:$0xff]  ;;  %v11378_v21 = vld [vmem:[#allocation187_spill] sm:$0xff] }
 0x2e1   : > { %5721 = vrsqrt.f32 %v2845_v23  ;;  %v2846_v55 = vadd.f32 0.001, %v2762_v59  ;;  %5115 = vst.msk [vmem:[%s7624_s16 + $0x128] sm:$0xff] %vm4993_vm2, %v2762_v59  ;;  %v9083_v31 = vmax.f32 %v2719_v57, 0.0  ;;  %v2720_v20 = vsub.f32 %v2552_v46, %v2636_v3  ;;  %3345 = vrot.lane.b32.xlu0 %v8392_v6, %s5859_s8  ;;  %v5718_v3 = vpop.eup %5717  ;;  %v11377_v46 = vld [vmem:[#allocation189_spill] sm:$0xff] }
 0x2e2   : > { %11372 = vst [vmem:[#allocation171_spill] sm:$0xff] %v9079_v10  ;;  %v9087_v60 = vmul.f32 0.0051020407, %v1704_v40  ;;  %v1708_v12 = vpop.xlane.xlu1 %1707  ;;  %3343 = vrot.lane.b32.xlu1 %v11373_v47, %s5859_s8  ;;  %v3202_v58 = vmul.f32 %v9075_v33, %v11376_v61  ;;  %v5720_v23 = vpop.eup %5719  ;;  %v2871_v59 = vadd.f32 0.001, %v8469_v28  ;;  %v3014_v10 = vld [vmem:[%s7711_s19 + $0x128] sm:$0xff] }
 0x2e3   : > { %5723 = vrsqrt.f32 %v2846_v55  ;;  %5156 = vst.msk [vmem:[%s7624_s16 + $0x270] sm:$0xff] %vm4993_vm2, %v9083_v31  ;;  %v9094_v4 = vmax.f32 %v2720_v20, 0.0  ;;  %v9096_v48 = vmul.f32 0.0051020407, %v1708_v12  ;;  %v2870_v40 = vadd.f32 0.001, %v11377_v46 }
 0x2e4   : > { %5032 = vst.msk [vmem:[%s7533_s13 + $0x130] sm:$0xff] %vm4993_vm2, %v9087_v60  ;;  %v1872_v6 = vpop.xlane.xlu0 %1871  ;;  %v3037_v20 = vld [vmem:[%s7711_s19 + $0x1e0] sm:$0xff]  ;;  %v2595_v47 = vmul.f32 %v9087_v60, %v9087_v60  ;;  %5725 = vrsqrt.f32 %v2871_v59 }
 0x2e5   : > { %11374 = vst [vmem:[#allocation169_spill] sm:$0xff] %v9094_v4  ;;  %5157 = vst.msk [vmem:[%s7624_s16 + $0x278] sm:$0xff] %vm4993_vm2, %v9094_v4  ;;  %v9111_v0 = vmul.f32 0.0051020407, %v1872_v6  ;;  %3429 = vrot.lane.b32.xlu0 %v3203_v51, %s5859_s8  ;;  %v3036_v51 = vld [vmem:[%s7711_s19 + $0x1d8] sm:$0xff]  ;;  %v3013_v6 = vld [vmem:[%s7711_s19 + $0x120] sm:$0xff]  ;;  %5727 = vrsqrt.f32 %v2870_v40  ;;  %v2596_v33 = vmul.f32 %v9096_v48, %v9096_v48 }
 0x2e6   : > { %5033 = vst.msk [vmem:[%s7533_s13 + $0x138] sm:$0xff] %vm4993_vm2, %v9096_v48  ;;  %v1876_v57 = vpop.xlane.xlu1 %1875  ;;  %3427 = vrot.lane.b32.xlu1 %v3202_v58, %s5859_s8  ;;  %v11379_v58 = vld [vmem:[#allocation186_spill] sm:$0xff] }
 0x2e7   : > { %5074 = vst.msk [vmem:[%s7533_s13 + $0x280] sm:$0xff] %vm4993_vm2, %v9111_v0  ;;  %v9120_v55 = vmul.f32 0.0051020407, %v1876_v57  ;;  %v9132_v57 = vmul.f32 %v5720_v23, %v3037_v20  ;;  %v2637_v23 = vmul.f32 %v9111_v0, %v9111_v0 }
 0x2e8   : > { %v2292_v12 = vpop.xlane.xlu0 %2291 }
 0x2e9   : > { %5075 = vst.msk [vmem:[%s7533_s13 + $0x288] sm:$0xff] %vm4993_vm2, %v9120_v55  ;;  %v2511_v28 = vmul.f32 0.0051020407, %v2292_v12  ;;  %3736 = vperm.xlu0 %5481, %v11378_v21   ;;  %11380 = vst [vmem:[#allocation158_spill] sm:$0xff] %v9132_v57  ;;  %v9137_v12 = vmul.f32 %v5718_v3, %v3036_v51  ;;  %v2638_v40 = vmul.f32 %v9120_v55, %v9120_v55  ;;  %v11381_v3 = vld [vmem:[#allocation188_spill] sm:$0xff] }
 0x2ea   : > { %v2296_v61 = vpop.xlane.xlu1 %2295  ;;  %3731 = vperm.xlu1 %5482, %v11379_v58   ;;  %v11383_v58 = vld [vmem:[#allocation220_spill] sm:$0xff] }
 0x2eb   : > { %v5722_v46 = vpop.eup %5721  ;;  %v2679_v42 = vsub.f32 %v2511_v28, %v2595_v47  ;;  %v2512_v32 = vmul.f32 0.0051020407, %v2296_v61  ;;  %v11382_v28 = vld [vmem:[#allocation173_spill] sm:$0xff] }
 0x2ec   : > { %v2460_v19 = vpop.xlane.xlu0 %2459  ;;  %v9139_v21 = vmul.f32 %v5722_v46, %v3013_v6  ;;  %v3205_v51 = vmul.f32 %v9132_v57, %v11382_v28  ;;  %v3204_v46 = vmul.f32 %v9137_v12, %v11383_v58  ;;  %v3039_v28 = vld [vmem:[%s7711_s19 + $0x1f0] sm:$0xff] }
 0x2ed   : > { %v5724_v59 = vpop.eup %5723  ;;  %v2763_v14 = vmax.f32 %v2679_v42, 0.0  ;;  %v2680_v4 = vsub.f32 %v2512_v32, %v2596_v33  ;;  %v2553_v20 = vmul.f32 0.0051020407, %v2460_v19  ;;  %3349 = vrot.lane.b32.xlu0 %v8456_v30, %s5859_s8 }
 0x2ee   : > { %v2464_v47 = vpop.xlane.xlu1 %2463  ;;  %3347 = vrot.lane.b32.xlu1 %v11381_v3, %s5859_s8  ;;  %v9153_v42 = vmul.f32 %v9139_v21, %v9004_v43  ;;  %v9155_v32 = vmul.f32 %v5724_v59, %v3014_v10 }
 0x2ef   : > { %v2847_v33 = vadd.f32 0.001, %v2763_v14  ;;  %5116 = vst.msk [vmem:[%s7624_s16 + $0x130] sm:$0xff] %vm4993_vm2, %v2763_v14  ;;  %v2764_v30 = vmax.f32 %v2680_v4, 0.0  ;;  %v2721_v19 = vsub.f32 %v2553_v20, %v2637_v23  ;;  %v2554_v6 = vmul.f32 0.0051020407, %v2464_v47  ;;  %v5726_v47 = vpop.eup %5725 }
 0x2f0   : > { %v1712_v61 = vpop.xlane.xlu0 %1711  ;;  %v9163_v3 = vmul.f32 %v9155_v32, %v9012_v17  ;;  %v2873_v4 = vadd.f32 0.001, %v8533_v27  ;;  %v2872_v23 = vadd.f32 0.001, %v8477_v34 }
 0x2f1   : > { %5729 = vrsqrt.f32 %v2847_v33  ;;  %v2848_v43 = vadd.f32 0.001, %v2764_v30  ;;  %5117 = vst.msk [vmem:[%s7624_s16 + $0x138] sm:$0xff] %vm4993_vm2, %v2764_v30  ;;  %v9167_v10 = vmax.f32 %v2721_v19, 0.0  ;;  %v2722_v14 = vsub.f32 %v2554_v6, %v2638_v40  ;;  %3433 = vrot.lane.b32.xlu0 %v3205_v51, %s5859_s8  ;;  %v5728_v51 = vpop.eup %5727  ;;  %v3038_v33 = vld [vmem:[%s7711_s19 + $0x1e8] sm:$0xff] }
 0x2f2   : > { %v9171_v59 = vmul.f32 0.0051020407, %v1712_v61  ;;  %3431 = vrot.lane.b32.xlu1 %v3204_v46, %s5859_s8  ;;  %v1716_v17 = vpop.xlane.xlu1 %1715  ;;  %v9202_v6 = vmul.f32 %v5726_v47, %v3039_v28  ;;  %v9204_v58 = vmul.f32 %v5728_v51, %v3038_v33  ;;  %v9214_v46 = vld [vmem:[%s7711_s19 + $0x130] sm:$0xff]  ;;  %v11387_v28 = vld [vmem:[#allocation222_spill] sm:$0xff]  ;;  %v11388_v33 = vld [vmem:[#allocation183_spill] sm:$0xff] }
 0x2f3   : > { %5731 = vrsqrt.f32 %v2848_v43  ;;  %5158 = vst.msk [vmem:[%s7624_s16 + $0x280] sm:$0xff] %vm4993_vm2, %v9167_v10  ;;  %v9178_v20 = vmax.f32 %v2722_v14, 0.0  ;;  %v9180_v40 = vmul.f32 0.0051020407, %v1716_v17  ;;  %11385 = vst [vmem:[#allocation189_spill] sm:$0xff] %v9214_v46 }
 0x2f4   : > { %5034 = vst.msk [vmem:[%s7533_s13 + $0x140] sm:$0xff] %vm4993_vm2, %v9171_v59  ;;  %v1880_v27 = vpop.xlane.xlu0 %1879  ;;  %5733 = vrsqrt.f32 %v2873_v4  ;;  %11384 = vst [vmem:[#allocation148_spill] sm:$0xff] %v9202_v6  ;;  %v3207_v47 = vmul.f32 %v9202_v6, %v8427_v5  ;;  %v2874_v51 = vadd.f32 0.001, %v11387_v28  ;;  %v11389_v6 = vld [vmem:[#allocation227_spill] sm:$0xff] }
 0x2f5   : > { %5159 = vst.msk [vmem:[%s7624_s16 + $0x288] sm:$0xff] %vm4993_vm2, %v9178_v20  ;;  %5035 = vst.msk [vmem:[%s7533_s13 + $0x148] sm:$0xff] %vm4993_vm2, %v9180_v40  ;;  %v9192_v34 = vmul.f32 0.0051020407, %v1880_v27  ;;  %3746 = vperm.xlu0 %5481, %v8458_v24   ;;  %5735 = vrsqrt.f32 %v2872_v23  ;;  %v2597_v24 = vmul.f32 %v9171_v59, %v9171_v59  ;;  %v2598_v17 = vmul.f32 %v9180_v40, %v9180_v40  ;;  %v9223_v27 = vld [vmem:[%s7711_s19 + $0x138] sm:$0xff] }
 0x2f6   : > { %3741 = vperm.xlu1 %5482, %v8447_v25   ;;  %v1884_v30 = vpop.xlane.xlu1 %1883  ;;  %11386 = vst [vmem:[#allocation187_spill] sm:$0xff] %v9223_v27  ;;  %v2875_v28 = vadd.f32 0.001, %v11389_v6  ;;  %5737 = vrsqrt.f32 %v2874_v51 }
 0x2f7   : > { %5076 = vst.msk [vmem:[%s7533_s13 + $0x290] sm:$0xff] %vm4993_vm2, %v9192_v34  ;;  %v9200_v19 = vmul.f32 0.0051020407, %v1884_v30  ;;  %v3206_v30 = vmul.f32 %v9204_v58, %v11388_v33 }
 0x2f8   : > { %v2300_v61 = vpop.xlane.xlu0 %2299 }
 0x2f9   : > { %5077 = vst.msk [vmem:[%s7533_s13 + $0x298] sm:$0xff] %vm4993_vm2, %v9200_v19  ;;  %v2513_v25 = vmul.f32 0.0051020407, %v2300_v61  ;;  %3353 = vrot.lane.b32.xlu0 %v8520_v62, %s5859_s8  ;;  %v2640_v33 = vmul.f32 %v9200_v19, %v9200_v19 }
 0x2fa   : > { %3351 = vrot.lane.b32.xlu1 %v8465_v2, %s5859_s8  ;;  %v2304_v43 = vpop.xlane.xlu1 %2303 }
 0x2fb   : > { %v5730_v14 = vpop.eup %5729  ;;  %v2681_v4 = vsub.f32 %v2513_v25, %v2597_v24  ;;  %v2514_v23 = vmul.f32 0.0051020407, %v2304_v43  ;;  %v2639_v43 = vmul.f32 %v9192_v34, %v9192_v34 }
 0x2fc   : > { %v2468_v62 = vpop.xlane.xlu0 %2467  ;;  %v9229_v2 = vmul.f32 %v5730_v14, %v9214_v46  ;;  %v3041_v46 = vld [vmem:[%s7711_s19 + $0x200] sm:$0xff] }
 0x2fd   : > { %v5732_v61 = vpop.eup %5731  ;;  %v2765_v24 = vmax.f32 %v2681_v4, 0.0  ;;  %v2682_v25 = vsub.f32 %v2514_v23, %v2598_v17  ;;  %v2555_v5 = vmul.f32 0.0051020407, %v2468_v62  ;;  %3437 = vrot.lane.b32.xlu0 %v3207_v47, %s5859_s8 }
 0x2fe   : > { %3435 = vrot.lane.b32.xlu1 %v3206_v30, %s5859_s8  ;;  %v2472_v14 = vpop.xlane.xlu1 %2471  ;;  %v9240_v4 = vmul.f32 %v9229_v2, %v9087_v60  ;;  %v9243_v17 = vmul.f32 %v5732_v61, %v9223_v27  ;;  %v5734_v30 = vpop.eup %5733 }
 0x2ff   : > { %v2849_v23 = vadd.f32 0.001, %v2765_v24  ;;  %5118 = vst.msk [vmem:[%s7624_s16 + $0x140] sm:$0xff] %vm4993_vm2, %v2765_v24  ;;  %v2766_v47 = vmax.f32 %v2682_v25, 0.0  ;;  %v2723_v6 = vsub.f32 %v2555_v5, %v2639_v43  ;;  %v2556_v62 = vmul.f32 0.0051020407, %v2472_v14  ;;  %v5736_v60 = vpop.eup %5735 }
 0x300   : > { %v9250_v57 = vmul.f32 %v9243_v17, %v9096_v48  ;;  %v11390_v25 = vld [vmem:[#allocation206_spill] sm:$0xff]  ;;  %v3040_v43 = vld [vmem:[%s7711_s19 + $0x1f8] sm:$0xff]  ;;  %v9266_v14 = vmul.f32 %v5734_v30, %v3041_v46 }
 0x301   : > { %5739 = vrsqrt.f32 %v2849_v23  ;;  %v2850_v61 = vadd.f32 0.001, %v2766_v47  ;;  %5119 = vst.msk [vmem:[%s7624_s16 + $0x148] sm:$0xff] %vm4993_vm2, %v2766_v47  ;;  %v9254_v27 = vmax.f32 %v2723_v6, 0.0  ;;  %v2724_v24 = vsub.f32 %v2556_v62, %v2640_v33  ;;  %3756 = vperm.xlu0 %5481, %v11390_v25   ;;  %v11391_v5 = vld [vmem:[#allocation205_spill] sm:$0xff]  ;;  %v11399_v62 = vld [vmem:[#allocation203_spill] sm:$0xff]  ;;  %v5738_v25 = vpop.eup %5737 }
 0x302   : > { %5741 = vrsqrt.f32 %v2875_v28  ;;  %3751 = vperm.xlu1 %5482, %v11391_v5   ;;  %v9259_v51 = vpop.permute.xlu1 %3861  ;;  %11393 = vst [vmem:[#allocation188_spill] sm:$0xff] %v9266_v14  ;;  %v9270_v33 = vmul.f32 %v5736_v60, %v3040_v43  ;;  %v11396_v28 = vld [vmem:[#allocation224_spill] sm:$0xff]  ;;  %v11397_v47 = vld [vmem:[#allocation221_spill] sm:$0xff]  ;;  %v3209_v46 = vmul.f32 %v9266_v14, %v11399_v62  ;;  %v11401_v60 = vld [vmem:[#allocation191_spill] sm:$0xff]  ;;  %v2877_v43 = vadd.f32 0.001, %v8670_v26 }
 0x303   : > { %11392 = vst [vmem:[#allocation186_spill] sm:$0xff] %v9259_v51  ;;  %5743 = vrsqrt.f32 %v2850_v61  ;;  %5160 = vst.msk [vmem:[%s7624_s16 + $0x290] sm:$0xff] %vm4993_vm2, %v9254_v27  ;;  %v9264_v48 = vmax.f32 %v2724_v24, 0.0  ;;  %v9289_v24 = vld [vmem:[%s7711_s19 + $0x140] sm:$0xff]  ;;  %v9297_v51 = vld [vmem:[%s7711_s19 + $0x148] sm:$0xff] }
 0x304   : > { %v9268_v23 = vpop.permute.xlu0 %3651  ;;  %11395 = vst [vmem:[#allocation220_spill] sm:$0xff] %v9270_v33  ;;  %v3208_v61 = vmul.f32 %v9270_v33, %v11401_v60  ;;  %11404 = vst [vmem:[#allocation206_spill] sm:$0xff] %v9297_v51  ;;  %v3043_v60 = vld [vmem:[%s7711_s19 + $0x210] sm:$0xff]  ;;  %v11406_v14 = vld [vmem:[#allocation225_spill] sm:$0xff]  ;;  %5745 = vrsqrt.f32 %v2877_v43 }
 0x305   : > { %11394 = vst [vmem:[#allocation173_spill] sm:$0xff] %v9268_v23  ;;  %5161 = vst.msk [vmem:[%s7624_s16 + $0x298] sm:$0xff] %vm4993_vm2, %v9264_v48  ;;  %3357 = vrot.lane.b32.xlu0 %v11396_v28, %s5859_s8  ;;  %v3042_v26 = vld [vmem:[%s7711_s19 + $0x208] sm:$0xff] }
 0x306   : > { %3355 = vrot.lane.b32.xlu1 %v11397_v47, %s5859_s8  ;;  %v9279_v6 = vpop.permute.xlu1 %3656  ;;  %v11403_v47 = vld [vmem:[#allocation228_spill] sm:$0xff] }
 0x307   : > { %11398 = vst [vmem:[#allocation222_spill] sm:$0xff] %v9279_v6  ;;  %v2876_v62 = vadd.f32 0.001, %v11403_v47 }
 0x308   : > { %v9283_v30 = vpop.permute.xlu0 %3313 }
 0x309   : > { %11400 = vst [vmem:[#allocation183_spill] sm:$0xff] %v9283_v30  ;;  %3441 = vrot.lane.b32.xlu0 %v3209_v46, %s5859_s8  ;;  %5747 = vrsqrt.f32 %v2876_v62 }
 0x30a   : > { %3439 = vrot.lane.b32.xlu1 %v3208_v61, %s5859_s8  ;;  %v9293_v5 = vpop.permute.xlu1 %3315  ;;  %v11407_v61 = vld [vmem:[#allocation199_spill] sm:$0xff] }
 0x30b   : > { %11402 = vst [vmem:[#allocation227_spill] sm:$0xff] %v9293_v5  ;;  %v5740_v28 = vpop.eup %5739 }
 0x30c   : > { %v5742_v23 = vpop.eup %5741  ;;  %v9299_v6 = vpop.permute.xlu0 %3397  ;;  %v9303_v46 = vmul.f32 %v5740_v28, %v9289_v24 }
 0x30d   : > { %11405 = vst [vmem:[#allocation205_spill] sm:$0xff] %v9299_v6  ;;  %v5744_v30 = vpop.eup %5743  ;;  %3766 = vperm.xlu0 %5481, %v11406_v14   ;;  %v9317_v6 = vmul.f32 %v5742_v23, %v3043_v60  ;;  %v9321_v14 = vmul.f32 %v5738_v25, %v3042_v26  ;;  %v11411_v23 = vld [vmem:[#allocation223_spill] sm:$0xff] }
 0x30e   : > { %3761 = vperm.xlu1 %5482, %v11407_v61   ;;  %v9308_v5 = vpop.permute.xlu1 %3399  ;;  %v9312_v47 = vmul.f32 %v9303_v46, %v9171_v59  ;;  %v9315_v33 = vmul.f32 %v5744_v30, %v9297_v51  ;;  %v11409_v59 = vld [vmem:[#allocation226_spill] sm:$0xff]  ;;  %v11413_v25 = vld [vmem:[#allocation99_spill] sm:$0xff]  ;;  %v2878_v61 = vadd.f32 0.001, %v8681_v16  ;;  %v9380_v51 = vld [vmem:[%s7711_s19 + $0x230] sm:$0xff] }
 0x30f   : > { %11408 = vst [vmem:[#allocation224_spill] sm:$0xff] %v9308_v5  ;;  %v3211_v62 = vmul.f32 %v9317_v6, %v11411_v23  ;;  %v3210_v26 = vmul.f32 %v9321_v14, %v11413_v25  ;;  %v3045_v5 = vld [vmem:[%s7711_s19 + $0x220] sm:$0xff]  ;;  %11420 = vst [vmem:[#allocation199_spill] sm:$0xff] %v9380_v51 }
 0x310   : > { %v9319_v28 = vpop.permute.xlu0 %3401  ;;  %v9325_v43 = vmul.f32 %v9315_v33, %v9180_v40  ;;  %v2879_v40 = vadd.f32 0.001, %v8752_v8 }
 0x311   : > { %3361 = vrot.lane.b32.xlu0 %v8658_v44, %s5859_s8 }
 0x312   : > { %3359 = vrot.lane.b32.xlu1 %v11409_v59, %s5859_s8  ;;  %v9331_v30 = vpop.permute.xlu1 %3661  ;;  %v5746_v59 = vpop.eup %5745  ;;  %5749 = vrsqrt.f32 %v2879_v40 }
 0x313   : > { %11410 = vst [vmem:[#allocation221_spill] sm:$0xff] %v9331_v30  ;;  %v5748_v23 = vpop.eup %5747  ;;  %5751 = vrsqrt.f32 %v2878_v61  ;;  %v9353_v8 = vmul.f32 %v5746_v59, %v3045_v5  ;;  %v11418_v5 = vld [vmem:[#allocation178_spill] sm:$0xff] }
 0x314   : > { %v9335_v60 = vpop.permute.xlu0 %3666 }
 0x315   : > { %11412 = vst [vmem:[#allocation203_spill] sm:$0xff] %v9335_v60  ;;  %3445 = vrot.lane.b32.xlu0 %v3211_v62, %s5859_s8  ;;  %v3044_v60 = vld [vmem:[%s7711_s19 + $0x218] sm:$0xff] }
 0x316   : > { %3443 = vrot.lane.b32.xlu1 %v3210_v26, %s5859_s8  ;;  %v9342_v44 = vpop.permute.xlu1 %3317  ;;  %v9357_v16 = vmul.f32 %v5748_v23, %v3044_v60  ;;  %v11414_v26 = vld [vmem:[#allocation209_spill] sm:$0xff]  ;;  %v2881_v60 = vadd.f32 0.001, %v8835_v15  ;;  %v2880_v23 = vadd.f32 0.001, %v8762_v1 }
 0x318   : > { %v9345_v30 = vpop.permute.xlu0 %3321  ;;  %v3212_v59 = vmul.f32 %v9357_v16, %v11418_v5  ;;  %5753 = vrsqrt.f32 %v2881_v60 }
 0x319   : > { %3776 = vperm.xlu0 %5481, %v8660_v22   ;;  %5755 = vrsqrt.f32 %v2880_v23  ;;  %v11424_v23 = vld [vmem:[#allocation216_spill] sm:$0xff] }
 0x31a   : > { %3771 = vperm.xlu1 %5482, %v8645_v36   ;;  %v9351_v62 = vpop.permute.xlu1 %3319  ;;  %v11416_v36 = vld [vmem:[#allocation229_spill] sm:$0xff] }
 0x31b   : > { %v3213_v40 = vmul.f32 %v9353_v8, %v11416_v36 }
 0x31c   : > { %v9355_v25 = vpop.permute.xlu0 %3405 }
 0x31d   : > { %3365 = vrot.lane.b32.xlu0 %v8739_v29, %s5859_s8 }
 0x31e   : > { %3363 = vrot.lane.b32.xlu1 %v11414_v26, %s5859_s8  ;;  %v9363_v22 = vpop.permute.xlu1 %3403  ;;  %v5750_v26 = vpop.eup %5749 }
 0x31f   : > { %11415 = vst [vmem:[#allocation191_spill] sm:$0xff] %v9363_v22  ;;  %v5752_v36 = vpop.eup %5751  ;;  %v9388_v15 = vmul.f32 %v5750_v26, %v9380_v51 }
 0x320   : > { %v9367_v61 = vpop.permute.xlu0 %3676 }
 0x321   : > { %11417 = vst [vmem:[#allocation228_spill] sm:$0xff] %v9367_v61  ;;  %3449 = vrot.lane.b32.xlu0 %v3213_v40, %s5859_s8  ;;  %v3046_v61 = vld [vmem:[%s7711_s19 + $0x228] sm:$0xff] }
 0x322   : > { %3447 = vrot.lane.b32.xlu1 %v3212_v59, %s5859_s8  ;;  %v9374_v29 = vpop.permute.xlu1 %3671  ;;  %v9392_v5 = vmul.f32 %v5752_v36, %v3046_v61  ;;  %v2883_v61 = vadd.f32 0.001, %v8919_v39  ;;  %v5754_v36 = vpop.eup %5753 }
 0x323   : > { %11419 = vst [vmem:[#allocation225_spill] sm:$0xff] %v9374_v29  ;;  %v9415_v29 = vld [vmem:[%s7711_s19 + $0x240] sm:$0xff] }
 0x324   : > { %v9377_v22 = vpop.permute.xlu0 %3325  ;;  %v3214_v26 = vmul.f32 %v9392_v5, %v11424_v23  ;;  %11426 = vst [vmem:[#allocation209_spill] sm:$0xff] %v9415_v29  ;;  %5757 = vrsqrt.f32 %v2883_v61  ;;  %v11428_v23 = vld [vmem:[#allocation185_spill] sm:$0xff]  ;;  %v9423_v39 = vmul.f32 %v5754_v36, %v9415_v29  ;;  %v11434_v36 = vld [vmem:[#allocation170_spill] sm:$0xff] }
 0x325   : > { %3786 = vperm.xlu0 %5481, %v8741_v7  }
 0x326   : > { %3781 = vperm.xlu1 %5482, %v8728_v63   ;;  %v9385_v40 = vpop.permute.xlu1 %3323  ;;  %v11422_v63 = vld [vmem:[#allocation197_spill] sm:$0xff] }
 0x327   : > { %v3215_v59 = vmul.f32 %v9388_v15, %v11422_v63  ;;  %v5756_v63 = vpop.eup %5755 }
 0x328   : > { %v9390_v1 = vpop.permute.xlu0 %3409 }
 0x329   : > { %3369 = vrot.lane.b32.xlu0 %v8821_v13, %s5859_s8 }
 0x32a   : > { %3367 = vrot.lane.b32.xlu1 %v8748_v45, %s5859_s8  ;;  %v9398_v7 = vpop.permute.xlu1 %3407  ;;  %v2882_v45 = vadd.f32 0.001, %v8846_v56 }
 0x32b   : > { %11421 = vst [vmem:[#allocation226_spill] sm:$0xff] %v9398_v7  ;;  %v3048_v7 = vld [vmem:[%s7711_s19 + $0x238] sm:$0xff] }
 0x32c   : > { %v9402_v60 = vpop.permute.xlu0 %3686  ;;  %5759 = vrsqrt.f32 %v2882_v45 }
 0x32d   : > { %11423 = vst [vmem:[#allocation223_spill] sm:$0xff] %v9402_v60  ;;  %3453 = vrot.lane.b32.xlu0 %v3215_v59, %s5859_s8  ;;  %v11427_v60 = vld [vmem:[#allocation110_spill] sm:$0xff] }
 0x32e   : > { %3451 = vrot.lane.b32.xlu1 %v3214_v26, %s5859_s8  ;;  %v9409_v13 = vpop.permute.xlu1 %3681  ;;  %v9427_v26 = vmul.f32 %v5756_v63, %v3048_v7  ;;  %v2885_v7 = vadd.f32 0.001, %v9000_v38  ;;  %v2884_v63 = vadd.f32 0.001, %v8930_v50 }
 0x32f   : > { %11425 = vst [vmem:[#allocation99_spill] sm:$0xff] %v9409_v13 }
 0x330   : > { %v9412_v51 = vpop.permute.xlu0 %3329  ;;  %v3216_v29 = vmul.f32 %v9427_v26, %v11434_v36  ;;  %5761 = vrsqrt.f32 %v2885_v7  ;;  %v11439_v7 = vld [vmem:[#allocation98_spill] sm:$0xff] }
 0x331   : > { %3796 = vperm.xlu0 %5481, %v11427_v60   ;;  %v11430_v60 = vld [vmem:[#allocation122_spill] sm:$0xff]  ;;  %5763 = vrsqrt.f32 %v2884_v63 }
 0x332   : > { %3791 = vperm.xlu1 %5482, %v11428_v23   ;;  %v9420_v59 = vpop.permute.xlu1 %3327  ;;  %v11432_v23 = vld [vmem:[#allocation214_spill] sm:$0xff] }
 0x333   : > { %v3217_v45 = vmul.f32 %v9423_v39, %v11432_v23 }
 0x334   : > { %v9425_v56 = vpop.permute.xlu0 %3413 }
 0x335   : > { %11429 = vst [vmem:[#allocation229_spill] sm:$0xff] %v9425_v56  ;;  %3373 = vrot.lane.b32.xlu0 %v8905_v52, %s5859_s8  ;;  %v9450_v56 = vld [vmem:[%s7711_s19 + $0x250] sm:$0xff] }
 0x336   : > { %3371 = vrot.lane.b32.xlu1 %v11430_v60, %s5859_s8  ;;  %v9433_v61 = vpop.permute.xlu1 %3411  ;;  %v5758_v60 = vpop.eup %5757  ;;  %11436 = vst [vmem:[#allocation110_spill] sm:$0xff] %v9450_v56 }
 0x337   : > { %11431 = vst [vmem:[#allocation178_spill] sm:$0xff] %v9433_v61  ;;  %v5760_v23 = vpop.eup %5759  ;;  %v9458_v38 = vmul.f32 %v5758_v60, %v9450_v56  ;;  %v9485_v56 = vld [vmem:[%s7711_s19 + $0x260] sm:$0xff] }
 0x338   : > { %v9437_v13 = vpop.permute.xlu0 %3696  ;;  %11441 = vst [vmem:[#allocation170_spill] sm:$0xff] %v9485_v56 }
 0x339   : > { %11433 = vst [vmem:[#allocation197_spill] sm:$0xff] %v9437_v13  ;;  %3457 = vrot.lane.b32.xlu0 %v3217_v45, %s5859_s8  ;;  %v3050_v13 = vld [vmem:[%s7711_s19 + $0x248] sm:$0xff] }
 0x33a   : > { %3455 = vrot.lane.b32.xlu1 %v3216_v29, %s5859_s8  ;;  %v9444_v52 = vpop.permute.xlu1 %3691  ;;  %v9462_v29 = vmul.f32 %v5760_v23, %v3050_v13  ;;  %v2887_v13 = vadd.f32 0.001, %v9083_v31  ;;  %v5762_v60 = vpop.eup %5761 }
 0x33b   : > { %11435 = vst [vmem:[#allocation216_spill] sm:$0xff] %v9444_v52  ;;  %v9493_v31 = vmul.f32 %v5762_v60, %v9485_v56  ;;  %v11446_v60 = vld [vmem:[#allocation123_spill] sm:$0xff] }
 0x33c   : > { %v9447_v61 = vpop.permute.xlu0 %3333  ;;  %v3218_v63 = vmul.f32 %v9462_v29, %v11439_v7  ;;  %5765 = vrsqrt.f32 %v2887_v13 }
 0x33d   : > { %3806 = vperm.xlu0 %5481, %v8907_v54  }
 0x33e   : > { %3801 = vperm.xlu1 %5482, %v8891_v41   ;;  %v9455_v45 = vpop.permute.xlu1 %3331  ;;  %v3219_v41 = vmul.f32 %v9458_v38, %v8863_v9  ;;  %v5764_v9 = vpop.eup %5763 }
 0x340   : > { %v9460_v50 = vpop.permute.xlu0 %3417 }
 0x341   : > { %3377 = vrot.lane.b32.xlu0 %v8987_v37, %s5859_s8 }
 0x342   : > { %3375 = vrot.lane.b32.xlu1 %v8915_v18, %s5859_s8  ;;  %v9468_v54 = vpop.permute.xlu1 %3415  ;;  %v2886_v18 = vadd.f32 0.001, %v9010_v11 }
 0x343   : > { %11437 = vst [vmem:[#allocation185_spill] sm:$0xff] %v9468_v54  ;;  %v3054_v54 = vld [vmem:[%s7711_s19 + $0x268] sm:$0xff] }
 0x344   : > { %v9472_v36 = vpop.permute.xlu0 %3706  ;;  %5767 = vrsqrt.f32 %v2886_v18 }
 0x345   : > { %11438 = vst [vmem:[#allocation122_spill] sm:$0xff] %v9472_v36  ;;  %3461 = vrot.lane.b32.xlu0 %v3219_v41, %s5859_s8  ;;  %v3052_v36 = vld [vmem:[%s7711_s19 + $0x258] sm:$0xff] }
 0x346   : > { %3459 = vrot.lane.b32.xlu1 %v3218_v63, %s5859_s8  ;;  %v9479_v37 = vpop.permute.xlu1 %3701  ;;  %v9497_v7 = vmul.f32 %v5764_v9, %v3052_v36  ;;  %v2889_v36 = vadd.f32 0.001, %v9167_v10  ;;  %v11448_v9 = vld [vmem:[#allocation169_spill] sm:$0xff] }
 0x347   : > { %11440 = vst [vmem:[#allocation214_spill] sm:$0xff] %v9479_v37  ;;  %v5766_v37 = vpop.eup %5765 }
 0x348   : > { %v9482_v23 = vpop.permute.xlu0 %3337  ;;  %v3220_v56 = vmul.f32 %v9497_v7, %v11446_v60  ;;  %5769 = vrsqrt.f32 %v2889_v36  ;;  %v11451_v60 = vld [vmem:[#allocation172_spill] sm:$0xff] }
 0x349   : > { %3816 = vperm.xlu0 %5481, %v8989_v35   ;;  %v11442_v35 = vld [vmem:[#allocation113_spill] sm:$0xff] }
 0x34a   : > { %3811 = vperm.xlu1 %5482, %v8976_v49   ;;  %v9490_v41 = vpop.permute.xlu1 %3335  ;;  %v11444_v49 = vld [vmem:[#allocation135_spill] sm:$0xff] }
 0x34b   : > { %v3221_v13 = vmul.f32 %v9493_v31, %v11444_v49 }
 0x34c   : > { %v9495_v11 = vpop.permute.xlu0 %3421 }
 0x34d   : > { %3381 = vrot.lane.b32.xlu0 %v9069_v53, %s5859_s8 }
 0x34e   : > { %3379 = vrot.lane.b32.xlu1 %v11442_v35, %s5859_s8  ;;  %v9503_v63 = vpop.permute.xlu1 %3419  ;;  %v2888_v35 = vadd.f32 0.001, %v11448_v9  ;;  %v5768_v49 = vpop.eup %5767 }
 0x34f   : > { %11443 = vst [vmem:[#allocation98_spill] sm:$0xff] %v9503_v63  ;;  %v9520_v63 = vld [vmem:[%s7711_s19 + $0x270] sm:$0xff]  ;;  %v9532_v9 = vmul.f32 %v5768_v49, %v3054_v54  ;;  %v2891_v54 = vadd.f32 0.001, %v9254_v27  ;;  %v2890_v49 = vadd.f32 0.001, %v9178_v20 }
 0x350   : > { %v9507_v18 = vpop.permute.xlu0 %3716  ;;  %11449 = vst [vmem:[#allocation123_spill] sm:$0xff] %v9520_v63  ;;  %5771 = vrsqrt.f32 %v2888_v35  ;;  %v9528_v10 = vmul.f32 %v5766_v37, %v9520_v63  ;;  %v11457_v37 = vld [vmem:[#allocation134_spill] sm:$0xff] }
 0x351   : > { %11445 = vst [vmem:[#allocation113_spill] sm:$0xff] %v9507_v18  ;;  %3465 = vrot.lane.b32.xlu0 %v3221_v13, %s5859_s8  ;;  %v11450_v18 = vld [vmem:[#allocation146_spill] sm:$0xff]  ;;  %v3222_v63 = vmul.f32 %v9532_v9, %v11457_v37  ;;  %5773 = vrsqrt.f32 %v2891_v54 }
 0x352   : > { %3463 = vrot.lane.b32.xlu1 %v3220_v56, %s5859_s8  ;;  %v9514_v53 = vpop.permute.xlu1 %3711  ;;  %5775 = vrsqrt.f32 %v2890_v49  ;;  %v11461_v54 = vld [vmem:[#allocation150_spill] sm:$0xff] }
 0x353   : > { %11447 = vst [vmem:[#allocation135_spill] sm:$0xff] %v9514_v53 }
 0x354   : > { %v9517_v52 = vpop.permute.xlu0 %3341 }
 0x355   : > { %3826 = vperm.xlu0 %5481, %v11450_v18   ;;  %v11453_v18 = vld [vmem:[#allocation171_spill] sm:$0xff] }
 0x356   : > { %3821 = vperm.xlu1 %5482, %v11451_v60   ;;  %v9525_v13 = vpop.permute.xlu1 %3339  ;;  %v11455_v60 = vld [vmem:[#allocation125_spill] sm:$0xff] }
 0x357   : > { %v3223_v35 = vmul.f32 %v9528_v10, %v11455_v60 }
 0x358   : > { %v9530_v56 = vpop.permute.xlu0 %3425 }
 0x359   : > { %11452 = vst [vmem:[#allocation169_spill] sm:$0xff] %v9530_v56  ;;  %3385 = vrot.lane.b32.xlu0 %v9153_v42, %s5859_s8  ;;  %v9555_v56 = vld [vmem:[%s7711_s19 + $0x280] sm:$0xff] }
 0x35a   : > { %3383 = vrot.lane.b32.xlu1 %v11453_v18, %s5859_s8  ;;  %v9538_v36 = vpop.permute.xlu1 %3423  ;;  %v5770_v18 = vpop.eup %5769  ;;  %11459 = vst [vmem:[#allocation125_spill] sm:$0xff] %v9555_v56 }
 0x35b   : > { %11454 = vst [vmem:[#allocation146_spill] sm:$0xff] %v9538_v36  ;;  %v5772_v60 = vpop.eup %5771  ;;  %v9563_v27 = vmul.f32 %v5770_v18, %v9555_v56 }
 0x35c   : > { %v9542_v53 = vpop.permute.xlu0 %3726  ;;  %v5774_v18 = vpop.eup %5773 }
 0x35d   : > { %11456 = vst [vmem:[#allocation172_spill] sm:$0xff] %v9542_v53  ;;  %3469 = vrot.lane.b32.xlu0 %v3223_v35, %s5859_s8  ;;  %v3056_v53 = vld [vmem:[%s7711_s19 + $0x278] sm:$0xff]  ;;  %v5776_v56 = vpop.eup %5775 }
 0x35e   : > { %3467 = vrot.lane.b32.xlu1 %v3222_v63, %s5859_s8  ;;  %v9549_v42 = vpop.permute.xlu1 %3721  ;;  %v9567_v63 = vmul.f32 %v5772_v60, %v3056_v53  ;;  %v9589_v60 = vld [vmem:[%s7711_s19 + $0x290] sm:$0xff] }
 0x35f   : > { %11458 = vst [vmem:[#allocation171_spill] sm:$0xff] %v9549_v42  ;;  %11463 = vst [vmem:[#allocation230_spill] sm:$0xff] %v9589_v60 }
 0x360   : > { %v9552_v36 = vpop.permute.xlu0 %3345  ;;  %v3224_v49 = vmul.f32 %v9567_v63, %v11461_v54 }
 0x361   : > { %3836 = vperm.xlu0 %5481, %v9155_v32  }
 0x362   : > { %3831 = vperm.xlu1 %5482, %v9139_v21   ;;  %v9560_v35 = vpop.permute.xlu1 %3343  ;;  %v3225_v21 = vmul.f32 %v9563_v27, %v9111_v0  ;;  %v9593_v0 = vld [vmem:[%s7711_s19 + $0x288] sm:$0xff] }
 0x363   : > { %11464 = vst [vmem:[#allocation231_spill] sm:$0xff] %v9593_v0 }
 0x364   : > { %v9565_v20 = vpop.permute.xlu0 %3429 }
 0x365   : > { %3389 = vrot.lane.b32.xlu0 %v9240_v4, %s5859_s8  ;;  %v2892_v4 = vadd.f32 0.001, %v9264_v48 }
 0x366   : > { %3387 = vrot.lane.b32.xlu1 %v9163_v3, %s5859_s8  ;;  %v9573_v32 = vpop.permute.xlu1 %3427 }
 0x367   : > { %5777 = vrsqrt.f32 %v2892_v4 }
 0x368   : > { %v9577_v37 = vpop.permute.xlu0 %3736 }
 0x369   : > { %11460 = vst [vmem:[#allocation134_spill] sm:$0xff] %v9577_v37  ;;  %3473 = vrot.lane.b32.xlu0 %v3225_v21, %s5859_s8  ;;  %v9599_v21 = vmul.f32 %v5774_v18, %v9589_v60 }
 0x36a   : > { %3471 = vrot.lane.b32.xlu1 %v3224_v49, %s5859_s8  ;;  %v9583_v53 = vpop.permute.xlu1 %3731  ;;  %v9604_v49 = vmul.f32 %v5776_v56, %v9593_v0 }
 0x36b   : > { %11462 = vst [vmem:[#allocation150_spill] sm:$0xff] %v9583_v53  ;;  %v11478_v53 = vld [vmem:[#allocation210_spill] sm:$0xff] }
 0x36c   : > { %v9586_v3 = vpop.permute.xlu0 %3349  ;;  %v3226_v18 = vmul.f32 %v9604_v49, %v9120_v55 }
 0x36d   : > { %3846 = vperm.xlu0 %5481, %v9243_v17  }
 0x36e   : > { %3841 = vperm.xlu1 %5482, %v9229_v2   ;;  %v9596_v54 = vpop.permute.xlu1 %3347  ;;  %v3227_v2 = vmul.f32 %v9599_v21, %v9192_v34 }
 0x370   : > { %v9601_v48 = vpop.permute.xlu0 %3433 }
 0x371   : > { %3393 = vrot.lane.b32.xlu0 %v9312_v47, %s5859_s8  ;;  %v5778_v0 = vpop.eup %5777 }
 0x372   : > { %3391 = vrot.lane.b32.xlu1 %v9250_v57, %s5859_s8  ;;  %v9610_v17 = vpop.permute.xlu1 %3431  ;;  %v9626_v57 = vld [vmem:[%s7711_s19 + $0x298] sm:$0xff] }
 0x373   : > { %11465 = vst [vmem:[#allocation232_spill] sm:$0xff] %v9610_v17  ;;  %11468 = vst [vmem:[#allocation235_spill] sm:$0xff] %v9626_v57  ;;  %v9634_v55 = vmul.f32 %v5778_v0, %v9626_v57  ;;  %v11474_v57 = vld [vmem:[#allocation218_spill] sm:$0xff] }
 0x374   : > { %v9614_v4 = vpop.permute.xlu0 %3746 }
 0x375   : > { %11466 = vst [vmem:[#allocation233_spill] sm:$0xff] %v9614_v4  ;;  %3477 = vrot.lane.b32.xlu0 %v3227_v2, %s5859_s8  ;;  %v11469_v2 = vld [vmem:[#allocation194_spill] sm:$0xff] }
 0x376   : > { %3475 = vrot.lane.b32.xlu1 %v3226_v18, %s5859_s8  ;;  %v9620_v56 = vpop.permute.xlu1 %3741 }
 0x377   : > { %11467 = vst [vmem:[#allocation234_spill] sm:$0xff] %v9620_v56 }
 0x378   : > { %v9622_v47 = vpop.permute.xlu0 %3353 }
 0x379   : > { %3856 = vperm.xlu0 %5481, %v9315_v33   ;;  %v3228_v33 = vmul.f32 %v9634_v55, %v9200_v19 }
 0x37a   : > { %3851 = vperm.xlu1 %5482, %v9303_v46   ;;  %v9629_v34 = vpop.permute.xlu1 %3351  ;;  %v11472_v46 = vld [vmem:[#allocation184_spill] sm:$0xff] }
 0x37c   : > { %v9631_v4 = vpop.permute.xlu0 %3437 }
 0x37d   : > { %3866 = vperm.xlu0 %5481, %v11469_v2   ;;  %v11475_v2 = vld [vmem:[#allocation202_spill] sm:$0xff] }
 0x37e   : > { %3395 = vrot.lane.b32.xlu1 %v9325_v43, %s5859_s8  ;;  %v9639_v18 = vpop.permute.xlu1 %3435 }
 0x37f   : > { %11470 = vst [vmem:[#allocation194_spill] sm:$0xff] %v9639_v18  ;;  %v11485_v18 = vld [vmem:[#allocation111_spill] sm:$0xff] }
 0x380   : > { %v9641_v37 = vpop.permute.xlu0 %3756 }
 0x381   : > { %11471 = vst [vmem:[#allocation236_spill] sm:$0xff] %v9641_v37  ;;  %3876 = vperm.xlu0 %5481, %v11472_v46   ;;  %v11477_v37 = vld [vmem:[#allocation204_spill] sm:$0xff] }
 0x382   : > { %3479 = vrot.lane.b32.xlu1 %v3228_v33, %s5859_s8  ;;  %v9647_v60 = vpop.permute.xlu1 %3751  ;;  %v11481_v33 = vld [vmem:[#allocation219_spill] sm:$0xff] }
 0x383   : > { %11473 = vst [vmem:[#allocation184_spill] sm:$0xff] %v9647_v60  ;;  %v11482_v60 = vld [vmem:[#allocation211_spill] sm:$0xff] }
 0x384   : > { %v9649_v0 = vpop.permute.xlu0 %3357 }
 0x385   : > { %3886 = vperm.xlu0 %5481, %v11474_v57  }
 0x386   : > { %3871 = vperm.xlu1 %5482, %v11475_v2   ;;  %v9653_v43 = vpop.permute.xlu1 %3355  ;;  %v11484_v2 = vld [vmem:[#allocation124_spill] sm:$0xff] }
 0x388   : > { %v9655_v56 = vpop.permute.xlu0 %3441 }
 0x389   : > { %11476 = vst [vmem:[#allocation218_spill] sm:$0xff] %v9655_v56  ;;  %3896 = vperm.xlu0 %5481, %v11477_v37  }
 0x38a   : > { %3881 = vperm.xlu1 %5482, %v11478_v53   ;;  %v9659_v19 = vpop.permute.xlu1 %3439  ;;  %v11487_v53 = vld [vmem:[#allocation137_spill] sm:$0xff] }
 0x38b   : > { %11479 = vst [vmem:[#allocation202_spill] sm:$0xff] %v9659_v19  ;;  %v11488_v19 = vld [vmem:[#allocation112_spill] sm:$0xff] }
 0x38c   : > { %v9661_v46 = vpop.permute.xlu0 %3766 }
 0x38d   : > { %11480 = vst [vmem:[#allocation204_spill] sm:$0xff] %v9661_v46  ;;  %3906 = vperm.xlu0 %5481, %v11481_v33  }
 0x38e   : > { %3891 = vperm.xlu1 %5482, %v11482_v60   ;;  %v9665_v42 = vpop.permute.xlu1 %3761  ;;  %v11491_v60 = vld [vmem:[#allocation168_spill] sm:$0xff] }
 0x38f   : > { %11483 = vst [vmem:[#allocation210_spill] sm:$0xff] %v9665_v42  ;;  %v11492_v42 = vld [vmem:[#allocation136_spill] sm:$0xff] }
 0x390   : > { %v9667_v57 = vpop.permute.xlu0 %3361 }
 0x391   : > { %3916 = vperm.xlu0 %5481, %v11484_v2  }
 0x392   : > { %3901 = vperm.xlu1 %5482, %v11485_v18   ;;  %v9671_v17 = vpop.permute.xlu1 %3359  ;;  %v11494_v18 = vld [vmem:[#allocation147_spill] sm:$0xff] }
 0x394   : > { %v9673_v37 = vpop.permute.xlu0 %3445 }
 0x395   : > { %11486 = vst [vmem:[#allocation219_spill] sm:$0xff] %v9673_v37  ;;  %3926 = vperm.xlu0 %5481, %v11487_v53  }
 0x396   : > { %3911 = vperm.xlu1 %5482, %v11488_v19   ;;  %v9677_v46 = vpop.permute.xlu1 %3443  ;;  %v11496_v19 = vld [vmem:[#allocation149_spill] sm:$0xff] }
 0x397   : > { %11489 = vst [vmem:[#allocation211_spill] sm:$0xff] %v9677_v46 }
 0x398   : > { %v9679_v33 = vpop.permute.xlu0 %3776 }
 0x399   : > { %11490 = vst [vmem:[#allocation124_spill] sm:$0xff] %v9679_v33  ;;  %3936 = vperm.xlu0 %5481, %v11491_v60  }
 0x39a   : > { %3921 = vperm.xlu1 %5482, %v11492_v42   ;;  %v9683_v56 = vpop.permute.xlu1 %3771  ;;  %v11498_v42 = vld [vmem:[#allocation220_spill] sm:$0xff] }
 0x39b   : > { %11493 = vst [vmem:[#allocation111_spill] sm:$0xff] %v9683_v56  ;;  %v11499_v56 = vld [vmem:[#allocation158_spill] sm:$0xff] }
 0x39c   : > { %v9685_v2 = vpop.permute.xlu0 %3365 }
 0x39d   : > { %3946 = vperm.xlu0 %5481, %v9137_v12  }
 0x39e   : > { %3931 = vperm.xlu1 %5482, %v11494_v18   ;;  %v9689_v37 = vpop.permute.xlu1 %3363  ;;  %v11501_v18 = vld [vmem:[#allocation148_spill] sm:$0xff] }
 0x3a0   : > { %v9691_v53 = vpop.permute.xlu0 %3449 }
 0x3a1   : > { %11495 = vst [vmem:[#allocation137_spill] sm:$0xff] %v9691_v53  ;;  %3956 = vperm.xlu0 %5481, %v9204_v58  }
 0x3a2   : > { %3941 = vperm.xlu1 %5482, %v11496_v19   ;;  %v9695_v33 = vpop.permute.xlu1 %3447  ;;  %v11502_v19 = vld [vmem:[#allocation188_spill] sm:$0xff] }
 0x3a4   : > { %v9697_v60 = vpop.permute.xlu0 %3786 }
 0x3a5   : > { %11497 = vst [vmem:[#allocation112_spill] sm:$0xff] %v9697_v60  ;;  %3966 = vperm.xlu0 %5481, %v11498_v42  }
 0x3a6   : > { %3951 = vperm.xlu1 %5482, %v11499_v56   ;;  %v9701_v46 = vpop.permute.xlu1 %3781 }
 0x3a7   : > { %11500 = vst [vmem:[#allocation168_spill] sm:$0xff] %v9701_v46  ;;  %v5783_v46 = vld [vmem:[%s7711_s19 + $0x10] sm:$0xff] }
 0x3a8   : > { %v9703_v12 = vpop.permute.xlu0 %3369 }
 0x3a9   : > { %3976 = vperm.xlu0 %5481, %v9321_v14  }
 0x3aa   : > { %3961 = vperm.xlu1 %5482, %v11501_v18   ;;  %v9707_v53 = vpop.permute.xlu1 %3367 }
 0x3ac   : > { %v9709_v58 = vpop.permute.xlu0 %3453 }
 0x3ad   : > { %3986 = vperm.xlu0 %5481, %v9357_v16  }
 0x3ae   : > { %3971 = vperm.xlu1 %5482, %v11502_v19   ;;  %v9713_v60 = vpop.permute.xlu1 %3451 }
 0x3b0   : > { %v9715_v42 = vpop.permute.xlu0 %3796 }
 0x3b1   : > { %11503 = vst [vmem:[#allocation136_spill] sm:$0xff] %v9715_v42  ;;  %3996 = vperm.xlu0 %5481, %v9392_v5   ;;  %v5780_v42 = vld [vmem:[%s7711_s19 + $0x20] sm:$0xff] }
 0x3b2   : > { %3981 = vperm.xlu1 %5482, %v9317_v6   ;;  %v9719_v56 = vpop.permute.xlu1 %3791 }
 0x3b3   : > { %11504 = vst [vmem:[#allocation147_spill] sm:$0xff] %v9719_v56 }
 0x3b4   : > { %v9721_v14 = vpop.permute.xlu0 %3373 }
 0x3b5   : > { %4006 = vperm.xlu0 %5481, %v9427_v26  }
 0x3b6   : > { %3991 = vperm.xlu1 %5482, %v9353_v8   ;;  %v9725_v18 = vpop.permute.xlu1 %3371 }
 0x3b8   : > { %v9727_v16 = vpop.permute.xlu0 %3457 }
 0x3b9   : > { %4016 = vperm.xlu0 %5481, %v9462_v29  }
 0x3ba   : > { %4001 = vperm.xlu1 %5482, %v9388_v15   ;;  %v9731_v19 = vpop.permute.xlu1 %3455 }
 0x3bc   : > { %v9733_v5 = vpop.permute.xlu0 %3806 }
 0x3bd   : > { %11505 = vst [vmem:[#allocation149_spill] sm:$0xff] %v9733_v5  ;;  %4026 = vperm.xlu0 %5481, %v9497_v7  }
 0x3be   : > { %4011 = vperm.xlu1 %5482, %v9423_v39   ;;  %v9737_v6 = vpop.permute.xlu1 %3801 }
 0x3bf   : > { %11506 = vst [vmem:[#allocation220_spill] sm:$0xff] %v9737_v6  ;;  %v11510_v6 = vld [vmem:[#allocation183_spill] sm:$0xff] }
 0x3c0   : > { %v9739_v26 = vpop.permute.xlu0 %3377 }
 0x3c1   : > { %4036 = vperm.xlu0 %5481, %v9532_v9  }
 0x3c2   : > { %4021 = vperm.xlu1 %5482, %v9458_v38   ;;  %v9743_v8 = vpop.permute.xlu1 %3375 }
 0x3c4   : > { %v9745_v15 = vpop.permute.xlu0 %3461 }
 0x3c5   : > { %4046 = vperm.xlu0 %5481, %v9567_v63   ;;  %v11509_v63 = vld [vmem:[#allocation227_spill] sm:$0xff] }
 0x3c6   : > { %4031 = vperm.xlu1 %5482, %v9493_v31   ;;  %v9749_v29 = vpop.permute.xlu1 %3459  ;;  %v5779_v31 = vld [vmem:[%s7711_s19 + $0x8] sm:$0xff] }
 0x3c7   : > { %v3566_v5 = vsub.f32 %v5779_v31, %v11509_v63 }
 0x3c8   : > { %v9751_v39 = vpop.permute.xlu0 %3816 }
 0x3c9   : > { %11507 = vst [vmem:[#allocation158_spill] sm:$0xff] %v9751_v39  ;;  %4056 = vperm.xlu0 %5481, %v9604_v49   ;;  %v5860_v49 = vmov 1  }
 0x3ca   : > { %4041 = vperm.xlu1 %5482, %v9528_v10   ;;  %v9755_v7 = vpop.permute.xlu1 %3811 }
 0x3cb   : > { %11508 = vst [vmem:[#allocation148_spill] sm:$0xff] %v9755_v7  ;;  %v5781_v7 = vld [vmem:[%s7711_s19] sm:$0xff] }
 0x3cc   : > { %v9757_v38 = vpop.permute.xlu0 %3381  ;;  %v3565_v31 = vsub.f32 %v5781_v7, %v11510_v6  ;;  %v5784_v6 = vld [vmem:[%s7711_s19 + $0x40] sm:$0xff] }
 0x3cd   : > { %4066 = vperm.xlu0 %5481, %v9634_v55   ;;  %v3569_v55 = vsub.f32 %v5780_v42, %v9345_v30  ;;  %v3567_v30 = vsub.f32 %v5783_v46, %v9342_v44  ;;  %v3573_v7 = vsub.f32 %v5784_v6, %v9412_v51  ;;  %v5788_v6 = vld [vmem:[%s7711_s19 + $0x60] sm:$0xff] }
 0x3ce   : > { %4051 = vperm.xlu1 %5482, %v9563_v27   ;;  %v9761_v9 = vpop.permute.xlu1 %3379 }
 0x3d0   : > { %v9765_v39 = vpop.permute.xlu0 %3465 }
 0x3d1   : > { %5484 = vset.pattern.permute.xlu0 %v5860_v49 }
 0x3d2   : > { %4244 = vperm.xlu0 %5484, %v3566_v5   ;;  %4061 = vperm.xlu1 %5482, %v9599_v21   ;;  %v9768_v10 = vpop.permute.xlu1 %3463  ;;  %v5782_v5 = vld [vmem:[%s7711_s19 + $0x30] sm:$0xff] }
 0x3d3   : > { %v3571_v21 = vsub.f32 %v5782_v5, %v9377_v22  ;;  %v5786_v5 = vld [vmem:[%s7711_s19 + $0x50] sm:$0xff] }
 0x3d4   : > { %v9772_v27 = vpop.permute.xlu0 %3826  ;;  %v3575_v44 = vsub.f32 %v5786_v5, %v9447_v61  ;;  %v5790_v5 = vld [vmem:[%s7711_s19 + $0x70] sm:$0xff] }
 0x3d6   : > { %4259 = vperm.xlu0 %5484, %v3569_v55   ;;  %5483 = vset.pattern.permute.xlu1 %v5860_v49  ;;  %v9776_v63 = vpop.permute.xlu1 %3821  ;;  %v5785_v55 = vld [vmem:[%s7711_s19 + $0x18] sm:$0xff] }
 0x3d7   : > { %4239 = vperm.xlu1 %5483, %v3565_v31   ;;  %v3568_v22 = vsub.f32 %v5785_v55, %v9351_v62  ;;  %v3577_v62 = vsub.f32 %v5788_v6, %v9482_v23  ;;  %v5789_v55 = vld [vmem:[%s7711_s19 + $0x38] sm:$0xff]  ;;  %v5792_v6 = vld [vmem:[%s7711_s19 + $0x80] sm:$0xff] }
 0x3d8   : > { %v9780_v56 = vpop.permute.xlu0 %3385  ;;  %v3572_v61 = vsub.f32 %v5789_v55, %v9420_v59  ;;  %v3581_v59 = vsub.f32 %v5792_v6, %v9552_v36  ;;  %v5793_v55 = vld [vmem:[%s7711_s19 + $0x58] sm:$0xff]  ;;  %v5796_v6 = vld [vmem:[%s7711_s19 + $0xa0] sm:$0xff] }
 0x3da   : > { %4269 = vperm.xlu0 %5484, %v3571_v21   ;;  %v9784_v42 = vpop.permute.xlu1 %3383  ;;  %v5787_v21 = vld [vmem:[%s7711_s19 + $0x28] sm:$0xff] }
 0x3db   : > { %4249 = vperm.xlu1 %5483, %v3567_v30   ;;  %v3570_v51 = vsub.f32 %v5787_v21, %v9385_v40  ;;  %v3579_v40 = vsub.f32 %v5790_v5, %v9517_v52  ;;  %v5791_v21 = vld [vmem:[%s7711_s19 + $0x48] sm:$0xff]  ;;  %v3576_v52 = vsub.f32 %v5793_v55, %v9490_v41  ;;  %v5794_v5 = vld [vmem:[%s7711_s19 + $0x90] sm:$0xff]  ;;  %v3585_v41 = vsub.f32 %v5796_v6, %v9622_v47  ;;  %v5797_v55 = vld [vmem:[%s7711_s19 + $0x78] sm:$0xff] }
 0x3dc   : > { %v9788_v49 = vpop.permute.xlu0 %3469  ;;  %v3574_v23 = vsub.f32 %v5791_v21, %v9455_v45  ;;  %v3583_v45 = vsub.f32 %v5794_v5, %v9586_v3  ;;  %v5795_v21 = vld [vmem:[%s7711_s19 + $0x68] sm:$0xff]  ;;  %v3580_v3 = vsub.f32 %v5797_v55, %v9560_v35  ;;  %v5798_v5 = vld [vmem:[%s7711_s19 + $0xb0] sm:$0xff]  ;;  %v5800_v6 = vld [vmem:[%s7711_s19 + $0xc0] sm:$0xff] }
 0x3dd   : > { %v3578_v36 = vsub.f32 %v5795_v21, %v9525_v13  ;;  %v3587_v13 = vsub.f32 %v5798_v5, %v9649_v0  ;;  %v5799_v21 = vld [vmem:[%s7711_s19 + $0x88] sm:$0xff]  ;;  %v3589_v35 = vsub.f32 %v5800_v6, %v9667_v57  ;;  %v5801_v55 = vld [vmem:[%s7711_s19 + $0x98] sm:$0xff]  ;;  %v5802_v5 = vld [vmem:[%s7711_s19 + $0xd0] sm:$0xff] }
 0x3de   : > { %4279 = vperm.xlu0 %5484, %v3573_v7   ;;  %v9792_v31 = vpop.permute.xlu1 %3467  ;;  %v3582_v47 = vsub.f32 %v5799_v21, %v9596_v54  ;;  %v3584_v0 = vsub.f32 %v5801_v55, %v9629_v34  ;;  %v3591_v54 = vsub.f32 %v5802_v5, %v9685_v2  ;;  %v5803_v21 = vld [vmem:[%s7711_s19 + $0xa8] sm:$0xff]  ;;  %v5804_v6 = vld [vmem:[%s7711_s19 + $0xe0] sm:$0xff]  ;;  %v5805_v55 = vld [vmem:[%s7711_s19 + $0xb8] sm:$0xff] }
 0x3df   : > { %4254 = vperm.xlu1 %5483, %v3568_v22   ;;  %v3586_v57 = vsub.f32 %v5803_v21, %v9653_v43  ;;  %v3593_v34 = vsub.f32 %v5804_v6, %v9703_v12  ;;  %v3588_v2 = vsub.f32 %v5805_v55, %v9671_v17  ;;  %v5806_v5 = vld [vmem:[%s7711_s19 + $0xf0] sm:$0xff]  ;;  %v5807_v21 = vld [vmem:[%s7711_s19 + $0xc8] sm:$0xff]  ;;  %v5808_v6 = vld [vmem:[%s7711_s19 + $0x100] sm:$0xff] }
 0x3e0   : > { %v9796_v46 = vpop.permute.xlu0 %3836  ;;  %v3595_v43 = vsub.f32 %v5806_v5, %v9721_v14  ;;  %v3590_v12 = vsub.f32 %v5807_v21, %v9689_v37  ;;  %v3597_v17 = vsub.f32 %v5808_v6, %v9739_v26  ;;  %v5809_v55 = vld [vmem:[%s7711_s19 + $0xd8] sm:$0xff]  ;;  %v5810_v5 = vld [vmem:[%s7711_s19 + $0x110] sm:$0xff]  ;;  %v5811_v21 = vld [vmem:[%s7711_s19 + $0xe8] sm:$0xff] }
 0x3e1   : > { %v3592_v14 = vsub.f32 %v5809_v55, %v9707_v53  ;;  %v3599_v37 = vsub.f32 %v5810_v5, %v9757_v38  ;;  %v5812_v6 = vld [vmem:[%s7711_s19 + $0x120] sm:$0xff]  ;;  %v5813_v55 = vld [vmem:[%s7711_s19 + $0xf8] sm:$0xff] }
 0x3e2   : > { %4289 = vperm.xlu0 %5484, %v3575_v44   ;;  %v9800_v30 = vpop.permute.xlu1 %3831  ;;  %v3601_v53 = vsub.f32 %v5812_v6, %v9780_v56 }
 0x3e3   : > { %4264 = vperm.xlu1 %5483, %v3570_v51  }
 0x3e4   : > { %v9804_v7 = vpop.permute.xlu0 %3389 }
 0x3e6   : > { %4299 = vperm.xlu0 %5484, %v3577_v62   ;;  %v9808_v22 = vpop.permute.xlu1 %3387 }
 0x3e7   : > { %4274 = vperm.xlu1 %5483, %v3572_v61  }
 0x3e8   : > { %v9812_v44 = vpop.permute.xlu0 %3473 }
 0x3ea   : > { %4309 = vperm.xlu0 %5484, %v3579_v40   ;;  %v9816_v51 = vpop.permute.xlu1 %3471 }
 0x3eb   : > { %4284 = vperm.xlu1 %5483, %v3574_v23  }
 0x3ec   : > { %v9820_v62 = vpop.permute.xlu0 %3846 }
 0x3ee   : > { %4319 = vperm.xlu0 %5484, %v3581_v59   ;;  %v9824_v61 = vpop.permute.xlu1 %3841 }
 0x3ef   : > { %4294 = vperm.xlu1 %5483, %v3576_v52  }
 0x3f0   : > { %v9828_v40 = vpop.permute.xlu0 %3393 }
 0x3f2   : > { %4329 = vperm.xlu0 %5484, %v3583_v45   ;;  %v9832_v23 = vpop.permute.xlu1 %3391 }
 0x3f3   : > { %4304 = vperm.xlu1 %5483, %v3578_v36  }
 0x3f4   : > { %v9836_v59 = vpop.permute.xlu0 %3477 }
 0x3f6   : > { %4339 = vperm.xlu0 %5484, %v3585_v41   ;;  %v9840_v52 = vpop.permute.xlu1 %3475 }
 0x3f7   : > { %4314 = vperm.xlu1 %5483, %v3580_v3  }
 0x3f8   : > { %v9844_v45 = vpop.permute.xlu0 %3856 }
 0x3fa   : > { %4349 = vperm.xlu0 %5484, %v3587_v13   ;;  %v9848_v36 = vpop.permute.xlu1 %3851 }
 0x3fb   : > { %4324 = vperm.xlu1 %5483, %v3582_v47  }
 0x3fc   : > { %v9852_v41 = vpop.permute.xlu0 %3866 }
 0x3fe   : > { %4359 = vperm.xlu0 %5484, %v3589_v35   ;;  %v9856_v3 = vpop.permute.xlu1 %3395 }
 0x3ff   : > { %4334 = vperm.xlu1 %5483, %v3584_v0  }
 0x400   : > { %v9860_v13 = vpop.permute.xlu0 %3876 }
 0x402   : > { %4369 = vperm.xlu0 %5484, %v3591_v54   ;;  %v9864_v47 = vpop.permute.xlu1 %3479 }
 0x403   : > { %4344 = vperm.xlu1 %5483, %v3586_v57  }
 0x404   : > { %v9868_v35 = vpop.permute.xlu0 %3886 }
 0x406   : > { %4379 = vperm.xlu0 %5484, %v3593_v34   ;;  %v9872_v0 = vpop.permute.xlu1 %3871 }
 0x407   : > { %4354 = vperm.xlu1 %5483, %v3588_v2  }
 0x408   : > { %v9876_v54 = vpop.permute.xlu0 %3896 }
 0x40a   : > { %4389 = vperm.xlu0 %5484, %v3595_v43   ;;  %v9880_v57 = vpop.permute.xlu1 %3881 }
 0x40b   : > { %4364 = vperm.xlu1 %5483, %v3590_v12   ;;  %v3594_v12 = vsub.f32 %v5811_v21, %v9725_v18  ;;  %v11511_v18 = vld [vmem:[#allocation189_spill] sm:$0xff]  ;;  %v5814_v21 = vld [vmem:[%s7711_s19 + $0x108] sm:$0xff] }
 0x40c   : > { %v9884_v34 = vpop.permute.xlu0 %3906  ;;  %v3603_v5 = vsub.f32 %v11511_v18, %v9804_v7  ;;  %v3598_v56 = vsub.f32 %v5814_v21, %v9761_v9  ;;  %v11513_v9 = vld [vmem:[#allocation205_spill] sm:$0xff]  ;;  %v5817_v21 = vld [vmem:[%s7711_s19 + $0x128] sm:$0xff] }
 0x40e   : > { %4399 = vperm.xlu0 %5484, %v3597_v17   ;;  %v9888_v2 = vpop.permute.xlu1 %3891 }
 0x40f   : > { %4374 = vperm.xlu1 %5483, %v3592_v14   ;;  %v3596_v14 = vsub.f32 %v5813_v55, %v9743_v8  ;;  %v3605_v8 = vsub.f32 %v9289_v24, %v9828_v40  ;;  %v5818_v40 = vld [vmem:[%s7711_s19 + $0x160] sm:$0xff] }
 0x410   : > { %v9892_v43 = vpop.permute.xlu0 %3916 }
 0x412   : > { %4409 = vperm.xlu0 %5484, %v3599_v37   ;;  %v9896_v26 = vpop.permute.xlu1 %3901 }
 0x413   : > { %4384 = vperm.xlu1 %5483, %v3594_v12  }
 0x414   : > { %v9900_v17 = vpop.permute.xlu0 %3926 }
 0x416   : > { %4419 = vperm.xlu0 %5484, %v3601_v53   ;;  %v9904_v38 = vpop.permute.xlu1 %3911  ;;  %v5815_v53 = vld [vmem:[%s7711_s19 + $0x118] sm:$0xff] }
 0x417   : > { %4394 = vperm.xlu1 %5483, %v3596_v14   ;;  %v3600_v55 = vsub.f32 %v5815_v53, %v9784_v42  ;;  %v5816_v14 = vld [vmem:[%s7711_s19 + $0x150] sm:$0xff]  ;;  %v3609_v42 = vsub.f32 %v5818_v40, %v9319_v28  ;;  %v11516_v53 = vld [vmem:[#allocation187_spill] sm:$0xff]  ;;  %v5820_v40 = vld [vmem:[%s7711_s19 + $0x180] sm:$0xff] }
 0x418   : > { %v9908_v37 = vpop.permute.xlu0 %3936  ;;  %v3607_v18 = vsub.f32 %v5816_v14, %v11513_v9 }
 0x41a   : > { %4429 = vperm.xlu0 %5484, %v3603_v5   ;;  %v9912_v12 = vpop.permute.xlu1 %3921 }
 0x41b   : > { %4404 = vperm.xlu1 %5483, %v3598_v56   ;;  %v3602_v56 = vsub.f32 %v5817_v21, %v9808_v22  ;;  %v5819_v22 = vld [vmem:[%s7711_s19 + $0x170] sm:$0xff]  ;;  %v11518_v21 = vld [vmem:[#allocation206_spill] sm:$0xff] }
 0x41c   : > { %v9916_v6 = vpop.permute.xlu0 %3946  ;;  %v3611_v9 = vsub.f32 %v5819_v22, %v9355_v25  ;;  %v3606_v28 = vsub.f32 %v11518_v21, %v9856_v3  ;;  %v5822_v22 = vld [vmem:[%s7711_s19 + $0x190] sm:$0xff]  ;;  %v11522_v3 = vld [vmem:[#allocation229_spill] sm:$0xff] }
 0x41d   : > { %11512 = vst [vmem:[#allocation188_spill] sm:$0xff] %v9916_v6  ;;  %v11524_v6 = vld [vmem:[#allocation119_spill] sm:$0xff] }
 0x41e   : > { %4439 = vperm.xlu0 %5484, %v3605_v8   ;;  %v9920_v7 = vpop.permute.xlu1 %3931 }
 0x41f   : > { %4414 = vperm.xlu1 %5483, %v3600_v55   ;;  %v3604_v55 = vsub.f32 %v11516_v53, %v9832_v23  ;;  %v3613_v23 = vsub.f32 %v5820_v40, %v9390_v1  ;;  %v5821_v53 = vld [vmem:[%s7711_s19 + $0x158] sm:$0xff] }
 0x420   : > { %v9924_v5 = vpop.permute.xlu0 %3956  ;;  %v11526_v40 = vld [vmem:[#allocation121_spill] sm:$0xff] }
 0x421   : > { %11514 = vst [vmem:[#allocation227_spill] sm:$0xff] %v9924_v5 }
 0x422   : > { %4449 = vperm.xlu0 %5484, %v3607_v18   ;;  %v9928_v24 = vpop.permute.xlu1 %3941 }
 0x423   : > { %4424 = vperm.xlu1 %5483, %v3602_v56  }
 0x424   : > { %v9932_v8 = vpop.permute.xlu0 %3966 }
 0x425   : > { %11515 = vst [vmem:[#allocation183_spill] sm:$0xff] %v9932_v8 }
 0x426   : > { %4459 = vperm.xlu0 %5484, %v3609_v42   ;;  %v9936_v14 = vpop.permute.xlu1 %3951 }
 0x427   : > { %4434 = vperm.xlu1 %5483, %v3604_v55   ;;  %v11520_v55 = vld [vmem:[#allocation224_spill] sm:$0xff] }
 0x428   : > { %v9940_v18 = vpop.permute.xlu0 %3976  ;;  %v3608_v8 = vsub.f32 %v5821_v53, %v11520_v55 }
 0x429   : > { %11517 = vst [vmem:[#allocation189_spill] sm:$0xff] %v9940_v18  ;;  %v5823_v18 = vld [vmem:[%s7711_s19 + $0x168] sm:$0xff] }
 0x42a   : > { %4469 = vperm.xlu0 %5484, %v3611_v9   ;;  %v9944_v56 = vpop.permute.xlu1 %3961  ;;  %v3615_v9 = vsub.f32 %v5822_v22, %v11522_v3  ;;  %v5825_v22 = vld [vmem:[%s7711_s19 + $0x178] sm:$0xff]  ;;  %v11528_v3 = vld [vmem:[#allocation226_spill] sm:$0xff] }
 0x42b   : > { %4444 = vperm.xlu1 %5483, %v3606_v28   ;;  %v11523_v28 = vld [vmem:[#allocation191_spill] sm:$0xff] }
 0x42c   : > { %v9948_v42 = vpop.permute.xlu0 %3986  ;;  %v3610_v5 = vsub.f32 %v5823_v18, %v11523_v28  ;;  %v11529_v18 = vld [vmem:[#allocation131_spill] sm:$0xff] }
 0x42d   : > { %11519 = vst [vmem:[#allocation205_spill] sm:$0xff] %v9948_v42 }
 0x42e   : > { %4479 = vperm.xlu0 %5484, %v3613_v23   ;;  %v9952_v25 = vpop.permute.xlu1 %3971 }
 0x42f   : > { %11521 = vst [vmem:[#allocation187_spill] sm:$0xff] %v9952_v25  ;;  %4454 = vperm.xlu1 %5483, %v3608_v8   ;;  %v5824_v8 = vld [vmem:[%s7711_s19 + $0x1a0] sm:$0xff]  ;;  %v3612_v25 = vsub.f32 %v5825_v22, %v11528_v3  ;;  %v11535_v22 = vld [vmem:[#allocation143_spill] sm:$0xff] }
 0x430   : > { %v3997_v21 = vpop.permute.xlu0 %3996  ;;  %v3617_v53 = vsub.f32 %v5824_v8, %v9460_v50  ;;  %v11534_v8 = vld [vmem:[#allocation178_spill] sm:$0xff] }
 0x431   : > { %v9959_v1 = vmul.f32 %v3997_v21, %v11524_v6  ;;  %v9962_v42 = vmul.f32 %v3997_v21, %v11526_v40  ;;  %v11531_v6 = vld [vmem:[#allocation133_spill] sm:$0xff]  ;;  %v5827_v40 = vld [vmem:[%s7711_s19 + $0x188] sm:$0xff] }
 0x432   : > { %4489 = vperm.xlu0 %5484, %v3615_v9   ;;  %v9964_v23 = vpop.permute.xlu1 %3981 }
 0x433   : > { %11525 = vst [vmem:[#allocation206_spill] sm:$0xff] %v9959_v1  ;;  %11527 = vst [vmem:[#allocation224_spill] sm:$0xff] %v9962_v42  ;;  %4464 = vperm.xlu1 %5483, %v3610_v5   ;;  %v5826_v5 = vld [vmem:[%s7711_s19 + $0x1b0] sm:$0xff]  ;;  %v3614_v42 = vsub.f32 %v5827_v40, %v11534_v8  ;;  %v11541_v40 = vld [vmem:[#allocation157_spill] sm:$0xff] }
 0x434   : > { %v4007_v55 = vpop.permute.xlu0 %4006  ;;  %v3619_v21 = vsub.f32 %v5826_v5, %v9495_v11  ;;  %v5829_v5 = vld [vmem:[%s7711_s19 + $0x198] sm:$0xff] }
 0x435   : > { %v9971_v28 = vmul.f32 %v4007_v55, %v11529_v18  ;;  %v9974_v1 = vmul.f32 %v4007_v55, %v11531_v6  ;;  %v11537_v18 = vld [vmem:[#allocation145_spill] sm:$0xff] }
 0x436   : > { %4499 = vperm.xlu0 %5484, %v3617_v53   ;;  %v9976_v9 = vpop.permute.xlu1 %3991  ;;  %v11539_v55 = vld [vmem:[#allocation169_spill] sm:$0xff] }
 0x437   : > { %11530 = vst [vmem:[#allocation229_spill] sm:$0xff] %v9971_v28  ;;  %11532 = vst [vmem:[#allocation191_spill] sm:$0xff] %v9974_v1  ;;  %4474 = vperm.xlu1 %5483, %v3612_v25   ;;  %v5828_v25 = vld [vmem:[%s7711_s19 + $0x1c0] sm:$0xff]  ;;  %v11540_v1 = vld [vmem:[#allocation185_spill] sm:$0xff] }
 0x438   : > { %11533 = vst [vmem:[#allocation119_spill] sm:$0xff] %v9976_v9  ;;  %v4017_v50 = vpop.permute.xlu0 %4016  ;;  %v3621_v6 = vsub.f32 %v5828_v25, %v11539_v55  ;;  %v3616_v9 = vsub.f32 %v5829_v5, %v11540_v1  ;;  %v5830_v25 = vld [vmem:[%s7711_s19 + $0x1d0] sm:$0xff]  ;;  %v5831_v5 = vld [vmem:[%s7711_s19 + $0x1a8] sm:$0xff] }
 0x439   : > { %v9983_v3 = vmul.f32 %v4017_v50, %v11535_v22  ;;  %v9986_v28 = vmul.f32 %v4017_v50, %v11537_v18  ;;  %v11543_v22 = vld [vmem:[#allocation159_spill] sm:$0xff]  ;;  %v3623_v1 = vsub.f32 %v5830_v25, %v9565_v20  ;;  %v5832_v20 = vld [vmem:[%s7711_s19 + $0x1e0] sm:$0xff] }
 0x43a   : > { %4509 = vperm.xlu0 %5484, %v3619_v21   ;;  %v9988_v53 = vpop.permute.xlu1 %4001  ;;  %v11545_v21 = vld [vmem:[#allocation139_spill] sm:$0xff]  ;;  %v3625_v25 = vsub.f32 %v5832_v20, %v9601_v48  ;;  %v5834_v48 = vld [vmem:[%s7711_s19 + $0x1f0] sm:$0xff] }
 0x43b   : > { %11536 = vst [vmem:[#allocation121_spill] sm:$0xff] %v9983_v3  ;;  %11538 = vst [vmem:[#allocation226_spill] sm:$0xff] %v9986_v28  ;;  %4484 = vperm.xlu1 %5483, %v3614_v42   ;;  %v11547_v42 = vld [vmem:[#allocation141_spill] sm:$0xff]  ;;  %v3627_v20 = vsub.f32 %v5834_v48, %v9631_v4  ;;  %v5836_v4 = vld [vmem:[%s7711_s19 + $0x200] sm:$0xff] }
 0x43c   : > { %v4027_v11 = vpop.permute.xlu0 %4026  ;;  %v11575_v48 = vld [vmem:[#allocation218_spill] sm:$0xff] }
 0x43d   : > { %v9995_v8 = vmul.f32 %v4027_v11, %v11541_v40  ;;  %v9998_v3 = vmul.f32 %v4027_v11, %v11543_v22  ;;  %v11549_v40 = vld [vmem:[#allocation98_spill] sm:$0xff] }
 0x43e   : > { %4519 = vperm.xlu0 %5484, %v3621_v6   ;;  %v4012_v50 = vpop.permute.xlu1 %4011  ;;  %v11550_v11 = vld [vmem:[#allocation166_spill] sm:$0xff]  ;;  %v11552_v6 = vld [vmem:[#allocation167_spill] sm:$0xff] }
 0x43f   : > { %11542 = vst [vmem:[#allocation131_spill] sm:$0xff] %v9995_v8  ;;  %11544 = vst [vmem:[#allocation133_spill] sm:$0xff] %v9998_v3  ;;  %v10001_v18 = vmul.f32 %v4012_v50, %v11545_v21  ;;  %v10004_v28 = vmul.f32 %v4012_v50, %v11547_v42  ;;  %4494 = vperm.xlu1 %5483, %v3616_v9   ;;  %v3618_v8 = vsub.f32 %v5831_v5, %v11549_v40  ;;  %v11556_v9 = vld [vmem:[#allocation155_spill] sm:$0xff]  ;;  %v5833_v40 = vld [vmem:[%s7711_s19 + $0x1b8] sm:$0xff] }
 0x440   : > { %v4037_v55 = vpop.permute.xlu0 %4036 }
 0x441   : > { %11546 = vst [vmem:[#allocation178_spill] sm:$0xff] %v10001_v18  ;;  %11548 = vst [vmem:[#allocation143_spill] sm:$0xff] %v10004_v28  ;;  %v10011_v22 = vmul.f32 %v4037_v55, %v11550_v11  ;;  %v10014_v3 = vmul.f32 %v4037_v55, %v11552_v6  ;;  %v11554_v18 = vld [vmem:[#allocation153_spill] sm:$0xff]  ;;  %v11558_v11 = vld [vmem:[#allocation146_spill] sm:$0xff] }
 0x442   : > { %4529 = vperm.xlu0 %5484, %v3623_v1   ;;  %v4022_v21 = vpop.permute.xlu1 %4021  ;;  %v11559_v55 = vld [vmem:[#allocation181_spill] sm:$0xff]  ;;  %v11561_v1 = vld [vmem:[#allocation182_spill] sm:$0xff] }
 0x443   : > { %11551 = vst [vmem:[#allocation145_spill] sm:$0xff] %v10011_v22  ;;  %11553 = vst [vmem:[#allocation169_spill] sm:$0xff] %v10014_v3  ;;  %v10017_v50 = vmul.f32 %v4022_v21, %v11554_v18  ;;  %v10020_v42 = vmul.f32 %v4022_v21, %v11556_v9  ;;  %4504 = vperm.xlu1 %5483, %v3618_v8   ;;  %v3620_v22 = vsub.f32 %v5833_v40, %v11558_v11  ;;  %v11565_v8 = vld [vmem:[#allocation165_spill] sm:$0xff]  ;;  %v5835_v11 = vld [vmem:[%s7711_s19 + $0x1c8] sm:$0xff] }
 0x444   : > { %v4047_v5 = vpop.permute.xlu0 %4046 }
 0x445   : > { %11555 = vst [vmem:[#allocation185_spill] sm:$0xff] %v10017_v50  ;;  %11557 = vst [vmem:[#allocation157_spill] sm:$0xff] %v10020_v42  ;;  %v10027_v6 = vmul.f32 %v4047_v5, %v11559_v55  ;;  %v10030_v3 = vmul.f32 %v4047_v5, %v11561_v1  ;;  %v11563_v50 = vld [vmem:[#allocation164_spill] sm:$0xff]  ;;  %v3622_v5 = vsub.f32 %v5835_v11, %v9573_v32  ;;  %v11569_v1 = vld [vmem:[#allocation201_spill] sm:$0xff] }
 0x446   : > { %4539 = vperm.xlu0 %5484, %v3625_v25   ;;  %v4032_v18 = vpop.permute.xlu1 %4031  ;;  %v11567_v55 = vld [vmem:[#allocation200_spill] sm:$0xff]  ;;  %v5837_v11 = vld [vmem:[%s7711_s19 + $0x1d8] sm:$0xff] }
 0x447   : > { %11560 = vst [vmem:[#allocation159_spill] sm:$0xff] %v10027_v6  ;;  %11562 = vst [vmem:[#allocation139_spill] sm:$0xff] %v10030_v3  ;;  %v10033_v21 = vmul.f32 %v4032_v18, %v11563_v50  ;;  %v10036_v9 = vmul.f32 %v4032_v18, %v11565_v8  ;;  %4514 = vperm.xlu1 %5483, %v3620_v22   ;;  %v11571_v18 = vld [vmem:[#allocation179_spill] sm:$0xff]  ;;  %v11573_v22 = vld [vmem:[#allocation180_spill] sm:$0xff] }
 0x448   : > { %v4057_v40 = vpop.permute.xlu0 %4056 }
 0x449   : > { %11564 = vst [vmem:[#allocation141_spill] sm:$0xff] %v10033_v21  ;;  %11566 = vst [vmem:[#allocation98_spill] sm:$0xff] %v10036_v9  ;;  %v10043_v25 = vmul.f32 %v4057_v40, %v11567_v55  ;;  %v10046_v3 = vmul.f32 %v4057_v40, %v11569_v1  ;;  %v3629_v9 = vsub.f32 %v5836_v4, %v11575_v48  ;;  %v11576_v55 = vld [vmem:[#allocation232_spill] sm:$0xff]  ;;  %v11577_v40 = vld [vmem:[#allocation101_spill] sm:$0xff] }
 0x44a   : > { %4549 = vperm.xlu0 %5484, %v3627_v20   ;;  %v4042_v50 = vpop.permute.xlu1 %4041  ;;  %v11579_v20 = vld [vmem:[#allocation217_spill] sm:$0xff]  ;;  %v11585_v4 = vld [vmem:[#allocation6_spill] sm:$0xff]  ;;  %v11596_v21 = vld [vmem:[#allocation20_spill] sm:$0xff] }
 0x44b   : > { %11568 = vst [vmem:[#allocation166_spill] sm:$0xff] %v10043_v25  ;;  %11570 = vst [vmem:[#allocation167_spill] sm:$0xff] %v10046_v3  ;;  %v10049_v8 = vmul.f32 %v4042_v50, %v11571_v18  ;;  %v10052_v6 = vmul.f32 %v4042_v50, %v11573_v22  ;;  %4524 = vperm.xlu1 %5483, %v3622_v5   ;;  %v3624_v25 = vsub.f32 %v5837_v11, %v11576_v55  ;;  %v11581_v18 = vld [vmem:[#allocation196_spill] sm:$0xff]  ;;  %v11583_v22 = vld [vmem:[#allocation198_spill] sm:$0xff] }
 0x44c   : > { %v4067_v32 = vpop.permute.xlu0 %4066  ;;  %v11586_v48 = vld [vmem:[#allocation222_spill] sm:$0xff]  ;;  %v11587_v11 = vld [vmem:[#allocation8_spill] sm:$0xff] }
 0x44d   : > { %11572 = vst [vmem:[#allocation153_spill] sm:$0xff] %v10049_v8  ;;  %11574 = vst [vmem:[#allocation155_spill] sm:$0xff] %v10052_v6  ;;  %v10059_v1 = vmul.f32 %v4067_v32, %v11577_v40  ;;  %v10062_v3 = vmul.f32 %v4067_v32, %v11579_v20  ;;  %v4071_v8 = vmul.f32 %v11586_v48, %v11585_v4  ;;  %v5838_v40 = vld [vmem:[%s7711_s19 + $0x210] sm:$0xff]  ;;  %v11588_v32 = vld [vmem:[#allocation219_spill] sm:$0xff] }
 0x44e   : > { %4559 = vperm.xlu0 %5484, %v3629_v9   ;;  %v4052_v50 = vpop.permute.xlu1 %4051  ;;  %v4072_v55 = vmul.f32 %v11586_v48, %v11587_v11  ;;  %v3631_v20 = vsub.f32 %v5838_v40, %v11588_v32  ;;  %v5839_v9 = vld [vmem:[%s7711_s19 + $0x1e8] sm:$0xff]  ;;  %v11590_v11 = vld [vmem:[#allocation100_spill] sm:$0xff] }
 0x44f   : > { %11578 = vst [vmem:[#allocation146_spill] sm:$0xff] %v10059_v1  ;;  %11580 = vst [vmem:[#allocation181_spill] sm:$0xff] %v10062_v3  ;;  %v10066_v5 = vmul.f32 %v4052_v50, %v11581_v18  ;;  %v10069_v6 = vmul.f32 %v4052_v50, %v11583_v22  ;;  %4534 = vperm.xlu1 %5483, %v3624_v25   ;;  %v11589_v50 = vld [vmem:[#allocation194_spill] sm:$0xff]  ;;  %v11592_v40 = vld [vmem:[#allocation215_spill] sm:$0xff] }
 0x450   : > { %v3626_v25 = vsub.f32 %v5839_v9, %v11589_v50  ;;  %v11594_v1 = vld [vmem:[#allocation18_spill] sm:$0xff]  ;;  %v11597_v50 = vld [vmem:[#allocation137_spill] sm:$0xff] }
 0x451   : > { %11582 = vst [vmem:[#allocation182_spill] sm:$0xff] %v10066_v5  ;;  %11584 = vst [vmem:[#allocation164_spill] sm:$0xff] %v10069_v6  ;;  %v4245_v18 = vpop.permute.xlu0 %4244  ;;  %v11595_v6 = vld [vmem:[#allocation225_spill] sm:$0xff]  ;;  %v5840_v9 = vld [vmem:[%s7711_s19 + $0x220] sm:$0xff] }
 0x452   : > { %v4659_v22 = vadd.f32 %v4245_v18, %v4071_v8  ;;  %v4660_v4 = vadd.f32 %v4245_v18, %v4072_v55  ;;  %4569 = vperm.xlu0 %5484, %v3631_v20   ;;  %v4062_v48 = vpop.permute.xlu1 %4061  ;;  %v4077_v5 = vmul.f32 %v11595_v6, %v11594_v1  ;;  %v4078_v42 = vmul.f32 %v11595_v6, %v11596_v21  ;;  %v11598_v8 = vld [vmem:[#allocation2_spill] sm:$0xff]  ;;  %v11599_v55 = vld [vmem:[#allocation173_spill] sm:$0xff]  ;;  %v11600_v18 = vld [vmem:[#allocation4_spill] sm:$0xff] }
 0x453   : > { %v10085_v3 = vmul.f32 %v4062_v48, %v11590_v11  ;;  %v10088_v32 = vmul.f32 %v4062_v48, %v11592_v40  ;;  %4544 = vperm.xlu1 %5483, %v3626_v25   ;;  %v3633_v28 = vsub.f32 %v5840_v9, %v11597_v50  ;;  %v4069_v20 = vmul.f32 %v11599_v55, %v11598_v8  ;;  %v5841_v48 = vld [vmem:[%s7711_s19 + $0x1f8] sm:$0xff]  ;;  %v11601_v11 = vld [vmem:[#allocation202_spill] sm:$0xff]  ;;  %v11603_v8 = vld [vmem:[#allocation99_spill] sm:$0xff] }
 0x454   : > { %4827 = vst [vmem:[%s10080_s24 + $0x10] sm:$0xff] %v4659_v22  ;;  %4828 = vst.msk [vmem:[%s10080_s24 + $0x18] sm:$0xff] %vm1548_vm1, %v4660_v4  ;;  %v4070_v25 = vmul.f32 %v11599_v55, %v11600_v18  ;;  %v3628_v1 = vsub.f32 %v5841_v48, %v11601_v11  ;;  %v11602_v50 = vld [vmem:[#allocation26_spill] sm:$0xff]  ;;  %v11605_v18 = vld [vmem:[#allocation199_spill] sm:$0xff] }
 0x455   : > { %11591 = vst [vmem:[#allocation165_spill] sm:$0xff] %v10085_v3  ;;  %11593 = vst [vmem:[#allocation200_spill] sm:$0xff] %v10088_v32  ;;  %v4260_v40 = vpop.permute.xlu0 %4259  ;;  %v4081_v32 = vmul.f32 %v11603_v8, %v11602_v50  ;;  %v11604_v3 = vld [vmem:[#allocation28_spill] sm:$0xff]  ;;  %v3635_v48 = vsub.f32 %v11605_v18, %v9709_v58 }
 0x456   : > { %v4665_v6 = vadd.f32 %v4260_v40, %v4077_v5  ;;  %v4666_v21 = vadd.f32 %v4260_v40, %v4078_v42  ;;  %4579 = vperm.xlu0 %5484, %v3633_v28   ;;  %v4240_v22 = vpop.permute.xlu1 %4239  ;;  %v4082_v55 = vmul.f32 %v11603_v8, %v11604_v3  ;;  %v11606_v5 = vld [vmem:[#allocation10_spill] sm:$0xff]  ;;  %v11607_v42 = vld [vmem:[#allocation221_spill] sm:$0xff]  ;;  %v11608_v28 = vld [vmem:[#allocation12_spill] sm:$0xff] }
 0x457   : > { %v4657_v4 = vadd.f32 %v4240_v22, %v4069_v20  ;;  %v4658_v9 = vadd.f32 %v4240_v22, %v4070_v25  ;;  %4554 = vperm.xlu1 %5483, %v3628_v1   ;;  %v4073_v11 = vmul.f32 %v11607_v42, %v11606_v5  ;;  %v4074_v20 = vmul.f32 %v11607_v42, %v11608_v28  ;;  %v5842_v25 = vld [vmem:[%s7711_s19 + $0x208] sm:$0xff]  ;;  %v11610_v8 = vld [vmem:[#allocation34_spill] sm:$0xff]  ;;  %v11611_v18 = vld [vmem:[#allocation216_spill] sm:$0xff] }
 0x458   : > { %4833 = vst [vmem:[%s10080_s24 + $0x40] sm:$0xff] %v4665_v6  ;;  %4834 = vst.msk [vmem:[%s10080_s24 + $0x48] sm:$0xff] %vm1548_vm1, %v4666_v21  ;;  %v11609_v1 = vld [vmem:[#allocation211_spill] sm:$0xff]  ;;  %v4085_v5 = vmul.f32 %v11611_v18, %v11610_v8  ;;  %v11612_v42 = vld [vmem:[#allocation36_spill] sm:$0xff] }
 0x459   : > { %v3630_v40 = vsub.f32 %v5842_v25, %v11609_v1  ;;  %4825 = vst [vmem:[%s10080_s24] sm:$0xff] %v4657_v4  ;;  %4826 = vst.msk [vmem:[%s10080_s24 + $0x8] sm:$0xff] %vm1548_vm1, %v4658_v9  ;;  %v4270_v3 = vpop.permute.xlu0 %4269  ;;  %v4086_v28 = vmul.f32 %v11611_v18, %v11612_v42  ;;  %v11613_v4 = vld [vmem:[#allocation209_spill] sm:$0xff]  ;;  %v11617_v8 = vld [vmem:[#allocation42_spill] sm:$0xff] }
 0x45a   : > { %v4669_v58 = vadd.f32 %v4270_v3, %v4081_v32  ;;  %v4670_v6 = vadd.f32 %v4270_v3, %v4082_v55  ;;  %4589 = vperm.xlu0 %5484, %v3635_v48   ;;  %v4250_v21 = vpop.permute.xlu1 %4249  ;;  %v3637_v9 = vsub.f32 %v11613_v4, %v9727_v16  ;;  %v11614_v32 = vld [vmem:[#allocation14_spill] sm:$0xff]  ;;  %v11615_v55 = vld [vmem:[#allocation203_spill] sm:$0xff]  ;;  %v11616_v48 = vld [vmem:[#allocation16_spill] sm:$0xff] }
 0x45b   : > { %v4661_v22 = vadd.f32 %v4250_v21, %v4073_v11  ;;  %v4662_v50 = vadd.f32 %v4250_v21, %v4074_v20  ;;  %4564 = vperm.xlu1 %5483, %v3630_v40   ;;  %v4075_v25 = vmul.f32 %v11615_v55, %v11614_v32  ;;  %v4076_v11 = vmul.f32 %v11615_v55, %v11616_v48  ;;  %v5843_v20 = vld [vmem:[%s7711_s19 + $0x218] sm:$0xff]  ;;  %v11618_v18 = vld [vmem:[#allocation214_spill] sm:$0xff]  ;;  %v11619_v4 = vld [vmem:[#allocation44_spill] sm:$0xff] }
 0x45c   : > { %4837 = vst [vmem:[%s10080_s24 + $0x60] sm:$0xff] %v4669_v58  ;;  %4838 = vst.msk [vmem:[%s10080_s24 + $0x68] sm:$0xff] %vm1548_vm1, %v4670_v6  ;;  %v3632_v1 = vsub.f32 %v5843_v20, %v9695_v33  ;;  %v4089_v42 = vmul.f32 %v11618_v18, %v11617_v8  ;;  %v4090_v33 = vmul.f32 %v11618_v18, %v11619_v4  ;;  %v11626_v18 = vld [vmem:[#allocation52_spill] sm:$0xff]  ;;  %v11629_v4 = vld [vmem:[#allocation223_spill] sm:$0xff] }
 0x45d   : > { %4829 = vst [vmem:[%s10080_s24 + $0x20] sm:$0xff] %v4661_v22  ;;  %4830 = vst.msk [vmem:[%s10080_s24 + $0x28] sm:$0xff] %vm1548_vm1, %v4662_v50  ;;  %v4280_v40 = vpop.permute.xlu0 %4279  ;;  %v11620_v22 = vld [vmem:[#allocation110_spill] sm:$0xff] }
 0x45e   : > { %v4673_v16 = vadd.f32 %v4280_v40, %v4085_v5  ;;  %v4674_v3 = vadd.f32 %v4280_v40, %v4086_v28  ;;  %4599 = vperm.xlu0 %5484, %v3637_v9   ;;  %v4255_v58 = vpop.permute.xlu1 %4254  ;;  %v3639_v50 = vsub.f32 %v11620_v22, %v9745_v15  ;;  %v11621_v5 = vld [vmem:[#allocation22_spill] sm:$0xff]  ;;  %v11622_v28 = vld [vmem:[#allocation228_spill] sm:$0xff] }
 0x45f   : > { %v4663_v6 = vadd.f32 %v4255_v58, %v4075_v25  ;;  %v4664_v21 = vadd.f32 %v4255_v58, %v4076_v11  ;;  %4574 = vperm.xlu1 %5483, %v3632_v1   ;;  %v4079_v32 = vmul.f32 %v11622_v28, %v11621_v5  ;;  %v11623_v9 = vld [vmem:[#allocation24_spill] sm:$0xff]  ;;  %v5844_v25 = vld [vmem:[%s7711_s19 + $0x228] sm:$0xff]  ;;  %v5845_v5 = vld [vmem:[%s7711_s19 + $0x238] sm:$0xff] }
 0x460   : > { %4841 = vst [vmem:[%s10080_s24 + $0x80] sm:$0xff] %v4673_v16  ;;  %4842 = vst.msk [vmem:[%s10080_s24 + $0x88] sm:$0xff] %vm1548_vm1, %v4674_v3  ;;  %v4080_v55 = vmul.f32 %v11622_v28, %v11623_v9  ;;  %v3634_v48 = vsub.f32 %v5844_v25, %v9713_v60  ;;  %v11624_v3 = vld [vmem:[#allocation50_spill] sm:$0xff]  ;;  %v11625_v58 = vld [vmem:[#allocation135_spill] sm:$0xff]  ;;  %v3636_v28 = vsub.f32 %v5845_v5, %v9731_v19 }
 0x461   : > { %4831 = vst [vmem:[%s10080_s24 + $0x30] sm:$0xff] %v4663_v6  ;;  %4832 = vst.msk [vmem:[%s10080_s24 + $0x38] sm:$0xff] %vm1548_vm1, %v4664_v21  ;;  %v4290_v11 = vpop.permute.xlu0 %4289  ;;  %v4093_v8 = vmul.f32 %v11625_v58, %v11624_v3  ;;  %v4094_v60 = vmul.f32 %v11625_v58, %v11626_v18  ;;  %v11627_v6 = vld [vmem:[#allocation170_spill] sm:$0xff]  ;;  %v11630_v22 = vld [vmem:[#allocation32_spill] sm:$0xff] }
 0x462   : > { %v4677_v15 = vadd.f32 %v4290_v11, %v4089_v42  ;;  %v4678_v20 = vadd.f32 %v4290_v11, %v4090_v33  ;;  %4609 = vperm.xlu0 %5484, %v3639_v50   ;;  %v4265_v1 = vpop.permute.xlu1 %4264  ;;  %v3641_v21 = vsub.f32 %v11627_v6, %v9765_v39  ;;  %v11628_v42 = vld [vmem:[#allocation30_spill] sm:$0xff]  ;;  %v4084_v50 = vmul.f32 %v11629_v4, %v11630_v22  ;;  %v11636_v58 = vld [vmem:[#allocation197_spill] sm:$0xff]  ;;  %v11637_v18 = vld [vmem:[#allocation40_spill] sm:$0xff] }
 0x463   : > { %v4667_v40 = vadd.f32 %v4265_v1, %v4079_v32  ;;  %v4668_v16 = vadd.f32 %v4265_v1, %v4080_v55  ;;  %4584 = vperm.xlu1 %5483, %v3634_v48   ;;  %v4083_v33 = vmul.f32 %v11629_v4, %v11628_v42  ;;  %v11631_v11 = vld [vmem:[#allocation58_spill] sm:$0xff]  ;;  %v11633_v1 = vld [vmem:[#allocation60_spill] sm:$0xff]  ;;  %v5846_v6 = vld [vmem:[%s7711_s19 + $0x248] sm:$0xff] }
 0x464   : > { %4845 = vst [vmem:[%s10080_s24 + $0xa0] sm:$0xff] %v4677_v15  ;;  %4846 = vst.msk [vmem:[%s10080_s24 + $0xa8] sm:$0xff] %vm1548_vm1, %v4678_v20  ;;  %v11632_v15 = vld [vmem:[#allocation171_spill] sm:$0xff]  ;;  %v11635_v3 = vld [vmem:[#allocation38_spill] sm:$0xff] }
 0x465   : > { %4835 = vst [vmem:[%s10080_s24 + $0x50] sm:$0xff] %v4667_v40  ;;  %4836 = vst.msk [vmem:[%s10080_s24 + $0x58] sm:$0xff] %vm1548_vm1, %v4668_v16  ;;  %v4300_v32 = vpop.permute.xlu0 %4299  ;;  %v4097_v20 = vmul.f32 %v11632_v15, %v11631_v11  ;;  %v4098_v19 = vmul.f32 %v11632_v15, %v11633_v1  ;;  %v11634_v40 = vld [vmem:[#allocation123_spill] sm:$0xff]  ;;  %v11638_v5 = vld [vmem:[#allocation66_spill] sm:$0xff] }
 0x466   : > { %v4681_v39 = vadd.f32 %v4300_v32, %v4093_v8  ;;  %v4682_v9 = vadd.f32 %v4300_v32, %v4094_v60  ;;  %4619 = vperm.xlu0 %5484, %v3641_v21   ;;  %v4275_v55 = vpop.permute.xlu1 %4274  ;;  %v3643_v16 = vsub.f32 %v11634_v40, %v9788_v49  ;;  %v4087_v8 = vmul.f32 %v11636_v58, %v11635_v3  ;;  %v11644_v15 = vld [vmem:[#allocation48_spill] sm:$0xff]  ;;  %v5847_v1 = vld [vmem:[%s7711_s19 + $0x258] sm:$0xff] }
 0x467   : > { %v4671_v25 = vadd.f32 %v4275_v55, %v4083_v33  ;;  %v4672_v48 = vadd.f32 %v4275_v55, %v4084_v50  ;;  %4594 = vperm.xlu1 %5483, %v3636_v28   ;;  %v4088_v60 = vmul.f32 %v11636_v58, %v11637_v18  ;;  %v3638_v21 = vsub.f32 %v5846_v6, %v9749_v29  ;;  %v11639_v28 = vld [vmem:[#allocation150_spill] sm:$0xff] }
 0x468   : > { %4849 = vst [vmem:[%s10080_s24 + $0xc0] sm:$0xff] %v4681_v39  ;;  %4850 = vst.msk [vmem:[%s10080_s24 + $0xc8] sm:$0xff] %vm1548_vm1, %v4682_v9  ;;  %v4101_v32 = vmul.f32 %v11639_v28, %v11638_v5  ;;  %v11640_v39 = vld [vmem:[#allocation68_spill] sm:$0xff]  ;;  %v11641_v9 = vld [vmem:[#allocation125_spill] sm:$0xff] }
 0x469   : > { %4839 = vst [vmem:[%s10080_s24 + $0x70] sm:$0xff] %v4671_v25  ;;  %4840 = vst.msk [vmem:[%s10080_s24 + $0x78] sm:$0xff] %vm1548_vm1, %v4672_v48  ;;  %v4310_v42 = vpop.permute.xlu0 %4309  ;;  %v4102_v29 = vmul.f32 %v11639_v28, %v11640_v39  ;;  %v3645_v55 = vsub.f32 %v11641_v9, %v9812_v44  ;;  %v11642_v25 = vld [vmem:[#allocation46_spill] sm:$0xff]  ;;  %v5848_v28 = vld [vmem:[%s7711_s19 + $0x268] sm:$0xff] }
 0x46a   : > { %v4685_v49 = vadd.f32 %v4310_v42, %v4097_v20  ;;  %v4686_v4 = vadd.f32 %v4310_v42, %v4098_v19  ;;  %4629 = vperm.xlu0 %5484, %v3643_v16   ;;  %v4285_v33 = vpop.permute.xlu1 %4284  ;;  %v11643_v48 = vld [vmem:[#allocation122_spill] sm:$0xff]  ;;  %v3640_v19 = vsub.f32 %v5847_v1, %v9768_v10 }
 0x46b   : > { %v4675_v22 = vadd.f32 %v4285_v33, %v4087_v8  ;;  %v4676_v50 = vadd.f32 %v4285_v33, %v4088_v60  ;;  %4604 = vperm.xlu1 %5483, %v3638_v21   ;;  %v4091_v11 = vmul.f32 %v11643_v48, %v11642_v25  ;;  %v4092_v20 = vmul.f32 %v11643_v48, %v11644_v15  ;;  %v11645_v18 = vld [vmem:[#allocation74_spill] sm:$0xff]  ;;  %v11647_v21 = vld [vmem:[#allocation76_spill] sm:$0xff]  ;;  %v11650_v33 = vld [vmem:[#allocation113_spill] sm:$0xff] }
 0x46c   : > { %4853 = vst [vmem:[%s10080_s24 + $0xe0] sm:$0xff] %v4685_v49  ;;  %4854 = vst.msk [vmem:[%s10080_s24 + $0xe8] sm:$0xff] %vm1548_vm1, %v4686_v4  ;;  %v11646_v60 = vld [vmem:[#allocation234_spill] sm:$0xff] }
 0x46d   : > { %4843 = vst [vmem:[%s10080_s24 + $0x90] sm:$0xff] %v4675_v22  ;;  %4844 = vst.msk [vmem:[%s10080_s24 + $0x98] sm:$0xff] %vm1548_vm1, %v4676_v50  ;;  %v4320_v40 = vpop.permute.xlu0 %4319  ;;  %v4105_v6 = vmul.f32 %v11646_v60, %v11645_v18  ;;  %v4106_v10 = vmul.f32 %v11646_v60, %v11647_v21  ;;  %v11648_v42 = vld [vmem:[#allocation230_spill] sm:$0xff]  ;;  %v11651_v50 = vld [vmem:[#allocation56_spill] sm:$0xff] }
 0x46e   : > { %v4689_v44 = vadd.f32 %v4320_v40, %v4101_v32  ;;  %v4690_v16 = vadd.f32 %v4320_v40, %v4102_v29  ;;  %4639 = vperm.xlu0 %5484, %v3645_v55   ;;  %v4295_v3 = vpop.permute.xlu1 %4294  ;;  %v3647_v49 = vsub.f32 %v11648_v42, %v9836_v59  ;;  %v11649_v4 = vld [vmem:[#allocation54_spill] sm:$0xff]  ;;  %v4096_v5 = vmul.f32 %v11650_v33, %v11651_v50 }
 0x46f   : > { %v4679_v58 = vadd.f32 %v4295_v3, %v4091_v11  ;;  %v4680_v8 = vadd.f32 %v4295_v3, %v4092_v20  ;;  %4614 = vperm.xlu1 %5483, %v3640_v19   ;;  %v4095_v22 = vmul.f32 %v11650_v33, %v11649_v4  ;;  %v3642_v32 = vsub.f32 %v5848_v28, %v9792_v31  ;;  %v11652_v48 = vld [vmem:[#allocation82_spill] sm:$0xff]  ;;  %v11653_v11 = vld [vmem:[#allocation184_spill] sm:$0xff]  ;;  %v5849_v3 = vld [vmem:[%s7711_s19 + $0x278] sm:$0xff] }
 0x470   : > { %4857 = vst [vmem:[%s10080_s24 + $0x100] sm:$0xff] %v4689_v44  ;;  %4858 = vst.msk [vmem:[%s10080_s24 + $0x108] sm:$0xff] %vm1548_vm1, %v4690_v16  ;;  %v4109_v15 = vmul.f32 %v11653_v11, %v11652_v48  ;;  %v11654_v20 = vld [vmem:[#allocation84_spill] sm:$0xff]  ;;  %v11655_v1 = vld [vmem:[#allocation62_spill] sm:$0xff] }
 0x471   : > { %4847 = vst [vmem:[%s10080_s24 + $0xb0] sm:$0xff] %v4679_v58  ;;  %4848 = vst.msk [vmem:[%s10080_s24 + $0xb8] sm:$0xff] %vm1548_vm1, %v4680_v8  ;;  %v4330_v39 = vpop.permute.xlu0 %4329  ;;  %v4110_v31 = vmul.f32 %v11653_v11, %v11654_v20  ;;  %v11656_v19 = vld [vmem:[#allocation172_spill] sm:$0xff]  ;;  %v3644_v58 = vsub.f32 %v5849_v3, %v9816_v51  ;;  %v11658_v42 = vld [vmem:[#allocation90_spill] sm:$0xff] }
 0x472   : > { %v4693_v59 = vadd.f32 %v4330_v39, %v4105_v6  ;;  %v4694_v29 = vadd.f32 %v4330_v39, %v4106_v10  ;;  %4649 = vperm.xlu0 %5484, %v3647_v49   ;;  %v4305_v9 = vpop.permute.xlu1 %4304  ;;  %v4099_v40 = vmul.f32 %v11656_v19, %v11655_v1  ;;  %v11657_v44 = vld [vmem:[#allocation64_spill] sm:$0xff]  ;;  %v11659_v49 = vld [vmem:[#allocation210_spill] sm:$0xff]  ;;  %v11664_v39 = vld [vmem:[#allocation231_spill] sm:$0xff] }
 0x473   : > { %v4683_v55 = vadd.f32 %v4305_v9, %v4095_v22  ;;  %v4684_v25 = vadd.f32 %v4305_v9, %v4096_v5  ;;  %4624 = vperm.xlu1 %5483, %v3642_v32   ;;  %v4100_v16 = vmul.f32 %v11656_v19, %v11657_v44  ;;  %v4113_v4 = vmul.f32 %v11659_v49, %v11658_v42  ;;  %v11660_v33 = vld [vmem:[#allocation92_spill] sm:$0xff]  ;;  %v11661_v51 = vld [vmem:[#allocation70_spill] sm:$0xff]  ;;  %v11666_v20 = vld [vmem:[#allocation111_spill] sm:$0xff] }
 0x474   : > { %4861 = vst [vmem:[%s10080_s24 + $0x120] sm:$0xff] %v4693_v59  ;;  %4862 = vst.msk [vmem:[%s10080_s24 + $0x128] sm:$0xff] %vm1548_vm1, %v4694_v29  ;;  %v4114_v22 = vmul.f32 %v11659_v49, %v11660_v33  ;;  %v11662_v50 = vld [vmem:[#allocation134_spill] sm:$0xff]  ;;  %v11663_v28 = vld [vmem:[#allocation72_spill] sm:$0xff]  ;;  %v3646_v59 = vsub.f32 %v11664_v39, %v9840_v52 }
 0x475   : > { %4851 = vst [vmem:[%s10080_s24 + $0xd0] sm:$0xff] %v4683_v55  ;;  %4852 = vst.msk [vmem:[%s10080_s24 + $0xd8] sm:$0xff] %vm1548_vm1, %v4684_v25  ;;  %v4340_v8 = vpop.permute.xlu0 %4339  ;;  %v4103_v5 = vmul.f32 %v11662_v50, %v11661_v51  ;;  %v4104_v32 = vmul.f32 %v11662_v50, %v11663_v28  ;;  %v11667_v1 = vld [vmem:[#allocation104_spill] sm:$0xff]  ;;  %v11668_v52 = vld [vmem:[#allocation78_spill] sm:$0xff] }
 0x476   : > { %v4697_v18 = vadd.f32 %v4340_v8, %v4109_v15  ;;  %v4698_v60 = vadd.f32 %v4340_v8, %v4110_v31  ;;  %v4315_v6 = vpop.permute.xlu1 %4314  ;;  %v11665_v15 = vld [vmem:[#allocation102_spill] sm:$0xff]  ;;  %v4118_v19 = vmul.f32 %v11666_v20, %v11667_v1  ;;  %v11676_v50 = vld [vmem:[#allocation236_spill] sm:$0xff] }
 0x477   : > { %v4687_v21 = vadd.f32 %v4315_v6, %v4099_v40  ;;  %v4688_v10 = vadd.f32 %v4315_v6, %v4100_v16  ;;  %4634 = vperm.xlu1 %5483, %v3644_v58   ;;  %v4117_v31 = vmul.f32 %v11666_v20, %v11665_v15  ;;  %v11669_v40 = vld [vmem:[#allocation233_spill] sm:$0xff]  ;;  %v11670_v16 = vld [vmem:[#allocation80_spill] sm:$0xff]  ;;  %v11671_v58 = vld [vmem:[#allocation235_spill] sm:$0xff] }
 0x478   : > { %4865 = vst [vmem:[%s10080_s24 + $0x140] sm:$0xff] %v4697_v18  ;;  %4866 = vst.msk [vmem:[%s10080_s24 + $0x148] sm:$0xff] %vm1548_vm1, %v4698_v60  ;;  %v4107_v44 = vmul.f32 %v11669_v40, %v11668_v52  ;;  %v4108_v3 = vmul.f32 %v11669_v40, %v11670_v16  ;;  %v3648_v8 = vsub.f32 %v11671_v58, %v9864_v47  ;;  %v11672_v49 = vld [vmem:[#allocation114_spill] sm:$0xff]  ;;  %v11677_v28 = vld [vmem:[#allocation88_spill] sm:$0xff] }
 0x479   : > { %4855 = vst [vmem:[%s10080_s24 + $0xf0] sm:$0xff] %v4687_v21  ;;  %4856 = vst.msk [vmem:[%s10080_s24 + $0xf8] sm:$0xff] %vm1548_vm1, %v4688_v10  ;;  %v4350_v29 = vpop.permute.xlu0 %4349  ;;  %v11675_v47 = vld [vmem:[#allocation86_spill] sm:$0xff]  ;;  %v11680_v20 = vld [vmem:[#allocation128_spill] sm:$0xff] }
 0x47a   : > { %v4701_v9 = vadd.f32 %v4350_v29, %v4113_v4  ;;  %v4702_v55 = vadd.f32 %v4350_v29, %v4114_v22  ;;  %v4325_v25 = vpop.permute.xlu1 %4324  ;;  %v11673_v4 = vld [vmem:[#allocation168_spill] sm:$0xff]  ;;  %v11681_v1 = vld [vmem:[#allocation94_spill] sm:$0xff] }
 0x47b   : > { %v4691_v48 = vadd.f32 %v4325_v25, %v4103_v5  ;;  %v4692_v11 = vadd.f32 %v4325_v25, %v4104_v32  ;;  %4644 = vperm.xlu1 %5483, %v3646_v59   ;;  %v4121_v33 = vmul.f32 %v11673_v4, %v11672_v49  ;;  %v11674_v22 = vld [vmem:[#allocation116_spill] sm:$0xff]  ;;  %v4111_v5 = vmul.f32 %v11676_v50, %v11675_v47 }
 0x47c   : > { %4869 = vst [vmem:[%s10080_s24 + $0x160] sm:$0xff] %v4701_v9  ;;  %4870 = vst.msk [vmem:[%s10080_s24 + $0x168] sm:$0xff] %vm1548_vm1, %v4702_v55  ;;  %v4122_v51 = vmul.f32 %v11673_v4, %v11674_v22  ;;  %v4112_v32 = vmul.f32 %v11676_v50, %v11677_v28  ;;  %v11683_v40 = vld [vmem:[#allocation96_spill] sm:$0xff]  ;;  %v11687_v4 = vld [vmem:[#allocation106_spill] sm:$0xff] }
 0x47d   : > { %4859 = vst [vmem:[%s10080_s24 + $0x110] sm:$0xff] %v4691_v48  ;;  %4860 = vst.msk [vmem:[%s10080_s24 + $0x118] sm:$0xff] %vm1548_vm1, %v4692_v11  ;;  %v4360_v18 = vpop.permute.xlu0 %4359  ;;  %v11678_v48 = vld [vmem:[#allocation126_spill] sm:$0xff]  ;;  %v11679_v11 = vld [vmem:[#allocation147_spill] sm:$0xff] }
 0x47e   : > { %v4705_v60 = vadd.f32 %v4360_v18, %v4117_v31  ;;  %v4706_v6 = vadd.f32 %v4360_v18, %v4118_v19  ;;  %v4335_v21 = vpop.permute.xlu1 %4334  ;;  %v4125_v15 = vmul.f32 %v11679_v11, %v11678_v48  ;;  %v4126_v31 = vmul.f32 %v11679_v11, %v11680_v20  ;;  %v11682_v19 = vld [vmem:[#allocation204_spill] sm:$0xff]  ;;  %v11693_v11 = vld [vmem:[#allocation118_spill] sm:$0xff] }
 0x47f   : > { %v4695_v10 = vadd.f32 %v4335_v21, %v4107_v44  ;;  %v4696_v42 = vadd.f32 %v4335_v21, %v4108_v3  ;;  %4654 = vperm.xlu1 %5483, %v3648_v8   ;;  %v4115_v52 = vmul.f32 %v11682_v19, %v11681_v1  ;;  %v4116_v44 = vmul.f32 %v11682_v19, %v11683_v40  ;;  %v11685_v21 = vld [vmem:[#allocation220_spill] sm:$0xff] }
 0x480   : > { %4873 = vst [vmem:[%s10080_s24 + $0x180] sm:$0xff] %v4705_v60  ;;  %4874 = vst.msk [vmem:[%s10080_s24 + $0x188] sm:$0xff] %vm1548_vm1, %v4706_v6  ;;  %v11684_v6 = vld [vmem:[#allocation138_spill] sm:$0xff] }
 0x481   : > { %4863 = vst [vmem:[%s10080_s24 + $0x130] sm:$0xff] %v4695_v10  ;;  %4864 = vst.msk [vmem:[%s10080_s24 + $0x138] sm:$0xff] %vm1548_vm1, %v4696_v42  ;;  %v4370_v39 = vpop.permute.xlu0 %4369  ;;  %v4129_v10 = vmul.f32 %v11685_v21, %v11684_v6  ;;  %v11686_v42 = vld [vmem:[#allocation140_spill] sm:$0xff]  ;;  %v11698_v6 = vld [vmem:[#allocation130_spill] sm:$0xff] }
 0x482   : > { %v4709_v59 = vadd.f32 %v4370_v39, %v4121_v33  ;;  %v4710_v29 = vadd.f32 %v4370_v39, %v4122_v51  ;;  %v4345_v9 = vpop.permute.xlu1 %4344  ;;  %v4130_v49 = vmul.f32 %v11685_v21, %v11686_v42  ;;  %v11688_v33 = vld [vmem:[#allocation124_spill] sm:$0xff] }
 0x483   : > { %v4699_v55 = vadd.f32 %v4345_v9, %v4111_v5  ;;  %v4700_v25 = vadd.f32 %v4345_v9, %v4112_v32  ;;  %v4119_v22 = vmul.f32 %v11688_v33, %v11687_v4  ;;  %v11689_v51 = vld [vmem:[#allocation108_spill] sm:$0xff] }
 0x484   : > { %4877 = vst [vmem:[%s10080_s24 + $0x1a0] sm:$0xff] %v4709_v59  ;;  %4878 = vst.msk [vmem:[%s10080_s24 + $0x1a8] sm:$0xff] %vm1548_vm1, %v4710_v29  ;;  %v4120_v47 = vmul.f32 %v11688_v33, %v11689_v51  ;;  %v11690_v29 = vld [vmem:[#allocation151_spill] sm:$0xff]  ;;  %v11691_v9 = vld [vmem:[#allocation148_spill] sm:$0xff] }
 0x485   : > { %4867 = vst [vmem:[%s10080_s24 + $0x150] sm:$0xff] %v4699_v55  ;;  %4868 = vst.msk [vmem:[%s10080_s24 + $0x158] sm:$0xff] %vm1548_vm1, %v4700_v25  ;;  %v4380_v16 = vpop.permute.xlu0 %4379  ;;  %v4133_v55 = vmul.f32 %v11691_v9, %v11690_v29  ;;  %v11692_v25 = vld [vmem:[#allocation152_spill] sm:$0xff] }
 0x486   : > { %v4713_v3 = vadd.f32 %v4380_v16, %v4125_v15  ;;  %v4714_v58 = vadd.f32 %v4380_v16, %v4126_v31  ;;  %v4355_v8 = vpop.permute.xlu1 %4354  ;;  %v4134_v48 = vmul.f32 %v11691_v9, %v11692_v25  ;;  %v11694_v15 = vld [vmem:[#allocation112_spill] sm:$0xff] }
 0x487   : > { %v4703_v18 = vadd.f32 %v4355_v8, %v4115_v52  ;;  %v4704_v60 = vadd.f32 %v4355_v8, %v4116_v44  ;;  %v4123_v20 = vmul.f32 %v11694_v15, %v11693_v11  ;;  %v11695_v31 = vld [vmem:[#allocation120_spill] sm:$0xff] }
 0x488   : > { %4881 = vst [vmem:[%s10080_s24 + $0x1c0] sm:$0xff] %v4713_v3  ;;  %4882 = vst.msk [vmem:[%s10080_s24 + $0x1c8] sm:$0xff] %vm1548_vm1, %v4714_v58  ;;  %v4124_v1 = vmul.f32 %v11694_v15, %v11695_v31  ;;  %v11696_v58 = vld [vmem:[#allocation160_spill] sm:$0xff]  ;;  %v11706_v31 = vld [vmem:[#allocation190_spill] sm:$0xff] }
 0x489   : > { %4871 = vst [vmem:[%s10080_s24 + $0x170] sm:$0xff] %v4703_v18  ;;  %4872 = vst.msk [vmem:[%s10080_s24 + $0x178] sm:$0xff] %vm1548_vm1, %v4704_v60  ;;  %v4390_v50 = vpop.permute.xlu0 %4389  ;;  %v4137_v8 = vmul.f32 %v9776_v63, %v11696_v58  ;;  %v11697_v18 = vld [vmem:[#allocation161_spill] sm:$0xff]  ;;  %v11699_v21 = vld [vmem:[#allocation136_spill] sm:$0xff] }
 0x48a   : > { %v4717_v5 = vadd.f32 %v4390_v50, %v4129_v10  ;;  %v4718_v28 = vadd.f32 %v4390_v50, %v4130_v49  ;;  %v4365_v32 = vpop.permute.xlu1 %4364  ;;  %v4138_v60 = vmul.f32 %v9776_v63, %v11697_v18  ;;  %v4127_v10 = vmul.f32 %v11699_v21, %v11698_v6  ;;  %v11700_v42 = vld [vmem:[#allocation132_spill] sm:$0xff]  ;;  %v11701_v50 = vld [vmem:[#allocation174_spill] sm:$0xff] }
 0x48b   : > { %v4707_v39 = vadd.f32 %v4365_v32, %v4119_v22  ;;  %v4708_v59 = vadd.f32 %v4365_v32, %v4120_v47  ;;  %v4128_v49 = vmul.f32 %v11699_v21, %v11700_v42  ;;  %v11705_v9 = vld [vmem:[#allocation144_spill] sm:$0xff] }
 0x48c   : > { %4885 = vst [vmem:[%s10080_s24 + $0x1e0] sm:$0xff] %v4717_v5  ;;  %4886 = vst.msk [vmem:[%s10080_s24 + $0x1e8] sm:$0xff] %vm1548_vm1, %v4718_v28  ;;  %v4141_v5 = vmul.f32 %v9800_v30, %v11701_v50  ;;  %v11702_v28 = vld [vmem:[#allocation175_spill] sm:$0xff] }
 0x48d   : > { %4875 = vst [vmem:[%s10080_s24 + $0x190] sm:$0xff] %v4707_v39  ;;  %4876 = vst.msk [vmem:[%s10080_s24 + $0x198] sm:$0xff] %vm1548_vm1, %v4708_v59  ;;  %v4400_v19 = vpop.permute.xlu0 %4399  ;;  %v4142_v32 = vmul.f32 %v9800_v30, %v11702_v28  ;;  %v11703_v39 = vld [vmem:[#allocation142_spill] sm:$0xff]  ;;  %v11704_v59 = vld [vmem:[#allocation149_spill] sm:$0xff] }
 0x48e   : > { %v4721_v52 = vadd.f32 %v4400_v19, %v4133_v55  ;;  %v4722_v40 = vadd.f32 %v4400_v19, %v4134_v48  ;;  %v4375_v44 = vpop.permute.xlu1 %4374  ;;  %v4131_v29 = vmul.f32 %v11704_v59, %v11703_v39  ;;  %v4132_v55 = vmul.f32 %v11704_v59, %v11705_v9  ;;  %v11707_v19 = vld [vmem:[#allocation192_spill] sm:$0xff]  ;;  %v11715_v39 = vld [vmem:[#allocation3_spill] sm:$0xff]  ;;  %v11716_v59 = vld [vmem:[#allocation186_spill] sm:$0xff] }
 0x48f   : > { %v4711_v16 = vadd.f32 %v4375_v44, %v4123_v20  ;;  %v4712_v3 = vadd.f32 %v4375_v44, %v4124_v1  ;;  %v4145_v1 = vmul.f32 %v9824_v61, %v11706_v31  ;;  %v11709_v44 = vld [vmem:[#allocation158_spill] sm:$0xff]  ;;  %v11717_v9 = vld [vmem:[#allocation5_spill] sm:$0xff] }
 0x490   : > { %4889 = vst [vmem:[%s10080_s24 + $0x200] sm:$0xff] %v4721_v52  ;;  %4890 = vst.msk [vmem:[%s10080_s24 + $0x208] sm:$0xff] %vm1548_vm1, %v4722_v40  ;;  %v4146_v52 = vmul.f32 %v9824_v61, %v11707_v19  ;;  %v11708_v40 = vld [vmem:[#allocation154_spill] sm:$0xff] }
 0x491   : > { %4879 = vst [vmem:[%s10080_s24 + $0x1b0] sm:$0xff] %v4711_v16  ;;  %4880 = vst.msk [vmem:[%s10080_s24 + $0x1b8] sm:$0xff] %vm1548_vm1, %v4712_v3  ;;  %v4410_v4 = vpop.permute.xlu0 %4409  ;;  %v4135_v16 = vmul.f32 %v11709_v44, %v11708_v40  ;;  %v11710_v3 = vld [vmem:[#allocation156_spill] sm:$0xff] }
 0x492   : > { %v4725_v33 = vadd.f32 %v4410_v4, %v4137_v8  ;;  %v4726_v22 = vadd.f32 %v4410_v4, %v4138_v60  ;;  %v4385_v51 = vpop.permute.xlu1 %4384  ;;  %v4136_v58 = vmul.f32 %v11709_v44, %v11710_v3  ;;  %v11721_v44 = vld [vmem:[#allocation13_spill] sm:$0xff] }
 0x493   : > { %v4715_v63 = vadd.f32 %v4385_v51, %v4127_v10  ;;  %v4716_v47 = vadd.f32 %v4385_v51, %v4128_v49  ;;  %v11711_v10 = vld [vmem:[#allocation207_spill] sm:$0xff]  ;;  %v11712_v49 = vld [vmem:[#allocation208_spill] sm:$0xff] }
 0x494   : > { %4893 = vst [vmem:[%s10080_s24 + $0x220] sm:$0xff] %v4725_v33  ;;  %4894 = vst.msk [vmem:[%s10080_s24 + $0x228] sm:$0xff] %vm1548_vm1, %v4726_v22  ;;  %v4149_v42 = vmul.f32 %v9848_v36, %v11711_v10  ;;  %v4150_v4 = vmul.f32 %v9848_v36, %v11712_v49  ;;  %v11713_v33 = vld [vmem:[#allocation162_spill] sm:$0xff]  ;;  %v11714_v51 = vld [vmem:[#allocation163_spill] sm:$0xff] }
 0x495   : > { %4883 = vst [vmem:[%s10080_s24 + $0x1d0] sm:$0xff] %v4715_v63  ;;  %4884 = vst.msk [vmem:[%s10080_s24 + $0x1d8] sm:$0xff] %vm1548_vm1, %v4716_v47  ;;  %v4420_v25 = vpop.permute.xlu0 %4419  ;;  %v4139_v22 = vmul.f32 %v9772_v27, %v11713_v33  ;;  %v4140_v63 = vmul.f32 %v9772_v27, %v11714_v51  ;;  %v11718_v27 = vld [vmem:[#allocation176_spill] sm:$0xff]  ;;  %v11724_v10 = vld [vmem:[#allocation19_spill] sm:$0xff] }
 0x496   : > { %v4729_v48 = vadd.f32 %v4420_v25, %v4141_v5  ;;  %v4730_v11 = vadd.f32 %v4420_v25, %v4142_v32  ;;  %v4395_v15 = vpop.permute.xlu1 %4394  ;;  %v4143_v25 = vmul.f32 %v9796_v46, %v11718_v27  ;;  %v11725_v49 = vld [vmem:[#allocation21_spill] sm:$0xff] }
 0x497   : > { %v4719_v30 = vadd.f32 %v4395_v15, %v4131_v29  ;;  %v4720_v20 = vadd.f32 %v4395_v15, %v4132_v55  ;;  %v4153_v29 = vmul.f32 %v11716_v59, %v11715_v39  ;;  %v4154_v55 = vmul.f32 %v11716_v59, %v11717_v9  ;;  %v11729_v39 = vld [vmem:[#allocation29_spill] sm:$0xff] }
 0x498   : > { %4897 = vst [vmem:[%s10080_s24 + $0x240] sm:$0xff] %v4729_v48  ;;  %4898 = vst.msk [vmem:[%s10080_s24 + $0x248] sm:$0xff] %vm1548_vm1, %v4730_v11  ;;  %v11719_v48 = vld [vmem:[#allocation177_spill] sm:$0xff]  ;;  %v4166_v59 = vmul.f32 %v9888_v2, %v11729_v39 }
 0x499   : > { %4887 = vst [vmem:[%s10080_s24 + $0x1f0] sm:$0xff] %v4719_v30  ;;  %4888 = vst.msk [vmem:[%s10080_s24 + $0x1f8] sm:$0xff] %vm1548_vm1, %v4720_v20  ;;  %v4430_v8 = vpop.permute.xlu0 %4429  ;;  %v4144_v11 = vmul.f32 %v9796_v46, %v11719_v48  ;;  %v11722_v46 = vld [vmem:[#allocation193_spill] sm:$0xff] }
 0x49a   : > { %v4733_v18 = vadd.f32 %v4430_v8, %v4145_v1  ;;  %v4734_v60 = vadd.f32 %v4430_v8, %v4146_v52  ;;  %v4405_v6 = vpop.permute.xlu1 %4404  ;;  %v11720_v52 = vld [vmem:[#allocation11_spill] sm:$0xff]  ;;  %v4147_v3 = vmul.f32 %v9820_v62, %v11722_v46  ;;  %v11731_v9 = vld [vmem:[#allocation9_spill] sm:$0xff] }
 0x49b   : > { %v4723_v61 = vadd.f32 %v4405_v6, %v4135_v16  ;;  %v4724_v21 = vadd.f32 %v4405_v6, %v4136_v58  ;;  %v4157_v40 = vmul.f32 %v9872_v0, %v11720_v52  ;;  %v4158_v16 = vmul.f32 %v9872_v0, %v11721_v44  ;;  %v11723_v58 = vld [vmem:[#allocation195_spill] sm:$0xff]  ;;  %v11735_v52 = vld [vmem:[#allocation17_spill] sm:$0xff] }
 0x49c   : > { %4901 = vst [vmem:[%s10080_s24 + $0x260] sm:$0xff] %v4733_v18  ;;  %4902 = vst.msk [vmem:[%s10080_s24 + $0x268] sm:$0xff] %vm1548_vm1, %v4734_v60  ;;  %v4148_v8 = vmul.f32 %v9820_v62, %v11723_v58  ;;  %v11726_v62 = vld [vmem:[#allocation212_spill] sm:$0xff] }
 0x49d   : > { %4891 = vst [vmem:[%s10080_s24 + $0x210] sm:$0xff] %v4723_v61  ;;  %4892 = vst.msk [vmem:[%s10080_s24 + $0x218] sm:$0xff] %vm1548_vm1, %v4724_v21  ;;  %v4440_v47 = vpop.permute.xlu0 %4439  ;;  %v4151_v33 = vmul.f32 %v9844_v45, %v11726_v62 }
 0x49e   : > { %v4737_v50 = vadd.f32 %v4440_v47, %v4149_v42  ;;  %v4738_v5 = vadd.f32 %v4440_v47, %v4150_v4  ;;  %v4415_v28 = vpop.permute.xlu1 %4414  ;;  %v4161_v42 = vmul.f32 %v9880_v57, %v11724_v10  ;;  %v4162_v4 = vmul.f32 %v9880_v57, %v11725_v49 }
 0x49f   : > { %v4727_v36 = vadd.f32 %v4415_v28, %v4139_v22  ;;  %v4728_v32 = vadd.f32 %v4415_v28, %v4140_v63  ;;  %v11727_v22 = vld [vmem:[#allocation213_spill] sm:$0xff] }
 0x4a0   : > { %4905 = vst [vmem:[%s10080_s24 + $0x280] sm:$0xff] %v4737_v50  ;;  %4906 = vst.msk [vmem:[%s10080_s24 + $0x288] sm:$0xff] %vm1548_vm1, %v4738_v5  ;;  %v4152_v51 = vmul.f32 %v9844_v45, %v11727_v22  ;;  %v11730_v45 = vld [vmem:[#allocation7_spill] sm:$0xff] }
 0x4a1   : > { %4895 = vst [vmem:[%s10080_s24 + $0x230] sm:$0xff] %v4727_v36  ;;  %4896 = vst.msk [vmem:[%s10080_s24 + $0x238] sm:$0xff] %vm1548_vm1, %v4728_v32  ;;  %v4450_v15 = vpop.permute.xlu0 %4449  ;;  %v11728_v36 = vld [vmem:[#allocation27_spill] sm:$0xff] }
 0x4a2   : > { %v4741_v30 = vadd.f32 %v4450_v15, %v4153_v29  ;;  %v4742_v20 = vadd.f32 %v4450_v15, %v4154_v55  ;;  %v4425_v31 = vpop.permute.xlu1 %4424  ;;  %v4165_v32 = vmul.f32 %v9888_v2, %v11728_v36  ;;  %v4155_v29 = vmul.f32 %v9852_v41, %v11730_v45 }
 0x4a3   : > { %v4731_v1 = vadd.f32 %v4425_v31, %v4143_v25  ;;  %v4732_v19 = vadd.f32 %v4425_v31, %v4144_v11  ;;  %v4156_v55 = vmul.f32 %v9852_v41, %v11731_v9  ;;  %v11733_v31 = vld [vmem:[#allocation37_spill] sm:$0xff]  ;;  %v11734_v41 = vld [vmem:[#allocation15_spill] sm:$0xff] }
 0x4a4   : > { %4909 = vst [vmem:[%s10080_s24 + $0x2a0] sm:$0xff] %v4741_v30  ;;  %4910 = vst.msk [vmem:[%s10080_s24 + $0x2a8] sm:$0xff] %vm1548_vm1, %v4742_v20  ;;  %v11732_v30 = vld [vmem:[#allocation35_spill] sm:$0xff] }
 0x4a5   : > { %4899 = vst [vmem:[%s10080_s24 + $0x250] sm:$0xff] %v4731_v1  ;;  %4900 = vst.msk [vmem:[%s10080_s24 + $0x258] sm:$0xff] %vm1548_vm1, %v4732_v19  ;;  %v4460_v18 = vpop.permute.xlu0 %4459  ;;  %v4169_v20 = vmul.f32 %v9896_v26, %v11732_v30  ;;  %v4170_v1 = vmul.f32 %v9896_v26, %v11733_v31  ;;  %v4159_v19 = vmul.f32 %v9860_v13, %v11734_v41 }
 0x4a6   : > { %v4745_v60 = vadd.f32 %v4460_v18, %v4157_v40  ;;  %v4746_v6 = vadd.f32 %v4460_v18, %v4158_v16  ;;  %v4435_v61 = vpop.permute.xlu1 %4434  ;;  %v4160_v40 = vmul.f32 %v9860_v13, %v11735_v52  ;;  %v11738_v13 = vld [vmem:[#allocation23_spill] sm:$0xff]  ;;  %v11751_v52 = vld [vmem:[#allocation49_spill] sm:$0xff] }
 0x4a7   : > { %v4735_v0 = vadd.f32 %v4435_v61, %v4147_v3  ;;  %v4736_v21 = vadd.f32 %v4435_v61, %v4148_v8  ;;  %v11736_v8 = vld [vmem:[#allocation43_spill] sm:$0xff]  ;;  %v4163_v61 = vmul.f32 %v9868_v35, %v11738_v13  ;;  %v11755_v13 = vld [vmem:[#allocation57_spill] sm:$0xff] }
 0x4a8   : > { %4913 = vst [vmem:[%s10080_s24 + $0x2c0] sm:$0xff] %v4745_v60  ;;  %4914 = vst.msk [vmem:[%s10080_s24 + $0x2c8] sm:$0xff] %vm1548_vm1, %v4746_v6  ;;  %v4173_v18 = vmul.f32 %v9904_v38, %v11736_v8  ;;  %v11737_v60 = vld [vmem:[#allocation45_spill] sm:$0xff] }
 0x4a9   : > { %4903 = vst [vmem:[%s10080_s24 + $0x270] sm:$0xff] %v4735_v0  ;;  %4904 = vst.msk [vmem:[%s10080_s24 + $0x278] sm:$0xff] %vm1548_vm1, %v4736_v21  ;;  %v4470_v63 = vpop.permute.xlu0 %4469  ;;  %v4174_v6 = vmul.f32 %v9904_v38, %v11737_v60  ;;  %v11739_v0 = vld [vmem:[#allocation25_spill] sm:$0xff] }
 0x4aa   : > { %v4749_v47 = vadd.f32 %v4470_v63, %v4161_v42  ;;  %v4750_v50 = vadd.f32 %v4470_v63, %v4162_v4  ;;  %v4445_v5 = vpop.permute.xlu1 %4444  ;;  %v4164_v21 = vmul.f32 %v9868_v35, %v11739_v0  ;;  %v11742_v35 = vld [vmem:[#allocation31_spill] sm:$0xff] }
 0x4ab   : > { %v4739_v57 = vadd.f32 %v4445_v5, %v4151_v33  ;;  %v4740_v28 = vadd.f32 %v4445_v5, %v4152_v51  ;;  %v11740_v33 = vld [vmem:[#allocation51_spill] sm:$0xff]  ;;  %v11741_v51 = vld [vmem:[#allocation53_spill] sm:$0xff] }
 0x4ac   : > { %4917 = vst [vmem:[%s10080_s24 + $0x2e0] sm:$0xff] %v4749_v47  ;;  %4918 = vst.msk [vmem:[%s10080_s24 + $0x2e8] sm:$0xff] %vm1548_vm1, %v4750_v50  ;;  %v4177_v22 = vmul.f32 %v9912_v12, %v11740_v33  ;;  %v4178_v63 = vmul.f32 %v9912_v12, %v11741_v51  ;;  %v4167_v47 = vmul.f32 %v9876_v54, %v11742_v35  ;;  %v11743_v50 = vld [vmem:[#allocation33_spill] sm:$0xff] }
 0x4ad   : > { %4907 = vst [vmem:[%s10080_s24 + $0x290] sm:$0xff] %v4739_v57  ;;  %4908 = vst.msk [vmem:[%s10080_s24 + $0x298] sm:$0xff] %vm1548_vm1, %v4740_v28  ;;  %v4480_v27 = vpop.permute.xlu0 %4479  ;;  %v4168_v5 = vmul.f32 %v9876_v54, %v11743_v50  ;;  %v11746_v54 = vld [vmem:[#allocation39_spill] sm:$0xff]  ;;  %v11759_v51 = vld [vmem:[#allocation65_spill] sm:$0xff] }
 0x4ae   : > { %v4753_v25 = vadd.f32 %v4480_v27, %v4165_v32  ;;  %v4754_v48 = vadd.f32 %v4480_v27, %v4166_v59  ;;  %v4455_v11 = vpop.permute.xlu1 %4454  ;;  %v11744_v59 = vld [vmem:[#allocation59_spill] sm:$0xff]  ;;  %v11747_v27 = vld [vmem:[#allocation41_spill] sm:$0xff] }
 0x4af   : > { %v4743_v2 = vadd.f32 %v4455_v11, %v4155_v29  ;;  %v4744_v15 = vadd.f32 %v4455_v11, %v4156_v55  ;;  %v4181_v45 = vmul.f32 %v9920_v7, %v11744_v59  ;;  %v11745_v29 = vld [vmem:[#allocation61_spill] sm:$0xff]  ;;  %v4171_v55 = vmul.f32 %v9884_v34, %v11746_v54  ;;  %v11764_v59 = vld [vmem:[#allocation188_spill] sm:$0xff] }
 0x4b0   : > { %4921 = vst [vmem:[%s10080_s24 + $0x300] sm:$0xff] %v4753_v25  ;;  %4922 = vst.msk [vmem:[%s10080_s24 + $0x308] sm:$0xff] %vm1548_vm1, %v4754_v48  ;;  %v4182_v9 = vmul.f32 %v9920_v7, %v11745_v29  ;;  %v4172_v25 = vmul.f32 %v9884_v34, %v11747_v27  ;;  %v11750_v34 = vld [vmem:[#allocation47_spill] sm:$0xff]  ;;  %v11765_v29 = vld [vmem:[#allocation73_spill] sm:$0xff] }
 0x4b1   : > { %4911 = vst [vmem:[%s10080_s24 + $0x2b0] sm:$0xff] %v4743_v2  ;;  %4912 = vst.msk [vmem:[%s10080_s24 + $0x2b8] sm:$0xff] %vm1548_vm1, %v4744_v15  ;;  %v4490_v44 = vpop.permute.xlu0 %4489 }
 0x4b2   : > { %v4757_v16 = vadd.f32 %v4490_v44, %v4169_v20  ;;  %v4758_v46 = vadd.f32 %v4490_v44, %v4170_v1  ;;  %v4465_v3 = vpop.permute.xlu1 %4464  ;;  %v11748_v20 = vld [vmem:[#allocation67_spill] sm:$0xff]  ;;  %v11749_v1 = vld [vmem:[#allocation69_spill] sm:$0xff] }
 0x4b3   : > { %v4747_v26 = vadd.f32 %v4465_v3, %v4159_v19  ;;  %v4748_v58 = vadd.f32 %v4465_v3, %v4160_v40  ;;  %v4185_v31 = vmul.f32 %v9928_v24, %v11748_v20  ;;  %v4186_v41 = vmul.f32 %v9928_v24, %v11749_v1  ;;  %v11768_v20 = vld [vmem:[#allocation79_spill] sm:$0xff] }
 0x4b4   : > { %4925 = vst [vmem:[%s10080_s24 + $0x320] sm:$0xff] %v4757_v16  ;;  %4926 = vst.msk [vmem:[%s10080_s24 + $0x328] sm:$0xff] %vm1548_vm1, %v4758_v46  ;;  %v4175_v19 = vmul.f32 %v9892_v43, %v11750_v34  ;;  %v4176_v40 = vmul.f32 %v9892_v43, %v11751_v52  ;;  %v11754_v43 = vld [vmem:[#allocation55_spill] sm:$0xff] }
 0x4b5   : > { %4915 = vst [vmem:[%s10080_s24 + $0x2d0] sm:$0xff] %v4747_v26  ;;  %4916 = vst.msk [vmem:[%s10080_s24 + $0x2d8] sm:$0xff] %vm1548_vm1, %v4748_v58  ;;  %v4500_v10 = vpop.permute.xlu0 %4499  ;;  %v11752_v58 = vld [vmem:[#allocation75_spill] sm:$0xff] }
 0x4b6   : > { %v4761_v42 = vadd.f32 %v4500_v10, %v4173_v18  ;;  %v4762_v49 = vadd.f32 %v4500_v10, %v4174_v6  ;;  %v4475_v4 = vpop.permute.xlu1 %4474  ;;  %v4189_v8 = vmul.f32 %v9936_v14, %v11752_v58  ;;  %v11753_v18 = vld [vmem:[#allocation77_spill] sm:$0xff]  ;;  %v4179_v6 = vmul.f32 %v9900_v17, %v11754_v43 }
 0x4b7   : > { %v4751_v38 = vadd.f32 %v4475_v4, %v4163_v61  ;;  %v4752_v62 = vadd.f32 %v4475_v4, %v4164_v21  ;;  %v4190_v60 = vmul.f32 %v9936_v14, %v11753_v18  ;;  %v4180_v61 = vmul.f32 %v9900_v17, %v11755_v13  ;;  %v11756_v4 = vld [vmem:[#allocation83_spill] sm:$0xff]  ;;  %v11776_v43 = vld [vmem:[#allocation89_spill] sm:$0xff] }
 0x4b8   : > { %4929 = vst [vmem:[%s10080_s24 + $0x340] sm:$0xff] %v4761_v42  ;;  %4930 = vst.msk [vmem:[%s10080_s24 + $0x348] sm:$0xff] %vm1548_vm1, %v4762_v49  ;;  %v11758_v17 = vld [vmem:[#allocation63_spill] sm:$0xff] }
 0x4b9   : > { %4919 = vst [vmem:[%s10080_s24 + $0x2f0] sm:$0xff] %v4751_v38  ;;  %4920 = vst.msk [vmem:[%s10080_s24 + $0x2f8] sm:$0xff] %vm1548_vm1, %v4752_v62  ;;  %v4510_v57 = vpop.permute.xlu0 %4509  ;;  %v4193_v38 = vmul.f32 %v9944_v56, %v11756_v4  ;;  %v11757_v62 = vld [vmem:[#allocation85_spill] sm:$0xff]  ;;  %v11775_v18 = vld [vmem:[#allocation183_spill] sm:$0xff] }
 0x4ba   : > { %v4765_v28 = vadd.f32 %v4510_v57, %v4177_v22  ;;  %v4766_v36 = vadd.f32 %v4510_v57, %v4178_v63  ;;  %v4485_v32 = vpop.permute.xlu1 %4484  ;;  %v4194_v33 = vmul.f32 %v9944_v56, %v11757_v62  ;;  %v4183_v22 = vmul.f32 %v9908_v37, %v11758_v17  ;;  %v11778_v4 = vld [vmem:[#allocation129_spill] sm:$0xff]  ;;  %v11779_v62 = vld [vmem:[#allocation95_spill] sm:$0xff] }
 0x4bb   : > { %v4755_v12 = vadd.f32 %v4485_v32, %v4167_v47  ;;  %v4756_v39 = vadd.f32 %v4485_v32, %v4168_v5  ;;  %v4184_v63 = vmul.f32 %v9908_v37, %v11759_v51  ;;  %v11763_v37 = vld [vmem:[#allocation71_spill] sm:$0xff] }
 0x4bc   : > { %4933 = vst [vmem:[%s10080_s24 + $0x360] sm:$0xff] %v4765_v28  ;;  %4934 = vst.msk [vmem:[%s10080_s24 + $0x368] sm:$0xff] %vm1548_vm1, %v4766_v36  ;;  %v11760_v28 = vld [vmem:[#allocation91_spill] sm:$0xff] }
 0x4bd   : > { %4923 = vst [vmem:[%s10080_s24 + $0x310] sm:$0xff] %v4755_v12  ;;  %4924 = vst.msk [vmem:[%s10080_s24 + $0x318] sm:$0xff] %vm1548_vm1, %v4756_v39  ;;  %v4520_v48 = vpop.permute.xlu0 %4519  ;;  %v11761_v36 = vld [vmem:[#allocation187_spill] sm:$0xff]  ;;  %v11762_v12 = vld [vmem:[#allocation93_spill] sm:$0xff] }
 0x4be   : > { %v4769_v11 = vadd.f32 %v4520_v48, %v4181_v45  ;;  %v4770_v2 = vadd.f32 %v4520_v48, %v4182_v9  ;;  %v4495_v15 = vpop.permute.xlu1 %4494  ;;  %v4197_v32 = vmul.f32 %v11761_v36, %v11760_v28  ;;  %v4198_v39 = vmul.f32 %v11761_v36, %v11762_v12  ;;  %v11784_v36 = vld [vmem:[#allocation109_spill] sm:$0xff] }
 0x4bf   : > { %v4759_v7 = vadd.f32 %v4495_v15, %v4171_v55  ;;  %v4760_v30 = vadd.f32 %v4495_v15, %v4172_v25  ;;  %v4187_v45 = vmul.f32 %v11764_v59, %v11763_v37  ;;  %v4188_v9 = vmul.f32 %v11764_v59, %v11765_v29  ;;  %v11786_v59 = vld [vmem:[#allocation143_spill] sm:$0xff] }
 0x4c0   : > { %4937 = vst [vmem:[%s10080_s24 + $0x380] sm:$0xff] %v4769_v11  ;;  %4938 = vst.msk [vmem:[%s10080_s24 + $0x388] sm:$0xff] %vm1548_vm1, %v4770_v2  ;;  %v11766_v2 = vld [vmem:[#allocation103_spill] sm:$0xff] }
 0x4c1   : > { %4927 = vst [vmem:[%s10080_s24 + $0x330] sm:$0xff] %v4759_v7  ;;  %4928 = vst.msk [vmem:[%s10080_s24 + $0x338] sm:$0xff] %vm1548_vm1, %v4760_v30  ;;  %v4530_v44 = vpop.permute.xlu0 %4529  ;;  %v4201_v15 = vmul.f32 %v9964_v23, %v11766_v2  ;;  %v11767_v7 = vld [vmem:[#allocation105_spill] sm:$0xff] }
 0x4c2   : > { %v4773_v16 = vadd.f32 %v4530_v44, %v4185_v31  ;;  %v4774_v46 = vadd.f32 %v4530_v44, %v4186_v41  ;;  %v4505_v3 = vpop.permute.xlu1 %4504  ;;  %v4202_v30 = vmul.f32 %v9964_v23, %v11767_v7  ;;  %v11769_v31 = vld [vmem:[#allocation227_spill] sm:$0xff]  ;;  %v11770_v41 = vld [vmem:[#allocation81_spill] sm:$0xff] }
 0x4c3   : > { %v4763_v24 = vadd.f32 %v4505_v3, %v4175_v19  ;;  %v4764_v26 = vadd.f32 %v4505_v3, %v4176_v40  ;;  %v4191_v1 = vmul.f32 %v11769_v31, %v11768_v20  ;;  %v4192_v34 = vmul.f32 %v11769_v31, %v11770_v41  ;;  %v11772_v3 = vld [vmem:[#allocation119_spill] sm:$0xff] }
 0x4c4   : > { %4941 = vst [vmem:[%s10080_s24 + $0x3a0] sm:$0xff] %v4773_v16  ;;  %4942 = vst.msk [vmem:[%s10080_s24 + $0x3a8] sm:$0xff] %vm1548_vm1, %v4774_v46  ;;  %v11771_v46 = vld [vmem:[#allocation115_spill] sm:$0xff] }
 0x4c5   : > { %4931 = vst [vmem:[%s10080_s24 + $0x350] sm:$0xff] %v4763_v24  ;;  %4932 = vst.msk [vmem:[%s10080_s24 + $0x358] sm:$0xff] %vm1548_vm1, %v4764_v26  ;;  %v4540_v0 = vpop.permute.xlu0 %4539  ;;  %v4205_v24 = vmul.f32 %v11772_v3, %v11771_v46  ;;  %v11773_v26 = vld [vmem:[#allocation117_spill] sm:$0xff] }
 0x4c6   : > { %v4777_v21 = vadd.f32 %v4540_v0, %v4189_v8  ;;  %v4778_v10 = vadd.f32 %v4540_v0, %v4190_v60  ;;  %v4515_v42 = vpop.permute.xlu1 %4514  ;;  %v4206_v58 = vmul.f32 %v11772_v3, %v11773_v26  ;;  %v11774_v8 = vld [vmem:[#allocation87_spill] sm:$0xff]  ;;  %v11795_v3 = vld [vmem:[#allocation153_spill] sm:$0xff] }
 0x4c7   : > { %v4767_v14 = vadd.f32 %v4515_v42, %v4179_v6  ;;  %v4768_v49 = vadd.f32 %v4515_v42, %v4180_v61  ;;  %v4195_v60 = vmul.f32 %v11775_v18, %v11774_v8  ;;  %v4196_v6 = vmul.f32 %v11775_v18, %v11776_v43  ;;  %v11796_v26 = vld [vmem:[#allocation155_spill] sm:$0xff]  ;;  %v11797_v18 = vld [vmem:[#allocation121_spill] sm:$0xff]  ;;  %v11798_v43 = vld [vmem:[#allocation226_spill] sm:$0xff] }
 0x4c8   : > { %4945 = vst [vmem:[%s10080_s24 + $0x3c0] sm:$0xff] %v4777_v21  ;;  %4946 = vst.msk [vmem:[%s10080_s24 + $0x3c8] sm:$0xff] %vm1548_vm1, %v4778_v10 }
 0x4c9   : > { %4935 = vst [vmem:[%s10080_s24 + $0x370] sm:$0xff] %v4767_v14  ;;  %4936 = vst.msk [vmem:[%s10080_s24 + $0x378] sm:$0xff] %vm1548_vm1, %v4768_v49  ;;  %v4550_v35 = vpop.permute.xlu0 %4549  ;;  %v11777_v14 = vld [vmem:[#allocation127_spill] sm:$0xff] }
 0x4ca   : > { %v4781_v47 = vadd.f32 %v4550_v35, %v4193_v38  ;;  %v4782_v50 = vadd.f32 %v4550_v35, %v4194_v33  ;;  %v4525_v5 = vpop.permute.xlu1 %4524  ;;  %v4209_v49 = vmul.f32 %v9988_v53, %v11777_v14  ;;  %v4210_v38 = vmul.f32 %v9988_v53, %v11778_v4  ;;  %v11780_v33 = vld [vmem:[#allocation189_spill] sm:$0xff]  ;;  %v11801_v14 = vld [vmem:[#allocation131_spill] sm:$0xff] }
 0x4cb   : > { %v4771_v56 = vadd.f32 %v4525_v5, %v4183_v22  ;;  %v4772_v57 = vadd.f32 %v4525_v5, %v4184_v63  ;;  %v4199_v17 = vmul.f32 %v11780_v33, %v11779_v62  ;;  %v11781_v22 = vld [vmem:[#allocation97_spill] sm:$0xff] }
 0x4cc   : > { %4949 = vst [vmem:[%s10080_s24 + $0x3e0] sm:$0xff] %v4781_v47  ;;  %4950 = vst.msk [vmem:[%s10080_s24 + $0x3e8] sm:$0xff] %vm1548_vm1, %v4782_v50  ;;  %v4200_v51 = vmul.f32 %v11780_v33, %v11781_v22  ;;  %v11802_v4 = vld [vmem:[#allocation133_spill] sm:$0xff]  ;;  %v11804_v22 = vld [vmem:[#allocation200_spill] sm:$0xff] }
 0x4cd   : > { %4939 = vst [vmem:[%s10080_s24 + $0x390] sm:$0xff] %v4771_v56  ;;  %4940 = vst.msk [vmem:[%s10080_s24 + $0x398] sm:$0xff] %vm1548_vm1, %v4772_v57  ;;  %v4560_v54 = vpop.permute.xlu0 %4559  ;;  %v11782_v56 = vld [vmem:[#allocation107_spill] sm:$0xff]  ;;  %v11783_v57 = vld [vmem:[#allocation205_spill] sm:$0xff] }
 0x4ce   : > { %v4785_v55 = vadd.f32 %v4560_v54, %v4197_v32  ;;  %v4786_v27 = vadd.f32 %v4560_v54, %v4198_v39  ;;  %v4535_v25 = vpop.permute.xlu1 %4534  ;;  %v4203_v28 = vmul.f32 %v11783_v57, %v11782_v56  ;;  %v4204_v32 = vmul.f32 %v11783_v57, %v11784_v36  ;;  %v11785_v39 = vld [vmem:[#allocation178_spill] sm:$0xff]  ;;  %v11803_v33 = vld [vmem:[#allocation165_spill] sm:$0xff]  ;;  %v11807_v56 = vld [vmem:[#allocation159_spill] sm:$0xff] }
 0x4cf   : > { %v4775_v48 = vadd.f32 %v4535_v25, %v4187_v45  ;;  %v4776_v11 = vadd.f32 %v4535_v25, %v4188_v9 }
 0x4d0   : > { %4953 = vst [vmem:[%s10080_s24 + $0x400] sm:$0xff] %v4785_v55  ;;  %4954 = vst.msk [vmem:[%s10080_s24 + $0x408] sm:$0xff] %vm1548_vm1, %v4786_v27  ;;  %v11787_v27 = vld [vmem:[#allocation185_spill] sm:$0xff] }
 0x4d1   : > { %4943 = vst [vmem:[%s10080_s24 + $0x3b0] sm:$0xff] %v4775_v48  ;;  %4944 = vst.msk [vmem:[%s10080_s24 + $0x3b8] sm:$0xff] %vm1548_vm1, %v4776_v11  ;;  %v4570_v19 = vpop.permute.xlu0 %4569  ;;  %v11788_v48 = vld [vmem:[#allocation157_spill] sm:$0xff] }
 0x4d2   : > { %v4789_v52 = vadd.f32 %v4570_v19, %v4201_v15  ;;  %v4790_v40 = vadd.f32 %v4570_v19, %v4202_v30  ;;  %v4545_v44 = vpop.permute.xlu1 %4544  ;;  %v11789_v15 = vld [vmem:[#allocation206_spill] sm:$0xff]  ;;  %v11790_v30 = vld [vmem:[#allocation224_spill] sm:$0xff] }
 0x4d3   : > { %v4779_v23 = vadd.f32 %v4545_v44, %v4191_v1  ;;  %v4780_v16 = vadd.f32 %v4545_v44, %v4192_v34  ;;  %v11791_v1 = vld [vmem:[#allocation141_spill] sm:$0xff]  ;;  %v11792_v34 = vld [vmem:[#allocation98_spill] sm:$0xff] }
 0x4d4   : > { %4957 = vst [vmem:[%s10080_s24 + $0x420] sm:$0xff] %v4789_v52  ;;  %4958 = vst.msk [vmem:[%s10080_s24 + $0x428] sm:$0xff] %vm1548_vm1, %v4790_v40  ;;  %v11793_v40 = vld [vmem:[#allocation229_spill] sm:$0xff] }
 0x4d5   : > { %4947 = vst [vmem:[%s10080_s24 + $0x3d0] sm:$0xff] %v4779_v23  ;;  %4948 = vst.msk [vmem:[%s10080_s24 + $0x3d8] sm:$0xff] %vm1548_vm1, %v4780_v16  ;;  %v4580_v13 = vpop.permute.xlu0 %4579  ;;  %v11794_v23 = vld [vmem:[#allocation191_spill] sm:$0xff] }
 0x4d6   : > { %v4793_v61 = vadd.f32 %v4580_v13, %v4205_v24  ;;  %v4794_v0 = vadd.f32 %v4580_v13, %v4206_v58  ;;  %v4555_v21 = vpop.permute.xlu1 %4554 }
 0x4d7   : > { %v4783_v10 = vadd.f32 %v4555_v21, %v4195_v60  ;;  %v4784_v42 = vadd.f32 %v4555_v21, %v4196_v6  ;;  %v11800_v21 = vld [vmem:[#allocation164_spill] sm:$0xff] }
 0x4d8   : > { %4961 = vst [vmem:[%s10080_s24 + $0x440] sm:$0xff] %v4793_v61  ;;  %4962 = vst.msk [vmem:[%s10080_s24 + $0x448] sm:$0xff] %vm1548_vm1, %v4794_v0  ;;  %v11799_v61 = vld [vmem:[#allocation182_spill] sm:$0xff] }
 0x4d9   : > { %4951 = vst [vmem:[%s10080_s24 + $0x3f0] sm:$0xff] %v4783_v10  ;;  %4952 = vst.msk [vmem:[%s10080_s24 + $0x3f8] sm:$0xff] %vm1548_vm1, %v4784_v42  ;;  %v4590_v63 = vpop.permute.xlu0 %4589 }
 0x4da   : > { %v4797_v35 = vadd.f32 %v4590_v63, %v4209_v49  ;;  %v4798_v47 = vadd.f32 %v4590_v63, %v4210_v38  ;;  %v4565_v50 = vpop.permute.xlu1 %4564 }
 0x4db   : > { %v4787_v53 = vadd.f32 %v4565_v50, %v4199_v17  ;;  %v4788_v5 = vadd.f32 %v4565_v50, %v4200_v51  ;;  %v11806_v50 = vld [vmem:[#allocation169_spill] sm:$0xff] }
 0x4dc   : > { %4965 = vst [vmem:[%s10080_s24 + $0x460] sm:$0xff] %v4797_v35  ;;  %4966 = vst.msk [vmem:[%s10080_s24 + $0x468] sm:$0xff] %vm1548_vm1, %v4798_v47  ;;  %v11805_v35 = vld [vmem:[#allocation145_spill] sm:$0xff] }
 0x4dd   : > { %4955 = vst [vmem:[%s10080_s24 + $0x410] sm:$0xff] %v4787_v53  ;;  %4956 = vst.msk [vmem:[%s10080_s24 + $0x418] sm:$0xff] %vm1548_vm1, %v4788_v5  ;;  %v4600_v12 = vpop.permute.xlu0 %4599 }
 0x4de   : > { %v4801_v37 = vadd.f32 %v4600_v12, %v11785_v39  ;;  %v4802_v45 = vadd.f32 %v4600_v12, %v11786_v59  ;;  %v4575_v29 = vpop.permute.xlu1 %4574  ;;  %v11809_v12 = vld [vmem:[#allocation166_spill] sm:$0xff] }
 0x4df   : > { %v4791_v9 = vadd.f32 %v4575_v29, %v4203_v28  ;;  %v4792_v54 = vadd.f32 %v4575_v29, %v4204_v32  ;;  %v11808_v28 = vld [vmem:[#allocation139_spill] sm:$0xff]  ;;  %v11811_v29 = vld [vmem:[#allocation146_spill] sm:$0xff] }
 0x4e0   : > { %4969 = vst [vmem:[%s10080_s24 + $0x480] sm:$0xff] %v4801_v37  ;;  %4970 = vst.msk [vmem:[%s10080_s24 + $0x488] sm:$0xff] %vm1548_vm1, %v4802_v45  ;;  %v11810_v37 = vld [vmem:[#allocation167_spill] sm:$0xff] }
 0x4e1   : > { %4959 = vst [vmem:[%s10080_s24 + $0x430] sm:$0xff] %v4791_v9  ;;  %4960 = vst.msk [vmem:[%s10080_s24 + $0x438] sm:$0xff] %vm1548_vm1, %v4792_v54  ;;  %v4610_v55 = vpop.permute.xlu0 %4609  ;;  %v11812_v54 = vld [vmem:[#allocation181_spill] sm:$0xff] }
 0x4e2   : > { %v4805_v25 = vadd.f32 %v4610_v55, %v11787_v27  ;;  %v4806_v11 = vadd.f32 %v4610_v55, %v11788_v48  ;;  %v4585_v2 = vpop.permute.xlu1 %4584 }
 0x4e3   : > { %v4795_v7 = vadd.f32 %v4585_v2, %v11789_v15  ;;  %v4796_v20 = vadd.f32 %v4585_v2, %v11790_v30 }
 0x4e4   : > { %4973 = vst [vmem:[%s10080_s24 + $0x4a0] sm:$0xff] %v4805_v25  ;;  %4974 = vst.msk [vmem:[%s10080_s24 + $0x4a8] sm:$0xff] %vm1548_vm1, %v4806_v11 }
 0x4e5   : > { %4963 = vst [vmem:[%s10080_s24 + $0x450] sm:$0xff] %v4795_v7  ;;  %4964 = vst.msk [vmem:[%s10080_s24 + $0x458] sm:$0xff] %vm1548_vm1, %v4796_v20  ;;  %v4620_v31 = vpop.permute.xlu0 %4619 }
 0x4e6   : > { %v4809_v41 = vadd.f32 %v4620_v31, %v11791_v1  ;;  %v4810_v19 = vadd.f32 %v4620_v31, %v11792_v34  ;;  %v4595_v52 = vpop.permute.xlu1 %4594 }
 0x4e7   : > { %v4799_v44 = vadd.f32 %v4595_v52, %v11793_v40  ;;  %v4800_v16 = vadd.f32 %v4595_v52, %v11794_v23 }
 0x4e8   : > { %4977 = vst [vmem:[%s10080_s24 + $0x4c0] sm:$0xff] %v4809_v41  ;;  %4978 = vst.msk [vmem:[%s10080_s24 + $0x4c8] sm:$0xff] %vm1548_vm1, %v4810_v19 }
 0x4e9   : > { %4967 = vst [vmem:[%s10080_s24 + $0x470] sm:$0xff] %v4799_v44  ;;  %4968 = vst.msk [vmem:[%s10080_s24 + $0x478] sm:$0xff] %vm1548_vm1, %v4800_v16  ;;  %v4630_v46 = vpop.permute.xlu0 %4629 }
 0x4ea   : > { %v4813_v24 = vadd.f32 %v4630_v46, %v11795_v3  ;;  %v4814_v58 = vadd.f32 %v4630_v46, %v11796_v26  ;;  %v4605_v8 = vpop.permute.xlu1 %4604 }
 0x4eb   : > { %v4803_v60 = vadd.f32 %v4605_v8, %v11797_v18  ;;  %v4804_v6 = vadd.f32 %v4605_v8, %v11798_v43 }
 0x4ec   : > { %4981 = vst [vmem:[%s10080_s24 + $0x4e0] sm:$0xff] %v4813_v24  ;;  %4982 = vst.msk [vmem:[%s10080_s24 + $0x4e8] sm:$0xff] %vm1548_vm1, %v4814_v58 }
 0x4ed   : > { %4971 = vst [vmem:[%s10080_s24 + $0x490] sm:$0xff] %v4803_v60  ;;  %4972 = vst.msk [vmem:[%s10080_s24 + $0x498] sm:$0xff] %vm1548_vm1, %v4804_v6  ;;  %v4640_v13 = vpop.permute.xlu0 %4639 }
 0x4ee   : > { %v4817_v0 = vadd.f32 %v4640_v13, %v11799_v61  ;;  %v4818_v10 = vadd.f32 %v4640_v13, %v11800_v21  ;;  %v4615_v42 = vpop.permute.xlu1 %4614 }
 0x4ef   : > { %v4807_v49 = vadd.f32 %v4615_v42, %v11801_v14  ;;  %v4808_v38 = vadd.f32 %v4615_v42, %v11802_v4 }
 0x4f0   : > { %4985 = vst [vmem:[%s10080_s24 + $0x500] sm:$0xff] %v4817_v0  ;;  %4986 = vst.msk [vmem:[%s10080_s24 + $0x508] sm:$0xff] %vm1548_vm1, %v4818_v10 }
 0x4f1   : > { %4975 = vst [vmem:[%s10080_s24 + $0x4b0] sm:$0xff] %v4807_v49  ;;  %4976 = vst.msk [vmem:[%s10080_s24 + $0x4b8] sm:$0xff] %vm1548_vm1, %v4808_v38  ;;  %v4650_v62 = vpop.permute.xlu0 %4649 }
 0x4f2   : > { %v4821_v17 = vadd.f32 %v4650_v62, %v11803_v33  ;;  %v4822_v51 = vadd.f32 %v4650_v62, %v11804_v22  ;;  %v4625_v63 = vpop.permute.xlu1 %4624 }
 0x4f3   : > { %v4811_v47 = vadd.f32 %v4625_v63, %v11805_v35  ;;  %v4812_v53 = vadd.f32 %v4625_v63, %v11806_v50 }
 0x4f4   : > { %4989 = vst [vmem:[%s10080_s24 + $0x520] sm:$0xff] %v4821_v17  ;;  %4990 = vst.msk [vmem:[%s10080_s24 + $0x528] sm:$0xff] %vm1548_vm1, %v4822_v51 }
 0x4f5   : > { %4979 = vst [vmem:[%s10080_s24 + $0x4d0] sm:$0xff] %v4811_v47  ;;  %4980 = vst.msk [vmem:[%s10080_s24 + $0x4d8] sm:$0xff] %vm1548_vm1, %v4812_v53 }
 0x4f6   : > { %v4635_v5 = vpop.permute.xlu1 %4634 }
 0x4f7   : > { %v4815_v57 = vadd.f32 %v4635_v5, %v11807_v56  ;;  %v4816_v36 = vadd.f32 %v4635_v5, %v11808_v28 }
 0x4f9   : > { %4983 = vst [vmem:[%s10080_s24 + $0x4f0] sm:$0xff] %v4815_v57  ;;  %4984 = vst.msk [vmem:[%s10080_s24 + $0x4f8] sm:$0xff] %vm1548_vm1, %v4816_v36 }
 0x4fa   : > { %v4645_v32 = vpop.permute.xlu1 %4644 }
 0x4fb   : > { %v4819_v39 = vadd.f32 %v4645_v32, %v11809_v12  ;;  %v4820_v59 = vadd.f32 %v4645_v32, %v11810_v37 }
 0x4fd   : > { %4987 = vst [vmem:[%s10080_s24 + $0x510] sm:$0xff] %v4819_v39  ;;  %4988 = vst.msk [vmem:[%s10080_s24 + $0x518] sm:$0xff] %vm1548_vm1, %v4820_v59 }
 0x4fe   : > { %v4655_v45 = vpop.permute.xlu1 %4654 }
 0x4ff   : > { %v4823_v9 = vadd.f32 %v4655_v45, %v11811_v29  ;;  %v4824_v55 = vadd.f32 %v4655_v45, %v11812_v54 }
 0x501   : > { %4991 = vst [vmem:[%s10080_s24 + $0x530] sm:$0xff] %v4823_v9  ;;  %4992 = vst.msk [vmem:[%s10080_s24 + $0x538] sm:$0xff] %vm1548_vm1, %v4824_v55 }
 0x502 PF: > { %s17_s21 = sadd.s32 1, %s5856_s21  }
 0x503   : > { %p14_p4 = scmp.ge.s32.totalorder %s17_s21, 4  }
 0x505   :  { %16 = sbr.rel (!%p14_p4) target bundleno = 1 (0x1), region = 93 }

</bundles_post_ra>
